<compile_context>
chip_gen: v7x
topology: tpu7x:2x2x1
jax: 0.10.0
libtpu: 0.0.40
codegen_flags: <defaults>
</compile_context>

<pallas_src>
import numpy as np
import jax
import jax.numpy as jnp
from jax import lax
from jax.experimental import pallas as pl
from jax.experimental.pallas import tpu as pltpu


# --------------------------- in-kernel building blocks ----------------------

def _block1_phases(p00, p01, p10, p11, w, b):
    """Conv(1->Cout,k=2,s=1)+bias+ReLU+MaxPool2d(2,2), phase-decomposed.

    p_rs: (N, Hh, Wh, 1) = x[:, r::2, s::2, :]  (input pooling phases, built
          outside the kernel with ordinary XLA strided slices).
    w:    (4, Cout) rows in (dy, dx) order.     b: (1, Cout).
    Returns (N, Hh-1, Wh-1, Cout).  Pure VPU work: unit-stride slices,
    multiply-adds and maxima -- no sublane even/odd selection at all.
    """
    N, Hh, Wh, _ = p00.shape
    Hp, Wp = Hh - 1, Wh - 1
    Cout = w.shape[1]
    # Broadcast the single input channel to Cout lanes ONCE per phase image.
    phases = {(0, 0): p00, (0, 1): p01, (1, 0): p10, (1, 1): p11}
    bp = {k: jnp.broadcast_to(v, (N, Hh, Wh, Cout)) for k, v in phases.items()}
    pooled = None
    for pa in (0, 1):            # output-row phase inside the 2x2 pool window
        for pb in (0, 1):        # output-col phase
            acc = None
            for dy in (0, 1):
                for dx in (0, 1):
                    u, v = pa + dy, pb + dx
                    src = bp[(u % 2, v % 2)]
                    term = (src[:, u // 2:u // 2 + Hp, v // 2:v // 2 + Wp, :]
                            * w[2 * dy + dx].reshape(1, 1, 1, Cout))
                    acc = term if acc is None else acc + term
            pooled = acc if pooled is None else jnp.maximum(pooled, acc)
    # max / ReLU commute and the bias is phase-invariant: add + ReLU once.
    return jnp.maximum(pooled + b.reshape(1, 1, 1, Cout), 0.0)


def _conv_block(y, w, b):
    """Conv2d(k=2,s=1)+bias+ReLU+MaxPool2d(2,2) on a VMEM-resident activation.

    y: (N, H, W, C) f32;  w: (4*C, Cout) rows in (dy, dx, cin) order;
    b: (1, Cout).  Two MXU matmuls (one per dy tap row, K=2C) with the batch
    folded into M.  H pooling = leading-dim regroup + elementwise max;
    W pooling = one shifted max + a small even-column gather (Wp <= 7 here).
    """
    N, H, W, C = y.shape
    Hc, Wc = H - 1, W - 1
    Hp, Wp = Hc // 2, Wc // 2
    Cout = w.shape[1]
    # Pad W once on the C-lane input (not the 2C-lane patches) so the
    # rank-4 <-> rank-2 reshapes around the matmuls stay sublane-tile aligned.
    Wcp = ((Wc + 7) // 8) * 8
    if W < Wcp + 1:
        y = jnp.concatenate(
            [y, jnp.zeros((N, H, Wcp + 1 - W, C), y.dtype)], axis=2)
    acc = None
    for dy in (0, 1):
        # Only the dx pair is concatenated on lanes (K = 2C per matmul).
        p = jnp.concatenate(
            [y[:, dy:dy + Hc, 0:Wcp, :], y[:, dy:dy + Hc, 1:Wcp + 1, :]],
            axis=3)
        term = jnp.dot(p.reshape(N * Hc * Wcp, 2 * C),
                       w[2 * C * dy:2 * C * (dy + 1), :],
                       preferred_element_type=jnp.float32)
        acc = term if acc is None else acc + term
    z = jnp.maximum(acc + b, 0.0)                               # bias + ReLU
    z = z.reshape(N, Hc, Wcp, Cout)[:, :2 * Hp, :2 * Wp, :]     # drop pad, crop
    # MaxPool2d(2,2): H pairs via leading-dim regroup (layout no-op) ...
    zr = z.reshape(N * Hp, 2, 2 * Wp, Cout)
    zh = jnp.maximum(zr[:, 0], zr[:, 1])                        # (N*Hp, 2Wp, Cout)
    # ... W pairs: one shifted max, then keep the even columns.
    if Wp == 1:
        zw = jnp.maximum(zh[:, 0:1, :], zh[:, 1:2, :])
    else:
        zm = jnp.maximum(zh[:, 0:2 * Wp - 1, :], zh[:, 1:2 * Wp, :])
        zw = jnp.concatenate(
            [zm[:, 2 * i:2 * i + 1, :] for i in range(Wp)], axis=1)
    return zw.reshape(N, Hp, Wp, Cout)


def cnn_kernel(p00_ref, p01_ref, p10_ref, p11_ref,
               w1_ref, b1_ref, w2_ref, b2_ref, w3_ref, b3_ref,
               w4_ref, b4_ref, wl_ref, bl_ref, o_ref):
    """Fused forward pass; every activation stays in VMEM / vregs."""
    y = _block1_phases(p00_ref[...], p01_ref[...], p10_ref[...], p11_ref[...],
                       w1_ref[...], b1_ref[...])                # (N, 15, 15, 16)
    y = _conv_block(y, w2_ref[...], b2_ref[...])                # (N, 7, 7, 32)
    y = _conv_block(y, w3_ref[...], b3_ref[...])                # (N, 3, 3, 64)
    y = _conv_block(y, w4_ref[...], b4_ref[...])                # (N, 1, 1, 128)
    # AdaptiveAvgPool2d(1) + Flatten on a (N,1,1,128) map == drop unit dims.
    feats = y.reshape(y.shape[0], y.shape[3])                   # (N, 128)
    out = jnp.dot(feats, wl_ref[...],
                  preferred_element_type=jnp.float32) + bl_ref[...]
    # TODO(synk): Dropout is identity at inference; training-mode dropout (RNG
    # mask) is intentionally not implemented.
    o_ref[...] = jnp.maximum(out, 0.0)                          # Linear + ReLU


# ------------------------------ JAX glue code --------------------------------

def prep_params(params):
    """One-time weight re-layout for the fused kernel (done once, not per call)."""
    convs = []
    for w, b in params["convs"]:
        cout, cin = w.shape[0], w.shape[1]
        wk = jnp.transpose(w, (2, 3, 1, 0)).reshape(4 * cin, cout)  # (dy,dx,cin) rows
        convs.append((wk, b.reshape(1, cout)))
    nc = params["w_lin"].shape[1]
    return {"convs": convs, "w_lin": params["w_lin"],
            "b_lin": params["b_lin"].reshape(1, nc)}


def cnn_forward(x_nchw, prepped, *, batch_block=8):
    N = x_nchw.shape[0]
    n_classes = prepped["w_lin"].shape[1]
    x = jnp.transpose(x_nchw, (0, 2, 3, 1))                     # NCHW -> NHWC (C=1)
    assert x.shape[1] % 2 == 0 and x.shape[2] % 2 == 0, "H, W must be even"
    # Pooling-phase decomposition of the input: stride-2 slicing stays outside
    # the kernel (plain XLA), so block 1 needs no in-kernel even/odd selection.
    phases = [x[:, r::2, s::2, :] for r in (0, 1) for s in (0, 1)]
    (w1, b1), (w2, b2), (w3, b3), (w4, b4) = prepped["convs"]
    weights = [w1, b1, w2, b2, w3, b3, w4, b4,
               prepped["w_lin"], prepped["b_lin"]]
    out_shape = jax.ShapeDtypeStruct((N, n_classes), jnp.float32)

    if N % batch_block == 0 and N > batch_block:
        # Large-N path: batch grid bounds resident VMEM, pipelines the input
        # DMA and shards batches across TensorCores (v7x megacore).
        nb = N // batch_block
        ph_spec = pl.BlockSpec((batch_block,) + phases[0].shape[1:],
                               lambda i: (i, 0, 0, 0))
        w_specs = [pl.BlockSpec(w.shape, lambda i, nd=w.ndim: (0,) * nd)
                   for w in weights]
        return pl.pallas_call(
            cnn_kernel,
            out_shape=out_shape,
            grid=(nb,),
            in_specs=[ph_spec] * 4 + w_specs,
            out_specs=pl.BlockSpec((batch_block, n_classes), lambda i: (i, 0)),
            compiler_params=pltpu.CompilerParams(
                dimension_semantics=("parallel",)),
        )(*phases, *weights)

    # Toy-size path (N=2 here): whole batch resident, no grid, default VMEM cap.
    vmem = pl.BlockSpec(memory_space=pltpu.MemorySpace.VMEM)
    return pl.pallas_call(
        cnn_kernel,
        out_shape=out_shape,
        in_specs=[vmem] * 14,
        out_specs=vmem,
    )(*phases, *weights)


# --------------------------- reference (pure JAX) ----------------------------

def cnn_forward_ref(x_nchw, params):
    y = x_nchw
    for w, b in params["convs"]:
        y = lax.conv_general_dilated(
            y, w, window_strides=(1, 1), padding="VALID",
            dimension_numbers=("NCHW", "OIHW", "NCHW")) + b[None, :, None, None]
        y = jnp.maximum(y, 0.0)
        y = lax.reduce_window(y, -jnp.inf, lax.max,
                              (1, 1, 2, 2), (1, 1, 2, 2), "VALID")
    feats = jnp.mean(y, axis=(2, 3))                            # AdaptiveAvgPool2d(1)+Flatten
    return jnp.maximum(feats @ params["w_lin"] + params["b_lin"], 0.0)


# ----------------------------------- main ------------------------------------

def init_params(key, n_classes=3):
    channels = [(1, 16), (16, 32), (32, 64), (64, 128)]
    params = {"convs": []}
    for cin, cout in channels:
        key, kw, kb = jax.random.split(key, 3)
        scale = 1.0 / np.sqrt(cin * 2 * 2)
        w = jax.random.normal(kw, (cout, cin, 2, 2), jnp.float32) * scale
        b = jax.random.normal(kb, (cout,), jnp.float32) * scale
        params["convs"].append((w, b))
    key, kw, kb = jax.random.split(key, 3)
    params["w_lin"] = jax.random.normal(kw, (128, n_classes), jnp.float32) * (1.0 / np.sqrt(128))
    params["b_lin"] = jax.random.normal(kb, (n_classes,), jnp.float32) * (1.0 / np.sqrt(128))
    return params


if __name__ == "__main__":
    key = jax.random.PRNGKey(0)
    key, kx = jax.random.split(key)
    # 32x32 single-channel input: 32 ->(conv)31->(pool)15 ->14->7 ->6->3 ->2->1
    x = jax.random.normal(kx, (2, 1, 32, 32), jnp.float32)
    params = init_params(key, n_classes=3)
    prepped = prep_params(params)

    out = jax.block_until_ready(jax.jit(cnn_forward)(x, prepped))
    ref = jax.block_until_ready(cnn_forward_ref(x, params))

    assert out.shape == (2, 3), out.shape
    np.testing.assert_allclose(np.asarray(out), np.asarray(ref), rtol=1e-4, atol=1e-4)
    print("KERNEL_OK")
</pallas_src>

<mosaic_0001>
module attributes {stable_mosaic.version = 11 : i64} {
  func.func @cnn_kernel(%arg0: memref<2x16x16x1xf32, #tpu.memory_space<vmem>>, %arg1: memref<2x16x16x1xf32, #tpu.memory_space<vmem>>, %arg2: memref<2x16x16x1xf32, #tpu.memory_space<vmem>>, %arg3: memref<2x16x16x1xf32, #tpu.memory_space<vmem>>, %arg4: memref<4x16xf32, #tpu.memory_space<vmem>>, %arg5: memref<1x16xf32, #tpu.memory_space<vmem>>, %arg6: memref<64x32xf32, #tpu.memory_space<vmem>>, %arg7: memref<1x32xf32, #tpu.memory_space<vmem>>, %arg8: memref<128x64xf32, #tpu.memory_space<vmem>>, %arg9: memref<1x64xf32, #tpu.memory_space<vmem>>, %arg10: memref<256x128xf32, #tpu.memory_space<vmem>>, %arg11: memref<1x128xf32, #tpu.memory_space<vmem>>, %arg12: memref<128x3xf32, #tpu.memory_space<vmem>>, %arg13: memref<1x3xf32, #tpu.memory_space<vmem>>, %arg14: memref<2x3xf32, #tpu.memory_space<vmem>>) attributes {dimension_semantics = [], scalar_prefetch = 0 : i64, scratch_operands = 0 : i64, tpu.core_type = #tpu.core_type<tc>} {
    %c0 = arith.constant 0 : index
    %c0_0 = arith.constant 0 : index
    %c0_1 = arith.constant 0 : index
    %c0_2 = arith.constant 0 : index
    %0 = vector.load %arg0[%c0, %c0_0, %c0_1, %c0_2] : memref<2x16x16x1xf32, #tpu.memory_space<vmem>>, vector<2x16x16x1xf32>
    %c0_3 = arith.constant 0 : index
    %c0_4 = arith.constant 0 : index
    %c0_5 = arith.constant 0 : index
    %c0_6 = arith.constant 0 : index
    %1 = vector.load %arg1[%c0_3, %c0_4, %c0_5, %c0_6] : memref<2x16x16x1xf32, #tpu.memory_space<vmem>>, vector<2x16x16x1xf32>
    %c0_7 = arith.constant 0 : index
    %c0_8 = arith.constant 0 : index
    %c0_9 = arith.constant 0 : index
    %c0_10 = arith.constant 0 : index
    %2 = vector.load %arg2[%c0_7, %c0_8, %c0_9, %c0_10] : memref<2x16x16x1xf32, #tpu.memory_space<vmem>>, vector<2x16x16x1xf32>
    %c0_11 = arith.constant 0 : index
    %c0_12 = arith.constant 0 : index
    %c0_13 = arith.constant 0 : index
    %c0_14 = arith.constant 0 : index
    %3 = vector.load %arg3[%c0_11, %c0_12, %c0_13, %c0_14] : memref<2x16x16x1xf32, #tpu.memory_space<vmem>>, vector<2x16x16x1xf32>
    %c0_15 = arith.constant 0 : index
    %c0_16 = arith.constant 0 : index
    %4 = vector.load %arg4[%c0_15, %c0_16] : memref<4x16xf32, #tpu.memory_space<vmem>>, vector<4x16xf32>
    %c0_17 = arith.constant 0 : index
    %c0_18 = arith.constant 0 : index
    %5 = vector.load %arg5[%c0_17, %c0_18] : memref<1x16xf32, #tpu.memory_space<vmem>>, vector<1x16xf32>
    %6 = vector.shape_cast %0 : vector<2x16x16x1xf32> to vector<2x16x16x1xf32>
    %7 = vector.broadcast %6 : vector<2x16x16x1xf32> to vector<2x16x16x16xf32>
    %8 = vector.shape_cast %1 : vector<2x16x16x1xf32> to vector<2x16x16x1xf32>
    %9 = vector.broadcast %8 : vector<2x16x16x1xf32> to vector<2x16x16x16xf32>
    %10 = vector.shape_cast %2 : vector<2x16x16x1xf32> to vector<2x16x16x1xf32>
    %11 = vector.broadcast %10 : vector<2x16x16x1xf32> to vector<2x16x16x16xf32>
    %12 = vector.shape_cast %3 : vector<2x16x16x1xf32> to vector<2x16x16x1xf32>
    %13 = vector.broadcast %12 : vector<2x16x16x1xf32> to vector<2x16x16x16xf32>
    %14 = vector.extract_strided_slice %7 {offsets = [0, 0, 0, 0], sizes = [2, 15, 15, 16], strides = [1, 1, 1, 1]} : vector<2x16x16x16xf32> to vector<2x15x15x16xf32>
    %15 = vector.extract_strided_slice %4 {offsets = [0, 0], sizes = [1, 16], strides = [1, 1]} : vector<4x16xf32> to vector<1x16xf32>
    %16 = vector.shape_cast %15 : vector<1x16xf32> to vector<16xf32>
    %17 = vector.shape_cast %16 : vector<16xf32> to vector<1x1x1x16xf32>
    %18 = vector.broadcast %17 : vector<1x1x1x16xf32> to vector<2x15x15x16xf32>
    %19 = arith.mulf %14, %18 : vector<2x15x15x16xf32>
    %20 = vector.extract_strided_slice %9 {offsets = [0, 0, 0, 0], sizes = [2, 15, 15, 16], strides = [1, 1, 1, 1]} : vector<2x16x16x16xf32> to vector<2x15x15x16xf32>
    %21 = vector.extract_strided_slice %4 {offsets = [1, 0], sizes = [1, 16], strides = [1, 1]} : vector<4x16xf32> to vector<1x16xf32>
    %22 = vector.shape_cast %21 : vector<1x16xf32> to vector<16xf32>
    %23 = vector.shape_cast %22 : vector<16xf32> to vector<1x1x1x16xf32>
    %24 = vector.broadcast %23 : vector<1x1x1x16xf32> to vector<2x15x15x16xf32>
    %25 = arith.mulf %20, %24 : vector<2x15x15x16xf32>
    %26 = arith.addf %19, %25 : vector<2x15x15x16xf32>
    %27 = vector.extract_strided_slice %11 {offsets = [0, 0, 0, 0], sizes = [2, 15, 15, 16], strides = [1, 1, 1, 1]} : vector<2x16x16x16xf32> to vector<2x15x15x16xf32>
    %28 = vector.extract_strided_slice %4 {offsets = [2, 0], sizes = [1, 16], strides = [1, 1]} : vector<4x16xf32> to vector<1x16xf32>
    %29 = vector.shape_cast %28 : vector<1x16xf32> to vector<16xf32>
    %30 = vector.shape_cast %29 : vector<16xf32> to vector<1x1x1x16xf32>
    %31 = vector.broadcast %30 : vector<1x1x1x16xf32> to vector<2x15x15x16xf32>
    %32 = arith.mulf %27, %31 : vector<2x15x15x16xf32>
    %33 = arith.addf %26, %32 : vector<2x15x15x16xf32>
    %34 = vector.extract_strided_slice %13 {offsets = [0, 0, 0, 0], sizes = [2, 15, 15, 16], strides = [1, 1, 1, 1]} : vector<2x16x16x16xf32> to vector<2x15x15x16xf32>
    %35 = vector.extract_strided_slice %4 {offsets = [3, 0], sizes = [1, 16], strides = [1, 1]} : vector<4x16xf32> to vector<1x16xf32>
    %36 = vector.shape_cast %35 : vector<1x16xf32> to vector<16xf32>
    %37 = vector.shape_cast %36 : vector<16xf32> to vector<1x1x1x16xf32>
    %38 = vector.broadcast %37 : vector<1x1x1x16xf32> to vector<2x15x15x16xf32>
    %39 = arith.mulf %34, %38 : vector<2x15x15x16xf32>
    %40 = arith.addf %33, %39 : vector<2x15x15x16xf32>
    %41 = vector.extract_strided_slice %9 {offsets = [0, 0, 0, 0], sizes = [2, 15, 15, 16], strides = [1, 1, 1, 1]} : vector<2x16x16x16xf32> to vector<2x15x15x16xf32>
    %42 = vector.extract_strided_slice %4 {offsets = [0, 0], sizes = [1, 16], strides = [1, 1]} : vector<4x16xf32> to vector<1x16xf32>
    %43 = vector.shape_cast %42 : vector<1x16xf32> to vector<16xf32>
    %44 = vector.shape_cast %43 : vector<16xf32> to vector<1x1x1x16xf32>
    %45 = vector.broadcast %44 : vector<1x1x1x16xf32> to vector<2x15x15x16xf32>
    %46 = arith.mulf %41, %45 : vector<2x15x15x16xf32>
    %47 = vector.extract_strided_slice %7 {offsets = [0, 0, 1, 0], sizes = [2, 15, 15, 16], strides = [1, 1, 1, 1]} : vector<2x16x16x16xf32> to vector<2x15x15x16xf32>
    %48 = vector.extract_strided_slice %4 {offsets = [1, 0], sizes = [1, 16], strides = [1, 1]} : vector<4x16xf32> to vector<1x16xf32>
    %49 = vector.shape_cast %48 : vector<1x16xf32> to vector<16xf32>
    %50 = vector.shape_cast %49 : vector<16xf32> to vector<1x1x1x16xf32>
    %51 = vector.broadcast %50 : vector<1x1x1x16xf32> to vector<2x15x15x16xf32>
    %52 = arith.mulf %47, %51 : vector<2x15x15x16xf32>
    %53 = arith.addf %46, %52 : vector<2x15x15x16xf32>
    %54 = vector.extract_strided_slice %13 {offsets = [0, 0, 0, 0], sizes = [2, 15, 15, 16], strides = [1, 1, 1, 1]} : vector<2x16x16x16xf32> to vector<2x15x15x16xf32>
    %55 = vector.extract_strided_slice %4 {offsets = [2, 0], sizes = [1, 16], strides = [1, 1]} : vector<4x16xf32> to vector<1x16xf32>
    %56 = vector.shape_cast %55 : vector<1x16xf32> to vector<16xf32>
    %57 = vector.shape_cast %56 : vector<16xf32> to vector<1x1x1x16xf32>
    %58 = vector.broadcast %57 : vector<1x1x1x16xf32> to vector<2x15x15x16xf32>
    %59 = arith.mulf %54, %58 : vector<2x15x15x16xf32>
    %60 = arith.addf %53, %59 : vector<2x15x15x16xf32>
    %61 = vector.extract_strided_slice %11 {offsets = [0, 0, 1, 0], sizes = [2, 15, 15, 16], strides = [1, 1, 1, 1]} : vector<2x16x16x16xf32> to vector<2x15x15x16xf32>
    %62 = vector.extract_strided_slice %4 {offsets = [3, 0], sizes = [1, 16], strides = [1, 1]} : vector<4x16xf32> to vector<1x16xf32>
    %63 = vector.shape_cast %62 : vector<1x16xf32> to vector<16xf32>
    %64 = vector.shape_cast %63 : vector<16xf32> to vector<1x1x1x16xf32>
    %65 = vector.broadcast %64 : vector<1x1x1x16xf32> to vector<2x15x15x16xf32>
    %66 = arith.mulf %61, %65 : vector<2x15x15x16xf32>
    %67 = arith.addf %60, %66 : vector<2x15x15x16xf32>
    %68 = arith.maximumf %40, %67 : vector<2x15x15x16xf32>
    %69 = vector.extract_strided_slice %11 {offsets = [0, 0, 0, 0], sizes = [2, 15, 15, 16], strides = [1, 1, 1, 1]} : vector<2x16x16x16xf32> to vector<2x15x15x16xf32>
    %70 = vector.extract_strided_slice %4 {offsets = [0, 0], sizes = [1, 16], strides = [1, 1]} : vector<4x16xf32> to vector<1x16xf32>
    %71 = vector.shape_cast %70 : vector<1x16xf32> to vector<16xf32>
    %72 = vector.shape_cast %71 : vector<16xf32> to vector<1x1x1x16xf32>
    %73 = vector.broadcast %72 : vector<1x1x1x16xf32> to vector<2x15x15x16xf32>
    %74 = arith.mulf %69, %73 : vector<2x15x15x16xf32>
    %75 = vector.extract_strided_slice %13 {offsets = [0, 0, 0, 0], sizes = [2, 15, 15, 16], strides = [1, 1, 1, 1]} : vector<2x16x16x16xf32> to vector<2x15x15x16xf32>
    %76 = vector.extract_strided_slice %4 {offsets = [1, 0], sizes = [1, 16], strides = [1, 1]} : vector<4x16xf32> to vector<1x16xf32>
    %77 = vector.shape_cast %76 : vector<1x16xf32> to vector<16xf32>
    %78 = vector.shape_cast %77 : vector<16xf32> to vector<1x1x1x16xf32>
    %79 = vector.broadcast %78 : vector<1x1x1x16xf32> to vector<2x15x15x16xf32>
    %80 = arith.mulf %75, %79 : vector<2x15x15x16xf32>
    %81 = arith.addf %74, %80 : vector<2x15x15x16xf32>
    %82 = vector.extract_strided_slice %7 {offsets = [0, 1, 0, 0], sizes = [2, 15, 15, 16], strides = [1, 1, 1, 1]} : vector<2x16x16x16xf32> to vector<2x15x15x16xf32>
    %83 = vector.extract_strided_slice %4 {offsets = [2, 0], sizes = [1, 16], strides = [1, 1]} : vector<4x16xf32> to vector<1x16xf32>
    %84 = vector.shape_cast %83 : vector<1x16xf32> to vector<16xf32>
    %85 = vector.shape_cast %84 : vector<16xf32> to vector<1x1x1x16xf32>
    %86 = vector.broadcast %85 : vector<1x1x1x16xf32> to vector<2x15x15x16xf32>
    %87 = arith.mulf %82, %86 : vector<2x15x15x16xf32>
    %88 = arith.addf %81, %87 : vector<2x15x15x16xf32>
    %89 = vector.extract_strided_slice %9 {offsets = [0, 1, 0, 0], sizes = [2, 15, 15, 16], strides = [1, 1, 1, 1]} : vector<2x16x16x16xf32> to vector<2x15x15x16xf32>
    %90 = vector.extract_strided_slice %4 {offsets = [3, 0], sizes = [1, 16], strides = [1, 1]} : vector<4x16xf32> to vector<1x16xf32>
    %91 = vector.shape_cast %90 : vector<1x16xf32> to vector<16xf32>
    %92 = vector.shape_cast %91 : vector<16xf32> to vector<1x1x1x16xf32>
    %93 = vector.broadcast %92 : vector<1x1x1x16xf32> to vector<2x15x15x16xf32>
    %94 = arith.mulf %89, %93 : vector<2x15x15x16xf32>
    %95 = arith.addf %88, %94 : vector<2x15x15x16xf32>
    %96 = arith.maximumf %68, %95 : vector<2x15x15x16xf32>
    %97 = vector.extract_strided_slice %13 {offsets = [0, 0, 0, 0], sizes = [2, 15, 15, 16], strides = [1, 1, 1, 1]} : vector<2x16x16x16xf32> to vector<2x15x15x16xf32>
    %98 = vector.extract_strided_slice %4 {offsets = [0, 0], sizes = [1, 16], strides = [1, 1]} : vector<4x16xf32> to vector<1x16xf32>
    %99 = vector.shape_cast %98 : vector<1x16xf32> to vector<16xf32>
    %100 = vector.shape_cast %99 : vector<16xf32> to vector<1x1x1x16xf32>
    %101 = vector.broadcast %100 : vector<1x1x1x16xf32> to vector<2x15x15x16xf32>
    %102 = arith.mulf %97, %101 : vector<2x15x15x16xf32>
    %103 = vector.extract_strided_slice %11 {offsets = [0, 0, 1, 0], sizes = [2, 15, 15, 16], strides = [1, 1, 1, 1]} : vector<2x16x16x16xf32> to vector<2x15x15x16xf32>
    %104 = vector.extract_strided_slice %4 {offsets = [1, 0], sizes = [1, 16], strides = [1, 1]} : vector<4x16xf32> to vector<1x16xf32>
    %105 = vector.shape_cast %104 : vector<1x16xf32> to vector<16xf32>
    %106 = vector.shape_cast %105 : vector<16xf32> to vector<1x1x1x16xf32>
    %107 = vector.broadcast %106 : vector<1x1x1x16xf32> to vector<2x15x15x16xf32>
    %108 = arith.mulf %103, %107 : vector<2x15x15x16xf32>
    %109 = arith.addf %102, %108 : vector<2x15x15x16xf32>
    %110 = vector.extract_strided_slice %9 {offsets = [0, 1, 0, 0], sizes = [2, 15, 15, 16], strides = [1, 1, 1, 1]} : vector<2x16x16x16xf32> to vector<2x15x15x16xf32>
    %111 = vector.extract_strided_slice %4 {offsets = [2, 0], sizes = [1, 16], strides = [1, 1]} : vector<4x16xf32> to vector<1x16xf32>
    %112 = vector.shape_cast %111 : vector<1x16xf32> to vector<16xf32>
    %113 = vector.shape_cast %112 : vector<16xf32> to vector<1x1x1x16xf32>
    %114 = vector.broadcast %113 : vector<1x1x1x16xf32> to vector<2x15x15x16xf32>
    %115 = arith.mulf %110, %114 : vector<2x15x15x16xf32>
    %116 = arith.addf %109, %115 : vector<2x15x15x16xf32>
    %117 = vector.extract_strided_slice %7 {offsets = [0, 1, 1, 0], sizes = [2, 15, 15, 16], strides = [1, 1, 1, 1]} : vector<2x16x16x16xf32> to vector<2x15x15x16xf32>
    %118 = vector.extract_strided_slice %4 {offsets = [3, 0], sizes = [1, 16], strides = [1, 1]} : vector<4x16xf32> to vector<1x16xf32>
    %119 = vector.shape_cast %118 : vector<1x16xf32> to vector<16xf32>
    %120 = vector.shape_cast %119 : vector<16xf32> to vector<1x1x1x16xf32>
    %121 = vector.broadcast %120 : vector<1x1x1x16xf32> to vector<2x15x15x16xf32>
    %122 = arith.mulf %117, %121 : vector<2x15x15x16xf32>
    %123 = arith.addf %116, %122 : vector<2x15x15x16xf32>
    %124 = arith.maximumf %96, %123 : vector<2x15x15x16xf32>
    %125 = vector.shape_cast %5 : vector<1x16xf32> to vector<1x1x1x16xf32>
    %126 = vector.broadcast %125 : vector<1x1x1x16xf32> to vector<2x15x15x16xf32>
    %127 = arith.addf %124, %126 : vector<2x15x15x16xf32>
    %cst = arith.constant 0.000000e+00 : f32
    %128 = vector.broadcast %cst : f32 to vector<2x15x15x16xf32>
    %129 = arith.maximumf %127, %128 : vector<2x15x15x16xf32>
    %c0_19 = arith.constant 0 : index
    %c0_20 = arith.constant 0 : index
    %130 = vector.load %arg6[%c0_19, %c0_20] : memref<64x32xf32, #tpu.memory_space<vmem>>, vector<64x32xf32>
    %c0_21 = arith.constant 0 : index
    %c0_22 = arith.constant 0 : index
    %131 = vector.load %arg7[%c0_21, %c0_22] : memref<1x32xf32, #tpu.memory_space<vmem>>, vector<1x32xf32>
    %cst_23 = arith.constant 0.000000e+00 : f32
    %132 = vector.broadcast %cst_23 : f32 to vector<2x15x2x16xf32>
    %133 = tpu.concatenate %129, %132 in 2 : vector<2x15x15x16xf32>, vector<2x15x2x16xf32> -> vector<2x15x17x16xf32>
    %134 = vector.extract_strided_slice %133 {offsets = [0, 0, 0, 0], sizes = [2, 14, 16, 16], strides = [1, 1, 1, 1]} : vector<2x15x17x16xf32> to vector<2x14x16x16xf32>
    %135 = vector.extract_strided_slice %133 {offsets = [0, 0, 1, 0], sizes = [2, 14, 16, 16], strides = [1, 1, 1, 1]} : vector<2x15x17x16xf32> to vector<2x14x16x16xf32>
    %136 = tpu.concatenate %134, %135 in 3 : vector<2x14x16x16xf32>, vector<2x14x16x16xf32> -> vector<2x14x16x32xf32>
    %137 = vector.shape_cast %136 : vector<2x14x16x32xf32> to vector<448x32xf32>
    %138 = vector.extract_strided_slice %130 {offsets = [0, 0], sizes = [32, 32], strides = [1, 1]} : vector<64x32xf32> to vector<32x32xf32>
    %cst_24 = arith.constant dense<0.000000e+00> : vector<448x32xf32>
    %139 = tpu.matmul %137, %138, %cst_24 {dimension_numbers = #tpu.dot_dimension_numbers<[1], [0], [0], [1], [0, 0, 1, 1], [], []>} : vector<448x32xf32>, vector<32x32xf32>, vector<448x32xf32> -> vector<448x32xf32>
    %140 = vector.extract_strided_slice %133 {offsets = [0, 1, 0, 0], sizes = [2, 14, 16, 16], strides = [1, 1, 1, 1]} : vector<2x15x17x16xf32> to vector<2x14x16x16xf32>
    %141 = vector.extract_strided_slice %133 {offsets = [0, 1, 1, 0], sizes = [2, 14, 16, 16], strides = [1, 1, 1, 1]} : vector<2x15x17x16xf32> to vector<2x14x16x16xf32>
    %142 = tpu.concatenate %140, %141 in 3 : vector<2x14x16x16xf32>, vector<2x14x16x16xf32> -> vector<2x14x16x32xf32>
    %143 = vector.shape_cast %142 : vector<2x14x16x32xf32> to vector<448x32xf32>
    %144 = vector.extract_strided_slice %130 {offsets = [32, 0], sizes = [32, 32], strides = [1, 1]} : vector<64x32xf32> to vector<32x32xf32>
    %cst_25 = arith.constant dense<0.000000e+00> : vector<448x32xf32>
    %145 = tpu.matmul %143, %144, %cst_25 {dimension_numbers = #tpu.dot_dimension_numbers<[1], [0], [0], [1], [0, 0, 1, 1], [], []>} : vector<448x32xf32>, vector<32x32xf32>, vector<448x32xf32> -> vector<448x32xf32>
    %146 = arith.addf %139, %145 : vector<448x32xf32>
    %147 = vector.broadcast %131 : vector<1x32xf32> to vector<448x32xf32>
    %148 = arith.addf %146, %147 : vector<448x32xf32>
    %cst_26 = arith.constant 0.000000e+00 : f32
    %149 = vector.broadcast %cst_26 : f32 to vector<448x32xf32>
    %150 = arith.maximumf %148, %149 : vector<448x32xf32>
    %151 = vector.shape_cast %150 : vector<448x32xf32> to vector<2x14x16x32xf32>
    %152 = vector.extract_strided_slice %151 {offsets = [0, 0, 0, 0], sizes = [2, 14, 14, 32], strides = [1, 1, 1, 1]} : vector<2x14x16x32xf32> to vector<2x14x14x32xf32>
    %153 = vector.shape_cast %152 : vector<2x14x14x32xf32> to vector<14x2x14x32xf32>
    %154 = vector.extract_strided_slice %153 {offsets = [0, 0, 0, 0], sizes = [14, 1, 14, 32], strides = [1, 1, 1, 1]} : vector<14x2x14x32xf32> to vector<14x1x14x32xf32>
    %155 = vector.shape_cast %154 : vector<14x1x14x32xf32> to vector<14x14x32xf32>
    %156 = vector.extract_strided_slice %153 {offsets = [0, 1, 0, 0], sizes = [14, 1, 14, 32], strides = [1, 1, 1, 1]} : vector<14x2x14x32xf32> to vector<14x1x14x32xf32>
    %157 = vector.shape_cast %156 : vector<14x1x14x32xf32> to vector<14x14x32xf32>
    %158 = arith.maximumf %155, %157 : vector<14x14x32xf32>
    %159 = vector.extract_strided_slice %158 {offsets = [0, 0, 0], sizes = [14, 13, 32], strides = [1, 1, 1]} : vector<14x14x32xf32> to vector<14x13x32xf32>
    %160 = vector.extract_strided_slice %158 {offsets = [0, 1, 0], sizes = [14, 13, 32], strides = [1, 1, 1]} : vector<14x14x32xf32> to vector<14x13x32xf32>
    %161 = arith.maximumf %159, %160 : vector<14x13x32xf32>
    %162 = vector.extract_strided_slice %161 {offsets = [0, 0, 0], sizes = [14, 1, 32], strides = [1, 1, 1]} : vector<14x13x32xf32> to vector<14x1x32xf32>
    %163 = vector.extract_strided_slice %161 {offsets = [0, 2, 0], sizes = [14, 1, 32], strides = [1, 1, 1]} : vector<14x13x32xf32> to vector<14x1x32xf32>
    %164 = vector.extract_strided_slice %161 {offsets = [0, 4, 0], sizes = [14, 1, 32], strides = [1, 1, 1]} : vector<14x13x32xf32> to vector<14x1x32xf32>
    %165 = vector.extract_strided_slice %161 {offsets = [0, 6, 0], sizes = [14, 1, 32], strides = [1, 1, 1]} : vector<14x13x32xf32> to vector<14x1x32xf32>
    %166 = vector.extract_strided_slice %161 {offsets = [0, 8, 0], sizes = [14, 1, 32], strides = [1, 1, 1]} : vector<14x13x32xf32> to vector<14x1x32xf32>
    %167 = vector.extract_strided_slice %161 {offsets = [0, 10, 0], sizes = [14, 1, 32], strides = [1, 1, 1]} : vector<14x13x32xf32> to vector<14x1x32xf32>
    %168 = vector.extract_strided_slice %161 {offsets = [0, 12, 0], sizes = [14, 1, 32], strides = [1, 1, 1]} : vector<14x13x32xf32> to vector<14x1x32xf32>
    %169 = tpu.concatenate %162, %163, %164, %165, %166, %167, %168 in 1 : vector<14x1x32xf32>, vector<14x1x32xf32>, vector<14x1x32xf32>, vector<14x1x32xf32>, vector<14x1x32xf32>, vector<14x1x32xf32>, vector<14x1x32xf32> -> vector<14x7x32xf32>
    %170 = vector.shape_cast %169 : vector<14x7x32xf32> to vector<2x7x7x32xf32>
    %c0_27 = arith.constant 0 : index
    %c0_28 = arith.constant 0 : index
    %171 = vector.load %arg8[%c0_27, %c0_28] : memref<128x64xf32, #tpu.memory_space<vmem>>, vector<128x64xf32>
    %c0_29 = arith.constant 0 : index
    %c0_30 = arith.constant 0 : index
    %172 = vector.load %arg9[%c0_29, %c0_30] : memref<1x64xf32, #tpu.memory_space<vmem>>, vector<1x64xf32>
    %cst_31 = arith.constant 0.000000e+00 : f32
    %173 = vector.broadcast %cst_31 : f32 to vector<2x7x2x32xf32>
    %174 = tpu.concatenate %170, %173 in 2 : vector<2x7x7x32xf32>, vector<2x7x2x32xf32> -> vector<2x7x9x32xf32>
    %175 = vector.extract_strided_slice %174 {offsets = [0, 0, 0, 0], sizes = [2, 6, 8, 32], strides = [1, 1, 1, 1]} : vector<2x7x9x32xf32> to vector<2x6x8x32xf32>
    %176 = vector.extract_strided_slice %174 {offsets = [0, 0, 1, 0], sizes = [2, 6, 8, 32], strides = [1, 1, 1, 1]} : vector<2x7x9x32xf32> to vector<2x6x8x32xf32>
    %177 = tpu.concatenate %175, %176 in 3 : vector<2x6x8x32xf32>, vector<2x6x8x32xf32> -> vector<2x6x8x64xf32>
    %178 = vector.shape_cast %177 : vector<2x6x8x64xf32> to vector<96x64xf32>
    %179 = vector.extract_strided_slice %171 {offsets = [0, 0], sizes = [64, 64], strides = [1, 1]} : vector<128x64xf32> to vector<64x64xf32>
    %cst_32 = arith.constant dense<0.000000e+00> : vector<96x64xf32>
    %180 = tpu.matmul %178, %179, %cst_32 {dimension_numbers = #tpu.dot_dimension_numbers<[1], [0], [0], [1], [0, 0, 1, 1], [], []>} : vector<96x64xf32>, vector<64x64xf32>, vector<96x64xf32> -> vector<96x64xf32>
    %181 = vector.extract_strided_slice %174 {offsets = [0, 1, 0, 0], sizes = [2, 6, 8, 32], strides = [1, 1, 1, 1]} : vector<2x7x9x32xf32> to vector<2x6x8x32xf32>
    %182 = vector.extract_strided_slice %174 {offsets = [0, 1, 1, 0], sizes = [2, 6, 8, 32], strides = [1, 1, 1, 1]} : vector<2x7x9x32xf32> to vector<2x6x8x32xf32>
    %183 = tpu.concatenate %181, %182 in 3 : vector<2x6x8x32xf32>, vector<2x6x8x32xf32> -> vector<2x6x8x64xf32>
    %184 = vector.shape_cast %183 : vector<2x6x8x64xf32> to vector<96x64xf32>
    %185 = vector.extract_strided_slice %171 {offsets = [64, 0], sizes = [64, 64], strides = [1, 1]} : vector<128x64xf32> to vector<64x64xf32>
    %cst_33 = arith.constant dense<0.000000e+00> : vector<96x64xf32>
    %186 = tpu.matmul %184, %185, %cst_33 {dimension_numbers = #tpu.dot_dimension_numbers<[1], [0], [0], [1], [0, 0, 1, 1], [], []>} : vector<96x64xf32>, vector<64x64xf32>, vector<96x64xf32> -> vector<96x64xf32>
    %187 = arith.addf %180, %186 : vector<96x64xf32>
    %188 = vector.broadcast %172 : vector<1x64xf32> to vector<96x64xf32>
    %189 = arith.addf %187, %188 : vector<96x64xf32>
    %cst_34 = arith.constant 0.000000e+00 : f32
    %190 = vector.broadcast %cst_34 : f32 to vector<96x64xf32>
    %191 = arith.maximumf %189, %190 : vector<96x64xf32>
    %192 = vector.shape_cast %191 : vector<96x64xf32> to vector<2x6x8x64xf32>
    %193 = vector.extract_strided_slice %192 {offsets = [0, 0, 0, 0], sizes = [2, 6, 6, 64], strides = [1, 1, 1, 1]} : vector<2x6x8x64xf32> to vector<2x6x6x64xf32>
    %194 = vector.shape_cast %193 : vector<2x6x6x64xf32> to vector<6x2x6x64xf32>
    %195 = vector.extract_strided_slice %194 {offsets = [0, 0, 0, 0], sizes = [6, 1, 6, 64], strides = [1, 1, 1, 1]} : vector<6x2x6x64xf32> to vector<6x1x6x64xf32>
    %196 = vector.shape_cast %195 : vector<6x1x6x64xf32> to vector<6x6x64xf32>
    %197 = vector.extract_strided_slice %194 {offsets = [0, 1, 0, 0], sizes = [6, 1, 6, 64], strides = [1, 1, 1, 1]} : vector<6x2x6x64xf32> to vector<6x1x6x64xf32>
    %198 = vector.shape_cast %197 : vector<6x1x6x64xf32> to vector<6x6x64xf32>
    %199 = arith.maximumf %196, %198 : vector<6x6x64xf32>
    %200 = vector.extract_strided_slice %199 {offsets = [0, 0, 0], sizes = [6, 5, 64], strides = [1, 1, 1]} : vector<6x6x64xf32> to vector<6x5x64xf32>
    %201 = vector.extract_strided_slice %199 {offsets = [0, 1, 0], sizes = [6, 5, 64], strides = [1, 1, 1]} : vector<6x6x64xf32> to vector<6x5x64xf32>
    %202 = arith.maximumf %200, %201 : vector<6x5x64xf32>
    %203 = vector.extract_strided_slice %202 {offsets = [0, 0, 0], sizes = [6, 1, 64], strides = [1, 1, 1]} : vector<6x5x64xf32> to vector<6x1x64xf32>
    %204 = vector.extract_strided_slice %202 {offsets = [0, 2, 0], sizes = [6, 1, 64], strides = [1, 1, 1]} : vector<6x5x64xf32> to vector<6x1x64xf32>
    %205 = vector.extract_strided_slice %202 {offsets = [0, 4, 0], sizes = [6, 1, 64], strides = [1, 1, 1]} : vector<6x5x64xf32> to vector<6x1x64xf32>
    %206 = tpu.concatenate %203, %204, %205 in 1 : vector<6x1x64xf32>, vector<6x1x64xf32>, vector<6x1x64xf32> -> vector<6x3x64xf32>
    %207 = vector.shape_cast %206 : vector<6x3x64xf32> to vector<2x3x3x64xf32>
    %c0_35 = arith.constant 0 : index
    %c0_36 = arith.constant 0 : index
    %208 = vector.load %arg10[%c0_35, %c0_36] : memref<256x128xf32, #tpu.memory_space<vmem>>, vector<256x128xf32>
    %c0_37 = arith.constant 0 : index
    %c0_38 = arith.constant 0 : index
    %209 = vector.load %arg11[%c0_37, %c0_38] : memref<1x128xf32, #tpu.memory_space<vmem>>, vector<1x128xf32>
    %cst_39 = arith.constant 0.000000e+00 : f32
    %210 = vector.broadcast %cst_39 : f32 to vector<2x3x6x64xf32>
    %211 = tpu.concatenate %207, %210 in 2 : vector<2x3x3x64xf32>, vector<2x3x6x64xf32> -> vector<2x3x9x64xf32>
    %212 = vector.extract_strided_slice %211 {offsets = [0, 0, 0, 0], sizes = [2, 2, 8, 64], strides = [1, 1, 1, 1]} : vector<2x3x9x64xf32> to vector<2x2x8x64xf32>
    %213 = vector.extract_strided_slice %211 {offsets = [0, 0, 1, 0], sizes = [2, 2, 8, 64], strides = [1, 1, 1, 1]} : vector<2x3x9x64xf32> to vector<2x2x8x64xf32>
    %214 = tpu.concatenate %212, %213 in 3 : vector<2x2x8x64xf32>, vector<2x2x8x64xf32> -> vector<2x2x8x128xf32>
    %215 = vector.shape_cast %214 : vector<2x2x8x128xf32> to vector<32x128xf32>
    %216 = vector.extract_strided_slice %208 {offsets = [0, 0], sizes = [128, 128], strides = [1, 1]} : vector<256x128xf32> to vector<128x128xf32>
    %cst_40 = arith.constant dense<0.000000e+00> : vector<32x128xf32>
    %217 = tpu.matmul %215, %216, %cst_40 {dimension_numbers = #tpu.dot_dimension_numbers<[1], [0], [0], [1], [0, 0, 1, 1], [], []>} : vector<32x128xf32>, vector<128x128xf32>, vector<32x128xf32> -> vector<32x128xf32>
    %218 = vector.extract_strided_slice %211 {offsets = [0, 1, 0, 0], sizes = [2, 2, 8, 64], strides = [1, 1, 1, 1]} : vector<2x3x9x64xf32> to vector<2x2x8x64xf32>
    %219 = vector.extract_strided_slice %211 {offsets = [0, 1, 1, 0], sizes = [2, 2, 8, 64], strides = [1, 1, 1, 1]} : vector<2x3x9x64xf32> to vector<2x2x8x64xf32>
    %220 = tpu.concatenate %218, %219 in 3 : vector<2x2x8x64xf32>, vector<2x2x8x64xf32> -> vector<2x2x8x128xf32>
    %221 = vector.shape_cast %220 : vector<2x2x8x128xf32> to vector<32x128xf32>
    %222 = vector.extract_strided_slice %208 {offsets = [128, 0], sizes = [128, 128], strides = [1, 1]} : vector<256x128xf32> to vector<128x128xf32>
    %cst_41 = arith.constant dense<0.000000e+00> : vector<32x128xf32>
    %223 = tpu.matmul %221, %222, %cst_41 {dimension_numbers = #tpu.dot_dimension_numbers<[1], [0], [0], [1], [0, 0, 1, 1], [], []>} : vector<32x128xf32>, vector<128x128xf32>, vector<32x128xf32> -> vector<32x128xf32>
    %224 = arith.addf %217, %223 : vector<32x128xf32>
    %225 = vector.broadcast %209 : vector<1x128xf32> to vector<32x128xf32>
    %226 = arith.addf %224, %225 : vector<32x128xf32>
    %cst_42 = arith.constant 0.000000e+00 : f32
    %227 = vector.broadcast %cst_42 : f32 to vector<32x128xf32>
    %228 = arith.maximumf %226, %227 : vector<32x128xf32>
    %229 = vector.shape_cast %228 : vector<32x128xf32> to vector<2x2x8x128xf32>
    %230 = vector.extract_strided_slice %229 {offsets = [0, 0, 0, 0], sizes = [2, 2, 2, 128], strides = [1, 1, 1, 1]} : vector<2x2x8x128xf32> to vector<2x2x2x128xf32>
    %231 = vector.extract_strided_slice %230 {offsets = [0, 0, 0, 0], sizes = [2, 1, 2, 128], strides = [1, 1, 1, 1]} : vector<2x2x2x128xf32> to vector<2x1x2x128xf32>
    %232 = vector.shape_cast %231 : vector<2x1x2x128xf32> to vector<2x2x128xf32>
    %233 = vector.extract_strided_slice %230 {offsets = [0, 1, 0, 0], sizes = [2, 1, 2, 128], strides = [1, 1, 1, 1]} : vector<2x2x2x128xf32> to vector<2x1x2x128xf32>
    %234 = vector.shape_cast %233 : vector<2x1x2x128xf32> to vector<2x2x128xf32>
    %235 = arith.maximumf %232, %234 : vector<2x2x128xf32>
    %236 = vector.extract_strided_slice %235 {offsets = [0, 0, 0], sizes = [2, 1, 128], strides = [1, 1, 1]} : vector<2x2x128xf32> to vector<2x1x128xf32>
    %237 = vector.extract_strided_slice %235 {offsets = [0, 1, 0], sizes = [2, 1, 128], strides = [1, 1, 1]} : vector<2x2x128xf32> to vector<2x1x128xf32>
    %238 = arith.maximumf %236, %237 : vector<2x1x128xf32>
    %239 = vector.shape_cast %238 : vector<2x1x128xf32> to vector<2x1x1x128xf32>
    %240 = vector.shape_cast %239 : vector<2x1x1x128xf32> to vector<2x128xf32>
    %c0_43 = arith.constant 0 : index
    %c0_44 = arith.constant 0 : index
    %241 = vector.load %arg12[%c0_43, %c0_44] : memref<128x3xf32, #tpu.memory_space<vmem>>, vector<128x3xf32>
    %cst_45 = arith.constant dense<0.000000e+00> : vector<2x3xf32>
    %242 = tpu.matmul %240, %241, %cst_45 {dimension_numbers = #tpu.dot_dimension_numbers<[1], [0], [0], [1], [0, 0, 1, 1], [], []>} : vector<2x128xf32>, vector<128x3xf32>, vector<2x3xf32> -> vector<2x3xf32>
    %c0_46 = arith.constant 0 : index
    %c0_47 = arith.constant 0 : index
    %243 = vector.load %arg13[%c0_46, %c0_47] : memref<1x3xf32, #tpu.memory_space<vmem>>, vector<1x3xf32>
    %244 = vector.broadcast %243 : vector<1x3xf32> to vector<2x3xf32>
    %245 = arith.addf %242, %244 : vector<2x3xf32>
    %cst_48 = arith.constant 0.000000e+00 : f32
    %246 = vector.broadcast %cst_48 : f32 to vector<2x3xf32>
    %247 = arith.maximumf %245, %246 : vector<2x3xf32>
    %c0_49 = arith.constant 0 : index
    %c0_50 = arith.constant 0 : index
    %248 = vector.load %arg14[%c0_49, %c0_50] : memref<2x3xf32, #tpu.memory_space<vmem>>, vector<2x3xf32>
    tpu.vector_store %arg14[%c0_49, %c0_50], %247 {strides = array<i32>} : memref<2x3xf32, #tpu.memory_space<vmem>>, vector<2x3xf32>,
    return
  }
}

</mosaic_0001>

<bundles_post_ra>
// kernel: cnn_forward.1
= control target key start
LH: loop header
LB: loop body
LE: loop exit
PB: predicated region body
PF: predicated region fallthrough
CT: control target
= control target key end

     0   :  { %v8169_v2 = vmov 0   ;;  %s14206_s0 = inlined_call_operand.vmem [shape: f32[2,16,16,1], index: 0, kind: input, shape index: {}]   ;;  %s14207_s1 = inlined_call_operand.vmem [shape: f32[2,16,16,1], index: 1, kind: input, shape index: {}]   ;;  %s14208_s2 = inlined_call_operand.vmem [shape: f32[2,16,16,1], index: 2, kind: input, shape index: {}]   ;;  %s14209_s3 = inlined_call_operand.vmem [shape: f32[2,16,16,1], index: 3, kind: input, shape index: {}]   ;;  %s14210_s4 = inlined_call_operand.vmem [shape: f32[4,16], index: 4, kind: input, shape index: {}]   ;;  %s14211_s5 = inlined_call_operand.vmem [shape: f32[1,16], index: 5, kind: input, shape index: {}]   ;;  %s14212_s6 = inlined_call_operand.vmem [shape: f32[64,32], index: 6, kind: input, shape index: {}]   ;;  %s14213_s7 = inlined_call_operand.vmem [shape: f32[1,32], index: 7, kind: input, shape index: {}]   ;;  %s14214_s8 = inlined_call_operand.vmem [shape: f32[128,64], index: 8, kind: input, shape index: {}]   ;;  %s14215_s9 = inlined_call_operand.vmem [shape: f32[1,64], index: 9, kind: input, shape index: {}]   ;;  %s14216_s10 = inlined_call_operand.vmem [shape: f32[256,128], index: 10, kind: input, shape index: {}]   ;;  %s14217_s11 = inlined_call_operand.vmem [shape: f32[1,128], index: 11, kind: input, shape index: {}]   ;;  %s14218_s12 = inlined_call_operand.vmem [shape: f32[128,3], index: 12, kind: input, shape index: {}]   ;;  %s14219_s13 = inlined_call_operand.vmem [shape: f32[1,3], index: 13, kind: input, shape index: {}]   ;;  %s14220_s14 = inlined_call_operand.hbm [shape: f32[2,3], index: 14, kind: output, shape index: {}]  }
   0x1   :  { %v115_v0 = vld [vmem:[%s14207_s1 + $0x18] sm:$0xff]  ;;  %v50_v1 = vld [vmem:[%s14206_s0 + $0x10] sm:$0xff]  ;;  %8129 = vset.pattern.permute.xlu1 %v8169_v2  ;;  %8128 = vset.pattern.permute.xlu0 %v8169_v2  ;;  %v53_v5 = vld [vmem:[%s14206_s0 + $0x28] sm:$0xff] }
   0x2   :  { %679 = vperm.xlu1 %8129, %v115_v0   ;;  %310 = vperm.xlu0 %8128, %v50_v1   ;;  %v114_v3 = vld [vmem:[%s14207_s1 + $0x10] sm:$0xff]  ;;  %v51_v4 = vld [vmem:[%s14206_s0 + $0x18] sm:$0xff]  ;;  %v52_v6 = vld [vmem:[%s14206_s0 + $0x20] sm:$0xff] }
   0x3   :  { %v179_v7 = vld [vmem:[%s14208_s2 + $0x18] sm:$0xff]  ;;  %v178_v8 = vld [vmem:[%s14208_s2 + $0x10] sm:$0xff]  ;;  %v116_v11 = vld [vmem:[%s14207_s1 + $0x20] sm:$0xff] }
   0x4   :  { %v238_v9 = vld [vmem:[%s14209_s3 + $0x10] sm:$0xff]  ;;  %v239_v10 = vld [vmem:[%s14209_s3 + $0x18] sm:$0xff]  ;;  %v117_v12 = vld [vmem:[%s14207_s1 + $0x28] sm:$0xff] }
   0x5   :  { %v55_v13 = vld [vmem:[%s14206_s0 + $0x38] sm:$0xff]  ;;  %v54_v14 = vld [vmem:[%s14206_s0 + $0x30] sm:$0xff] }
   0x6   :  { %674 = vperm.xlu1 %8129, %v114_v3   ;;  %315 = vperm.xlu0 %8128, %v51_v4  }
   0xa   :  { %325 = vperm.xlu1 %8129, %v53_v5   ;;  %320 = vperm.xlu0 %8128, %v52_v6  }
   0xe   :  { %1103 = vperm.xlu1 %8129, %v179_v7   ;;  %1098 = vperm.xlu0 %8128, %v178_v8  }
  0x12   :  { %1522 = vperm.xlu1 %8129, %v238_v9   ;;  %1527 = vperm.xlu0 %8128, %v239_v10  }
  0x16   :  { %684 = vperm.xlu1 %8129, %v116_v11   ;;  %689 = vperm.xlu0 %8128, %v117_v12  }
  0x17   :  { %19 = vsyncpa [#allocation3], 0  ;;  %v181_v15 = vld [vmem:[%s14208_s2 + $0x28] sm:$0xff]  ;;  %v180_v16 = vld [vmem:[%s14208_s2 + $0x20] sm:$0xff]  ;;  %vm2114_vm0 = vcmask 1046528   ;;  %s8171_s24 = smov 16  }
  0x18   :  { %v240_v17 = vld [vmem:[%s14209_s3 + $0x20] sm:$0xff]  ;;  %v241_v18 = vld [vmem:[%s14209_s3 + $0x28] sm:$0xff]  ;;  %v118_v19 = vld [vmem:[%s14207_s1 + $0x30] sm:$0xff]  ;;  %vm4758_vm1 = vcmask 130048   ;;  %vm4843_vm2 = vcmask 261120   ;;  %vm6182_vm3 = vcmask 1040384  }
  0x19   :  { %v119_v20 = vld [vmem:[%s14207_s1 + $0x38] sm:$0xff]  ;;  %v57_v21 = vld [vmem:[%s14206_s0 + $0x48] sm:$0xff]  ;;  %v56_v22 = vld [vmem:[%s14206_s0 + $0x40] sm:$0xff]  ;;  %vm6197_vm4 = vcmask 1041408   ;;  %vm6212_vm5 = vcmask 1042432   ;;  %vm6227_vm6 = vcmask 1043456  }
  0x1a   :  { %335 = vperm.xlu1 %8129, %v55_v13   ;;  %330 = vperm.xlu0 %8128, %v54_v14   ;;  %v183_v23 = vld [vmem:[%s14208_s2 + $0x38] sm:$0xff]  ;;  %v182_v24 = vld [vmem:[%s14208_s2 + $0x30] sm:$0xff]  ;;  %v120_v27 = vld [vmem:[%s14207_s1 + $0x40] sm:$0xff]  ;;  %v598_v13 = vlaneseq  ;;  %vm6242_vm7 = vcmask 1044480   ;;  %vm6257_vm8 = vcmask 1045504   ;;  %s8172_s23 = smov 32  }
  0x1b   :  { %v242_v25 = vld [vmem:[%s14209_s3 + $0x30] sm:$0xff]  ;;  %v243_v26 = vld [vmem:[%s14209_s3 + $0x38] sm:$0xff]  ;;  %v121_v28 = vld [vmem:[%s14207_s1 + $0x48] sm:$0xff]  ;;  %vm6401_vm9 = vcmask 523264   ;;  %vm8175_vm10 = vmmov 0   ;;  %vm7097_vm11 = vcmask 1041409  }
  0x1c   :  { %v59_v29 = vld [vmem:[%s14206_s0 + $0x58] sm:$0xff]  ;;  %v58_v30 = vld [vmem:[%s14206_s0 + $0x50] sm:$0xff]  ;;  %v185_v31 = vld [vmem:[%s14208_s2 + $0x48] sm:$0xff]  ;;  %s8176_s16 = smov [#allocation2]   ;;  %vm7171_vm12 = vcmask 17408  }
  0x1d   :  { %v184_v32 = vld [vmem:[%s14208_s2 + $0x40] sm:$0xff]  ;;  %v245_v34 = vld [vmem:[%s14209_s3 + $0x48] sm:$0xff]  ;;  %v122_v35 = vld [vmem:[%s14207_s1 + $0x50] sm:$0xff]  ;;  %s7179_s17 = sshll.u32 %s8176_s16, 4  ;;  %s7180_s17 = int_to_ptr.vmem [resolvable:$true] %s7179_s17 }
  0x1e   :  { %1113 = vperm.xlu1 %8129, %v181_v15   ;;  %1108 = vperm.xlu0 %8128, %v180_v16   ;;  %v244_v33 = vld [vmem:[%s14209_s3 + $0x40] sm:$0xff]  ;;  %v123_v36 = vld [vmem:[%s14207_s1 + $0x58] sm:$0xff]  ;;  %v61_v37 = vld [vmem:[%s14206_s0 + $0x68] sm:$0xff]  ;;  %s8145_s18 = scalar_lea.vmem %s7180_s17, 32  ;;  %p8150_p1 = scmp.lt.s32.totalorder %s7180_s17, %s7180_s17 }
  0x1f   :  { %v60_v38 = vld [vmem:[%s14206_s0 + $0x60] sm:$0xff]  ;;  %v187_v39 = vld [vmem:[%s14208_s2 + $0x58] sm:$0xff]  ;;  %v186_v40 = vld [vmem:[%s14208_s2 + $0x50] sm:$0xff]  ;;  %p8146_p0 = scmp.ne.s32.totalorder %s7180_s17, %s8145_s18  ;;  %p8151_p2 = scmp.lt.s32.totalorder %s8145_s18, %s8145_s18 }
  0x20   :  { %v246_v41 = vld [vmem:[%s14209_s3 + $0x50] sm:$0xff]  ;;  %v247_v42 = vld [vmem:[%s14209_s3 + $0x58] sm:$0xff]  ;;  %v124_v43 = vld [vmem:[%s14207_s1 + $0x60] sm:$0xff] }
  0x21   :  { %v125_v44 = vld [vmem:[%s14207_s1 + $0x68] sm:$0xff]  ;;  %v63_v45 = vld [vmem:[%s14206_s0 + $0x78] sm:$0xff]  ;;  %v62_v46 = vld [vmem:[%s14206_s0 + $0x70] sm:$0xff]  ;;  %p8152_p3 = por %p8151_p2, %p8150_p1 }
  0x22   :  { %1532 = vperm.xlu1 %8129, %v240_v17   ;;  %1537 = vperm.xlu0 %8128, %v241_v18   ;;  %v189_v47 = vld [vmem:[%s14208_s2 + $0x68] sm:$0xff]  ;;  %v188_v48 = vld [vmem:[%s14208_s2 + $0x60] sm:$0xff]  ;;  %v126_v51 = vld [vmem:[%s14207_s1 + $0x70] sm:$0xff]  ;;  %v599_v18 = vshrl.u32 %v598_v13, 7 }
  0x23   :  { %v248_v49 = vld [vmem:[%s14209_s3 + $0x60] sm:$0xff]  ;;  %v249_v50 = vld [vmem:[%s14209_s3 + $0x68] sm:$0xff]  ;;  %v127_v52 = vld [vmem:[%s14207_s1 + $0x78] sm:$0xff]  ;;  %p8153_p4 = pnand %p8152_p3, %p8146_p0 }
  0x24   :  { %v65_v53 = vld [vmem:[%s14206_s0 + $0x88] sm:$0xff]  ;;  %v64_v54 = vld [vmem:[%s14206_s0 + $0x80] sm:$0xff]  ;;  %v191_v55 = vld [vmem:[%s14208_s2 + $0x78] sm:$0xff] }
  0x25   :  { %v190_v56 = vld [vmem:[%s14208_s2 + $0x70] sm:$0xff]  ;;  %v251_v58 = vld [vmem:[%s14209_s3 + $0x78] sm:$0xff]  ;;  %v128_v59 = vld [vmem:[%s14207_s1 + $0x80] sm:$0xff] }
  0x26   :  { %694 = vperm.xlu1 %8129, %v118_v19   ;;  %699 = vperm.xlu0 %8128, %v119_v20   ;;  %v250_v57 = vld [vmem:[%s14209_s3 + $0x70] sm:$0xff]  ;;  %v129_v60 = vld [vmem:[%s14207_s1 + $0x88] sm:$0xff]  ;;  %v67_v61 = vld [vmem:[%s14206_s0 + $0x98] sm:$0xff] }
  0x27   :  { %v66_v62 = vld [vmem:[%s14206_s0 + $0x90] sm:$0xff]  ;;  %v193_v63 = vld [vmem:[%s14208_s2 + $0x88] sm:$0xff]  ;;  %v192_v0 = vld [vmem:[%s14208_s2 + $0x80] sm:$0xff] }
  0x28   :  { %v252_v1 = vld [vmem:[%s14209_s3 + $0x80] sm:$0xff]  ;;  %v253_v2 = vld [vmem:[%s14209_s3 + $0x88] sm:$0xff]  ;;  %v130_v5 = vld [vmem:[%s14207_s1 + $0x90] sm:$0xff] }
  0x29   :  { %v131_v6 = vld [vmem:[%s14207_s1 + $0x98] sm:$0xff]  ;;  %v69_v9 = vld [vmem:[%s14206_s0 + $0xa8] sm:$0xff]  ;;  %v68_v10 = vld [vmem:[%s14206_s0 + $0xa0] sm:$0xff] }
  0x2a   :  { %345 = vperm.xlu1 %8129, %v57_v21   ;;  %340 = vperm.xlu0 %8128, %v56_v22   ;;  %v195_v14 = vld [vmem:[%s14208_s2 + $0x98] sm:$0xff]  ;;  %v194_v15 = vld [vmem:[%s14208_s2 + $0x90] sm:$0xff] }
  0x2b   :  { %v254_v19 = vld [vmem:[%s14209_s3 + $0x90] sm:$0xff]  ;;  %v255_v20 = vld [vmem:[%s14209_s3 + $0x98] sm:$0xff] }
  0x2e   :  { %1123 = vperm.xlu1 %8129, %v183_v23   ;;  %1118 = vperm.xlu0 %8128, %v182_v24   ;;  %v964_v23 = vsub.s32 1, %v599_v18  ;;  %v296_v24 = vld [vmem:[%s14210_s4] sm:$0xf] }
  0x32   :  { %1542 = vperm.xlu1 %8129, %v242_v25   ;;  %1547 = vperm.xlu0 %8128, %v243_v26   ;;  %v132_v25 = vld [vmem:[%s14207_s1 + $0xa0] sm:$0xff]  ;;  %v133_v26 = vld [vmem:[%s14207_s1 + $0xa8] sm:$0xff] }
  0x36   :  { %704 = vperm.xlu1 %8129, %v120_v27   ;;  %709 = vperm.xlu0 %8128, %v121_v28  }
  0x3a   :  { %355 = vperm.xlu1 %8129, %v59_v29   ;;  %350 = vperm.xlu0 %8128, %v58_v30   ;;  %v600_v29 = vsub.s32 0, %v599_v18  ;;  %v8507_v30 = vrot.slane %v296_v24, %v964_v23  ;;  %v134_v23 = vld [vmem:[%s14207_s1 + $0xb0] sm:$0xff] }
  0x3e   :  { %1133 = vperm.xlu1 %8129, %v185_v31   ;;  %1128 = vperm.xlu0 %8128, %v184_v32   ;;  %v1388_v31 = vsub.s32 2, %v599_v18  ;;  %v1812_v32 = vsub.s32 3, %v599_v18 }
  0x42   :  { %1552 = vperm.xlu1 %8129, %v244_v33   ;;  %1557 = vperm.xlu0 %8128, %v245_v34   ;;  %v71_v33 = vld [vmem:[%s14206_s0 + $0xb8] sm:$0xff] }
  0x46   :  { %714 = vperm.xlu1 %8129, %v122_v35   ;;  %719 = vperm.xlu0 %8128, %v123_v36   ;;  %v70_v35 = vld [vmem:[%s14206_s0 + $0xb0] sm:$0xff] }
  0x4a   :  { %365 = vperm.xlu1 %8129, %v61_v37   ;;  %360 = vperm.xlu0 %8128, %v60_v38   ;;  %v8521_v38 = vrot.slane %v296_v24, %v600_v29 }
  0x4e   :  { %1143 = vperm.xlu1 %8129, %v187_v39   ;;  %1138 = vperm.xlu0 %8128, %v186_v40   ;;  %v8525_v40 = vrot.slane %v296_v24, %v1388_v31  ;;  %v135_v31 = vld [vmem:[%s14207_s1 + $0xb8] sm:$0xff] }
  0x52   :  { %1562 = vperm.xlu1 %8129, %v246_v41   ;;  %1567 = vperm.xlu0 %8128, %v247_v42   ;;  %v8527_v41 = vrot.slane %v296_v24, %v1812_v32  ;;  %v197_v42 = vld [vmem:[%s14208_s2 + $0xa8] sm:$0xff] }
  0x56   :  { %724 = vperm.xlu1 %8129, %v124_v43   ;;  %729 = vperm.xlu0 %8128, %v125_v44  }
  0x5a   :  { %375 = vperm.xlu1 %8129, %v63_v45   ;;  %370 = vperm.xlu0 %8128, %v62_v46   ;;  %v196_v45 = vld [vmem:[%s14208_s2 + $0xa0] sm:$0xff] }
  0x5e   :  { %1153 = vperm.xlu1 %8129, %v189_v47   ;;  %1148 = vperm.xlu0 %8128, %v188_v48  }
  0x62   :  { %1572 = vperm.xlu1 %8129, %v248_v49   ;;  %1577 = vperm.xlu0 %8128, %v249_v50  }
  0x66   :  { %734 = vperm.xlu1 %8129, %v126_v51   ;;  %739 = vperm.xlu0 %8128, %v127_v52  }
  0x6a   :  { %385 = vperm.xlu1 %8129, %v65_v53   ;;  %380 = vperm.xlu0 %8128, %v64_v54  }
  0x6e   :  { %1163 = vperm.xlu1 %8129, %v191_v55   ;;  %1158 = vperm.xlu0 %8128, %v190_v56  }
  0x72   :  { %1582 = vperm.xlu1 %8129, %v250_v57   ;;  %1587 = vperm.xlu0 %8128, %v251_v58   ;;  %v256_v57 = vld [vmem:[%s14209_s3 + $0xa0] sm:$0xff] }
  0x76   :  { %744 = vperm.xlu1 %8129, %v128_v59   ;;  %749 = vperm.xlu0 %8128, %v129_v60  }
  0x7a   :  { %395 = vperm.xlu1 %8129, %v67_v61   ;;  %390 = vperm.xlu0 %8128, %v66_v62   ;;  %v257_v62 = vld [vmem:[%s14209_s3 + $0xa8] sm:$0xff] }
  0x7e   :  { %1173 = vperm.xlu1 %8129, %v193_v63   ;;  %1168 = vperm.xlu0 %8128, %v192_v0  }
  0x81   :  { %v8450_v3 = vpop.permute.xlu1 %679  ;;  %v8452_v4 = vpop.permute.xlu0 %310 }
  0x82   :  { %14356 = vst [vmem:[#allocation5_spill] sm:$0xff] %v8450_v3  ;;  %14357 = vst [vmem:[#allocation6_spill] sm:$0xff] %v8452_v4  ;;  %1592 = vperm.xlu1 %8129, %v252_v1   ;;  %1597 = vperm.xlu0 %8128, %v253_v2   ;;  %v1996_v39 = vmul.f32 %v8507_v30, %v8452_v4  ;;  %v969_v49 = vmul.f32 %v8507_v30, %v8450_v3 }
  0x83   :  { %v1937_v50 = vmul.f32 %v8450_v3, %v8521_v38  ;;  %v604_v51 = vmul.f32 %v8521_v38, %v8452_v4  ;;  %v8551_v53 = vmul.f32 %v8527_v41, %v8450_v3  ;;  %v8555_v54 = vmul.f32 %v8525_v40, %v8452_v4 }
  0x84   :  { %v2118_v52 = vrot.slane %v1996_v39, 1 }
  0x85   :  { %v8460_v7 = vpop.permute.xlu1 %674  ;;  %v8462_v8 = vpop.permute.xlu0 %315  ;;  %14360 = vst [vmem:[#allocation9_spill] sm:$0xff] %v8551_v53  ;;  %14361 = vst [vmem:[#allocation10_spill] sm:$0xff] %v8555_v54  ;;  %v201_v53 = vld [vmem:[%s14208_s2 + $0xc8] sm:$0xff] }
  0x86   :  { %14358 = vst [vmem:[#allocation7_spill] sm:$0xff] %v8460_v7  ;;  %14359 = vst [vmem:[#allocation8_spill] sm:$0xff] %v8462_v8  ;;  %754 = vperm.xlu1 %8129, %v130_v5   ;;  %759 = vperm.xlu0 %8128, %v131_v6   ;;  %v1997_v34 = vmul.f32 %v8507_v30, %v8462_v8  ;;  %v968_v43 = vmul.f32 %v8507_v30, %v8460_v7 }
  0x87   :  { %v605_v46 = vmul.f32 %v8521_v38, %v8462_v8  ;;  %v1936_v55 = vmul.f32 %v8460_v7, %v8521_v38  ;;  %v8561_v56 = vmul.f32 %v8525_v40, %v8462_v8 }
  0x88   :  { %v2119_v44 = vrot.slane %v1997_v34, 1  ;;  %v1028_v58 = vadd.f32 %v968_v43, %v604_v51 }
  0x89   :  { %v8470_v11 = vpop.permute.xlu1 %325  ;;  %v8472_v12 = vpop.permute.xlu0 %320  ;;  %14362 = vst [vmem:[#allocation11_spill] sm:$0xff] %v8561_v56  ;;  %v1029_v63 = vadd.f32 %v969_v49, %v605_v46 }
  0x8a   :  { %405 = vperm.xlu1 %8129, %v69_v9   ;;  %400 = vperm.xlu0 %8128, %v68_v10   ;;  %v2120_v61 = vsel %vm2114_vm0, %v2118_v52, %v2119_v44  ;;  %v8578_v0 = vmul.f32 %v8507_v30, %v8470_v11  ;;  %v2268_v9 = vadd.f32 %v2119_v44, %v1937_v50  ;;  %v73_v52 = vld [vmem:[%s14206_s0 + $0xc8] sm:$0xff] }
  0x8b   :  { %v3038_v10 = vmul.f32 %v8525_v40, %v8470_v11  ;;  %v8592_v13 = vmul.f32 %v8527_v41, %v8470_v11  ;;  %v1998_v32 = vmul.f32 %v8507_v30, %v8472_v12  ;;  %v3037_v44 = vmul.f32 %v8525_v40, %v8472_v12 }
  0x8d   :  { %v8480_v16 = vpop.permute.xlu1 %1103  ;;  %v8482_v17 = vpop.permute.xlu0 %1098  ;;  %v14221_v43 = vrot.slane %v8592_v13, 1 }
  0x8e   :  { %1183 = vperm.xlu1 %8129, %v195_v14   ;;  %1178 = vperm.xlu0 %8128, %v194_v15   ;;  %v8568_v59 = vmul.f32 %v8527_v41, %v8480_v16  ;;  %v2447_v60 = vmul.f32 %v8527_v41, %v8482_v17  ;;  %v8596_v14 = vmul.f32 %v8521_v38, %v8472_v12 }
  0x8f   :  { %v8600_v15 = vmul.f32 %v8480_v16, %v8507_v30  ;;  %v2837_v18 = vmul.f32 %v8482_v17, %v8521_v38  ;;  %v2838_v46 = vmul.f32 %v8480_v16, %v8521_v38 }
  0x90   :  { %v2569_v24 = vrot.slane %v8568_v59, 1 }
  0x91   :  { %v8490_v21 = vpop.permute.xlu1 %1522  ;;  %v8492_v22 = vpop.permute.xlu0 %1527  ;;  %v3539_v49 = vrot.slane %v8600_v15, 1 }
  0x92   :  { %1602 = vperm.xlu1 %8129, %v254_v19   ;;  %1607 = vperm.xlu0 %8128, %v255_v20   ;;  %v2327_v1 = vmul.f32 %v8490_v21, %v8525_v40  ;;  %v2897_v2 = vmul.f32 %v8490_v21, %v8507_v30  ;;  %v3417_v19 = vmul.f32 %v8482_v17, %v8507_v30 }
  0x93   :  { %v2267_v20 = vadd.f32 %v2120_v61, %v1936_v55  ;;  %v2328_v29 = vmul.f32 %v8492_v22, %v8525_v40  ;;  %v1816_v51 = vmul.f32 %v8527_v41, %v8490_v21  ;;  %v1393_v55 = vmul.f32 %v8525_v40, %v8480_v16 }
  0x94   :  { %v2957_v34 = vadd.f32 %v2897_v2, %v2837_v18  ;;  %v3538_v50 = vrot.slane %v3417_v19, 1  ;;  %v2121_v19 = vrot.slane %v1998_v32, 1 }
  0x95   :  { %v8503_v27 = vpop.permute.xlu1 %684  ;;  %v8505_v28 = vpop.permute.xlu0 %689  ;;  %v2388_v59 = vadd.f32 %v2328_v29, %v2268_v9  ;;  %v1817_v9 = vmul.f32 %v8527_v41, %v8492_v22  ;;  %v199_v29 = vld [vmem:[%s14208_s2 + $0xb8] sm:$0xff] }
  0x96   :  { %764 = vperm.xlu1 %8129, %v132_v25   ;;  %769 = vperm.xlu0 %8128, %v133_v26   ;;  %v1392_v25 = vmul.f32 %v8525_v40, %v8482_v17  ;;  %v2568_v26 = vrot.slane %v2447_v60, 1  ;;  %v2122_v17 = vrot.slane %v8578_v0, 1  ;;  %v72_v60 = vld [vmem:[%s14206_s0 + $0xc0] sm:$0xff]  ;;  %v3177_v2 = vmul.f32 %v8527_v41, %v8503_v27 }
  0x97   :  { %v1938_v32 = vmul.f32 %v8503_v27, %v8521_v38 }
  0x99   :  { %v8517_v36 = vpop.permute.xlu1 %335  ;;  %v8519_v37 = vpop.permute.xlu0 %330 }
  0x9a   :  { %415 = vperm.xlu1 %8129, %v71_v33   ;;  %410 = vperm.xlu0 %8128, %v70_v35   ;;  %v2387_v33 = vadd.f32 %v2327_v1, %v2267_v20  ;;  %v2898_v35 = vmul.f32 %v8492_v22, %v8507_v30  ;;  %v3097_v1 = vadd.f32 %v3037_v44, %v2957_v34 }
  0x9d   :  { %v8539_v47 = vpop.permute.xlu1 %1113  ;;  %v8541_v48 = vpop.permute.xlu0 %1108 }
  0x9e   :  { %1193 = vperm.xlu1 %8129, %v197_v42   ;;  %1188 = vperm.xlu0 %8128, %v196_v45   ;;  %v3867_v45 = vmul.f32 %v8527_v41, %v8472_v12  ;;  %v2570_v12 = vsel %vm2114_vm0, %v2568_v26, %v2569_v24  ;;  %v970_v26 = vmul.f32 %v8507_v30, %v8503_v27 }
  0x9f   :  { %v2717_v61 = vadd.f32 %v2570_v12, %v2387_v33  ;;  %v3747_v33 = vmul.f32 %v8525_v40, %v8503_v27  ;;  %v2123_v27 = vsel %vm2114_vm0, %v2121_v19, %v2122_v17 }
  0xa0   :  { %v3988_v16 = vrot.slane %v3867_v45, 1  ;;  %v3178_v45 = vmul.f32 %v8527_v41, %v8505_v28 }
  0xa1   :  { %v8584_v5 = vpop.permute.xlu1 %1532  ;;  %v8586_v6 = vpop.permute.xlu0 %1537 }
  0xa2   :  { %1612 = vperm.xlu1 %8129, %v256_v57   ;;  %1617 = vperm.xlu0 %8128, %v257_v62   ;;  %v1452_v57 = vadd.f32 %v1392_v25, %v1028_v58  ;;  %v2958_v62 = vadd.f32 %v2898_v35, %v2838_v46  ;;  %v3357_v58 = vmul.f32 %v8490_v21, %v8521_v38 }
  0xa3   :  { %v3358_v25 = vmul.f32 %v8492_v22, %v8521_v38  ;;  %v2718_v21 = vadd.f32 %v2569_v24, %v2388_v59  ;;  %v198_v22 = vld [vmem:[%s14208_s2 + $0xb0] sm:$0xff]  ;;  %v3237_v35 = vadd.f32 %v3177_v2, %v3097_v1  ;;  %v607_v24 = vmul.f32 %v8521_v38, %v8470_v11 }
  0xa4   :  { %v1876_v20 = vadd.f32 %v1816_v51, %v1452_v57  ;;  %v3098_v44 = vadd.f32 %v3038_v10, %v2958_v62  ;;  %v1030_v10 = vadd.f32 %v970_v26, %v8596_v14  ;;  %v1939_v57 = vmul.f32 %v8505_v28, %v8521_v38  ;;  %v258_v11 = vld [vmem:[%s14209_s3 + $0xb0] sm:$0xff]  ;;  %v259_v14 = vld [vmem:[%s14209_s3 + $0xb8] sm:$0xff] }
  0xa5   :  { %v8621_v39 = vpop.permute.xlu1 %694  ;;  %v8623_v42 = vpop.permute.xlu0 %699  ;;  %v2269_v59 = vadd.f32 %v2123_v27, %v1938_v32  ;;  %v3990_v62 = vsel %vm2114_vm0, %v3988_v16, %v14221_v43  ;;  %v8701_v2 = vmul.f32 %v8507_v30, %v8517_v36  ;;  %v8717_v16 = vmul.f32 %v8539_v47, %v8507_v30 }
  0xa6   :  { %774 = vperm.xlu1 %8129, %v134_v23   ;;  %779 = vperm.xlu0 %8128, %v135_v31   ;;  %v3540_v23 = vsel %vm2114_vm0, %v3538_v50, %v3539_v49  ;;  %v1453_v31 = vadd.f32 %v1393_v55, %v1029_v63  ;;  %v2777_v34 = vmax.f32 %v1876_v20, %v2717_v61 }
  0xa7   :  { %v3687_v50 = vadd.f32 %v3540_v23, %v3357_v58  ;;  %v971_v55 = vmul.f32 %v8507_v30, %v8505_v28  ;;  %v3748_v61 = vmul.f32 %v8525_v40, %v8505_v28  ;;  %v3238_v1 = vadd.f32 %v3178_v45, %v3098_v44 }
  0xa8   :  { %v1877_v51 = vadd.f32 %v1817_v9, %v1453_v31  ;;  %v8709_v28 = vmul.f32 %v8521_v38, %v8517_v36  ;;  %v8713_v9 = vmul.f32 %v8527_v41, %v8539_v47  ;;  %v2449_v20 = vmul.f32 %v8527_v41, %v8541_v48  ;;  %v136_v31 = vld [vmem:[%s14207_s1 + $0xc0] sm:$0xff] }
  0xa9   :  { %v8647_v15 = vpop.permute.xlu1 %345  ;;  %v8649_v18 = vpop.permute.xlu0 %340  ;;  %v1031_v23 = vadd.f32 %v971_v55, %v607_v24  ;;  %v3419_v26 = vmul.f32 %v8541_v48, %v8507_v30  ;;  %v2899_v0 = vmul.f32 %v8584_v5, %v8507_v30  ;;  %v1394_v44 = vmul.f32 %v8525_v40, %v8541_v48 }
  0xaa   :  { %425 = vperm.xlu1 %8129, %v73_v52   ;;  %420 = vperm.xlu0 %8128, %v72_v60   ;;  %v3688_v52 = vadd.f32 %v3539_v49, %v3358_v25  ;;  %v2778_v12 = vmax.f32 %v1877_v51, %v2718_v21  ;;  %v3807_v60 = vadd.f32 %v3747_v33, %v3687_v50  ;;  %v2572_v50 = vrot.slane %v8713_v9, 1 }
  0xab   :  { %v8694_v49 = vmax.f32 %v2777_v34, %v3237_v35  ;;  %v2270_v25 = vadd.f32 %v2122_v17, %v1939_v57  ;;  %v3040_v33 = vmul.f32 %v8525_v40, %v8517_v36  ;;  %v137_v17 = vld [vmem:[%s14207_s1 + $0xc8] sm:$0xff]  ;;  %v8746_v35 = vmul.f32 %v8527_v41, %v8517_v36 }
  0xac   :  { %v8730_v21 = vadd.f32 %v3990_v62, %v3807_v60  ;;  %v8732_v32 = vadd.f32 %v3748_v61, %v3688_v52  ;;  %v3542_v51 = vrot.slane %v8717_v16, 1  ;;  %v2571_v27 = vrot.slane %v2449_v20, 1 }
  0xad   :  { %v8672_v46 = vpop.permute.xlu1 %1123  ;;  %v8674_v63 = vpop.permute.xlu0 %1118  ;;  %14363 = vst [vmem:[#allocation12_spill] sm:$0xff] %v8694_v49  ;;  %v2839_v52 = vmul.f32 %v8541_v48, %v8521_v38  ;;  %v3541_v55 = vrot.slane %v3419_v26, 1  ;;  %v2330_v36 = vmul.f32 %v8586_v6, %v8525_v40  ;;  %v608_v60 = vmul.f32 %v8521_v38, %v8519_v37 }
  0xae   :  { %1203 = vperm.xlu1 %8129, %v199_v29   ;;  %1198 = vperm.xlu0 %8128, %v198_v22   ;;  %v2329_v29 = vmul.f32 %v8584_v5, %v8525_v40  ;;  %14364 = vst [vmem:[#allocation13_spill] sm:$0xff] %v8730_v21  ;;  %v8741_v22 = vmax.f32 %v2778_v12, %v3238_v1  ;;  %v75_v12 = vld [vmem:[%s14206_s0 + $0xd8] sm:$0xff] }
  0xaf   :  { %v2000_v48 = vmul.f32 %v8507_v30, %v8519_v37  ;;  %v2959_v61 = vadd.f32 %v2899_v0, %v2839_v52  ;;  %v1395_v1 = vmul.f32 %v8525_v40, %v8539_v47  ;;  %v2840_v9 = vmul.f32 %v8539_v47, %v8521_v38 }
  0xb0   :  { %14365 = vst [vmem:[#allocation14_spill] sm:$0xff] %v8741_v22  ;;  %v2389_v57 = vadd.f32 %v2329_v29, %v2269_v59  ;;  %v3869_v59 = vmul.f32 %v8527_v41, %v8519_v37  ;;  %v1818_v20 = vmul.f32 %v8527_v41, %v8584_v5  ;;  %v1454_v0 = vadd.f32 %v1394_v44, %v1030_v10 }
  0xb1   :  { %v8703_v19 = vpop.permute.xlu1 %1542  ;;  %v8705_v58 = vpop.permute.xlu0 %1547  ;;  %v3359_v52 = vmul.f32 %v8584_v5, %v8521_v38  ;;  %v3543_v47 = vsel %vm2114_vm0, %v3541_v55, %v3542_v51  ;;  %v2390_v43 = vadd.f32 %v2330_v36, %v2270_v25  ;;  %v200_v5 = vld [vmem:[%s14208_s2 + $0xc0] sm:$0xff]  ;;  %v1819_v25 = vmul.f32 %v8527_v41, %v8586_v6 }
  0xb2   :  { %1622 = vperm.xlu1 %8129, %v258_v11   ;;  %1627 = vperm.xlu0 %8128, %v259_v14   ;;  %v2900_v11 = vmul.f32 %v8586_v6, %v8507_v30  ;;  %v74_v14 = vld [vmem:[%s14206_s0 + $0xd0] sm:$0xff]  ;;  %v3991_v10 = vrot.slane %v3869_v59, 1  ;;  %v3749_v55 = vmul.f32 %v8525_v40, %v8621_v39  ;;  %v3360_v59 = vmul.f32 %v8586_v6, %v8521_v38 }
  0xb3   :  { %v973_v6 = vmul.f32 %v8507_v30, %v8623_v42 }
  0xb4   :  { %v2960_v34 = vadd.f32 %v2900_v11, %v2840_v9 }
  0xb5   :  { %v8750_v45 = vpop.permute.xlu1 %704  ;;  %v8752_v24 = vpop.permute.xlu0 %709 }
  0xb6   :  { %784 = vperm.xlu1 %8129, %v136_v31   ;;  %789 = vperm.xlu0 %8128, %v137_v17   ;;  %v3039_v31 = vmul.f32 %v8525_v40, %v8519_v37  ;;  %v2573_v17 = vsel %vm2114_vm0, %v2571_v27, %v2572_v50  ;;  %v2124_v37 = vrot.slane %v2000_v48, 1  ;;  %v3179_v27 = vmul.f32 %v8527_v41, %v8621_v39 }
  0xb7   :  { %v2719_v62 = vadd.f32 %v2573_v17, %v2389_v57  ;;  %v1455_v57 = vadd.f32 %v1395_v1, %v1031_v23  ;;  %v3689_v48 = vadd.f32 %v3543_v47, %v3359_v52  ;;  %v1940_v23 = vmul.f32 %v8621_v39, %v8521_v38 }
  0xb8   :  { %v3099_v44 = vadd.f32 %v3039_v31, %v2959_v61  ;;  %v972_v61 = vmul.f32 %v8507_v30, %v8621_v39  ;;  %v2720_v1 = vadd.f32 %v2572_v50, %v2390_v43  ;;  %v3100_v9 = vadd.f32 %v3040_v33, %v2960_v34  ;;  %v260_v31 = vld [vmem:[%s14209_s3 + $0xc0] sm:$0xff]  ;;  %v261_v39 = vld [vmem:[%s14209_s3 + $0xc8] sm:$0xff] }
  0xb9   :  { %v8781_v26 = vpop.permute.xlu1 %355  ;;  %v8783_v29 = vpop.permute.xlu0 %350  ;;  %v1941_v17 = vmul.f32 %v8623_v42, %v8521_v38  ;;  %v1879_v43 = vadd.f32 %v1819_v25, %v1455_v57  ;;  %v14366_v33 = vrot.slane %v8701_v2, 1  ;;  %v3809_v50 = vadd.f32 %v3749_v55, %v3689_v48 }
  0xba   :  { %435 = vperm.xlu1 %8129, %v75_v12   ;;  %430 = vperm.xlu0 %8128, %v74_v14   ;;  %v1878_v12 = vadd.f32 %v1818_v20, %v1454_v0  ;;  %v3180_v20 = vmul.f32 %v8527_v41, %v8623_v42  ;;  %v3239_v0 = vadd.f32 %v3179_v27, %v3099_v44 }
  0xbb   :  { %v2126_v34 = vsel %vm2114_vm0, %v2124_v37, %v14366_v33  ;;  %v3690_v27 = vadd.f32 %v3542_v51, %v3360_v59  ;;  %v2780_v57 = vmax.f32 %v1879_v43, %v2720_v1  ;;  %v8854_v48 = vmul.f32 %v8521_v38, %v8647_v15  ;;  %v77_v43 = vld [vmem:[%s14206_s0 + $0xe8] sm:$0xff] }
  0xbc   :  { %v2779_v14 = vmax.f32 %v1878_v12, %v2719_v62  ;;  %v8834_v62 = vmul.f32 %v8507_v30, %v8647_v15  ;;  %v2271_v37 = vadd.f32 %v2126_v34, %v1940_v23  ;;  %v14368_v12 = vrot.slane %v8746_v35, 1 }
  0xbd   :  { %v8805_v36 = vpop.permute.xlu1 %1133  ;;  %v8807_v11 = vpop.permute.xlu0 %1128  ;;  %v3240_v55 = vadd.f32 %v3180_v20, %v3100_v9  ;;  %v14370_v51 = vmov %v14366_v33  ;;  %v2452_v1 = vmul.f32 %v8527_v41, %v8672_v46  ;;  %v8880_v2 = vmul.f32 %v8525_v40, %v8647_v15 }
  0xbe   :  { %1213 = vperm.xlu1 %8129, %v201_v53   ;;  %1208 = vperm.xlu0 %8128, %v200_v5   ;;  %v3750_v53 = vmul.f32 %v8525_v40, %v8623_v42  ;;  %v14367_v42 = vrot.slane %v8592_v13, 1  ;;  %v8847_v5 = vadd.f32 %v972_v61, %v608_v60  ;;  %v3993_v25 = vsel %vm2114_vm0, %v3991_v10, %v14368_v12  ;;  %v138_v13 = vld [vmem:[%s14207_s1 + $0xd0] sm:$0xff]  ;;  %v139_v10 = vld [vmem:[%s14207_s1 + $0xd8] sm:$0xff] }
  0xbf   :  { %v8859_v16 = vmax.f32 %v2779_v14, %v3239_v0  ;;  %v2272_v60 = vadd.f32 %v14370_v51, %v1941_v17  ;;  %v8867_v61 = vadd.f32 %v3993_v25, %v3809_v50  ;;  %v2451_v14 = vmul.f32 %v8527_v41, %v8674_v63 }
  0xc0   :  { %v8843_v44 = vadd.f32 %v14367_v42, %v8732_v32  ;;  %v1033_v32 = vadd.f32 %v973_v6, %v8709_v28  ;;  %v3810_v59 = vadd.f32 %v3750_v53, %v3690_v27  ;;  %v8884_v20 = vmul.f32 %v8672_v46, %v8507_v30  ;;  %v76_v27 = vld [vmem:[%s14206_s0 + $0xe0] sm:$0xff] }
  0xc1   :  { %v8836_v52 = vpop.permute.xlu1 %1552  ;;  %v8838_v47 = vpop.permute.xlu0 %1557  ;;  %14369 = vst [vmem:[#allocation15_spill] sm:$0xff] %v8859_v16  ;;  %14371 = vst [vmem:[#allocation16_spill] sm:$0xff] %v8867_v61  ;;  %v2331_v0 = vmul.f32 %v8703_v19, %v8525_v40  ;;  %v8890_v6 = vmax.f32 %v2780_v57, %v3240_v55  ;;  %v8894_v17 = vmul.f32 %v8527_v41, %v8647_v15  ;;  %v14373_v33 = vmov %v14368_v12 }
  0xc2   :  { %1632 = vperm.xlu1 %8129, %v260_v31   ;;  %1637 = vperm.xlu0 %8128, %v261_v39   ;;  %v3421_v31 = vmul.f32 %v8674_v63, %v8507_v30  ;;  %v8898_v53 = vmul.f32 %v8521_v38, %v8649_v18  ;;  %v2002_v39 = vmul.f32 %v8507_v30, %v8649_v18  ;;  %v2575_v35 = vrot.slane %v2452_v1, 1 }
  0xc3   :  { %14372 = vst [vmem:[#allocation17_spill] sm:$0xff] %v8890_v6  ;;  %v8907_v34 = vadd.f32 %v14373_v33, %v3810_v59  ;;  %v3041_v15 = vmul.f32 %v8525_v40, %v8649_v18  ;;  %v1397_v50 = vmul.f32 %v8525_v40, %v8672_v46  ;;  %v2332_v42 = vmul.f32 %v8705_v58, %v8525_v40 }
  0xc4   :  { %v8920_v57 = vmul.f32 %v8527_v41, %v8649_v18  ;;  %v2574_v12 = vrot.slane %v2451_v14, 1  ;;  %v2901_v25 = vmul.f32 %v8703_v19, %v8507_v30  ;;  %v3545_v51 = vrot.slane %v8884_v20, 1  ;;  %v203_v20 = vld [vmem:[%s14208_s2 + $0xd8] sm:$0xff] }
  0xc5   :  { %v8874_v9 = vpop.permute.xlu1 %714  ;;  %v8876_v28 = vpop.permute.xlu0 %719  ;;  %14374 = vst [vmem:[#allocation18_spill] sm:$0xff] %v8907_v34  ;;  %v1396_v59 = vmul.f32 %v8525_v40, %v8674_v63  ;;  %v2391_v33 = vadd.f32 %v2331_v0, %v2271_v37  ;;  %v2127_v23 = vrot.slane %v2002_v39, 1  ;;  %v2842_v1 = vmul.f32 %v8672_v46, %v8521_v38  ;;  %v202_v46 = vld [vmem:[%s14208_s2 + $0xd0] sm:$0xff] }
  0xc6   :  { %794 = vperm.xlu1 %8129, %v138_v13   ;;  %799 = vperm.xlu0 %8128, %v139_v10   ;;  %v3544_v10 = vrot.slane %v3421_v31, 1  ;;  %v2841_v14 = vmul.f32 %v8674_v63, %v8521_v38  ;;  %v1457_v4 = vadd.f32 %v1397_v50, %v1033_v32  ;;  %v1820_v31 = vmul.f32 %v8527_v41, %v8703_v19 }
  0xc7   :  { %v2392_v37 = vadd.f32 %v2332_v42, %v2272_v60  ;;  %v2902_v0 = vmul.f32 %v8705_v58, %v8507_v30  ;;  %v2576_v39 = vsel %vm2114_vm0, %v2574_v12, %v2575_v35  ;;  %v1821_v32 = vmul.f32 %v8527_v41, %v8705_v58 }
  0xc8   :  { %v2961_v63 = vadd.f32 %v2901_v25, %v2841_v14  ;;  %v1456_v60 = vadd.f32 %v1396_v59, %v8847_v5  ;;  %v8956_v42 = vadd.f32 %v2576_v39, %v2391_v33  ;;  %v3546_v18 = vsel %vm2114_vm0, %v3544_v10, %v3545_v51  ;;  %v262_v59 = vld [vmem:[%s14209_s3 + $0xd0] sm:$0xff]  ;;  %v263_v39 = vld [vmem:[%s14209_s3 + $0xd8] sm:$0xff] }
  0xc9   :  { %v8924_v55 = vpop.permute.xlu1 %365  ;;  %v8926_v13 = vpop.permute.xlu0 %360  ;;  %v3362_v12 = vmul.f32 %v8705_v58, %v8521_v38  ;;  %v1942_v25 = vmul.f32 %v8750_v45, %v8521_v38  ;;  %v8967_v14 = vmul.f32 %v8507_v30, %v8781_v26  ;;  %v2004_v5 = vmul.f32 %v8507_v30, %v8783_v29 }
  0xca   :  { %445 = vperm.xlu1 %8129, %v77_v43   ;;  %440 = vperm.xlu0 %8128, %v76_v27   ;;  %v3361_v43 = vmul.f32 %v8703_v19, %v8521_v38  ;;  %v974_v19 = vmul.f32 %v8507_v30, %v8750_v45  ;;  %v3994_v58 = vrot.slane %v8920_v57, 1  ;;  %v1880_v10 = vadd.f32 %v1820_v31, %v1456_v60 }
  0xcb   :  { %v8975_v33 = vadd.f32 %v2575_v35, %v2392_v37  ;;  %v8980_v7 = vadd.f32 %v1821_v32, %v1457_v4  ;;  %v3101_v3 = vadd.f32 %v3041_v15, %v2961_v63  ;;  %v8989_v35 = vadd.f32 %v3545_v51, %v3362_v12  ;;  %v140_v51 = vld [vmem:[%s14207_s1 + $0xe0] sm:$0xff]  ;;  %v141_v32 = vld [vmem:[%s14207_s1 + $0xe8] sm:$0xff] }
  0xcc   :  { %v3691_v8 = vadd.f32 %v3546_v18, %v3361_v43  ;;  %v2781_v57 = vmax.f32 %v1880_v10, %v8956_v42  ;;  %v3751_v4 = vmul.f32 %v8525_v40, %v8750_v45  ;;  %v8997_v15 = vadd.f32 %v974_v19, %v8898_v53 }
  0xcd   :  { %v8951_v50 = vpop.permute.xlu1 %1143  ;;  %v8953_v27 = vpop.permute.xlu0 %1138  ;;  %v14227_v37 = vrot.slane %v8967_v14, 1  ;;  %v14376_v63 = vrot.slane %v8894_v17, 1  ;;  %v976_v43 = vmul.f32 %v8507_v30, %v8874_v9  ;;  %v975_v42 = vmul.f32 %v8507_v30, %v8752_v24 }
  0xce   :  { %1223 = vperm.xlu1 %8129, %v203_v20   ;;  %1218 = vperm.xlu0 %8128, %v202_v46   ;;  %v2962_v20 = vadd.f32 %v2902_v0, %v2842_v1  ;;  %v3181_v46 = vmul.f32 %v8527_v41, %v8750_v45  ;;  %v14375_v1 = vrot.slane %v8834_v62, 1  ;;  %v2130_v0 = vrot.slane %v2004_v5, 1 }
  0xcf   :  { %v9010_v45 = vsel %vm2114_vm0, %v3994_v58, %v14376_v63  ;;  %v1943_v12 = vmul.f32 %v8752_v24, %v8521_v38  ;;  %v1944_v19 = vmul.f32 %v8874_v9, %v8521_v38  ;;  %v3811_v5 = vadd.f32 %v3751_v4, %v3691_v8 }
  0xd0   :  { %v2129_v31 = vsel %vm2114_vm0, %v2127_v23, %v14375_v1  ;;  %v9013_v53 = vadd.f32 %v8880_v2, %v2962_v20  ;;  %v3241_v60 = vadd.f32 %v3181_v46, %v3101_v3  ;;  %v612_v3 = vmul.f32 %v8521_v38, %v8783_v29  ;;  %v83_v46 = vld [vmem:[%s14206_s0 + $0x118] sm:$0xff] }
  0xd1   :  { %v8984_v54 = vpop.permute.xlu1 %1562  ;;  %v8986_v56 = vpop.permute.xlu0 %1567  ;;  %v8999_v18 = vadd.f32 %v2129_v31, %v1942_v25  ;;  %v9036_v58 = vmul.f32 %v8527_v41, %v8951_v50  ;;  %v3752_v10 = vmul.f32 %v8525_v40, %v8752_v24  ;;  %v2132_v20 = vsel %vm2114_vm0, %v2130_v0, %v14227_v37  ;;  %v82_v0 = vld [vmem:[%s14206_s0 + $0x110] sm:$0xff] }
  0xd2   :  { %1642 = vperm.xlu1 %8129, %v262_v59   ;;  %1647 = vperm.xlu0 %8128, %v263_v39   ;;  %v3182_v59 = vmul.f32 %v8527_v41, %v8752_v24  ;;  %v9045_v8 = vmul.f32 %v8951_v50, %v8507_v30  ;;  %v1400_v39 = vmul.f32 %v8525_v40, %v8953_v27 }
  0xd3   :  { %v1036_v1 = vadd.f32 %v976_v43, %v612_v3  ;;  %v2455_v24 = vmul.f32 %v8527_v41, %v8953_v27  ;;  %v3425_v4 = vmul.f32 %v8953_v27, %v8507_v30  ;;  %v2335_v43 = vmul.f32 %v8984_v54, %v8525_v40 }
  0xd4   :  { %v2845_v31 = vmul.f32 %v8953_v27, %v8521_v38  ;;  %v9077_v63 = vmul.f32 %v8521_v38, %v8781_v26  ;;  %v9084_v27 = vmul.f32 %v8527_v41, %v8805_v36 }
  0xd5   :  { %v9026_v25 = vpop.permute.xlu1 %724  ;;  %v9028_v2 = vpop.permute.xlu0 %729  ;;  %v2580_v23 = vrot.slane %v2455_v24, 1  ;;  %v3550_v16 = vrot.slane %v3425_v4, 1  ;;  %v1460_v61 = vadd.f32 %v1400_v39, %v1036_v1  ;;  %v205_v24 = vld [vmem:[%s14208_s2 + $0xe8] sm:$0xff]  ;;  %v14378_v4 = vrot.slane %v9036_v58, 1  ;;  %v204_v39 = vld [vmem:[%s14208_s2 + $0xe0] sm:$0xff] }
  0xd6   :  { %804 = vperm.xlu1 %8129, %v140_v51   ;;  %809 = vperm.xlu0 %8128, %v141_v32   ;;  %v2275_v51 = vadd.f32 %v2132_v20, %v1944_v19  ;;  %v1824_v32 = vmul.f32 %v8527_v41, %v8984_v54  ;;  %v2905_v19 = vmul.f32 %v8984_v54, %v8507_v30 }
  0xd7   :  { %v9073_v20 = vmax.f32 %v2781_v57, %v3241_v60  ;;  %v2582_v57 = vsel %vm2114_vm0, %v2580_v23, %v14378_v4  ;;  %v2453_v1 = vmul.f32 %v8527_v41, %v8807_v11  ;;  %v9110_v4 = vmul.f32 %v8805_v36, %v8507_v30 }
  0xd8   :  { %v2395_v6 = vadd.f32 %v2335_v43, %v2275_v51  ;;  %v2965_v60 = vadd.f32 %v2905_v19, %v2845_v31  ;;  %v1884_v51 = vadd.f32 %v1824_v32, %v1460_v61  ;;  %v1035_v31 = vadd.f32 %v975_v42, %v8854_v48 }
  0xd9   :  { %v9065_v3 = vpop.permute.xlu1 %375  ;;  %v9067_v37 = vpop.permute.xlu0 %370  ;;  %14377 = vst [vmem:[#allocation19_spill] sm:$0xff] %v9073_v20  ;;  %v3423_v61 = vmul.f32 %v8807_v11, %v8507_v30  ;;  %v9122_v48 = vadd.f32 %v9010_v45, %v3811_v5  ;;  %v3242_v42 = vadd.f32 %v3182_v59, %v9013_v53  ;;  %v2843_v45 = vmul.f32 %v8807_v11, %v8521_v38 }
  0xda   :  { %465 = vperm.xlu1 %8129, %v83_v46   ;;  %460 = vperm.xlu0 %8128, %v82_v0   ;;  %v14379_v46 = vrot.slane %v9045_v8, 1  ;;  %v3045_v0 = vmul.f32 %v8525_v40, %v8926_v13  ;;  %v2725_v43 = vadd.f32 %v2582_v57, %v2395_v6  ;;  %v2903_v6 = vmul.f32 %v8836_v52, %v8507_v30 }
  0xdb   :  { %14381 = vst [vmem:[#allocation20_spill] sm:$0xff] %v9122_v48  ;;  %v9144_v5 = vmul.f32 %v8527_v41, %v8781_v26  ;;  %v79_v48 = vld [vmem:[%s14206_s0 + $0xf8] sm:$0xff] }
  0xdc   :  { %v9092_v20 = vsel %vm2114_vm0, %v3550_v16, %v14379_v46  ;;  %v14380_v16 = vrot.slane %v8834_v62, 1  ;;  %v2333_v46 = vmul.f32 %v8836_v52, %v8525_v40  ;;  %v2785_v32 = vmax.f32 %v1884_v51, %v2725_v43  ;;  %v264_v62 = vld [vmem:[%s14209_s3 + $0xe0] sm:$0xff] }
  0xdd   :  { %v9101_v34 = vpop.permute.xlu1 %1153  ;;  %v9103_v23 = vpop.permute.xlu0 %1148  ;;  %v3105_v57 = vadd.f32 %v3045_v0, %v2965_v60  ;;  %v265_v60 = vld [vmem:[%s14209_s3 + $0xe8] sm:$0xff]  ;;  %v1398_v0 = vmul.f32 %v8525_v40, %v8807_v11  ;;  %v2577_v51 = vrot.slane %v2453_v1, 1  ;;  %v3548_v1 = vrot.slane %v9110_v4, 1 }
  0xde   :  { %v2274_v19 = vadd.f32 %v14380_v16, %v1943_v12  ;;  %1233 = vperm.xlu1 %8129, %v205_v24   ;;  %1228 = vperm.xlu0 %8128, %v204_v39   ;;  %v9126_v12 = vadd.f32 %v3752_v10, %v8989_v35  ;;  %v3185_v24 = vmul.f32 %v8527_v41, %v9026_v25  ;;  %v2578_v39 = vrot.slane %v9084_v27, 1 }
  0xdf   :  { %v2393_v59 = vadd.f32 %v2333_v46, %v8999_v18  ;;  %v2334_v10 = vmul.f32 %v8838_v47, %v8525_v40  ;;  %v3547_v43 = vrot.slane %v3423_v61, 1  ;;  %v2963_v16 = vadd.f32 %v2903_v6, %v2843_v45  ;;  %v147_v61 = vld [vmem:[%s14207_s1 + $0x118] sm:$0xff] }
  0xe0   :  { %v3245_v27 = vadd.f32 %v3185_v24, %v3105_v57  ;;  %v2904_v11 = vmul.f32 %v8838_v47, %v8507_v30  ;;  %v3043_v18 = vmul.f32 %v8525_v40, %v8783_v29  ;;  %v1399_v46 = vmul.f32 %v8525_v40, %v8805_v36 }
  0xe1   :  { %v9138_v53 = vpop.permute.xlu1 %1572  ;;  %v9140_v35 = vpop.permute.xlu0 %1577  ;;  %v1822_v57 = vmul.f32 %v8527_v41, %v8836_v52  ;;  %v3873_v6 = vmul.f32 %v8527_v41, %v8783_v29  ;;  %v1458_v24 = vadd.f32 %v1398_v0, %v8997_v15  ;;  %v2394_v21 = vadd.f32 %v2334_v10, %v2274_v19  ;;  %v78_v0 = vld [vmem:[%s14206_s0 + $0xf0] sm:$0xff] }
  0xe2   :  { %1652 = vperm.xlu1 %8129, %v264_v62   ;;  %1657 = vperm.xlu0 %8128, %v265_v60   ;;  %v9161_v4 = vmax.f32 %v2785_v32, %v3245_v27  ;;  %v2844_v62 = vmul.f32 %v8805_v36, %v8521_v38  ;;  %v2579_v60 = vsel %vm2114_vm0, %v2577_v51, %v2578_v39 }
  0xe3   :  { %v2723_v32 = vadd.f32 %v2579_v60, %v2393_v59  ;;  %v3363_v27 = vmul.f32 %v8836_v52, %v8521_v38  ;;  %v3549_v29 = vsel %vm2114_vm0, %v3547_v43, %v3548_v1  ;;  %v3103_v22 = vadd.f32 %v3043_v18, %v2963_v16 }
  0xe4   :  { %14382 = vst [vmem:[#allocation21_spill] sm:$0xff] %v9161_v4  ;;  %v1823_v4 = vmul.f32 %v8527_v41, %v8838_v47  ;;  %v2964_v36 = vadd.f32 %v2904_v11, %v2844_v62  ;;  %v3183_v15 = vmul.f32 %v8527_v41, %v8874_v9  ;;  %v3044_v52 = vmul.f32 %v8525_v40, %v8781_v26 }
  0xe5   :  { %v9172_v45 = vpop.permute.xlu1 %734  ;;  %v9174_v49 = vpop.permute.xlu0 %739  ;;  %v1459_v51 = vadd.f32 %v1399_v46, %v1035_v31  ;;  %v1882_v59 = vadd.f32 %v1822_v57, %v1458_v24  ;;  %v3753_v19 = vmul.f32 %v8525_v40, %v8874_v9  ;;  %v14383_v10 = vmax.f32 %v8980_v7, %v8975_v33 }
  0xe6   :  { %3022 = vperm.xlu1 %8129, %v79_v48   ;;  %829 = vperm.xlu0 %8128, %v147_v61   ;;  %v146_v48 = vld [vmem:[%s14207_s1 + $0x110] sm:$0xff]  ;;  %v3998_v16 = vrot.slane %v9144_v5, 1  ;;  %v3997_v11 = vrot.slane %v3873_v6, 1  ;;  %v3364_v26 = vmul.f32 %v8838_v47, %v8521_v38  ;;  %v3693_v46 = vadd.f32 %v3549_v29, %v3363_v27  ;;  %v85_v47 = vld [vmem:[%s14206_s0 + $0x128] sm:$0xff] }
  0xe7   :  { %v9196_v43 = vmax.f32 %v14383_v10, %v3242_v42  ;;  %v2783_v9 = vmax.f32 %v1882_v59, %v2723_v32  ;;  %v1883_v57 = vadd.f32 %v1823_v4, %v1459_v51  ;;  %v2724_v61 = vadd.f32 %v2578_v39, %v2394_v21  ;;  %v84_v39 = vld [vmem:[%s14206_s0 + $0x120] sm:$0xff] }
  0xe8   :  { %v3243_v62 = vadd.f32 %v3183_v15, %v3103_v22  ;;  %v3104_v24 = vadd.f32 %v3044_v52, %v2964_v36  ;;  %v9207_v7 = vmul.f32 %v8527_v41, %v9065_v3  ;;  %v3877_v33 = vmul.f32 %v8527_v41, %v9067_v37 }
  0xe9   :  { %v9201_v31 = vpop.permute.xlu1 %385  ;;  %v9203_v18 = vpop.permute.xlu0 %380  ;;  %v3813_v42 = vadd.f32 %v3753_v19, %v3693_v46  ;;  %v977_v4 = vmul.f32 %v8507_v30, %v8876_v28  ;;  %v1945_v21 = vmul.f32 %v8876_v28, %v8521_v38  ;;  %v3184_v22 = vmul.f32 %v8527_v41, %v8876_v28  ;;  %v209_v19 = vld [vmem:[%s14208_s2 + $0x118] sm:$0xff]  ;;  %v208_v46 = vld [vmem:[%s14208_s2 + $0x110] sm:$0xff] }
  0xea   :  { %3017 = vperm.xlu1 %8129, %v78_v0   ;;  %824 = vperm.xlu0 %8128, %v146_v48   ;;  %v14384_v6 = vrot.slane %v8894_v17, 1  ;;  %v3694_v32 = vadd.f32 %v3548_v1, %v3364_v26  ;;  %v3754_v27 = vmul.f32 %v8525_v40, %v8876_v28  ;;  %v9232_v29 = vmul.f32 %v8507_v30, %v8924_v55 }
  0xeb   :  { %v2784_v0 = vmax.f32 %v1883_v57, %v2724_v61  ;;  %v3999_v52 = vsel %vm2114_vm0, %v3997_v11, %v3998_v16  ;;  %v2006_v17 = vmul.f32 %v8507_v30, %v8926_v13  ;;  %v9245_v28 = vmax.f32 %v2783_v9, %v3243_v62 }
  0xec   :  { %v9226_v60 = vadd.f32 %v14384_v6, %v9126_v12  ;;  %v2336_v12 = vmul.f32 %v8986_v56, %v8525_v40  ;;  %v9249_v1 = vmul.f32 %v8521_v38, %v8924_v55  ;;  %v14228_v51 = vrot.slane %v9207_v7, 1 }
  0xed   :  { %v9234_v36 = vpop.permute.xlu1 %1163  ;;  %v9236_v15 = vpop.permute.xlu0 %1158  ;;  %14385 = vst [vmem:[#allocation22_spill] sm:$0xff] %v9245_v28  ;;  %v4003_v59 = vrot.slane %v3877_v33, 1  ;;  %v9255_v48 = vadd.f32 %v3999_v52, %v3813_v42  ;;  %v1037_v10 = vadd.f32 %v977_v4, %v9077_v63  ;;  %v14387_v11 = vrot.slane %v8967_v14, 1 }
  0xee   :  { %475 = vperm.xlu1 %8129, %v85_v47   ;;  %470 = vperm.xlu0 %8128, %v84_v39   ;;  %v3244_v9 = vadd.f32 %v3184_v22, %v3104_v24  ;;  %v3814_v57 = vadd.f32 %v3754_v27, %v3694_v32  ;;  %v2134_v61 = vrot.slane %v9232_v29, 1  ;;  %v1401_v62 = vmul.f32 %v8525_v40, %v8951_v50  ;;  %v143_v32 = vld [vmem:[%s14207_s1 + $0xf8] sm:$0xff] }
  0xef   :  { %14386 = vst [vmem:[#allocation23_spill] sm:$0xff] %v9255_v48  ;;  %v2276_v26 = vadd.f32 %v14387_v11, %v1945_v21  ;;  %v2906_v33 = vmul.f32 %v8986_v56, %v8507_v30  ;;  %v9274_v14 = vmul.f32 %v8527_v41, %v8924_v55  ;;  %v2133_v24 = vrot.slane %v2006_v17, 1  ;;  %v269_v17 = vld [vmem:[%s14209_s3 + $0x118] sm:$0xff] }
  0xf0   :  { %v3875_v42 = vmul.f32 %v8527_v41, %v8926_v13  ;;  %v2846_v21 = vmul.f32 %v8951_v50, %v8521_v38  ;;  %v3365_v22 = vmul.f32 %v8984_v54, %v8521_v38  ;;  %v1825_v39 = vmul.f32 %v8527_v41, %v8986_v56 }
  0xf1   :  { %v9268_v47 = vpop.permute.xlu1 %1582  ;;  %v9270_v63 = vpop.permute.xlu0 %1587  ;;  %v2396_v4 = vadd.f32 %v2336_v12, %v2276_v26  ;;  %v9287_v6 = vsel %vm2114_vm0, %v4003_v59, %v14228_v51  ;;  %v3046_v27 = vmul.f32 %v8525_v40, %v8924_v55  ;;  %v3366_v50 = vmul.f32 %v8986_v56, %v8521_v38 }
  0xf2   :  { %1253 = vperm.xlu1 %8129, %v209_v19   ;;  %1248 = vperm.xlu0 %8128, %v208_v46   ;;  %v978_v54 = vmul.f32 %v8507_v30, %v9026_v25  ;;  %v1946_v52 = vmul.f32 %v9026_v25, %v8521_v38  ;;  %v9303_v12 = vmax.f32 %v2784_v0, %v3244_v9  ;;  %v14229_v46 = vrot.slane %v9274_v14, 1 }
  0xf3   :  { %v1461_v59 = vadd.f32 %v1401_v62, %v1037_v10  ;;  %v2966_v19 = vadd.f32 %v2906_v33, %v2846_v21  ;;  %v3755_v55 = vmul.f32 %v8525_v40, %v9026_v25  ;;  %v9313_v26 = vadd.f32 %v3998_v16, %v3814_v57  ;;  %v142_v16 = vld [vmem:[%s14207_s1 + $0xf0] sm:$0xff] }
  0xf4   :  { %14388 = vst [vmem:[#allocation24_spill] sm:$0xff] %v9303_v12  ;;  %v614_v51 = vmul.f32 %v8521_v38, %v8926_v13  ;;  %v14389_v0 = vrot.slane %v9036_v58, 1  ;;  %v4000_v9 = vrot.slane %v3875_v42, 1  ;;  %v3695_v25 = vadd.f32 %v9092_v20, %v3365_v22  ;;  %v268_v20 = vld [vmem:[%s14209_s3 + $0x110] sm:$0xff] }
  0xf5   :  { %v9307_v11 = vpop.permute.xlu1 %744  ;;  %v9309_v56 = vpop.permute.xlu0 %749  ;;  %v9323_v62 = vadd.f32 %v1825_v39, %v1461_v59  ;;  %v2135_v5 = vsel %vm2114_vm0, %v2133_v24, %v2134_v61  ;;  %v14390_v13 = vrot.slane %v9045_v8, 1  ;;  %v979_v42 = vmul.f32 %v8507_v30, %v9028_v2 }
  0xf6   :  { %v9320_v10 = vadd.f32 %v14389_v0, %v2396_v4  ;;  %3162 = vperm.xlu1 %8129, %v143_v32   ;;  %1677 = vperm.xlu0 %8128, %v269_v17   ;;  %v1038_v57 = vadd.f32 %v978_v54, %v614_v51  ;;  %v2277_v33 = vadd.f32 %v2135_v5, %v1946_v52 }
  0xf7   :  { %v3696_v58 = vadd.f32 %v14390_v13, %v3366_v50  ;;  %v3815_v4 = vadd.f32 %v3755_v55, %v3695_v25  ;;  %v3106_v21 = vadd.f32 %v3046_v27, %v2966_v19  ;;  %v1947_v24 = vmul.f32 %v9028_v2, %v8521_v38  ;;  %v148_v19 = vld [vmem:[%s14207_s1 + $0x120] sm:$0xff]  ;;  %v149_v25 = vld [vmem:[%s14207_s1 + $0x128] sm:$0xff] }
  0xf8   :  { %v3186_v22 = vmul.f32 %v8527_v41, %v9028_v2  ;;  %v9350_v32 = vmul.f32 %v8527_v41, %v9101_v34  ;;  %v9354_v27 = vmul.f32 %v9101_v34, %v8507_v30  ;;  %v2457_v50 = vmul.f32 %v8527_v41, %v9103_v23 }
  0xf9   :  { %v9342_v39 = vpop.permute.xlu1 %395  ;;  %v9344_v8 = vpop.permute.xlu0 %390  ;;  %v4002_v54 = vsel %vm2114_vm0, %v4000_v9, %v14229_v46  ;;  %v3756_v52 = vmul.f32 %v8525_v40, %v9028_v2  ;;  %v3427_v17 = vmul.f32 %v9103_v23, %v8507_v30  ;;  %v2337_v59 = vmul.f32 %v9138_v53, %v8525_v40 }
  0xfa   :  { %3157 = vperm.xlu1 %8129, %v142_v16   ;;  %1672 = vperm.xlu0 %8128, %v268_v20   ;;  %v1039_v55 = vadd.f32 %v979_v42, %v9249_v1  ;;  %v9373_v0 = vmul.f32 %v8521_v38, %v9065_v3  ;;  %v9377_v2 = vmul.f32 %v8507_v30, %v9065_v3  ;;  %v2584_v46 = vrot.slane %v9350_v32, 1 }
  0xfb   :  { %v2907_v9 = vmul.f32 %v9138_v53, %v8507_v30  ;;  %v9384_v5 = vadd.f32 %v4002_v54, %v3815_v4  ;;  %v2278_v1 = vadd.f32 %v2134_v61, %v1947_v24  ;;  %v9388_v16 = vadd.f32 %v3186_v22, %v3106_v21  ;;  %v49_v22 = vld [vmem:[%s14206_s0 + $0x8] sm:$0xff] }
  0xfc   :  { %v1402_v13 = vmul.f32 %v8525_v40, %v9103_v23  ;;  %v2583_v28 = vrot.slane %v2457_v50, 1  ;;  %v2847_v4 = vmul.f32 %v9103_v23, %v8521_v38  ;;  %v3553_v29 = vrot.slane %v3427_v17, 1 }
  0xfd   :  { %14391 = vst [vmem:[#allocation25_spill] sm:$0xff] %v9384_v5  ;;  %v9392_v42 = vpop.permute.xlu1 %1173  ;;  %v9394_v20 = vpop.permute.xlu0 %1168  ;;  %v2397_v61 = vadd.f32 %v2337_v59, %v2277_v33  ;;  %v2338_v21 = vmul.f32 %v9140_v35, %v8525_v40  ;;  %v2908_v24 = vmul.f32 %v9140_v35, %v8507_v30  ;;  %v3816_v32 = vadd.f32 %v3756_v52, %v3696_v58  ;;  %v48_v33 = vld [vmem:[%s14206_s0] sm:$0xff] }
  0xfe   :  { %834 = vperm.xlu1 %8129, %v148_v19   ;;  %839 = vperm.xlu0 %8128, %v149_v25   ;;  %v2008_v23 = vmul.f32 %v8507_v30, %v9067_v37  ;;  %v2967_v54 = vadd.f32 %v2907_v9, %v2847_v4  ;;  %v3048_v17 = vmul.f32 %v8525_v40, %v9065_v3 }
  0xff   :  { %v1403_v59 = vmul.f32 %v8525_v40, %v9101_v34  ;;  %v2848_v19 = vmul.f32 %v9101_v34, %v8521_v38  ;;  %v1826_v58 = vmul.f32 %v8527_v41, %v9138_v53  ;;  %v3047_v9 = vmul.f32 %v8525_v40, %v9067_v37 }
 0x100   :  { %v1462_v25 = vadd.f32 %v1402_v13, %v1038_v57  ;;  %v2585_v4 = vsel %vm2114_vm0, %v2583_v28, %v2584_v46  ;;  %v3367_v3 = vmul.f32 %v9138_v53, %v8521_v38  ;;  %v14392_v34 = vrot.slane %v9354_v27, 1  ;;  %v211_v57 = vld [vmem:[%s14208_s2 + $0x128] sm:$0xff] }
 0x101   :  { %v9421_v52 = vpop.permute.xlu1 %1592  ;;  %v9428_v50 = vpop.permute.xlu0 %1597  ;;  %v2727_v51 = vadd.f32 %v2585_v4, %v2397_v61  ;;  %v2398_v48 = vadd.f32 %v2338_v21, %v2278_v1  ;;  %v2968_v12 = vadd.f32 %v2908_v24, %v2848_v19  ;;  %v616_v28 = vmul.f32 %v8521_v38, %v9067_v37  ;;  %v210_v61 = vld [vmem:[%s14208_s2 + $0x120] sm:$0xff] }
 0x102   :  { %305 = vperm.xlu1 %8129, %v49_v22   ;;  %v3555_v5 = vsel %vm2114_vm0, %v3553_v29, %v14392_v34  ;;  %300 = vperm.xlu0 %8128, %v48_v33   ;;  %v2136_v13 = vrot.slane %v2008_v23, 1  ;;  %v3107_v53 = vadd.f32 %v3047_v9, %v2967_v54  ;;  %v3187_v22 = vmul.f32 %v8527_v41, %v9172_v45 }
 0x103   :  { %v1463_v29 = vadd.f32 %v1403_v59, %v1039_v55  ;;  %v1886_v1 = vadd.f32 %v1826_v58, %v1462_v25  ;;  %v1827_v21 = vmul.f32 %v8527_v41, %v9140_v35  ;;  %v3757_v24 = vmul.f32 %v8525_v40, %v9172_v45 }
 0x104   :  { %v3697_v37 = vadd.f32 %v3555_v5, %v3367_v3  ;;  %v3368_v23 = vmul.f32 %v9140_v35, %v8521_v38  ;;  %v980_v54 = vmul.f32 %v8507_v30, %v9172_v45  ;;  %v1948_v19 = vmul.f32 %v9172_v45, %v8521_v38  ;;  %v270_v35 = vld [vmem:[%s14209_s3 + $0x120] sm:$0xff] }
 0x105   :  { %v9447_v33 = vpop.permute.xlu1 %754  ;;  %v9455_v55 = vpop.permute.xlu0 %759  ;;  %v2787_v59 = vmax.f32 %v1886_v1, %v2727_v51  ;;  %v2728_v58 = vadd.f32 %v2584_v46, %v2398_v48  ;;  %v3108_v9 = vadd.f32 %v3048_v17, %v2968_v12  ;;  %v3188_v25 = vmul.f32 %v8527_v41, %v9174_v49  ;;  %v271_v48 = vld [vmem:[%s14209_s3 + $0x128] sm:$0xff] }
 0x106   :  { %1263 = vperm.xlu1 %8129, %v211_v57   ;;  %1258 = vperm.xlu0 %8128, %v210_v61   ;;  %v3247_v5 = vadd.f32 %v3187_v22, %v3107_v53  ;;  %v981_v4 = vmul.f32 %v8507_v30, %v9174_v49  ;;  %v1949_v45 = vmul.f32 %v9174_v49, %v8521_v38  ;;  %v14397_v22 = vrot.slane %v9354_v27, 1 }
 0x107   :  { %v3758_v51 = vmul.f32 %v8525_v40, %v9174_v49  ;;  %v14393_v12 = vmax.f32 %v9323_v62, %v9320_v10  ;;  %v1887_v17 = vadd.f32 %v1827_v21, %v1463_v29  ;;  %v3817_v3 = vadd.f32 %v3757_v24, %v3697_v37 }
 0x108   :  { %v9479_v34 = vmul.f32 %v8507_v30, %v9201_v31  ;;  %v14395_v49 = vrot.slane %v9274_v14, 1  ;;  %v3698_v61 = vadd.f32 %v14397_v22, %v3368_v23  ;;  %v1040_v1 = vadd.f32 %v980_v54, %v616_v28  ;;  %v113_v14 = vld [vmem:[%s14207_s1 + $0x8] sm:$0xff]  ;;  %v87_v54 = vld [vmem:[%s14206_s0 + $0x138] sm:$0xff] }
 0x109   :  { %v9475_v46 = vmax.f32 %v14393_v12, %v9388_v16  ;;  %v9481_v57 = vpop.permute.xlu1 %405  ;;  %v14398_v10 = vrot.slane %v9377_v2, 1  ;;  %v9492_v16 = vpop.permute.xlu0 %400  ;;  %v2788_v29 = vmax.f32 %v1887_v17, %v2728_v58  ;;  %v3248_v24 = vadd.f32 %v3188_v25, %v3108_v9  ;;  %v112_v12 = vld [vmem:[%s14207_s1] sm:$0xff] }
 0x10a   :  { %v9485_v53 = vadd.f32 %v14395_v49, %v3816_v32  ;;  %1682 = vperm.xlu1 %8129, %v270_v35   ;;  %v9496_v37 = vmul.f32 %v8521_v38, %v9201_v31  ;;  %1687 = vperm.xlu0 %8128, %v271_v48   ;;  %v9501_v27 = vmax.f32 %v2787_v59, %v3247_v5  ;;  %v14403_v17 = vrot.slane %v9207_v7, 1 }
 0x10b   :  { %14394 = vst [vmem:[#allocation26_spill] sm:$0xff] %v9475_v46  ;;  %v2138_v62 = vsel %vm2114_vm0, %v2136_v13, %v14398_v10  ;;  %v9504_v32 = vadd.f32 %v981_v4, %v9373_v0  ;;  %v14400_v28 = vmov %v14398_v10  ;;  %v3818_v23 = vadd.f32 %v3758_v51, %v3698_v61  ;;  %v86_v61 = vld [vmem:[%s14206_s0 + $0x130] sm:$0xff] }
 0x10c   :  { %14396 = vst [vmem:[#allocation27_spill] sm:$0xff] %v9485_v53  ;;  %v2279_v21 = vadd.f32 %v2138_v62, %v1948_v19  ;;  %14399 = vst [vmem:[#allocation28_spill] sm:$0xff] %v9501_v27  ;;  %v2280_v13 = vadd.f32 %v14400_v28, %v1949_v45  ;;  %v9512_v19 = vadd.f32 %v9287_v6, %v3817_v3 }
 0x10d   :  { %v9517_v59 = vmul.f32 %v8527_v41, %v9234_v36  ;;  %v2459_v0 = vmul.f32 %v8527_v41, %v9236_v15  ;;  %v9521_v9 = vpop.permute.xlu1 %1183  ;;  %v9525_v2 = vmul.f32 %v9234_v36, %v8507_v30  ;;  %v3429_v25 = vmul.f32 %v9236_v15, %v8507_v30  ;;  %v9533_v5 = vpop.permute.xlu0 %1178 }
 0x10e   :  { %14401 = vst [vmem:[#allocation29_spill] sm:$0xff] %v9512_v19  ;;  %v2339_v6 = vmul.f32 %v9268_v47, %v8525_v40  ;;  %v2909_v35 = vmul.f32 %v9268_v47, %v8507_v30  ;;  %669 = vperm.xlu1 %8129, %v113_v14   ;;  %v9535_v4 = vmax.f32 %v2788_v29, %v3248_v24 }
 0x10f   :  { %v3050_v45 = vmul.f32 %v8525_v40, %v9201_v31  ;;  %v9541_v51 = vmul.f32 %v8527_v41, %v9201_v31  ;;  %v9545_v48 = vmul.f32 %v8521_v38, %v9203_v18  ;;  %485 = vperm.xlu0 %8128, %v87_v54   ;;  %v9552_v3 = vadd.f32 %v14403_v17, %v3818_v23 }
 0x110   :  { %14402 = vst [vmem:[#allocation30_spill] sm:$0xff] %v9535_v4  ;;  %v2010_v49 = vmul.f32 %v8507_v30, %v9203_v18  ;;  %v1404_v31 = vmul.f32 %v8525_v40, %v9236_v15  ;;  %v2849_v22 = vmul.f32 %v9236_v15, %v8521_v38  ;;  %v2587_v10 = vrot.slane %v9517_v59, 1 }
 0x111   :  { %14404 = vst [vmem:[#allocation31_spill] sm:$0xff] %v9552_v3  ;;  %v2586_v62 = vrot.slane %v2459_v0, 1  ;;  %v2340_v7 = vmul.f32 %v9270_v63, %v8525_v40  ;;  %v2910_v29 = vmul.f32 %v9270_v63, %v8507_v30  ;;  %v9568_v24 = vpop.permute.xlu1 %1602  ;;  %v3557_v14 = vrot.slane %v9525_v2, 1  ;;  %v9571_v54 = vpop.permute.xlu0 %1607 }
 0x112   :  { %v3556_v28 = vrot.slane %v3429_v25, 1  ;;  %v2399_v23 = vadd.f32 %v2339_v6, %v2279_v21  ;;  %v2969_v15 = vadd.f32 %v2909_v35, %v2849_v22  ;;  %664 = vperm.xlu1 %8129, %v112_v12   ;;  %v3049_v59 = vmul.f32 %v8525_v40, %v9203_v18  ;;  %v176_v21 = vld [vmem:[%s14208_s2] sm:$0xff] }
 0x113   :  { %v3879_v0 = vmul.f32 %v8527_v41, %v9203_v18  ;;  %v1405_v17 = vmul.f32 %v8525_v40, %v9234_v36  ;;  %v2850_v58 = vmul.f32 %v9234_v36, %v8521_v38  ;;  %480 = vperm.xlu0 %8128, %v86_v61   ;;  %v2139_v2 = vrot.slane %v2010_v49, 1  ;;  %v151_v18 = vld [vmem:[%s14207_s1 + $0x138] sm:$0xff] }
 0x114   :  { %v1464_v25 = vadd.f32 %v1404_v31, %v1040_v1  ;;  %v1828_v6 = vmul.f32 %v8527_v41, %v9268_v47  ;;  %v3369_v35 = vmul.f32 %v9268_v47, %v8521_v38  ;;  %v2588_v12 = vsel %vm2114_vm0, %v2586_v62, %v2587_v10 }
 0x115   :  { %v1829_v36 = vmul.f32 %v8527_v41, %v9270_v63  ;;  %v2400_v22 = vadd.f32 %v2340_v7, %v2280_v13  ;;  %v2970_v61 = vadd.f32 %v2910_v29, %v2850_v58  ;;  %v9594_v27 = vpop.permute.xlu1 %764  ;;  %v2729_v1 = vadd.f32 %v2588_v12, %v2399_v23  ;;  %v9599_v19 = vpop.permute.xlu0 %769  ;;  %v237_v58 = vld [vmem:[%s14209_s3 + $0x8] sm:$0xff] }
 0x116   :  { %v3558_v49 = vsel %vm2114_vm0, %v3556_v28, %v3557_v14  ;;  %v3109_v31 = vadd.f32 %v3049_v59, %v2969_v15  ;;  %v3189_v47 = vmul.f32 %v8527_v41, %v9307_v11  ;;  %1088 = vperm.xlu1 %8129, %v176_v21   ;;  %v4006_v62 = vrot.slane %v3879_v0, 1 }
 0x117   :  { %v3370_v3 = vmul.f32 %v9270_v63, %v8521_v38  ;;  %v982_v13 = vmul.f32 %v8507_v30, %v9307_v11  ;;  %849 = vperm.xlu0 %8128, %v151_v18   ;;  %v1465_v7 = vadd.f32 %v1405_v17, %v9504_v32  ;;  %v1888_v29 = vadd.f32 %v1828_v6, %v1464_v25  ;;  %v177_v63 = vld [vmem:[%s14208_s2 + $0x8] sm:$0xff] }
 0x118   :  { %v1950_v28 = vmul.f32 %v9307_v11, %v8521_v38  ;;  %v3759_v23 = vmul.f32 %v8525_v40, %v9307_v11  ;;  %v3699_v15 = vadd.f32 %v3558_v49, %v3369_v35  ;;  %v2730_v59 = vadd.f32 %v2587_v10, %v2400_v22 }
 0x119   :  { %v3110_v0 = vadd.f32 %v3050_v45, %v2970_v61  ;;  %v3190_v21 = vmul.f32 %v8527_v41, %v9309_v56  ;;  %v9619_v18 = vpop.permute.xlu1 %415  ;;  %v2789_v32 = vmax.f32 %v1888_v29, %v2729_v1  ;;  %v1889_v17 = vadd.f32 %v1829_v36, %v1465_v7  ;;  %v9624_v11 = vpop.permute.xlu0 %410  ;;  %v236_v36 = vld [vmem:[%s14209_s3] sm:$0xff] }
 0x11a   :  { %v14405_v25 = vrot.slane %v9479_v34, 1  ;;  %v3249_v12 = vadd.f32 %v3189_v47, %v3109_v31  ;;  %1517 = vperm.xlu1 %8129, %v237_v58   ;;  %v3700_v4 = vadd.f32 %v3557_v14, %v3370_v3  ;;  %v1042_v35 = vadd.f32 %v982_v13, %v9545_v48  ;;  %v150_v48 = vld [vmem:[%s14207_s1 + $0x130] sm:$0xff] }
 0x11b   :  { %v983_v45 = vmul.f32 %v8507_v30, %v9309_v56  ;;  %v1951_v10 = vmul.f32 %v9309_v56, %v8521_v38  ;;  %1093 = vperm.xlu0 %8128, %v177_v63   ;;  %v3760_v61 = vmul.f32 %v8525_v40, %v9309_v56  ;;  %v9638_v3 = vmul.f32 %v8507_v30, %v9342_v39 }
 0x11c   :  { %v2141_v6 = vsel %vm2114_vm0, %v2139_v2, %v14405_v25  ;;  %v3819_v2 = vadd.f32 %v3759_v23, %v3699_v15  ;;  %v2790_v14 = vmax.f32 %v1889_v17, %v2730_v59  ;;  %v14406_v1 = vrot.slane %v9541_v51, 1 }
 0x11d   :  { %v2281_v22 = vadd.f32 %v2141_v6, %v1950_v28  ;;  %v3250_v31 = vadd.f32 %v3190_v21, %v3110_v0  ;;  %v9648_v47 = vmul.f32 %v8521_v38, %v9342_v39  ;;  %v9650_v13 = vpop.permute.xlu1 %1193  ;;  %v9652_v56 = vmax.f32 %v2789_v32, %v3249_v12 }
 0x11e   :  { %v4008_v49 = vsel %vm2114_vm0, %v4006_v62, %v14406_v1  ;;  %v2462_v58 = vmul.f32 %v8527_v41, %v9392_v42  ;;  %v9658_v7 = vmul.f32 %v9392_v42, %v8507_v30  ;;  %v2461_v29 = vmul.f32 %v8527_v41, %v9394_v20  ;;  %v9662_v62 = vpop.permute.xlu0 %1188  ;;  %1512 = vperm.xlu1 %8129, %v236_v36  }
 0x11f   :  { %14407 = vst [vmem:[#allocation32_spill] sm:$0xff] %v9652_v56  ;;  %v1043_v28 = vadd.f32 %v983_v45, %v9496_v37  ;;  %v14408_v23 = vmov %v14405_v25  ;;  %v3431_v15 = vmul.f32 %v9394_v20, %v8507_v30  ;;  %v2341_v59 = vmul.f32 %v9421_v52, %v8525_v40  ;;  %844 = vperm.xlu0 %8128, %v150_v48  }
 0x120   :  { %v2282_v63 = vadd.f32 %v14408_v23, %v1951_v10  ;;  %v9671_v0 = vadd.f32 %v4008_v49, %v3819_v2  ;;  %v3820_v21 = vadd.f32 %v3760_v61, %v3700_v4  ;;  %v2911_v17 = vmul.f32 %v9421_v52, %v8507_v30 }
 0x121   :  { %v9676_v25 = vmax.f32 %v2790_v14, %v3250_v31  ;;  %v3052_v34 = vmul.f32 %v8525_v40, %v9342_v39  ;;  %v9682_v37 = vmul.f32 %v8527_v41, %v9342_v39  ;;  %v1406_v6 = vmul.f32 %v8525_v40, %v9394_v20  ;;  %v9686_v12 = vpop.permute.xlu1 %1612 }
 0x122   :  { %14409 = vst [vmem:[#allocation33_spill] sm:$0xff] %v9671_v0  ;;  %v2590_v4 = vrot.slane %v2462_v58, 1  ;;  %v3560_v45 = vrot.slane %v9658_v7, 1  ;;  %v2589_v10 = vrot.slane %v2461_v29, 1  ;;  %v2851_v36 = vmul.f32 %v9394_v20, %v8521_v38  ;;  %v9691_v2 = vpop.permute.xlu0 %1617 }
 0x123   :  { %14410 = vst [vmem:[#allocation34_spill] sm:$0xff] %v9676_v25  ;;  %v3559_v61 = vrot.slane %v3431_v15, 1  ;;  %v2401_v48 = vadd.f32 %v2341_v59, %v2281_v22  ;;  %v2342_v39 = vmul.f32 %v9428_v50, %v8525_v40  ;;  %v2912_v14 = vmul.f32 %v9428_v50, %v8507_v30 }
 0x124   :  { %v620_v1 = vmul.f32 %v8521_v38, %v9344_v8  ;;  %v2012_v49 = vmul.f32 %v8507_v30, %v9344_v8  ;;  %v3881_v31 = vmul.f32 %v8527_v41, %v9344_v8  ;;  %v2971_v20 = vadd.f32 %v2911_v17, %v2851_v36 }
 0x125   :  { %v3051_v58 = vmul.f32 %v8525_v40, %v9344_v8  ;;  %v1407_v22 = vmul.f32 %v8525_v40, %v9392_v42  ;;  %v2852_v7 = vmul.f32 %v9392_v42, %v8521_v38  ;;  %v1830_v29 = vmul.f32 %v8527_v41, %v9421_v52  ;;  %v9711_v23 = vpop.permute.xlu1 %774 }
 0x126   :  { %14411 = vst [vmem:[#allocation35_spill] sm:$0xff] %v9711_v23  ;;  %v1466_v59 = vadd.f32 %v1406_v6, %v1042_v35  ;;  %v2591_v32 = vsel %vm2114_vm0, %v2589_v10, %v2590_v4  ;;  %v3371_v17 = vmul.f32 %v9421_v52, %v8521_v38  ;;  %v9717_v8 = vpop.permute.xlu0 %779  ;;  %v3561_v56 = vsel %vm2114_vm0, %v3559_v61, %v3560_v45 }
 0x127   :  { %v2731_v36 = vadd.f32 %v2591_v32, %v2401_v48  ;;  %v2402_v0 = vadd.f32 %v2342_v39, %v2282_v63  ;;  %v2972_v42 = vadd.f32 %v2912_v14, %v2852_v7  ;;  %v2142_v25 = vrot.slane %v2012_v49, 1 }
 0x128   :  { %v4009_v46 = vrot.slane %v3881_v31, 1  ;;  %v3111_v53 = vadd.f32 %v3051_v58, %v2971_v20  ;;  %v3191_v23 = vmul.f32 %v8527_v41, %v9447_v33  ;;  %v1467_v15 = vadd.f32 %v1407_v22, %v1043_v28 }
 0x129   :  { %v1890_v35 = vadd.f32 %v1830_v29, %v1466_v59  ;;  %v1831_v6 = vmul.f32 %v8527_v41, %v9428_v50  ;;  %v3761_v52 = vmul.f32 %v8525_v40, %v9447_v33  ;;  %v9726_v10 = vpop.permute.xlu1 %425  ;;  %v3701_v32 = vadd.f32 %v3561_v56, %v3371_v17 }
 0x12a   :  { %v3372_v63 = vmul.f32 %v9428_v50, %v8521_v38  ;;  %v984_v61 = vmul.f32 %v8507_v30, %v9447_v33  ;;  %v1952_v48 = vmul.f32 %v9447_v33, %v8521_v38  ;;  %v9734_v28 = vpop.permute.xlu0 %420  ;;  %v2732_v14 = vadd.f32 %v2590_v4, %v2402_v0 }
 0x12b   :  { %v2791_v39 = vmax.f32 %v1890_v35, %v2731_v36  ;;  %v3112_v49 = vadd.f32 %v3052_v34, %v2972_v42  ;;  %v3192_v31 = vmul.f32 %v8527_v41, %v9455_v55  ;;  %v3251_v20 = vadd.f32 %v3191_v23, %v3111_v53 }
 0x12c   :  { %v985_v56 = vmul.f32 %v8507_v30, %v9455_v55  ;;  %v1953_v50 = vmul.f32 %v9455_v55, %v8521_v38  ;;  %v3762_v58 = vmul.f32 %v8525_v40, %v9455_v55  ;;  %v1891_v22 = vadd.f32 %v1831_v6, %v1467_v15 }
 0x12d   :  { %v14412_v33 = vrot.slane %v9638_v3, 1  ;;  %v3821_v0 = vadd.f32 %v3761_v52, %v3701_v32  ;;  %v9749_v34 = vmul.f32 %v8507_v30, %v9481_v57  ;;  %v9751_v53 = vpop.permute.xlu1 %1203  ;;  %v14413_v4 = vrot.slane %v9541_v51, 1  ;;  %v14424_v32 = vld [vmem:[#allocation13_spill] sm:$0xff] }
 0x12e   :  { %v3702_v23 = vadd.f32 %v3560_v45, %v3372_v63  ;;  %v1044_v59 = vadd.f32 %v984_v61, %v620_v1  ;;  %v9757_v55 = vpop.permute.xlu0 %1198  ;;  %v2792_v15 = vmax.f32 %v1891_v22, %v2732_v14  ;;  %v14414_v36 = vrot.slane %v9682_v37, 1 }
 0x12f   :  { %v2144_v7 = vsel %vm2114_vm0, %v2142_v25, %v14412_v33  ;;  %v9755_v29 = vadd.f32 %v14413_v4, %v3820_v21  ;;  %v3252_v42 = vadd.f32 %v3192_v31, %v3112_v49  ;;  %v9764_v35 = vmul.f32 %v8521_v38, %v9481_v57 }
 0x130   :  { %v2283_v17 = vadd.f32 %v2144_v7, %v1952_v48  ;;  %v4011_v25 = vsel %vm2114_vm0, %v4009_v46, %v14414_v36  ;;  %v9766_v6 = vmax.f32 %v2791_v39, %v3251_v20  ;;  %v1045_v51 = vadd.f32 %v985_v56, %v9648_v47 }
 0x131   :  { %v14416_v21 = vmov %v14412_v33  ;;  %v3822_v1 = vadd.f32 %v3762_v58, %v3702_v23  ;;  %v9771_v52 = vadd.f32 %v4011_v25, %v3821_v0  ;;  %v9776_v46 = vmul.f32 %v8527_v41, %v9481_v57  ;;  %v9782_v61 = vpop.permute.xlu1 %1622 }
 0x132   :  { %14415 = vst [vmem:[#allocation36_spill] sm:$0xff] %v9766_v6  ;;  %v2284_v45 = vadd.f32 %v14416_v21, %v1953_v50  ;;  %v9780_v63 = vmul.f32 %v8507_v30, %v9492_v16  ;;  %14418 = vst [vmem:[#allocation38_spill] sm:$0xff] %v9782_v61  ;;  %v9786_v47 = vmul.f32 %v8527_v41, %v9492_v16  ;;  %v9796_v14 = vpop.permute.xlu0 %1627  ;;  %v14420_v50 = vmov %v14414_v36 }
 0x133   :  { %14417 = vst [vmem:[#allocation37_spill] sm:$0xff] %v9771_v52  ;;  %v1409_v3 = vmul.f32 %v8525_v40, %v9521_v9  ;;  %v9792_v48 = vmul.f32 %v9521_v9, %v8507_v30  ;;  %v3433_v39 = vmul.f32 %v9533_v5, %v8507_v30  ;;  %14419 = vst [vmem:[#allocation39_spill] sm:$0xff] %v9796_v14  ;;  %v14236_v61 = vmov 0.0  }
 0x134   :  { %v9798_v49 = vmax.f32 %v2792_v15, %v3252_v42  ;;  %v9802_v31 = vmul.f32 %v8525_v40, %v9481_v57  ;;  %v2464_v20 = vmul.f32 %v8527_v41, %v9521_v9  ;;  %v2463_v56 = vmul.f32 %v8527_v41, %v9533_v5 }
 0x135   :  { %v9810_v58 = vadd.f32 %v14420_v50, %v3822_v1  ;;  %v9814_v22 = vmul.f32 %v8521_v38, %v9492_v16  ;;  %v3053_v33 = vmul.f32 %v8525_v40, %v9492_v16  ;;  %v2343_v57 = vmul.f32 %v9568_v24, %v8525_v40  ;;  %v9826_v23 = vpop.permute.xlu1 %784  ;;  %v9839_v50 = vld [vmem:[%s14211_s5] ss:$0 sm:$0xff] }
 0x136   :  { %v2145_v0 = vrot.slane %v9780_v63, 1  ;;  %v2854_v4 = vmul.f32 %v9521_v9, %v8521_v38  ;;  %v1408_v37 = vmul.f32 %v8525_v40, %v9533_v5  ;;  %14421 = vst [vmem:[#allocation40_spill] sm:$0xff] %v9826_v23  ;;  %v1469_v36 = vadd.f32 %v1409_v3, %v1045_v51  ;;  %v9830_v42 = vpop.permute.xlu0 %789 }
 0x137   :  { %v3563_v16 = vrot.slane %v9792_v48, 1  ;;  %v3562_v25 = vrot.slane %v3433_v39, 1  ;;  %14422 = vst [vmem:[#allocation41_spill] sm:$0xff] %v9830_v42  ;;  %v2593_v21 = vrot.slane %v2464_v20, 1  ;;  %v2592_v1 = vrot.slane %v2463_v56, 1  ;;  %v14423_v39 = vld [vmem:[#allocation14_spill] sm:$0xff] }
 0x138   :  { %v1832_v63 = vmul.f32 %v8527_v41, %v9568_v24  ;;  %v2913_v9 = vmul.f32 %v9568_v24, %v8507_v30  ;;  %v2853_v51 = vmul.f32 %v9533_v5, %v8521_v38  ;;  %v2403_v3 = vadd.f32 %v2343_v57, %v2283_v17  ;;  %v14425_v42 = vld [vmem:[#allocation12_spill] sm:$0xff] }
 0x139   :  { %v2344_v48 = vmul.f32 %v9571_v54, %v8525_v40  ;;  %v4198_v20 = vmax.f32 %v14423_v39, %v8843_v44  ;;  %v1468_v56 = vadd.f32 %v1408_v37, %v1044_v59  ;;  %v3373_v15 = vmul.f32 %v9568_v24, %v8521_v38  ;;  %v9853_v14 = vpop.permute.xlu1 %435 }
 0x13a   :  { %v2914_v7 = vmul.f32 %v9571_v54, %v8507_v30  ;;  %v4197_v23 = vmax.f32 %v14425_v42, %v14424_v32  ;;  %14426 = vst [vmem:[#allocation14_spill] sm:$0xff] %v9853_v14  ;;  %v3564_v5 = vsel %vm2114_vm0, %v3562_v25, %v3563_v16  ;;  %v1833_v17 = vmul.f32 %v8527_v41, %v9571_v54  ;;  %v9859_v44 = vpop.permute.xlu0 %430 }
 0x13b   :  { %v4264_v57 = vadd.f32 %v9839_v50, %v4198_v20  ;;  %v1892_v59 = vadd.f32 %v1832_v63, %v1468_v56  ;;  %v2594_v24 = vsel %vm2114_vm0, %v2592_v1, %v2593_v21  ;;  %v2973_v37 = vadd.f32 %v2913_v9, %v2853_v51 }
 0x13c   :  { %v9863_v39 = vadd.f32 %v9839_v50, %v4197_v23  ;;  %v2733_v6 = vadd.f32 %v2594_v24, %v2403_v3  ;;  %v2404_v32 = vadd.f32 %v2344_v48, %v2284_v45  ;;  %v3374_v42 = vmul.f32 %v9571_v54, %v8521_v38 }
 0x13d   :  { %v4324_v25 = vmax.f32 %v4264_v57, 0.0  ;;  %v3703_v14 = vadd.f32 %v3564_v5, %v3373_v15  ;;  %v2974_v52 = vadd.f32 %v2914_v7, %v2854_v4  ;;  %v9868_v20 = vrot.slane %v14236_v61, 1  ;;  %v9871_v56 = vpop.permute.xlu1 %1213  ;;  %v14450_v61 = vld [vmem:[#allocation23_spill] sm:$0xff] }
 0x13e   :  { %14427 = vst [vmem:[#allocation13_spill] sm:$0xff] %v9863_v39  ;;  %v14238_v63 = vmax.f32 %v9863_v39, 0.0  ;;  %v1893_v1 = vadd.f32 %v1833_v17, %v1469_v36  ;;  %v986_v23 = vmul.f32 %v8507_v30, %v9594_v27  ;;  %v1954_v45 = vmul.f32 %v9594_v27, %v8521_v38  ;;  %v9880_v15 = vpop.permute.xlu0 %1208 }
 0x13f   :  { %v9878_v54 = vsel %vm2114_vm0, %v4324_v25, 0.0  ;;  %v3113_v7 = vadd.f32 %v3053_v33, %v2973_v37  ;;  %v3193_v4 = vmul.f32 %v8527_v41, %v9594_v27  ;;  %v2793_v51 = vmax.f32 %v1892_v59, %v2733_v6 }
 0x140   :  { %14428 = vst [vmem:[#allocation12_spill] sm:$0xff] %v9878_v54  ;;  %v4483_v9 = vrot.slane %v9878_v54, 1  ;;  %v4482_v36 = vrot.slane %v14238_v63, 1  ;;  %v2734_v3 = vadd.f32 %v2593_v21, %v2404_v32  ;;  %v3704_v48 = vadd.f32 %v3563_v16, %v3374_v42  ;;  %v14431_v16 = vld [vmem:[#allocation17_spill] sm:$0xff]  ;;  %v14432_v21 = vld [vmem:[#allocation16_spill] sm:$0xff] }
 0x141   :  { %v14429_v5 = vrot.slane %v9749_v34, 1  ;;  %v3763_v57 = vmul.f32 %v8525_v40, %v9594_v27  ;;  %v3114_v33 = vadd.f32 %v9802_v31, %v2974_v52  ;;  %v9896_v25 = vpop.permute.xlu1 %1632  ;;  %v3194_v6 = vmul.f32 %v8527_v41, %v9599_v19  ;;  %v14433_v52 = vld [vmem:[#allocation15_spill] sm:$0xff] }
 0x142   :  { %v4485_v24 = vsel %vm2114_vm0, %v4483_v9, %v9868_v20  ;;  %v4484_v37 = vsel %vm2114_vm0, %v4482_v36, %v4483_v9  ;;  %v4199_v31 = vmax.f32 %v14433_v52, %v14432_v21  ;;  %v9906_v59 = vpop.permute.xlu0 %1637  ;;  %v9909_v32 = vadd.f32 %v986_v23, %v9814_v22  ;;  %v14439_v52 = vld [vmem:[#allocation20_spill] sm:$0xff] }
 0x143   :  { %v2147_v17 = vsel %vm2114_vm0, %v2145_v0, %v14429_v5  ;;  %4596 = vrot.lane.b32.xlu1 %v4485_v24, %s8171_s24  ;;  %4594 = vrot.lane.b32.xlu0 %v4484_v37, %s8171_s24  ;;  %v14430_v0 = vld [vmem:[#allocation18_spill] sm:$0xff]  ;;  %v3253_v9 = vadd.f32 %v3193_v4, %v3113_v7  ;;  %v987_v36 = vmul.f32 %v8507_v30, %v9599_v19  ;;  %v14435_v23 = vrot.slane %v9776_v46, 1 }
 0x144   :  { %v4200_v27 = vmax.f32 %v14431_v16, %v14430_v0  ;;  %v9911_v42 = vadd.f32 %v2147_v17, %v1954_v45  ;;  %v1955_v5 = vmul.f32 %v9599_v19, %v8521_v38  ;;  %v3764_v24 = vmul.f32 %v8525_v40, %v9599_v19 }
 0x145   :  { %v9921_v0 = vadd.f32 %v9839_v50, %v4199_v31  ;;  %v2794_v16 = vmax.f32 %v1893_v1, %v2734_v3  ;;  %v3823_v22 = vadd.f32 %v3763_v57, %v3703_v14  ;;  %v14436_v45 = vrot.slane %v9786_v47, 1  ;;  %v9932_v17 = vpop.permute.xlu1 %794  ;;  %v14440_v31 = vld [vmem:[#allocation19_spill] sm:$0xff] }
 0x146   :  { %v4266_v37 = vadd.f32 %v9839_v50, %v4200_v27  ;;  %v9930_v4 = vmul.f32 %v8521_v38, %v9619_v18  ;;  %14437 = vst [vmem:[#allocation17_spill] sm:$0xff] %v9932_v17  ;;  %v3254_v19 = vadd.f32 %v3194_v6, %v3114_v33  ;;  %v9936_v27 = vmul.f32 %v8507_v30, %v9619_v18  ;;  %v9939_v1 = vpop.permute.xlu0 %799 }
 0x147   :  { %14434 = vst [vmem:[#allocation18_spill] sm:$0xff] %v9921_v0  ;;  %v4014_v7 = vsel %vm2114_vm0, %v14436_v45, %v14435_v23  ;;  %v14237_v14 = vmax.f32 %v9921_v0, 0.0  ;;  %14438 = vst [vmem:[#allocation16_spill] sm:$0xff] %v9939_v1  ;;  %v9941_v3 = vmax.f32 %v2793_v51, %v3253_v9  ;;  %v9944_v47 = vadd.f32 %v987_v36, %v9764_v35 }
 0x148   :  { %v4326_v21 = vmax.f32 %v4266_v37, 0.0  ;;  %v4202_v57 = vmax.f32 %v9196_v43, %v9226_v60  ;;  %v4201_v33 = vmax.f32 %v14440_v31, %v14439_v52  ;;  %v14441_v6 = vrot.slane %v9749_v34, 1 }
 0x149   :  { %v3824_v37 = vadd.f32 %v3764_v24, %v3704_v48  ;;  %v4486_v51 = vrot.slane %v14237_v14, 1  ;;  %v9959_v9 = vadd.f32 %v4014_v7, %v3823_v22  ;;  %v9966_v36 = vpop.permute.xlu1 %445  ;;  %v9968_v34 = vmax.f32 %v2794_v16, %v3254_v19 }
 0x14a   :  { %v9952_v23 = vadd.f32 %v14441_v6, %v1955_v5  ;;  %v9955_v45 = vsel %vm2114_vm0, %v4326_v21, 0.0  ;;  %v4268_v43 = vadd.f32 %v9839_v50, %v4202_v57  ;;  %v9964_v60 = vadd.f32 %v9839_v50, %v4201_v33  ;;  %14444 = vst [vmem:[#allocation19_spill] sm:$0xff] %v9966_v36  ;;  %v9982_v22 = vpop.permute.xlu0 %440 }
 0x14b   :  { %14442 = vst [vmem:[#allocation15_spill] sm:$0xff] %v9955_v45  ;;  %v4487_v35 = vrot.slane %v9955_v45, 1  ;;  %v9972_v48 = vmul.f32 %v8525_v40, %v9619_v18  ;;  %v9976_v5 = vmul.f32 %v8527_v41, %v9619_v18  ;;  %v9980_v24 = vmul.f32 %v8521_v38, %v9624_v11  ;;  %14445 = vst [vmem:[#allocation42_spill] sm:$0xff] %v9982_v22 }
 0x14c   :  { %14443 = vst [vmem:[#allocation20_spill] sm:$0xff] %v9964_v60  ;;  %v4328_v19 = vmax.f32 %v4268_v43, 0.0  ;;  %v14239_v21 = vmax.f32 %v9964_v60, 0.0  ;;  %v14446_v57 = vrot.slane %v9776_v46, 1  ;;  %v9995_v31 = vmul.f32 %v8507_v30, %v9624_v11 }
 0x14d   :  { %v4489_v7 = vsel %vm2114_vm0, %v4487_v35, %v9868_v20  ;;  %v4488_v16 = vsel %vm2114_vm0, %v4486_v51, %v4487_v35  ;;  %v9999_v33 = vmul.f32 %v8525_v40, %v9624_v11  ;;  %v10005_v6 = vmul.f32 %v8527_v41, %v9650_v13  ;;  %v14448_v51 = vld [vmem:[#allocation24_spill] sm:$0xff]  ;;  %v10014_v43 = vpop.permute.xlu1 %1223 }
 0x14e   :  { %v9990_v52 = vadd.f32 %v14446_v57, %v3824_v37  ;;  %4600 = vrot.lane.b32.xlu1 %v4489_v7, %s8171_s24  ;;  %4598 = vrot.lane.b32.xlu0 %v4488_v16, %s8171_s24  ;;  %v10008_v46 = vsel %vm2114_vm0, %v4328_v19, 0.0  ;;  %v4490_v37 = vrot.slane %v14239_v21, 1  ;;  %v4204_v35 = vmax.f32 %v14448_v51, %v9313_v26  ;;  %14449 = vst [vmem:[#allocation24_spill] sm:$0xff] %v10014_v43  ;;  %v14451_v19 = vld [vmem:[#allocation22_spill] sm:$0xff]  ;;  %v10025_v63 = vpop.permute.xlu0 %1218 }
 0x14f   :  { %14447 = vst [vmem:[#allocation43_spill] sm:$0xff] %v10008_v46  ;;  %v10018_v7 = vmul.f32 %v9650_v13, %v8507_v30  ;;  %v1410_v16 = vmul.f32 %v8525_v40, %v9662_v62  ;;  %v4491_v57 = vrot.slane %v10008_v46, 1  ;;  %v4203_v14 = vmax.f32 %v14451_v19, %v14450_v61  ;;  %14452 = vst [vmem:[#allocation23_spill] sm:$0xff] %v10025_v63  ;;  %v14461_v63 = vld [vmem:[#allocation21_spill] sm:$0xff] }
 0x150   :  { %v10029_v21 = vmul.f32 %v8527_v41, %v9624_v11  ;;  %v2465_v26 = vmul.f32 %v8527_v41, %v9662_v62  ;;  %v3435_v51 = vmul.f32 %v9662_v62, %v8507_v30  ;;  %v4270_v18 = vadd.f32 %v9839_v50, %v4204_v35 }
 0x151   :  { %v2345_v46 = vmul.f32 %v9686_v12, %v8525_v40  ;;  %v4493_v61 = vsel %vm2114_vm0, %v4491_v57, %v9868_v20  ;;  %v4492_v19 = vsel %vm2114_vm0, %v4490_v37, %v4491_v57  ;;  %v10042_v60 = vadd.f32 %v9839_v50, %v4203_v14  ;;  %v10051_v54 = vpop.permute.xlu1 %1642 }
 0x152   :  { %v1411_v11 = vmul.f32 %v8525_v40, %v9650_v13  ;;  %v2596_v45 = vrot.slane %v10005_v6, 1  ;;  %v2856_v0 = vmul.f32 %v9650_v13, %v8521_v38  ;;  %4604 = vrot.lane.b32.xlu1 %v4493_v61, %s8171_s24  ;;  %4602 = vrot.lane.b32.xlu0 %v4492_v19, %s8171_s24  ;;  %v4330_v35 = vmax.f32 %v4270_v18, 0.0  ;;  %14454 = vst [vmem:[#allocation44_spill] sm:$0xff] %v10051_v54  ;;  %v10058_v6 = vpop.permute.xlu0 %1647  ;;  %v14460_v54 = vld [vmem:[#allocation25_spill] sm:$0xff] }
 0x153   :  { %14453 = vst [vmem:[#allocation22_spill] sm:$0xff] %v10042_v60  ;;  %v3566_v37 = vrot.slane %v10018_v7, 1  ;;  %v1470_v14 = vadd.f32 %v1410_v16, %v9909_v32  ;;  %v2855_v57 = vmul.f32 %v9662_v62, %v8521_v38  ;;  %v14248_v39 = vmax.f32 %v10042_v60, 0.0  ;;  %14455 = vst [vmem:[#allocation45_spill] sm:$0xff] %v10058_v6  ;;  %v14459_v60 = vld [vmem:[#allocation26_spill] sm:$0xff] }
 0x154   :  { %v2595_v22 = vrot.slane %v2465_v26, 1  ;;  %v3565_v13 = vrot.slane %v3435_v51, 1  ;;  %v2915_v61 = vmul.f32 %v9686_v12, %v8507_v30  ;;  %v10063_v18 = vsel %vm2114_vm0, %v4330_v35, 0.0 }
 0x155   :  { %14456 = vst [vmem:[#allocation46_spill] sm:$0xff] %v10063_v18  ;;  %v2405_v19 = vadd.f32 %v2345_v46, %v9911_v42  ;;  %v2346_v32 = vmul.f32 %v9691_v2, %v8525_v40  ;;  %v4495_v7 = vrot.slane %v10063_v18, 1  ;;  %v4494_v62 = vrot.slane %v14248_v39, 1  ;;  %v10079_v46 = vpop.permute.xlu1 %804  ;;  %v14458_v39 = vld [vmem:[#allocation27_spill] sm:$0xff] }
 0x156   :  { %v1834_v16 = vmul.f32 %v8527_v41, %v9686_v12  ;;  %v3375_v26 = vmul.f32 %v9686_v12, %v8521_v38  ;;  %v1835_v51 = vmul.f32 %v8527_v41, %v9691_v2  ;;  %v2916_v42 = vmul.f32 %v9691_v2, %v8507_v30  ;;  %14457 = vst [vmem:[#allocation47_spill] sm:$0xff] %v10079_v46  ;;  %v10088_v12 = vpop.permute.xlu0 %809 }
 0x157   :  { %v4497_v35 = vsel %vm2114_vm0, %v4495_v7, %v9868_v20  ;;  %v4496_v18 = vsel %vm2114_vm0, %v4494_v62, %v4495_v7  ;;  %v4206_v6 = vmax.f32 %v14459_v60, %v14458_v39  ;;  %v4205_v43 = vmax.f32 %v14461_v63, %v14460_v54 }
 0x158   :  { %v4016_v36 = vrot.slane %v9976_v5, 1  ;;  %v2597_v1 = vsel %vm2114_vm0, %v2595_v22, %v2596_v45  ;;  %v2975_v17 = vadd.f32 %v2915_v61, %v2855_v57  ;;  %v3567_v46 = vsel %vm2114_vm0, %v3565_v13, %v3566_v37  ;;  %4608 = vrot.lane.b32.xlu1 %v4497_v35, %s8171_s24  ;;  %4606 = vrot.lane.b32.xlu0 %v4496_v18, %s8171_s24 }
 0x159   :  { %v2735_v7 = vadd.f32 %v2597_v1, %v2405_v19  ;;  %v2406_v62 = vadd.f32 %v2346_v32, %v9952_v23  ;;  %v4272_v39 = vadd.f32 %v9839_v50, %v4206_v6  ;;  %v10098_v63 = vadd.f32 %v9839_v50, %v4205_v43  ;;  %v14463_v43 = vld [vmem:[#allocation35_spill] sm:$0xff] }
 0x15a   :  { %v2148_v54 = vrot.slane %v9995_v31, 1  ;;  %v4015_v60 = vrot.slane %v10029_v21, 1  ;;  %v1471_v22 = vadd.f32 %v1411_v11, %v9944_v47  ;;  %v3376_v57 = vmul.f32 %v9691_v2, %v8521_v38  ;;  %v10109_v31 = vpop.permute.xlu1 %465 }
 0x15b   :  { %14462 = vst [vmem:[#allocation27_spill] sm:$0xff] %v10098_v63  ;;  %v1894_v13 = vadd.f32 %v1834_v16, %v1470_v14  ;;  %v2976_v61 = vadd.f32 %v2916_v42, %v2856_v0  ;;  %v4332_v18 = vmax.f32 %v4272_v39, 0.0  ;;  %v14260_v1 = vmax.f32 %v10098_v63, 0.0  ;;  %14464 = vst [vmem:[#allocation26_spill] sm:$0xff] %v10109_v31  ;;  %v10116_v0 = vpop.permute.xlu0 %460  ;;  %v14468_v42 = vld [vmem:[#allocation30_spill] sm:$0xff]  ;;  %v14469_v39 = vld [vmem:[#allocation29_spill] sm:$0xff] }
 0x15c   :  { %v3705_v23 = vadd.f32 %v3567_v46, %v3375_v26  ;;  %v1895_v19 = vadd.f32 %v1835_v51, %v1471_v22  ;;  %v3115_v6 = vadd.f32 %v9999_v33, %v2975_v17  ;;  %v3195_v32 = vmul.f32 %v8527_v41, %v14463_v43  ;;  %14466 = vst [vmem:[#allocation21_spill] sm:$0xff] %v10116_v0  ;;  %v14467_v51 = vld [vmem:[#allocation31_spill] sm:$0xff]  ;;  %v14470_v22 = vld [vmem:[#allocation28_spill] sm:$0xff] }
 0x15d   :  { %v2795_v21 = vmax.f32 %v1894_v13, %v2735_v7  ;;  %v2736_v35 = vadd.f32 %v2596_v45, %v2406_v62  ;;  %v10112_v47 = vsel %vm2114_vm0, %v4332_v18, 0.0  ;;  %v4498_v2 = vrot.slane %v14260_v1, 1 }
 0x15e   :  { %14465 = vst [vmem:[#allocation25_spill] sm:$0xff] %v10112_v47  ;;  %v3706_v11 = vadd.f32 %v3566_v37, %v3376_v57  ;;  %v988_v14 = vmul.f32 %v8507_v30, %v14463_v43  ;;  %v1956_v17 = vmul.f32 %v14463_v43, %v8521_v38  ;;  %v4499_v33 = vrot.slane %v10112_v47, 1 }
 0x15f   :  { %v3765_v45 = vmul.f32 %v8525_v40, %v14463_v43  ;;  %v3116_v16 = vadd.f32 %v9972_v48, %v2976_v61  ;;  %v3196_v26 = vmul.f32 %v8527_v41, %v9717_v8  ;;  %v4208_v46 = vmax.f32 %v14468_v42, %v14467_v51 }
 0x160   :  { %v3255_v37 = vadd.f32 %v3195_v32, %v3115_v6  ;;  %v4501_v7 = vsel %vm2114_vm0, %v4499_v33, %v9868_v20  ;;  %v4500_v62 = vsel %vm2114_vm0, %v4498_v2, %v4499_v33  ;;  %v4207_v57 = vmax.f32 %v14470_v22, %v14469_v39  ;;  %v10151_v33 = vpop.permute.xlu1 %1233 }
 0x161   :  { %v989_v13 = vmul.f32 %v8507_v30, %v9717_v8  ;;  %v3766_v48 = vmul.f32 %v8525_v40, %v9717_v8  ;;  %4612 = vrot.lane.b32.xlu1 %v4501_v7, %s8171_s24  ;;  %4610 = vrot.lane.b32.xlu0 %v4500_v62, %s8171_s24  ;;  %v4274_v61 = vadd.f32 %v9839_v50, %v4208_v46  ;;  %v14471_v43 = vrot.slane %v9936_v27, 1  ;;  %v10155_v46 = vpop.permute.xlu0 %1228 }
 0x162   :  { %v2796_v18 = vmax.f32 %v1895_v19, %v2736_v35  ;;  %v10143_v6 = vadd.f32 %v988_v14, %v9980_v24  ;;  %v10149_v2 = vadd.f32 %v9839_v50, %v4207_v57  ;;  %v3825_v51 = vadd.f32 %v3765_v45, %v3705_v23 }
 0x163   :  { %v2150_v32 = vsel %vm2114_vm0, %v2148_v54, %v14471_v43  ;;  %v1957_v42 = vmul.f32 %v9717_v8, %v8521_v38  ;;  %v3256_v7 = vadd.f32 %v3196_v26, %v3116_v16  ;;  %v4334_v62 = vmax.f32 %v4274_v61, 0.0  ;;  %v14474_v8 = vld [vmem:[#allocation34_spill] sm:$0xff]  ;;  %v14475_v26 = vld [vmem:[#allocation33_spill] sm:$0xff] }
 0x164   :  { %14472 = vst [vmem:[#allocation35_spill] sm:$0xff] %v10149_v2  ;;  %v2287_v19 = vadd.f32 %v2150_v32, %v1956_v17  ;;  %v10157_v24 = vmax.f32 %v2795_v21, %v3255_v37  ;;  %v4017_v54 = vsel %vm2114_vm0, %v4015_v60, %v4016_v36  ;;  %v14258_v35 = vmax.f32 %v10149_v2, 0.0  ;;  %v14476_v37 = vld [vmem:[#allocation32_spill] sm:$0xff]  ;;  %v10199_v32 = vpop.permute.xlu1 %1652  ;;  %v14486_v2 = vld [vmem:[#allocation39_spill] sm:$0xff] }
 0x165   :  { %v10164_v14 = vadd.f32 %v989_v13, %v9930_v4  ;;  %v3826_v23 = vadd.f32 %v3766_v48, %v3706_v11  ;;  %v10167_v45 = vsel %vm2114_vm0, %v4334_v62, 0.0  ;;  %v4210_v16 = vmax.f32 %v14474_v8, %v9755_v29 }
 0x166   :  { %14473 = vst [vmem:[#allocation31_spill] sm:$0xff] %v10167_v45  ;;  %v10173_v21 = vmul.f32 %v8507_v30, %v9726_v10  ;;  %v4503_v17 = vrot.slane %v10167_v45, 1  ;;  %v4502_v60 = vrot.slane %v14258_v35, 1  ;;  %v4209_v4 = vmax.f32 %v14476_v37, %v14475_v26 }
 0x167   :  { %v10180_v39 = vadd.f32 %v4017_v54, %v3825_v51  ;;  %v14477_v11 = vmov %v14471_v43  ;;  %v10186_v57 = vmax.f32 %v2796_v18, %v3256_v7  ;;  %v4276_v29 = vadd.f32 %v9839_v50, %v4210_v16  ;;  %v10215_v7 = vpop.permute.xlu0 %1657 }
 0x168   :  { %v10184_v22 = vadd.f32 %v14477_v11, %v1957_v42  ;;  %v10191_v13 = vmul.f32 %v8521_v38, %v9726_v10  ;;  %v4505_v48 = vsel %vm2114_vm0, %v4503_v17, %v9868_v20  ;;  %v4504_v61 = vsel %vm2114_vm0, %v4502_v60, %v4503_v17  ;;  %v14480_v11 = vld [vmem:[#allocation38_spill] sm:$0xff]  ;;  %v10262_v62 = vpop.permute.xlu1 %3022 }
 0x169   :  { %v10197_v43 = vadd.f32 %v9839_v50, %v4209_v4  ;;  %v10203_v27 = vadd.f32 %v4016_v36, %v3826_v23  ;;  %v10207_v18 = vmul.f32 %v8525_v40, %v9726_v10  ;;  %v10211_v51 = vmul.f32 %v8527_v41, %v9726_v10  ;;  %4616 = vrot.lane.b32.xlu1 %v4505_v48, %s8171_s24 }
 0x16a   :  { %4614 = vrot.lane.b32.xlu0 %v4504_v61, %s8171_s24  ;;  %v4336_v42 = vmax.f32 %v4276_v29, 0.0  ;;  %v10220_v36 = vmul.f32 %v8521_v38, %v9734_v28  ;;  %v10224_v5 = vmul.f32 %v8527_v41, %v9751_v53  ;;  %v10229_v54 = vmul.f32 %v8507_v30, %v9734_v28  ;;  %14483 = vst [vmem:[#allocation28_spill] sm:$0xff] %v10262_v62 }
 0x16b   :  { %14478 = vst [vmem:[#allocation30_spill] sm:$0xff] %v10197_v43  ;;  %v14259_v10 = vmax.f32 %v10197_v43, 0.0  ;;  %v10233_v23 = vmul.f32 %v9751_v53, %v8507_v30  ;;  %v4212_v16 = vmax.f32 %v9798_v49, %v9810_v58  ;;  %v2467_v17 = vmul.f32 %v8527_v41, %v9757_v55  ;;  %v14481_v49 = vld [vmem:[#allocation37_spill] sm:$0xff]  ;;  %v14482_v58 = vld [vmem:[#allocation36_spill] sm:$0xff] }
 0x16c   :  { %v10236_v8 = vsel %vm2114_vm0, %v4336_v42, 0.0  ;;  %v3437_v60 = vmul.f32 %v9757_v55, %v8507_v30  ;;  %v3057_v4 = vmul.f32 %v8525_v40, %v9734_v28  ;;  %v2347_v29 = vmul.f32 %v14480_v11, %v8525_v40 }
 0x16d   :  { %14479 = vst [vmem:[#allocation29_spill] sm:$0xff] %v10236_v8  ;;  %v4507_v26 = vrot.slane %v10236_v8, 1  ;;  %v4506_v37 = vrot.slane %v14259_v10, 1  ;;  %v4278_v48 = vadd.f32 %v9839_v50, %v4212_v16  ;;  %v4211_v61 = vmax.f32 %v14482_v58, %v14481_v49  ;;  %v10273_v49 = vpop.permute.xlu0 %829 }
 0x16e   :  { %v10256_v42 = vmul.f32 %v8527_v41, %v9734_v28  ;;  %v2599_v35 = vrot.slane %v10224_v5, 1  ;;  %v1412_v8 = vmul.f32 %v8525_v40, %v9757_v55  ;;  %v2917_v16 = vmul.f32 %v14480_v11, %v8507_v30  ;;  %14485 = vst [vmem:[#allocation33_spill] sm:$0xff] %v10273_v49  ;;  %v10303_v49 = vpop.permute.xlu1 %3017 }
 0x16f   :  { %v4509_v10 = vsel %vm2114_vm0, %v4507_v26, %v9868_v20  ;;  %v4508_v1 = vsel %vm2114_vm0, %v4506_v37, %v4507_v26  ;;  %v4338_v28 = vmax.f32 %v4278_v48, 0.0  ;;  %v10271_v5 = vadd.f32 %v9839_v50, %v4211_v61 }
 0x170   :  { %4620 = vrot.lane.b32.xlu1 %v4509_v10, %s8171_s24  ;;  %4618 = vrot.lane.b32.xlu0 %v4508_v1, %s8171_s24  ;;  %v3569_v26 = vrot.slane %v10233_v23, 1  ;;  %v2598_v37 = vrot.slane %v2467_v17, 1  ;;  %v2857_v58 = vmul.f32 %v9757_v55, %v8521_v38  ;;  %v3568_v43 = vrot.slane %v3437_v60, 1 }
 0x171   :  { %14484 = vst [vmem:[#allocation34_spill] sm:$0xff] %v10271_v5  ;;  %v2407_v45 = vadd.f32 %v2347_v29, %v2287_v19  ;;  %v2348_v47 = vmul.f32 %v14486_v2, %v8525_v40  ;;  %v10281_v10 = vsel %vm2114_vm0, %v4338_v28, 0.0  ;;  %v14269_v1 = vmax.f32 %v10271_v5, 0.0 }
 0x172   :  { %14487 = vst [vmem:[#allocation32_spill] sm:$0xff] %v10281_v10  ;;  %v1413_v48 = vmul.f32 %v8525_v40, %v9751_v53  ;;  %v2858_v23 = vmul.f32 %v9751_v53, %v8521_v38  ;;  %v2918_v17 = vmul.f32 %v14486_v2, %v8507_v30  ;;  %v4511_v55 = vrot.slane %v10281_v10, 1 }
 0x173   :  { %v1472_v19 = vadd.f32 %v1412_v8, %v10143_v6  ;;  %v1836_v60 = vmul.f32 %v8527_v41, %v14480_v11  ;;  %v2977_v29 = vadd.f32 %v2917_v16, %v2857_v58  ;;  %v4510_v61 = vrot.slane %v14269_v1, 1  ;;  %v10309_v58 = vpop.permute.xlu0 %824 }
 0x174   :  { %v2600_v28 = vsel %vm2114_vm0, %v2598_v37, %v2599_v35  ;;  %v3377_v63 = vmul.f32 %v14480_v11, %v8521_v38  ;;  %v1837_v53 = vmul.f32 %v8527_v41, %v14486_v2  ;;  %v4513_v10 = vsel %vm2114_vm0, %v4511_v55, %v9868_v20  ;;  %14488 = vst [vmem:[#allocation38_spill] sm:$0xff] %v10309_v58 }
 0x175   :  { %v2737_v6 = vadd.f32 %v2600_v28, %v2407_v45  ;;  %v3570_v8 = vsel %vm2114_vm0, %v3568_v43, %v3569_v26  ;;  %v2408_v16 = vadd.f32 %v2348_v47, %v10184_v22  ;;  %4624 = vrot.lane.b32.xlu1 %v4513_v10, %s8171_s24  ;;  %v4512_v37 = vsel %vm2114_vm0, %v4510_v61, %v4511_v55  ;;  %v81_v45 = vld [vmem:[%s14206_s0 + $0x108] sm:$0xff]  ;;  %v14489_v10 = vld [vmem:[#allocation40_spill] sm:$0xff] }
 0x176   :  { %v4019_v11 = vrot.slane %v10211_v51, 1  ;;  %v2151_v1 = vrot.slane %v10229_v54, 1  ;;  %v1473_v5 = vadd.f32 %v1413_v48, %v10164_v14  ;;  %v2978_v62 = vadd.f32 %v2918_v17, %v2858_v23  ;;  %4622 = vrot.lane.b32.xlu0 %v4512_v37, %s8171_s24  ;;  %v80_v54 = vld [vmem:[%s14206_s0 + $0x100] sm:$0xff] }
 0x177   :  { %v4018_v47 = vrot.slane %v10256_v42, 1  ;;  %v1896_v22 = vadd.f32 %v1836_v60, %v1472_v19  ;;  %v3117_v43 = vadd.f32 %v3057_v4, %v2977_v29  ;;  %v3197_v55 = vmul.f32 %v8527_v41, %v14489_v10  ;;  %v10342_v29 = vpop.permute.xlu1 %475 }
 0x178   :  { %v3707_v61 = vadd.f32 %v3570_v8, %v3377_v63  ;;  %v1897_v14 = vadd.f32 %v1837_v53, %v1473_v5  ;;  %v3378_v48 = vmul.f32 %v14486_v2, %v8521_v38  ;;  %v3767_v23 = vmul.f32 %v8525_v40, %v14489_v10  ;;  %v14490_v5 = vld [vmem:[#allocation41_spill] sm:$0xff] }
 0x179   :  { %v2797_v17 = vmax.f32 %v1896_v22, %v2737_v6  ;;  %v2738_v28 = vadd.f32 %v2599_v35, %v2408_v16  ;;  %v990_v4 = vmul.f32 %v8507_v30, %v14489_v10  ;;  %455 = vperm.xlu1 %8129, %v81_v45   ;;  %v4213_v42 = vmax.f32 %v9941_v3, %v9959_v9  ;;  %v145_v35 = vld [vmem:[%s14207_s1 + $0x108] sm:$0xff] }
 0x17a   :  { %v1958_v19 = vmul.f32 %v14489_v10, %v8521_v38  ;;  %v3118_v63 = vadd.f32 %v10207_v18, %v2978_v62  ;;  %v3198_v2 = vmul.f32 %v8527_v41, %v14490_v5  ;;  %450 = vperm.xlu0 %8128, %v80_v54   ;;  %v4214_v60 = vmax.f32 %v9968_v34, %v9990_v52  ;;  %v10351_v62 = vpop.permute.xlu0 %470 }
 0x17b   :  { %v3257_v53 = vadd.f32 %v3197_v55, %v3117_v43  ;;  %v991_v3 = vmul.f32 %v8507_v30, %v14490_v5  ;;  %v3768_v9 = vmul.f32 %v8525_v40, %v14490_v5  ;;  %v10349_v18 = vadd.f32 %v9839_v50, %v4213_v42 }
 0x17c   :  { %v3708_v6 = vadd.f32 %v3569_v26, %v3378_v48  ;;  %v3827_v8 = vadd.f32 %v3767_v23, %v3707_v61  ;;  %v1959_v16 = vmul.f32 %v14490_v5, %v8521_v38  ;;  %v4280_v34 = vadd.f32 %v9839_v50, %v4214_v60  ;;  %v144_v61 = vld [vmem:[%s14207_s1 + $0x100] sm:$0xff] }
 0x17d   :  { %14491 = vst [vmem:[#allocation37_spill] sm:$0xff] %v10349_v18  ;;  %v2798_v52 = vmax.f32 %v1897_v14, %v2738_v28  ;;  %v10357_v37 = vadd.f32 %v990_v4, %v10220_v36  ;;  %v14492_v45 = vrot.slane %v10173_v21, 1  ;;  %819 = vperm.xlu1 %8129, %v145_v35   ;;  %v14272_v43 = vmax.f32 %v10349_v18, 0.0 }
 0x17e   :  { %v4020_v26 = vsel %vm2114_vm0, %v4018_v47, %v4019_v11  ;;  %v3258_v55 = vadd.f32 %v3198_v2, %v3118_v63  ;;  %v4340_v54 = vmax.f32 %v4280_v34, 0.0  ;;  %v10369_v36 = vmax.f32 %v2797_v17, %v3257_v53  ;;  %v14494_v47 = vld [vmem:[#allocation14_spill] sm:$0xff]  ;;  %v10385_v17 = vpop.permute.xlu1 %1253  ;;  %v10398_v2 = vpop.permute.xlu0 %1248 }
 0x17f   :  { %v2153_v22 = vsel %vm2114_vm0, %v2151_v1, %v14492_v45  ;;  %v1051_v14 = vadd.f32 %v991_v3, %v10191_v13  ;;  %v3828_v48 = vadd.f32 %v3768_v9, %v3708_v6  ;;  %v4514_v1 = vrot.slane %v14272_v43, 1  ;;  %14496 = vst [vmem:[#allocation39_spill] sm:$0xff] %v10385_v17  ;;  %14497 = vst [vmem:[#allocation40_spill] sm:$0xff] %v10398_v2  ;;  %v207_v9 = vld [vmem:[%s14208_s2 + $0x108] sm:$0xff] }
 0x180   :  { %v2289_v10 = vadd.f32 %v2153_v22, %v1958_v19  ;;  %v10374_v23 = vadd.f32 %v4020_v26, %v3827_v8  ;;  %v14493_v28 = vmov %v14492_v45  ;;  %v10380_v42 = vmul.f32 %v8507_v30, %v14494_v47 }
 0x181   :  { %v2290_v4 = vadd.f32 %v14493_v28, %v1959_v16  ;;  %v10383_v19 = vsel %vm2114_vm0, %v4340_v54, 0.0  ;;  %v10389_v13 = vmul.f32 %v8521_v38, %v14494_v47  ;;  %v10393_v63 = vmul.f32 %v8527_v41, %v9871_v56  ;;  %814 = vperm.xlu1 %8129, %v144_v61  }
 0x182   :  { %14495 = vst [vmem:[#allocation36_spill] sm:$0xff] %v10383_v19  ;;  %v2469_v21 = vmul.f32 %v8527_v41, %v9880_v15  ;;  %v4515_v5 = vrot.slane %v10383_v19, 1  ;;  %v10400_v35 = vmax.f32 %v2798_v52, %v3258_v55  ;;  %v10404_v60 = vmul.f32 %v9871_v56, %v8507_v30  ;;  %v10455_v43 = vpop.permute.xlu0 %1677 }
 0x183   :  { %v3439_v53 = vmul.f32 %v9880_v15, %v8507_v30  ;;  %v2349_v3 = vmul.f32 %v9896_v25, %v8525_v40  ;;  %v10415_v6 = vadd.f32 %v4019_v11, %v3828_v48  ;;  %v3060_v8 = vmul.f32 %v8525_v40, %v14494_v47  ;;  %14499 = vst [vmem:[#allocation14_spill] sm:$0xff] %v10455_v43 }
 0x184   :  { %v2919_v16 = vmul.f32 %v9896_v25, %v8507_v30  ;;  %v4516_v34 = vsel %vm2114_vm0, %v4514_v1, %v4515_v5  ;;  %v10425_v45 = vmul.f32 %v8527_v41, %v14494_v47  ;;  %v10429_v22 = vmul.f32 %v8521_v38, %v9859_v44  ;;  %v266_v47 = vld [vmem:[%s14209_s3 + $0x100] sm:$0xff] }
 0x185   :  { %v10433_v51 = vmul.f32 %v8507_v30, %v9859_v44  ;;  %4626 = vrot.lane.b32.xlu0 %v4516_v34, %s8171_s24  ;;  %v2602_v11 = vrot.slane %v10393_v63, 1  ;;  %v2601_v26 = vrot.slane %v2469_v21, 1  ;;  %v2859_v55 = vmul.f32 %v9880_v15, %v8521_v38  ;;  %1243 = vperm.xlu1 %8129, %v207_v9   ;;  %v10447_v63 = vpop.permute.xlu1 %3162 }
 0x186   :  { %v2350_v54 = vmul.f32 %v9906_v59, %v8525_v40  ;;  %v3572_v61 = vrot.slane %v10404_v60, 1  ;;  %v1414_v48 = vmul.f32 %v8525_v40, %v9880_v15  ;;  %v3571_v1 = vrot.slane %v3439_v53, 1  ;;  %14498 = vst [vmem:[#allocation41_spill] sm:$0xff] %v10447_v63 }
 0x187   :  { %v2409_v28 = vadd.f32 %v2349_v3, %v2289_v10  ;;  %v1415_v21 = vmul.f32 %v8525_v40, %v9871_v56  ;;  %v2979_v34 = vadd.f32 %v2919_v16, %v2859_v55  ;;  %v2920_v9 = vmul.f32 %v9906_v59, %v8507_v30 }
 0x188   :  { %v4517_v60 = vsel %vm2114_vm0, %v4515_v5, %v9868_v20  ;;  %v3059_v15 = vmul.f32 %v8525_v40, %v9859_v44  ;;  %v3889_v10 = vmul.f32 %v8527_v41, %v9859_v44  ;;  %v2860_v53 = vmul.f32 %v9871_v56, %v8521_v38  ;;  %v206_v44 = vld [vmem:[%s14208_s2 + $0x100] sm:$0xff] }
 0x189   :  { %v1838_v3 = vmul.f32 %v8527_v41, %v9896_v25  ;;  %4628 = vrot.lane.b32.xlu0 %v4517_v60, %s8171_s24  ;;  %v2603_v16 = vsel %vm2114_vm0, %v2601_v26, %v2602_v11  ;;  %v3379_v5 = vmul.f32 %v9896_v25, %v8521_v38  ;;  %v1839_v55 = vmul.f32 %v8527_v41, %v9906_v59  ;;  %v14500_v25 = vld [vmem:[#allocation17_spill] sm:$0xff]  ;;  %v10482_v56 = vpop.permute.xlu1 %3157 }
 0x18a   :  { %v2410_v52 = vadd.f32 %v2350_v54, %v2290_v4  ;;  %1662 = vperm.xlu1 %8129, %v266_v47   ;;  %v1474_v19 = vadd.f32 %v1414_v48, %v10357_v37  ;;  %v2739_v18 = vadd.f32 %v2603_v16, %v2409_v28  ;;  %v3573_v60 = vsel %vm2114_vm0, %v3571_v1, %v3572_v61  ;;  %v267_v1 = vld [vmem:[%s14209_s3 + $0x108] sm:$0xff] }
 0x18b   :  { %v1475_v26 = vadd.f32 %v1415_v21, %v1051_v14  ;;  %v2980_v43 = vadd.f32 %v2920_v9, %v2860_v53  ;;  %v3119_v63 = vadd.f32 %v3059_v15, %v2979_v34  ;;  %v3199_v2 = vmul.f32 %v8527_v41, %v14500_v25  ;;  %v10489_v21 = vpop.permute.xlu0 %1672  ;;  %v14501_v15 = vld [vmem:[#allocation16_spill] sm:$0xff] }
 0x18c   :  { %v2154_v4 = vrot.slane %v10433_v51, 1  ;;  %v4021_v54 = vrot.slane %v3889_v10, 1  ;;  %v1898_v17 = vadd.f32 %v1838_v3, %v1474_v19  ;;  %v3380_v47 = vmul.f32 %v9906_v59, %v8521_v38 }
 0x18d   :  { %1238 = vperm.xlu0 %8128, %v206_v44   ;;  %v3709_v37 = vadd.f32 %v3573_v60, %v3379_v5  ;;  %v1899_v48 = vadd.f32 %v1839_v55, %v1475_v26  ;;  %v2740_v28 = vadd.f32 %v2602_v11, %v2410_v52  ;;  %v992_v14 = vmul.f32 %v8507_v30, %v14500_v25  ;;  %v10518_v16 = vpop.permute.xlu1 %834 }
 0x18e   :  { %v2799_v51 = vmax.f32 %v1898_v17, %v2739_v18  ;;  %v3769_v19 = vmul.f32 %v8525_v40, %v14500_v25  ;;  %v4216_v59 = vmax.f32 %v10186_v57, %v10203_v27  ;;  %v4215_v34 = vmax.f32 %v10157_v24, %v10180_v39 }
 0x18f   :  { %v1960_v52 = vmul.f32 %v14500_v25, %v8521_v38  ;;  %v3259_v11 = vadd.f32 %v3199_v2, %v3119_v63  ;;  %v3120_v9 = vadd.f32 %v3060_v8, %v2980_v43  ;;  %v3200_v10 = vmul.f32 %v8527_v41, %v14501_v15  ;;  %v10525_v26 = vpop.permute.xlu0 %839 }
 0x190   :  { %v3710_v53 = vadd.f32 %v3572_v61, %v3380_v47  ;;  %v3770_v18 = vmul.f32 %v8525_v40, %v14501_v15  ;;  %v4282_v17 = vadd.f32 %v9839_v50, %v4216_v59  ;;  %v10505_v57 = vadd.f32 %v9839_v50, %v4215_v34 }
 0x191   :  { %1667 = vperm.xlu0 %8128, %v267_v1   ;;  %v2800_v27 = vmax.f32 %v1899_v48, %v2740_v28  ;;  %v10508_v24 = vadd.f32 %v992_v14, %v10429_v22  ;;  %v14503_v39 = vrot.slane %v10380_v42, 1  ;;  %v993_v2 = vmul.f32 %v8507_v30, %v14501_v15 }
 0x192   :  { %14502 = vst [vmem:[#allocation17_spill] sm:$0xff] %v10505_v57  ;;  %v3829_v8 = vadd.f32 %v3769_v19, %v3709_v37  ;;  %v1961_v61 = vmul.f32 %v14501_v15, %v8521_v38  ;;  %v4342_v63 = vmax.f32 %v4282_v17, 0.0  ;;  %v14280_v3 = vmax.f32 %v10505_v57, 0.0 }
 0x193   :  { %v2156_v43 = vsel %vm2114_vm0, %v2154_v4, %v14503_v39  ;;  %v10520_v55 = vmax.f32 %v2799_v51, %v3259_v11  ;;  %v14504_v22 = vrot.slane %v10425_v45, 1  ;;  %v3260_v60 = vadd.f32 %v3200_v10, %v3120_v9  ;;  %v14505_v4 = vld [vmem:[#allocation19_spill] sm:$0xff]  ;;  %v10574_v10 = vpop.permute.xlu1 %305 }
 0x194   :  { %v2291_v5 = vadd.f32 %v2156_v43, %v1960_v52  ;;  %v3830_v25 = vadd.f32 %v3770_v18, %v3710_v53  ;;  %v10529_v47 = vmul.f32 %v8507_v30, %v14505_v4  ;;  %v10532_v37 = vsel %vm2114_vm0, %v4342_v63, 0.0  ;;  %14510 = vst [vmem:[#allocation48_spill] sm:$0xff] %v10574_v10  ;;  %v14512_v45 = vld [vmem:[#allocation23_spill] sm:$0xff] }
 0x195   :  { %v4023_v44 = vsel %vm2114_vm0, %v4021_v54, %v14504_v22  ;;  %14506 = vst [vmem:[#allocation16_spill] sm:$0xff] %v10532_v37  ;;  %v4518_v48 = vrot.slane %v14280_v3, 1  ;;  %v1053_v28 = vadd.f32 %v993_v2, %v10389_v13  ;;  %v4519_v14 = vrot.slane %v10532_v37, 1  ;;  %v14514_v2 = vld [vmem:[#allocation42_spill] sm:$0xff]  ;;  %v14519_v10 = vld [vmem:[#allocation47_spill] sm:$0xff] }
 0x196   :  { %v4218_v54 = vmax.f32 %v10400_v35, %v10415_v6  ;;  %v4217_v1 = vmax.f32 %v10369_v36, %v10374_v23  ;;  %v10542_v51 = vadd.f32 %v4023_v44, %v3829_v8  ;;  %v14507_v19 = vmov %v14503_v39  ;;  %v10583_v39 = vpop.permute.xlu0 %300 }
 0x197   :  { %v2292_v59 = vadd.f32 %v14507_v19, %v1961_v61  ;;  %v10548_v34 = vmul.f32 %v8521_v38, %v14505_v4  ;;  %v10552_v13 = vmul.f32 %v8527_v41, %v14505_v4  ;;  %v4521_v52 = vsel %vm2114_vm0, %v4519_v14, %v9868_v20  ;;  %v10624_v9 = vpop.permute.xlu1 %1263 }
 0x198   :  { %v4520_v35 = vsel %vm2114_vm0, %v4518_v48, %v4519_v14  ;;  %v4284_v36 = vadd.f32 %v9839_v50, %v4218_v54  ;;  %v10559_v23 = vadd.f32 %v9839_v50, %v4217_v1  ;;  %v10561_v42 = vmax.f32 %v2800_v27, %v3260_v60  ;;  %4632 = vrot.lane.b32.xlu1 %v4521_v52, %s8171_s24  ;;  %v14511_v50 = vld [vmem:[#allocation24_spill] sm:$0xff] }
 0x199   :  { %v14509_v6 = vmov %v14504_v22  ;;  %v10570_v15 = vmul.f32 %v8525_v40, %v14505_v4  ;;  %4630 = vrot.lane.b32.xlu0 %v4520_v35, %s8171_s24  ;;  %v10578_v53 = vmul.f32 %v14511_v50, %v8507_v30  ;;  %v3441_v18 = vmul.f32 %v14512_v45, %v8507_v30  ;;  %14513 = vst [vmem:[#allocation24_spill] sm:$0xff] %v10583_v39  ;;  %v14516_v48 = vld [vmem:[#allocation44_spill] sm:$0xff] }
 0x19a   :  { %14508 = vst [vmem:[#allocation19_spill] sm:$0xff] %v10559_v23  ;;  %v10565_v11 = vadd.f32 %v14509_v6, %v3830_v25  ;;  %v4344_v17 = vmax.f32 %v4284_v36, 0.0  ;;  %v14279_v27 = vmax.f32 %v10559_v23, 0.0  ;;  %v10588_v8 = vmul.f32 %v8521_v38, %v14514_v2  ;;  %v14517_v36 = vld [vmem:[#allocation45_spill] sm:$0xff] }
 0x19b   :  { %v10592_v61 = vmul.f32 %v8507_v30, %v14514_v2  ;;  %v1417_v63 = vmul.f32 %v8525_v40, %v14511_v50  ;;  %v2472_v22 = vmul.f32 %v8527_v41, %v14511_v50  ;;  %v2471_v44 = vmul.f32 %v8527_v41, %v14512_v45 }
 0x19c   :  { %v10601_v60 = vsel %vm2114_vm0, %v4344_v17, 0.0  ;;  %v4522_v25 = vrot.slane %v14279_v27, 1  ;;  %v1416_v4 = vmul.f32 %v8525_v40, %v14512_v45  ;;  %v2351_v14 = vmul.f32 %v14516_v48, %v8525_v40 }
 0x19d   :  { %14515 = vst [vmem:[#allocation23_spill] sm:$0xff] %v10601_v60  ;;  %v2921_v54 = vmul.f32 %v14516_v48, %v8507_v30  ;;  %v4523_v1 = vrot.slane %v10601_v60, 1  ;;  %v3575_v19 = vrot.slane %v10578_v53, 1  ;;  %v2861_v52 = vmul.f32 %v14512_v45, %v8521_v38  ;;  %v10632_v60 = vpop.permute.xlu0 %1258 }
 0x19e   :  { %v3574_v35 = vrot.slane %v3441_v18, 1  ;;  %v2352_v6 = vmul.f32 %v14517_v36, %v8525_v40  ;;  %v1840_v17 = vmul.f32 %v8527_v41, %v14516_v48  ;;  %v2922_v27 = vmul.f32 %v14517_v36, %v8507_v30  ;;  %14518 = vst [vmem:[#allocation42_spill] sm:$0xff] %v10632_v60 }
 0x19f   :  { %v4525_v3 = vsel %vm2114_vm0, %v4523_v1, %v9868_v20  ;;  %v4524_v43 = vsel %vm2114_vm0, %v4522_v25, %v4523_v1  ;;  %v2605_v53 = vrot.slane %v2472_v22, 1  ;;  %v2862_v45 = vmul.f32 %v14511_v50, %v8521_v38  ;;  %v89_v50 = vld [vmem:[%s14206_s0 + $0x148] sm:$0xff] }
 0x1a0   :  { %v2604_v18 = vrot.slane %v2471_v44, 1  ;;  %v1841_v23 = vmul.f32 %v8527_v41, %v14517_v36  ;;  %4636 = vrot.lane.b32.xlu1 %v4525_v3, %s8171_s24  ;;  %4634 = vrot.lane.b32.xlu0 %v4524_v43, %s8171_s24  ;;  %v1476_v57 = vadd.f32 %v1416_v4, %v10508_v24  ;;  %v2411_v37 = vadd.f32 %v2351_v14, %v2291_v5  ;;  %v88_v44 = vld [vmem:[%s14206_s0 + $0x140] sm:$0xff] }
 0x1a1   :  { %v2981_v25 = vadd.f32 %v2921_v54, %v2861_v52  ;;  %v3381_v22 = vmul.f32 %v14516_v48, %v8521_v38  ;;  %v3061_v3 = vmul.f32 %v8525_v40, %v14514_v2  ;;  %v1477_v43 = vadd.f32 %v1417_v63, %v1053_v28 }
 0x1a2   :  { %v3576_v1 = vsel %vm2114_vm0, %v3574_v35, %v3575_v19  ;;  %v2412_v24 = vadd.f32 %v2352_v6, %v2292_v59  ;;  %v3891_v5 = vmul.f32 %v8527_v41, %v14514_v2  ;;  %v1900_v4 = vadd.f32 %v1840_v17, %v1476_v57  ;;  %v212_v2 = vld [vmem:[%s14208_s2 + $0x130] sm:$0xff]  ;;  %v10670_v6 = vpop.permute.xlu0 %1687 }
 0x1a3   :  { %v2982_v48 = vadd.f32 %v2922_v27, %v2862_v45  ;;  %v3382_v14 = vmul.f32 %v14517_v36, %v8521_v38  ;;  %v2157_v54 = vrot.slane %v10592_v61, 1  ;;  %v2606_v52 = vsel %vm2114_vm0, %v2604_v18, %v2605_v53  ;;  %v213_v27 = vld [vmem:[%s14208_s2 + $0x138] sm:$0xff] }
 0x1a4   :  { %v1901_v39 = vadd.f32 %v1841_v23, %v1477_v43  ;;  %v994_v60 = vmul.f32 %v8507_v30, %v14519_v10  ;;  %495 = vperm.xlu1 %8129, %v89_v50   ;;  %490 = vperm.xlu0 %8128, %v88_v44   ;;  %v2741_v28 = vadd.f32 %v2606_v52, %v2411_v37  ;;  %v10662_v23 = vpop.permute.xlu1 %1682  ;;  %v272_v44 = vld [vmem:[%s14209_s3 + $0x130] sm:$0xff] }
 0x1a5   :  { %v3711_v59 = vadd.f32 %v3576_v1, %v3381_v22  ;;  %v3121_v63 = vadd.f32 %v3061_v3, %v2981_v25  ;;  %v3201_v57 = vmul.f32 %v8527_v41, %v14519_v10  ;;  %v2742_v61 = vadd.f32 %v2605_v53, %v2412_v24  ;;  %v273_v3 = vld [vmem:[%s14209_s3 + $0x138] sm:$0xff] }
 0x1a6   :  { %v1962_v35 = vmul.f32 %v14519_v10, %v8521_v38  ;;  %v4219_v37 = vmax.f32 %v10520_v55, %v10542_v51  ;;  %v4220_v36 = vmax.f32 %v10561_v42, %v10565_v11  ;;  %v3712_v17 = vadd.f32 %v3575_v19, %v3382_v14  ;;  %v10682_v55 = vld [vmem:[%s14211_s5] ss:$0 sm:$0xff] }
 0x1a7   :  { %v3771_v45 = vmul.f32 %v8525_v40, %v14519_v10  ;;  %v3122_v18 = vadd.f32 %v10570_v15, %v2982_v48  ;;  %v3202_v53 = vmul.f32 %v8527_v41, %v10088_v12  ;;  %v4024_v25 = vrot.slane %v3891_v5, 1 }
 0x1a8   :  { %v3772_v22 = vmul.f32 %v8525_v40, %v10088_v12  ;;  %1273 = vperm.xlu1 %8129, %v213_v27   ;;  %1268 = vperm.xlu0 %8128, %v212_v2   ;;  %v10685_v51 = vadd.f32 %v10682_v55, %v4219_v37  ;;  %v4286_v42 = vadd.f32 %v10682_v55, %v4220_v36  ;;  %v14521_v10 = vrot.slane %v10529_v47, 1  ;;  %v10703_v14 = vpop.permute.xlu1 %669  ;;  %v153_v2 = vld [vmem:[%s14207_s1 + $0x148] sm:$0xff] }
 0x1a9   :  { %v2801_v11 = vmax.f32 %v1900_v4, %v2741_v28  ;;  %v1054_v15 = vadd.f32 %v994_v60, %v10588_v8  ;;  %v3261_v50 = vadd.f32 %v3201_v57, %v3121_v63  ;;  %v995_v43 = vmul.f32 %v8507_v30, %v10088_v12  ;;  %14522 = vst [vmem:[#allocation45_spill] sm:$0xff] %v10703_v14  ;;  %v10714_v63 = vpop.permute.xlu0 %485 }
 0x1aa   :  { %14520 = vst [vmem:[#allocation44_spill] sm:$0xff] %v10685_v51  ;;  %v2159_v19 = vsel %vm2114_vm0, %v2157_v54, %v14521_v10  ;;  %v1963_v1 = vmul.f32 %v10088_v12, %v8521_v38  ;;  %v14288_v8 = vmax.f32 %v10685_v51, 0.0  ;;  %v4346_v60 = vmax.f32 %v4286_v42, 0.0  ;;  %14524 = vst [vmem:[#allocation49_spill] sm:$0xff] %v10714_v63 }
 0x1ab   :  { %v2802_v24 = vmax.f32 %v1901_v39, %v2742_v61  ;;  %v2293_v5 = vadd.f32 %v2159_v19, %v1962_v35  ;;  %v3831_v4 = vadd.f32 %v3771_v45, %v3711_v59  ;;  %v3262_v48 = vadd.f32 %v3202_v53, %v3122_v18 }
 0x1ac   :  { %v3832_v54 = vadd.f32 %v3772_v22, %v3712_v17  ;;  %v10707_v52 = vmul.f32 %v8507_v30, %v10109_v31  ;;  %1692 = vperm.xlu1 %8129, %v272_v44   ;;  %1697 = vperm.xlu0 %8128, %v273_v3   ;;  %v10710_v28 = vsel %vm2114_vm0, %v4346_v60, 0.0  ;;  %v4526_v12 = vrot.slane %v14288_v8, 1  ;;  %v152_v3 = vld [vmem:[%s14207_s1 + $0x140] sm:$0xff] }
 0x1ad   :  { %14523 = vst [vmem:[#allocation47_spill] sm:$0xff] %v10710_v28  ;;  %v10716_v39 = vmax.f32 %v2801_v11, %v3261_v50  ;;  %v14525_v59 = vrot.slane %v10552_v13, 1  ;;  %v10723_v27 = vmul.f32 %v8507_v30, %v10116_v0  ;;  %v4527_v61 = vrot.slane %v10710_v28, 1 }
 0x1ae   :  { %v1055_v35 = vadd.f32 %v995_v43, %v10548_v34  ;;  %v14526_v37 = vmov %v14521_v10  ;;  %v1419_v17 = vmul.f32 %v8525_v40, %v10151_v33  ;;  %v10736_v45 = vmul.f32 %v8527_v41, %v10151_v33  ;;  %v10769_v43 = vpop.permute.xlu1 %664 }
 0x1af   :  { %v4026_v57 = vsel %vm2114_vm0, %v4024_v25, %v14525_v59  ;;  %v2294_v36 = vadd.f32 %v14526_v37, %v1963_v1  ;;  %v10740_v53 = vmax.f32 %v2802_v24, %v3262_v48  ;;  %v1418_v25 = vmul.f32 %v8525_v40, %v10155_v46  ;;  %14528 = vst [vmem:[#allocation50_spill] sm:$0xff] %v10769_v43  ;;  %v10776_v48 = vpop.permute.xlu0 %480  ;;  %v14530_v37 = vld [vmem:[#allocation28_spill] sm:$0xff] }
 0x1b0   :  { %v10738_v18 = vadd.f32 %v4026_v57, %v3831_v4  ;;  %v4528_v22 = vsel %vm2114_vm0, %v4526_v12, %v4527_v61  ;;  %v14527_v34 = vmov %v14525_v59  ;;  %v635_v42 = vmul.f32 %v8521_v38, %v10109_v31  ;;  %859 = vperm.xlu1 %8129, %v153_v2   ;;  %14529 = vst [vmem:[#allocation51_spill] sm:$0xff] %v10776_v48 }
 0x1b1   :  { %v10747_v47 = vadd.f32 %v14527_v34, %v3832_v54  ;;  %v2164_v11 = vrot.slane %v10707_v52, 1  ;;  %v10754_v10 = vmul.f32 %v10151_v33, %v8507_v30  ;;  %4638 = vrot.lane.b32.xlu0 %v4528_v22, %s8171_s24  ;;  %v634_v19 = vmul.f32 %v8521_v38, %v10116_v0  ;;  %v14538_v0 = vld [vmem:[#allocation41_spill] sm:$0xff] }
 0x1b2   :  { %v2163_v50 = vrot.slane %v10723_v27, 1  ;;  %v10762_v13 = vmul.f32 %v8527_v41, %v10155_v46  ;;  %v1842_v44 = vmul.f32 %v8527_v41, %v10199_v32  ;;  %v1479_v1 = vadd.f32 %v1419_v17, %v1055_v35  ;;  %v91_v17 = vld [vmem:[%s14206_s0 + $0x158] sm:$0xff]  ;;  %v10825_v57 = vpop.permute.xlu1 %1088 }
 0x1b3   :  { %v2864_v24 = vmul.f32 %v10151_v33, %v8521_v38  ;;  %v2863_v4 = vmul.f32 %v10155_v46, %v8521_v38  ;;  %v1478_v54 = vadd.f32 %v1418_v25, %v1054_v15  ;;  %v2353_v52 = vmul.f32 %v10199_v32, %v8525_v40  ;;  %v90_v25 = vld [vmem:[%s14206_s0 + $0x150] sm:$0xff]  ;;  %14532 = vst [vmem:[#allocation28_spill] sm:$0xff] %v10825_v57 }
 0x1b4   :  { %v2924_v12 = vmul.f32 %v10215_v7, %v8507_v30  ;;  %v4529_v59 = vsel %vm2114_vm0, %v4527_v61, %v9868_v20  ;;  %v10787_v33 = vmul.f32 %v10155_v46, %v8507_v30  ;;  %v1843_v27 = vmul.f32 %v8527_v41, %v10215_v7  ;;  %854 = vperm.xlu1 %8129, %v152_v3  }
 0x1b5   :  { %v2354_v15 = vmul.f32 %v10215_v7, %v8525_v40  ;;  %4640 = vrot.lane.b32.xlu0 %v4529_v59, %s8171_s24  ;;  %v10795_v35 = vadd.f32 %v1842_v44, %v1478_v54  ;;  %v2923_v61 = vmul.f32 %v10199_v32, %v8507_v30  ;;  %v3064_v46 = vmul.f32 %v14530_v37, %v8525_v40  ;;  %v14531_v44 = vld [vmem:[#allocation33_spill] sm:$0xff] }
 0x1b6   :  { %v10809_v22 = vmul.f32 %v10199_v32, %v8521_v38  ;;  %v10813_v34 = vmul.f32 %v14530_v37, %v8527_v41  ;;  %v999_v3 = vmul.f32 %v8507_v30, %v14531_v44  ;;  %v1967_v54 = vmul.f32 %v14531_v44, %v8521_v38 }
 0x1b7   :  { %v10819_v59 = vadd.f32 %v2353_v52, %v2293_v5  ;;  %v2984_v8 = vadd.f32 %v2924_v12, %v2864_v24  ;;  %v3063_v2 = vmul.f32 %v10303_v49, %v8525_v40  ;;  %v998_v32 = vmul.f32 %v8507_v30, %v10309_v58  ;;  %v10834_v5 = vpop.permute.xlu0 %849 }
 0x1b8   :  { %v10828_v60 = vadd.f32 %v1843_v27, %v1479_v1  ;;  %v2414_v28 = vadd.f32 %v2354_v15, %v2294_v36  ;;  %v10832_v51 = vmul.f32 %v10303_v49, %v8527_v41  ;;  %505 = vperm.xlu1 %8129, %v91_v17   ;;  %14533 = vst [vmem:[#allocation52_spill] sm:$0xff] %v10834_v5  ;;  %v215_v36 = vld [vmem:[%s14208_s2 + $0x148] sm:$0xff]  ;;  %v214_v49 = vld [vmem:[%s14208_s2 + $0x140] sm:$0xff]  ;;  %v14540_v43 = vrot.slane %v10754_v10, 1 }
 0x1b9   :  { %500 = vperm.xlu0 %8128, %v90_v25   ;;  %v3384_v24 = vmul.f32 %v10215_v7, %v8521_v38  ;;  %v3124_v52 = vadd.f32 %v3064_v46, %v2984_v8  ;;  %v2983_v12 = vadd.f32 %v2923_v61, %v2863_v4  ;;  %v1966_v44 = vmul.f32 %v10309_v58, %v8521_v38  ;;  %v14534_v25 = vld [vmem:[#allocation39_spill] sm:$0xff] }
 0x1ba   :  { %v1059_v27 = vadd.f32 %v999_v3, %v635_v42  ;;  %v10847_v15 = vadd.f32 %v2164_v11, %v1967_v54  ;;  %v10851_v7 = vmul.f32 %v8507_v30, %v10342_v29  ;;  %v2165_v4 = vsel %vm2114_vm0, %v2163_v50, %v2164_v11 }
 0x1bb   :  { %v10853_v8 = vadd.f32 %v3063_v2, %v2983_v12  ;;  %v1058_v61 = vadd.f32 %v998_v32, %v634_v19  ;;  %v10858_v46 = vmul.f32 %v8527_v41, %v10342_v29  ;;  %v10863_v42 = vmul.f32 %v8507_v30, %v10351_v62  ;;  %v274_v32 = vld [vmem:[%s14209_s3 + $0x140] sm:$0xff]  ;;  %v10889_v12 = vpop.permute.xlu1 %1517  ;;  %v10902_v1 = vpop.permute.xlu0 %1093 }
 0x1bc   :  { %v1423_v3 = vmul.f32 %v8525_v40, %v14534_v25  ;;  %v10869_v2 = vmul.f32 %v8527_v41, %v14534_v25  ;;  %1283 = vperm.xlu1 %8129, %v215_v36   ;;  %v2297_v11 = vadd.f32 %v2165_v4, %v1966_v44  ;;  %v10873_v19 = vmul.f32 %v8521_v38, %v10342_v29  ;;  %v275_v44 = vld [vmem:[%s14209_s3 + $0x148] sm:$0xff]  ;;  %v14536_v4 = vld [vmem:[#allocation40_spill] sm:$0xff] }
 0x1bd   :  { %1278 = vperm.xlu0 %8128, %v214_v49   ;;  %v10877_v50 = vmul.f32 %v8525_v40, %v10342_v29  ;;  %v10881_v54 = vmul.f32 %v14534_v25, %v8507_v30  ;;  %14535 = vst [vmem:[#allocation39_spill] sm:$0xff] %v10889_v12  ;;  %v10894_v29 = vmul.f32 %v8521_v38, %v10351_v62  ;;  %14537 = vst [vmem:[#allocation40_spill] sm:$0xff] %v10902_v1 }
 0x1be   :  { %v10898_v49 = vmul.f32 %v8525_v40, %v10351_v62  ;;  %v1422_v17 = vmul.f32 %v8525_v40, %v14536_v4  ;;  %v10907_v58 = vmul.f32 %v8527_v41, %v10351_v62  ;;  %v10911_v36 = vmul.f32 %v8527_v41, %v14536_v4 }
 0x1bf   :  { %v3204_v31 = vmul.f32 %v14538_v0, %v8527_v41  ;;  %v1483_v5 = vadd.f32 %v1423_v3, %v1059_v27  ;;  %v2868_v1 = vmul.f32 %v14534_v25, %v8521_v38  ;;  %v2867_v37 = vmul.f32 %v14536_v4, %v8521_v38  ;;  %v155_v27 = vld [vmem:[%s14207_s1 + $0x158] sm:$0xff] }
 0x1c0   :  { %1702 = vperm.xlu1 %8129, %v274_v32   ;;  %v10924_v48 = vmul.f32 %v14536_v4, %v8507_v30  ;;  %v4221_v3 = vmax.f32 %v10716_v39, %v10738_v18  ;;  %v10931_v12 = vadd.f32 %v1422_v17, %v1058_v61  ;;  %v14539_v25 = vrot.slane %v10736_v45, 1  ;;  %v10945_v39 = vpop.permute.xlu1 %1512 }
 0x1c1   :  { %1707 = vperm.xlu0 %8128, %v275_v44   ;;  %v3774_v44 = vmul.f32 %v14538_v0, %v8525_v40  ;;  %v4222_v62 = vmax.f32 %v10740_v53, %v10747_v47  ;;  %v2613_v4 = vrot.slane %v10911_v36, 1  ;;  %v3264_v57 = vadd.f32 %v3204_v31, %v3124_v52  ;;  %v10960_v52 = vpop.permute.xlu0 %844  ;;  %v14545_v36 = vld [vmem:[#allocation14_spill] sm:$0xff] }
 0x1c2   :  { %v2744_v32 = vadd.f32 %v14539_v25, %v2414_v28  ;;  %v3714_v63 = vadd.f32 %v14540_v43, %v3384_v24  ;;  %v10943_v14 = vadd.f32 %v10682_v55, %v4221_v3  ;;  %v14541_v18 = vmov %v14539_v25 }
 0x1c3   :  { %v14542_v28 = vrot.slane %v10762_v13, 1  ;;  %v3203_v53 = vmul.f32 %v10482_v56, %v8527_v41  ;;  %v14543_v47 = vmov %v14540_v43  ;;  %v14544_v31 = vrot.slane %v10787_v33, 1  ;;  %v154_v33 = vld [vmem:[%s14207_s1 + $0x150] sm:$0xff] }
 0x1c4   :  { %869 = vperm.xlu1 %8129, %v155_v27   ;;  %v4288_v24 = vadd.f32 %v10682_v55, %v4222_v62  ;;  %v3773_v45 = vmul.f32 %v10482_v56, %v8525_v40  ;;  %v2357_v13 = vmul.f32 %v10489_v21, %v8525_v40  ;;  %v2927_v61 = vmul.f32 %v10489_v21, %v8507_v30 }
 0x1c5   :  { %v2609_v0 = vsel %vm2114_vm0, %v14542_v28, %v14541_v18  ;;  %v3579_v43 = vsel %vm2114_vm0, %v14544_v31, %v14543_v47  ;;  %v14306_v10 = vmax.f32 %v10943_v14, 0.0  ;;  %v3834_v17 = vadd.f32 %v3774_v44, %v3714_v63  ;;  %v93_v31 = vld [vmem:[%s14206_s0 + $0x168] sm:$0xff] }
 0x1c6   :  { %v2358_v62 = vmul.f32 %v14545_v36, %v8525_v40  ;;  %v2743_v27 = vadd.f32 %v2609_v0, %v10819_v59  ;;  %v4348_v3 = vmax.f32 %v4288_v24, 0.0  ;;  %v2804_v56 = vmax.f32 %v10828_v60, %v2744_v32 }
 0x1c7   :  { %v1847_v25 = vmul.f32 %v8527_v41, %v14545_v36  ;;  %v3713_v18 = vadd.f32 %v3579_v43, %v10809_v22  ;;  %v4530_v28 = vrot.slane %v14306_v10, 1  ;;  %v2928_v47 = vmul.f32 %v14545_v36, %v8507_v30  ;;  %v10993_v43 = vpop.permute.xlu1 %4596 }
 0x1c8   :  { %v3388_v63 = vmul.f32 %v14545_v36, %v8521_v38  ;;  %v3263_v44 = vadd.f32 %v3203_v53, %v10853_v8  ;;  %v10987_v59 = vsel %vm2114_vm0, %v4348_v3, 0.0  ;;  %864 = vperm.xlu1 %8129, %v154_v33   ;;  %v2417_v32 = vadd.f32 %v2357_v13, %v2297_v11  ;;  %v10999_v33 = vpop.permute.xlu0 %4594 }
 0x1c9   :  { %v3833_v60 = vadd.f32 %v3773_v45, %v3713_v18  ;;  %v2987_v0 = vadd.f32 %v2927_v61, %v2867_v37  ;;  %v4531_v22 = vrot.slane %v10987_v59, 1  ;;  %v3324_v24 = vmax.f32 %v2804_v56, %v3264_v57 }
 0x1ca   :  { %v14546_v36 = vrot.slane %v10813_v34, 1  ;;  %v2418_v8 = vadd.f32 %v2358_v62, %v10847_v15  ;;  %v2803_v53 = vmax.f32 %v10795_v35, %v2743_v27  ;;  %v11001_v11 = vadd.f32 %v1847_v25, %v1483_v5 }
 0x1cb   :  { %v14548_v45 = vrot.slane %v10832_v51, 1  ;;  %v1846_v57 = vmul.f32 %v8527_v41, %v10489_v21  ;;  %v4532_v61 = vsel %vm2114_vm0, %v4530_v28, %v4531_v22  ;;  %v2988_v15 = vadd.f32 %v2928_v47, %v2868_v1 }
 0x1cc   :  { %v4164_v10 = vadd.f32 %v14546_v36, %v3834_v17  ;;  %v14547_v37 = vmov %v14546_v36  ;;  %v3583_v17 = vrot.slane %v10924_v48, 1  ;;  %v3323_v62 = vmax.f32 %v2803_v53, %v3263_v44  ;;  %4642 = vrot.lane.b32.xlu0 %v4532_v61, %s8171_s24  ;;  %515 = vperm.xlu1 %8129, %v93_v31   ;;  %v217_v48 = vld [vmem:[%s14208_s2 + $0x158] sm:$0xff] }
 0x1cd   :  { %v4029_v13 = vsel %vm2114_vm0, %v14548_v45, %v14547_v37  ;;  %v14549_v35 = vrot.slane %v10869_v2, 1  ;;  %v3127_v27 = vadd.f32 %v10898_v49, %v2987_v0  ;;  %v3207_v3 = vmul.f32 %v8527_v41, %v10518_v16  ;;  %v11046_v0 = vpop.permute.xlu0 %4598 }
 0x1ce   :  { %v4163_v34 = vadd.f32 %v4029_v13, %v3833_v60  ;;  %v4224_v1 = vmax.f32 %v3324_v24, %v4164_v10  ;;  %v3387_v28 = vmul.f32 %v10489_v21, %v8521_v38  ;;  %v1906_v47 = vadd.f32 %v1846_v57, %v10931_v12  ;;  %v11035_v60 = vpop.permute.xlu1 %4600 }
 0x1cf   :  { %v2615_v5 = vsel %vm2114_vm0, %v2613_v4, %v14549_v35  ;;  %v14550_v56 = vmov %v14549_v35  ;;  %v14551_v4 = vrot.slane %v10881_v54, 1  ;;  %v1000_v49 = vmul.f32 %v8507_v30, %v10518_v16  ;;  %v92_v54 = vld [vmem:[%s14206_s0 + $0x160] sm:$0xff] }
 0x1d0   :  { %v2747_v51 = vadd.f32 %v2615_v5, %v2417_v32  ;;  %v2748_v25 = vadd.f32 %v14550_v56, %v2418_v8  ;;  %v1968_v44 = vmul.f32 %v10518_v16, %v8521_v38  ;;  %v4533_v10 = vsel %vm2114_vm0, %v4531_v22, %v9868_v20  ;;  %1293 = vperm.xlu1 %8129, %v217_v48  }
 0x1d1   :  { %v3718_v18 = vadd.f32 %v14551_v4, %v3388_v63  ;;  %v4033_v2 = vrot.slane %v10907_v58, 1  ;;  %v14552_v63 = vmov %v14551_v4  ;;  %v3777_v21 = vmul.f32 %v8525_v40, %v10518_v16  ;;  %4644 = vrot.lane.b32.xlu0 %v4533_v10, %s8171_s24  ;;  %v276_v16 = vld [vmem:[%s14209_s3 + $0x150] sm:$0xff]  ;;  %v11098_v4 = vpop.permute.xlu0 %4602 }
 0x1d2   :  { %v3585_v32 = vsel %vm2114_vm0, %v3583_v17, %v14552_v63  ;;  %v1001_v12 = vmul.f32 %v8507_v30, %v10525_v26  ;;  %v4223_v22 = vmax.f32 %v3323_v62, %v4163_v34  ;;  %v2807_v31 = vmax.f32 %v1906_v47, %v2747_v51 }
 0x1d3   :  { %v3267_v24 = vadd.f32 %v3207_v3, %v3127_v27  ;;  %v3208_v58 = vmul.f32 %v8527_v41, %v10525_v26  ;;  %v3717_v36 = vadd.f32 %v3585_v32, %v3387_v28  ;;  %v14553_v8 = vrot.slane %v10851_v7, 1  ;;  %v14557_v28 = vld [vmem:[#allocation42_spill] sm:$0xff] }
 0x1d4   :  { %v14554_v53 = vrot.slane %v10863_v42, 1  ;;  %v1969_v45 = vmul.f32 %v10525_v26, %v8521_v38  ;;  %v3778_v13 = vmul.f32 %v8525_v40, %v10525_v26  ;;  %v2808_v57 = vmax.f32 %v11001_v11, %v2748_v25  ;;  %1712 = vperm.xlu1 %8129, %v276_v16  }
 0x1d5   :  { %v1060_v61 = vadd.f32 %v1000_v49, %v10894_v29  ;;  %v3128_v62 = vadd.f32 %v10877_v50, %v2988_v15  ;;  %v3837_v35 = vadd.f32 %v3777_v21, %v3717_v36  ;;  %v14555_v5 = vrot.slane %v10858_v46, 1  ;;  %510 = vperm.xlu0 %8128, %v92_v54   ;;  %v216_v29 = vld [vmem:[%s14208_s2 + $0x150] sm:$0xff]  ;;  %v157_v50 = vld [vmem:[%s14207_s1 + $0x168] sm:$0xff]  ;;  %v14559_v21 = vld [vmem:[#allocation24_spill] sm:$0xff] }
 0x1d6   :  { %v2168_v37 = vsel %vm2114_vm0, %v14554_v53, %v14553_v8  ;;  %v11072_v34 = vadd.f32 %v1001_v12, %v10873_v19  ;;  %v11074_v51 = vmax.f32 %v2807_v31, %v3267_v24  ;;  %v11083_v11 = vadd.f32 %v10682_v55, %v4223_v22  ;;  %v11086_v19 = vpop.permute.xlu1 %4604  ;;  %v277_v31 = vld [vmem:[%s14209_s3 + $0x158] sm:$0xff]  ;;  %v156_v24 = vld [vmem:[%s14207_s1 + $0x160] sm:$0xff] }
 0x1d7   :  { %v2299_v17 = vadd.f32 %v2168_v37, %v1968_v44  ;;  %v4035_v42 = vsel %vm2114_vm0, %v4033_v2, %v14555_v5  ;;  %v3268_v26 = vadd.f32 %v3208_v58, %v3128_v62  ;;  %v4290_v15 = vadd.f32 %v10682_v55, %v4224_v1  ;;  %v14558_v44 = vld [vmem:[#allocation48_spill] sm:$0xff] }
 0x1d8   :  { %v14556_v27 = vmov %v14553_v8  ;;  %v3838_v48 = vadd.f32 %v3778_v13, %v3718_v18  ;;  %v11092_v56 = vmul.f32 %v8527_v41, %v10624_v9  ;;  %v11096_v25 = vmul.f32 %v10624_v9, %v8507_v30  ;;  %879 = vperm.xlu1 %8129, %v157_v50  }
 0x1d9   :  { %v2300_v3 = vadd.f32 %v14556_v27, %v1969_v45  ;;  %v2479_v47 = vmul.f32 %v8527_v41, %v14557_v28  ;;  %v3449_v1 = vmul.f32 %v14557_v28, %v8507_v30  ;;  %v14307_v7 = vmax.f32 %v11083_v11, 0.0  ;;  %1288 = vperm.xlu0 %8128, %v216_v29   ;;  %v95_v27 = vld [vmem:[%s14206_s0 + $0x178] sm:$0xff] }
 0x1da   :  { %v4350_v49 = vmax.f32 %v4290_v15, 0.0  ;;  %v11105_v18 = vadd.f32 %v4035_v42, %v3837_v35  ;;  %v11109_v10 = vmul.f32 %v8521_v38, %v14558_v44  ;;  %v2359_v2 = vmul.f32 %v10662_v23, %v8525_v40  ;;  %v4386_v42 = vld [vmem:[%s14212_s6 + $0x28] sm:$0xff] }
 0x1db   :  { %v11113_v63 = vmax.f32 %v2808_v57, %v3268_v26  ;;  %v11117_v32 = vmul.f32 %v8507_v30, %v14558_v44  ;;  %v11121_v12 = vmul.f32 %v8521_v38, %v14559_v21  ;;  %v1424_v22 = vmul.f32 %v8525_v40, %v14557_v28  ;;  %v11144_v57 = vpop.permute.xlu1 %4608  ;;  %v11158_v26 = vpop.permute.xlu0 %4606 }
 0x1dc   :  { %v14560_v58 = vmov %v14555_v5  ;;  %v2617_v16 = vrot.slane %v11092_v56, 1  ;;  %v2360_v36 = vmul.f32 %v10670_v6, %v8525_v40  ;;  %v11139_v8 = vsel %vm2114_vm0, %v4350_v49, 0.0  ;;  %874 = vperm.xlu1 %8129, %v156_v24   ;;  %v4385_v5 = vld [vmem:[%s14212_s6 + $0x20] sm:$0xff] }
 0x1dd   :  { %v11133_v54 = vadd.f32 %v14560_v58, %v3838_v48  ;;  %v3587_v53 = vrot.slane %v11096_v25, 1  ;;  %v2616_v37 = vrot.slane %v2479_v47, 1  ;;  %v3586_v45 = vrot.slane %v3449_v1, 1  ;;  %1717 = vperm.xlu0 %8128, %v277_v31  }
 0x1de   :  { %v4819_v13 = vrot.slane %v14307_v7, 1  ;;  %v11148_v46 = vmul.f32 %v8507_v30, %v14559_v21  ;;  %v1425_v62 = vmul.f32 %v8525_v40, %v10624_v9  ;;  %v2419_v35 = vadd.f32 %v2359_v2, %v2299_v17  ;;  %v159_v7 = vld [vmem:[%s14207_s1 + $0x178] sm:$0xff] }
 0x1df   :  { %v2870_v29 = vmul.f32 %v10624_v9, %v8521_v38  ;;  %v1484_v50 = vadd.f32 %v1424_v22, %v1060_v61  ;;  %v2869_v15 = vmul.f32 %v14557_v28, %v8521_v38  ;;  %v4820_v17 = vrot.slane %v11139_v8, 1  ;;  %v14561_v22 = vld [vmem:[#allocation45_spill] sm:$0xff]  ;;  %v11192_v24 = vpop.permute.xlu1 %4612 }
 0x1e0   :  { %v1848_v48 = vmul.f32 %v8527_v41, %v10662_v23  ;;  %v2929_v56 = vmul.f32 %v10662_v23, %v8507_v30  ;;  %v3389_v25 = vmul.f32 %v10662_v23, %v8521_v38  ;;  %v2420_v9 = vadd.f32 %v2360_v36, %v2300_v3  ;;  %525 = vperm.xlu1 %8129, %v95_v27  }
 0x1e1   :  { %v2618_v61 = vsel %vm2114_vm0, %v2616_v37, %v2617_v16  ;;  %v3588_v28 = vsel %vm2114_vm0, %v3586_v45, %v3587_v53  ;;  %v4821_v47 = vsel %vm2114_vm0, %v4819_v13, %v4820_v17  ;;  %v7908_v1 = vpack.c.bf16 %v4386_v42, %v4385_v5  ;;  %v11202_v13 = vpop.permute.xlu0 %4610 }
 0x1e2   :  { %v2116_v49 = vrot.slane %v11117_v32, 1  ;;  %v11178_v44 = vadd.f32 %v2618_v61, %v2419_v35  ;;  %v1849_v2 = vmul.f32 %v8527_v41, %v10670_v6  ;;  %v2930_v23 = vmul.f32 %v10670_v6, %v8507_v30  ;;  %4827 = vrot.lane.b32.xlu0 %v4821_v47, %s8171_s24 }
 0x1e3   :  { %v2115_v3 = vrot.slane %v11148_v46, 1  ;;  %v3390_v21 = vmul.f32 %v10670_v6, %v8521_v38  ;;  %v967_v31 = vmul.f32 %v8507_v30, %v14561_v22  ;;  %v1935_v32 = vmul.f32 %v14561_v22, %v8521_v38  ;;  %7909 = vmatprep.subr.bf16.mxu0 %v7908_v1  ;;  %8044 = vmatprep.subr.bf16.mxu1 %v7908_v1  ;;  %v219_v6 = vld [vmem:[%s14208_s2 + $0x168] sm:$0xff] }
 0x1e4   :  { %v1485_v58 = vadd.f32 %v1425_v62, %v11072_v34  ;;  %v11195_v36 = vadd.f32 %v1848_v48, %v1484_v50  ;;  %v2989_v37 = vadd.f32 %v2929_v56, %v2869_v15  ;;  %v11197_v45 = vadd.f32 %v2617_v16, %v2420_v9  ;;  %7911 = vmatpush3.bf16.msra.mxu0 %v7908_v1  ;;  %v14562_v46 = vld [vmem:[#allocation49_spill] sm:$0xff]  ;;  %v14563_v34 = vld [vmem:[#allocation50_spill] sm:$0xff] }
 0x1e5   :  { %v3070_v35 = vmul.f32 %v8525_v40, %v14562_v46  ;;  %v11208_v5 = vmul.f32 %v8527_v41, %v14562_v46  ;;  %v966_v62 = vmul.f32 %v8507_v30, %v14563_v34  ;;  %v4822_v16 = vsel %vm2114_vm0, %v4820_v17, %v9868_v20  ;;  %8046 = vmatpush3.bf16.msra.mxu1 %v7908_v1  ;;  %v94_v17 = vld [vmem:[%s14206_s0 + $0x170] sm:$0xff] }
 0x1e6   :  { %v11214_v42 = vadd.f32 %v3588_v28, %v3389_v25  ;;  %v11216_v50 = vadd.f32 %v1849_v2, %v1485_v58  ;;  %v2990_v15 = vadd.f32 %v2930_v23, %v2870_v29  ;;  %v1934_v27 = vmul.f32 %v14563_v34, %v8521_v38  ;;  %4829 = vrot.lane.b32.xlu0 %v4822_v16, %s8171_s24  ;;  %v4387_v29 = vld [vmem:[%s14212_s6 + $0x30] sm:$0xff]  ;;  %v4388_v25 = vld [vmem:[%s14212_s6 + $0x38] sm:$0xff]  ;;  %v278_v2 = vld [vmem:[%s14209_s3 + $0x160] sm:$0xff]  ;;  %v11265_v34 = vpop.permute.xlu0 %4614 }
 0x1e7   :  { %v3720_v56 = vadd.f32 %v3587_v53, %v3390_v21  ;;  %v11224_v9 = vadd.f32 %v967_v31, %v11109_v10  ;;  %v11226_v61 = vadd.f32 %v2116_v49, %v1935_v32  ;;  %1303 = vperm.xlu1 %8129, %v219_v6   ;;  %v2117_v10 = vsel %vm2114_vm0, %v2115_v3, %v2116_v49  ;;  %v14564_v28 = vld [vmem:[#allocation51_spill] sm:$0xff]  ;;  %v14565_v31 = vld [vmem:[#allocation28_spill] sm:$0xff]  ;;  %v11253_v49 = vpop.permute.xlu1 %4616 }
 0x1e8   :  { %v3069_v47 = vmul.f32 %v8525_v40, %v14564_v28  ;;  %v11244_v1 = vmul.f32 %v8527_v41, %v14564_v28  ;;  %v3130_v23 = vadd.f32 %v3070_v35, %v2990_v15  ;;  %v1026_v22 = vadd.f32 %v966_v62, %v11121_v12  ;;  %v14566_v62 = vld [vmem:[#allocation52_spill] sm:$0xff] }
 0x1e9   :  { %v1390_v32 = vmul.f32 %v8525_v40, %v14565_v31  ;;  %v11255_v3 = vadd.f32 %v2117_v10, %v1934_v27  ;;  %v11259_v58 = vmul.f32 %v8527_v41, %v14565_v31  ;;  %v11263_v6 = vmul.f32 %v14565_v31, %v8521_v38  ;;  %v218_v27 = vld [vmem:[%s14208_s2 + $0x160] sm:$0xff] }
 0x1ea   :  { %520 = vperm.xlu0 %8128, %v94_v17   ;;  %v7912_v35 = vpack.c.bf16 %v4388_v25, %v4387_v29  ;;  %v11269_v12 = vmul.f32 %v14565_v31, %v8507_v30  ;;  %v3210_v16 = vmul.f32 %v8527_v41, %v14566_v62  ;;  %v3780_v15 = vmul.f32 %v8525_v40, %v14566_v62  ;;  %v14567_v17 = vld [vmem:[#allocation13_spill] sm:$0xff] }
 0x1eb   :  { %1722 = vperm.xlu1 %8129, %v278_v2   ;;  %v14568_v29 = vmax.f32 %v14567_v17, 0.0  ;;  %v3129_v10 = vadd.f32 %v3069_v47, %v2989_v37  ;;  %v4036_v31 = vrot.slane %v11244_v1, 1  ;;  %v4227_v2 = vmax.f32 %v11074_v51, %v11105_v18  ;;  %v14570_v47 = vld [vmem:[#allocation12_spill] sm:$0xff]  ;;  %v14572_v51 = vld [vmem:[#allocation18_spill] sm:$0xff] }
 0x1ec   :  { %7913 = vmatprep.subr.bf16.mxu0 %v7912_v35  ;;  %v4228_v17 = vmax.f32 %v11113_v63, %v11133_v54  ;;  %v11294_v48 = vadd.f32 %v1390_v32, %v1026_v22  ;;  %v3779_v37 = vmul.f32 %v8525_v40, %v10960_v52  ;;  %v11303_v1 = vsel %vm4758_vm1, %v14570_v47, %v10993_v43  ;;  %v14575_v43 = vld [vmem:[#allocation39_spill] sm:$0xff] }
 0x1ed   :  { %v11282_v25 = vsel %vm4758_vm1, %v14568_v29, %v10999_v33  ;;  %v3209_v33 = vmul.f32 %v8527_v41, %v10960_v52  ;;  %7915 = vmatpush3.bf16.msra.mxu0 %v7912_v35  ;;  %14571 = vst [vmem:[#allocation14_spill] sm:$0xff] %v11303_v1  ;;  %v14573_v18 = vmax.f32 %v14572_v51, 0.0  ;;  %v11313_v54 = vadd.f32 %v10682_v55, %v4227_v2  ;;  %v11322_v51 = vpop.permute.xlu1 %4620  ;;  %v14576_v2 = vld [vmem:[#allocation40_spill] sm:$0xff]  ;;  %v14577_v29 = vld [vmem:[#allocation15_spill] sm:$0xff] }
 0x1ee   :  { %14569 = vst [vmem:[#allocation41_spill] sm:$0xff] %v11282_v25  ;;  %7553 = vmatprep.mubr.msk.f32.mxu0 %vm4843_vm2, %v11282_v25  ;;  %1298 = vperm.xlu0 %8128, %v218_v27   ;;  %v4294_v22 = vadd.f32 %v10682_v55, %v4228_v17  ;;  %v3270_v21 = vadd.f32 %v3210_v16, %v3130_v23  ;;  %v279_v27 = vld [vmem:[%s14209_s3 + $0x168] sm:$0xff]  ;;  %v158_v16 = vld [vmem:[%s14207_s1 + $0x170] sm:$0xff] }
 0x1ef   :  { %v11310_v63 = vsel %vm4758_vm1, %v14573_v18, %v11046_v0  ;;  %v3840_v53 = vadd.f32 %v3780_v15, %v3720_v56  ;;  %v2326_v47 = vmul.f32 %v14575_v43, %v8525_v40  ;;  %889 = vperm.xlu1 %8129, %v159_v7   ;;  %v2896_v0 = vmul.f32 %v14575_v43, %v8507_v30  ;;  %v11334_v15 = vpop.permute.xlu0 %4618 }
 0x1f0   :  { %14574 = vst [vmem:[#allocation42_spill] sm:$0xff] %v11310_v63  ;;  %v1391_v17 = vmul.f32 %v8525_v40, %v14576_v2  ;;  %7554 = vmatmul.mubr.msk.f32.vlgmr.msra.gmra.mrb[0].mxu0 %vm4843_vm2, %v11303_v1  ;;  %v4354_v23 = vmax.f32 %v4294_v22, 0.0  ;;  %8045 = vmatprep.subr.bf16.mxu1 %v7912_v35  ;;  %v2446_v7 = vmul.f32 %v8527_v41, %v14576_v2  ;;  %v14578_v25 = vmax.f32 %v11313_v54, 0.0 }
 0x1f1   :  { %v3269_v18 = vadd.f32 %v3209_v33, %v3129_v10  ;;  %v3839_v32 = vadd.f32 %v3779_v37, %v11214_v42  ;;  %v11342_v1 = vsel %vm4758_vm1, %v14577_v29, %v11035_v60  ;;  %7556 = vmatprep.mubr.msk.f32.mxu0 %vm4843_vm2, %v11310_v63  ;;  %v3416_v22 = vmul.f32 %v14576_v2, %v8507_v30  ;;  %v14579_v42 = vld [vmem:[#allocation20_spill] sm:$0xff] }
 0x1f2   :  { %1727 = vperm.xlu0 %8128, %v279_v27   ;;  %v11349_v56 = vsel %vm2114_vm0, %v4354_v23, 0.0  ;;  %v4538_v10 = vrot.slane %v14578_v25, 1  ;;  %v14580_v33 = vmax.f32 %v14579_v42, 0.0  ;;  %8047 = vmatpush3.bf16.msra.mxu1 %v7912_v35  ;;  %v2836_v60 = vmul.f32 %v14576_v2, %v8521_v38 }
 0x1f3   :  { %v2325_v29 = vmul.f32 %v10945_v39, %v8525_v40  ;;  %v2895_v27 = vmul.f32 %v10945_v39, %v8507_v30  ;;  %v4539_v23 = vrot.slane %v11349_v56, 1  ;;  %884 = vperm.xlu1 %8129, %v158_v16   ;;  %v14581_v25 = vmax.f32 %v11216_v50, %v11197_v45  ;;  %v97_v16 = vld [vmem:[%s14206_s0 + $0x188] sm:$0xff] }
 0x1f4   :  { %v11357_v37 = vsel %vm4758_vm1, %v14580_v33, %v11098_v4  ;;  %v14582_v4 = vrot.slane %v11208_v5, 1  ;;  %v1451_v35 = vadd.f32 %v1391_v17, %v11224_v9  ;;  %7557 = vmatmul.mubr.msk.f32.gmra.mrb[2].mxu0 %vm4843_vm2, %v11342_v1  ;;  %v14584_v45 = vmax.f32 %v11195_v36, %v11178_v44  ;;  %v14585_v9 = vld [vmem:[#allocation43_spill] sm:$0xff]  ;;  %v14587_v44 = vld [vmem:[#allocation22_spill] sm:$0xff] }
 0x1f5   :  { %v3330_v42 = vmax.f32 %v14581_v25, %v3270_v21  ;;  %v11387_v5 = vsel %vm4758_vm1, %v14585_v9, %v11086_v19  ;;  %7559 = vmatprep.mubr.msk.f32.mxu0 %vm4843_vm2, %v11357_v37  ;;  %v2386_v17 = vadd.f32 %v2326_v47, %v11226_v61  ;;  %v2566_v25 = vrot.slane %v2446_v7, 1 }
 0x1f6   :  { %v4170_v33 = vadd.f32 %v14582_v4, %v3840_v53  ;;  %v14583_v2 = vmov %v14582_v4  ;;  %v3329_v50 = vmax.f32 %v14584_v45, %v3269_v18  ;;  %v4540_v53 = vsel %vm2114_vm0, %v4538_v10, %v4539_v23  ;;  %14586 = vst [vmem:[#allocation48_spill] sm:$0xff] %v11387_v5 }
 0x1f7   :  { %v4038_v63 = vsel %vm2114_vm0, %v4036_v31, %v14583_v2  ;;  %v11391_v31 = vpop.permute.xlu1 %4624  ;;  %v3536_v4 = vrot.slane %v3416_v22, 1  ;;  %4650 = vrot.lane.b32.xlu0 %v4540_v53, %s8171_s24  ;;  %v14588_v36 = vmax.f32 %v14587_v44, 0.0  ;;  %v1815_v19 = vmul.f32 %v8527_v41, %v14575_v43  ;;  %535 = vperm.xlu1 %8129, %v97_v16   ;;  %v14597_v16 = vld [vmem:[#allocation11_spill] sm:$0xff]  ;;  %v14598_v53 = vld [vmem:[#allocation10_spill] sm:$0xff] }
 0x1f8   :  { %v4169_v21 = vadd.f32 %v4038_v63, %v3839_v32  ;;  %v11401_v32 = vpop.permute.xlu0 %4622  ;;  %v2956_v18 = vadd.f32 %v2896_v0, %v2836_v60  ;;  %v2385_v10 = vadd.f32 %v2325_v29, %v11255_v3  ;;  %v2955_v61 = vadd.f32 %v2895_v27, %v11263_v6  ;;  %7560 = vmatmul.mubr.msk.f32.gmra.mrb[4].mxu0 %vm4843_vm2, %v11387_v5  ;;  %v221_v0 = vld [vmem:[%s14208_s2 + $0x178] sm:$0xff] }
 0x1f9   :  { %v11399_v63 = vsel %vm4758_vm1, %v14588_v36, %v11158_v26  ;;  %v3356_v47 = vmul.f32 %v14575_v43, %v8521_v38  ;;  %v1814_v7 = vmul.f32 %v8527_v41, %v10945_v39  ;;  %v3355_v26 = vmul.f32 %v10945_v39, %v8521_v38  ;;  %v14590_v43 = vld [vmem:[#allocation46_spill] sm:$0xff]  ;;  %v14600_v44 = vld [vmem:[#allocation7_spill] sm:$0xff]  ;;  %v14601_v36 = vld [vmem:[#allocation8_spill] sm:$0xff] }
 0x1fa   :  { %14589 = vst [vmem:[#allocation24_spill] sm:$0xff] %v11399_v63  ;;  %v4230_v3 = vmax.f32 %v3330_v42, %v4170_v33  ;;  %v1875_v22 = vadd.f32 %v1815_v19, %v1451_v35  ;;  %v4541_v6 = vsel %vm2114_vm0, %v4539_v23, %v9868_v20  ;;  %v11423_v60 = vsel %vm4758_vm1, %v14590_v43, %v11144_v57  ;;  %v14594_v23 = vld [vmem:[#allocation27_spill] sm:$0xff] }
 0x1fb   :  { %14591 = vst [vmem:[#allocation45_spill] sm:$0xff] %v11423_v60  ;;  %7562 = vmatprep.mubr.msk.f32.mxu0 %vm4843_vm2, %v11399_v63  ;;  %v4229_v39 = vmax.f32 %v3329_v50, %v4169_v21  ;;  %v2716_v29 = vadd.f32 %v2566_v25, %v2386_v17  ;;  %v14592_v27 = vrot.slane %v11259_v58, 1  ;;  %v14593_v42 = vrot.slane %v11269_v12, 1  ;;  %4652 = vrot.lane.b32.xlu0 %v4541_v6, %s8171_s24  ;;  %v96_v12 = vld [vmem:[%s14206_s0 + $0x180] sm:$0xff]  ;;  %v11445_v9 = vpop.permute.xlu1 %455 }
 0x1fc   :  { %v14595_v35 = vmax.f32 %v14594_v23, 0.0  ;;  %v3096_v45 = vadd.f32 %v14597_v16, %v2956_v18  ;;  %v3686_v50 = vadd.f32 %v3536_v4, %v3356_v47  ;;  %v3095_v58 = vadd.f32 %v14598_v53, %v2955_v61  ;;  %1313 = vperm.xlu1 %8129, %v221_v0   ;;  %v14599_v17 = vld [vmem:[#allocation5_spill] sm:$0xff]  ;;  %7563 = vmatmul.mubr.msk.f32.gmra.mrb[6].mxu0 %vm4843_vm2, %v11423_v60 }
 0x1fd   :  { %v2567_v2 = vsel %vm2114_vm0, %v14592_v27, %v2566_v25  ;;  %v3537_v33 = vsel %vm2114_vm0, %v14593_v42, %v3536_v4  ;;  %v3746_v25 = vmul.f32 %v8525_v40, %v14599_v17  ;;  %v3866_v19 = vmul.f32 %v8527_v41, %v14601_v36  ;;  %v280_v4 = vld [vmem:[%s14209_s3 + $0x170] sm:$0xff]  ;;  %v14602_v0 = vld [vmem:[#allocation25_spill] sm:$0xff] }
 0x1fe   :  { %v11438_v57 = vsel %vm4758_vm1, %v14595_v35, %v11202_v13  ;;  %v2715_v21 = vadd.f32 %v2567_v2, %v2385_v10  ;;  %v3175_v13 = vmul.f32 %v8527_v41, %v14600_v44  ;;  %v4296_v18 = vadd.f32 %v10682_v55, %v4230_v3  ;;  %v11459_v10 = vpop.permute.xlu0 %450  ;;  %v14604_v27 = vld [vmem:[#allocation6_spill] sm:$0xff] }
 0x1ff   :  { %14596 = vst [vmem:[#allocation49_spill] sm:$0xff] %v11438_v57  ;;  %v1874_v61 = vadd.f32 %v1814_v7, %v11294_v48  ;;  %v3685_v47 = vadd.f32 %v3537_v33, %v3355_v26  ;;  %v11465_v6 = vsel %vm4758_vm1, %v14602_v0, %v11192_v24  ;;  %7565 = vmatprep.mubr.msk.f32.mxu0 %vm4843_vm2, %v11438_v57  ;;  %v14605_v48 = vld [vmem:[#allocation35_spill] sm:$0xff]  ;;  %v14608_v26 = vld [vmem:[#allocation9_spill] sm:$0xff]  ;;  %v11486_v16 = vpop.permute.xlu1 %819 }
 0x200   :  { %14603 = vst [vmem:[#allocation50_spill] sm:$0xff] %v11465_v6  ;;  %v11470_v43 = vadd.f32 %v10682_v55, %v4229_v39  ;;  %v3865_v2 = vmul.f32 %v8527_v41, %v14604_v27  ;;  %v3745_v3 = vmul.f32 %v8525_v40, %v14600_v44  ;;  %v2776_v42 = vmax.f32 %v1875_v22, %v2716_v29  ;;  %v220_v39 = vld [vmem:[%s14208_s2 + $0x170] sm:$0xff]  ;;  %v14615_v0 = vld [vmem:[#allocation21_spill] sm:$0xff] }
 0x201   :  { %530 = vperm.xlu0 %8128, %v96_v12   ;;  %v14606_v7 = vmax.f32 %v14605_v48, 0.0  ;;  %v3236_v33 = vadd.f32 %v14608_v26, %v3096_v45  ;;  %v3806_v23 = vadd.f32 %v3746_v25, %v3686_v50  ;;  %v2775_v35 = vmax.f32 %v1874_v61, %v2715_v21  ;;  %1732 = vperm.xlu1 %8129, %v280_v4   ;;  %v14609_v50 = vld [vmem:[#allocation31_spill] sm:$0xff]  ;;  %v14611_v12 = vld [vmem:[#allocation30_spill] sm:$0xff]  ;;  %v14616_v27 = vld [vmem:[#allocation29_spill] sm:$0xff] }
 0x202   :  { %v3235_v55 = vadd.f32 %v3175_v13, %v3095_v58  ;;  %v3986_v22 = vrot.slane %v3866_v19, 1  ;;  %7566 = vmatmul.mubr.msk.f32.gmra.mrb[8].mxu0 %vm4843_vm2, %v11465_v6  ;;  %v4356_v29 = vmax.f32 %v4296_v18, 0.0  ;;  %v3805_v45 = vadd.f32 %v3745_v3, %v3685_v47  ;;  %v4627_v44 = vpop.permute.xlu0 %4626  ;;  %v14614_v13 = vld [vmem:[#allocation26_spill] sm:$0xff]  ;;  %v281_v4 = vld [vmem:[%s14209_s3 + $0x178] sm:$0xff] }
 0x203   :  { %v11480_v24 = vsel %vm4758_vm1, %v14606_v7, %v11265_v34  ;;  %v161_v34 = vld [vmem:[%s14207_s1 + $0x188] sm:$0xff]  ;;  %v11496_v21 = vsel %vm4758_vm1, %v14609_v50, %v11253_v49  ;;  %v14311_v53 = vmax.f32 %v11470_v43, 0.0  ;;  %v3985_v58 = vrot.slane %v3865_v2, 1  ;;  %v815_v18 = vpop.permute.xlu1 %814 }
 0x204   :  { %14607 = vst [vmem:[#allocation51_spill] sm:$0xff] %v11480_v24  ;;  %14610 = vst [vmem:[#allocation28_spill] sm:$0xff] %v11496_v21  ;;  %7568 = vmatprep.mubr.msk.f32.mxu0 %vm4843_vm2, %v11480_v24  ;;  %v14612_v17 = vmax.f32 %v14611_v12, 0.0  ;;  %v11509_v36 = vmul.f32 %v8527_v41, %v14614_v13  ;;  %v3296_v49 = vmax.f32 %v2776_v42, %v3236_v33  ;;  %v11527_v3 = vsel %vm2114_vm0, %v4356_v29, 0.0  ;;  %v160_v42 = vld [vmem:[%s14207_s1 + $0x180] sm:$0xff] }
 0x205   :  { %1308 = vperm.xlu0 %8128, %v220_v39   ;;  %v4136_v19 = vadd.f32 %v3986_v22, %v3806_v23  ;;  %899 = vperm.xlu1 %8129, %v161_v34   ;;  %v3295_v61 = vmax.f32 %v2775_v35, %v3235_v55  ;;  %v3987_v47 = vsel %vm2114_vm0, %v3985_v58, %v3986_v22  ;;  %v4542_v48 = vrot.slane %v14311_v53, 1  ;;  %v14618_v35 = vld [vmem:[#allocation34_spill] sm:$0xff]  ;;  %v14621_v12 = vld [vmem:[#allocation33_spill] sm:$0xff]  ;;  %v14628_v53 = vld [vmem:[#allocation36_spill] sm:$0xff] }
 0x206   :  { %v11505_v25 = vsel %vm4758_vm1, %v14612_v17, %v11334_v15  ;;  %v11517_v15 = vmul.f32 %v8527_v41, %v14615_v0  ;;  %7569 = vmatmul.mubr.msk.f32.gmra.mrb[10].mxu0 %vm4843_vm2, %v11496_v21  ;;  %v11524_v2 = vsel %vm4758_vm1, %v14616_v27, %v11322_v51  ;;  %v11538_v7 = vmul.f32 %v8507_v30, %v11445_v9 }
 0x207   :  { %14613 = vst [vmem:[#allocation52_spill] sm:$0xff] %v11505_v25  ;;  %14617 = vst [vmem:[#allocation13_spill] sm:$0xff] %v11524_v2  ;;  %7571 = vmatprep.mubr.msk.f32.mxu0 %vm4843_vm2, %v11505_v25  ;;  %v2024_v51 = vmul.f32 %v8507_v30, %v11459_v10  ;;  %v4135_v26 = vadd.f32 %v3987_v47, %v3805_v45  ;;  %v11544_v33 = vmul.f32 %v8525_v40, %v14614_v13  ;;  %v11558_v29 = vpop.permute.xlu1 %1243  ;;  %v14622_v13 = vld [vmem:[#allocation38_spill] sm:$0xff] }
 0x208   :  { %v11548_v23 = vmul.f32 %v8525_v40, %v14615_v0  ;;  %v14619_v55 = vmax.f32 %v14618_v35, 0.0  ;;  %v4543_v34 = vrot.slane %v11527_v3, 1  ;;  %v4196_v50 = vmax.f32 %v3296_v49, %v4136_v19  ;;  %v99_v49 = vld [vmem:[%s14206_s0 + $0x198] sm:$0xff]  ;;  %v4629_v19 = vpop.permute.xlu0 %4628 }
 0x209   :  { %1737 = vperm.xlu0 %8128, %v281_v4   ;;  %894 = vperm.xlu1 %8129, %v160_v42   ;;  %v4195_v45 = vmax.f32 %v3295_v61, %v4135_v26  ;;  %v11563_v17 = vmul.f32 %v8525_v40, %v14621_v12  ;;  %v11567_v4 = vmul.f32 %v8527_v41, %v14622_v13  ;;  %v2161_v0 = vrot.slane %v11538_v7, 1  ;;  %v14625_v26 = vld [vmem:[#allocation37_spill] sm:$0xff] }
 0x20a   :  { %v11554_v39 = vsel %vm4758_vm1, %v14619_v55, %v11401_v32  ;;  %7572 = vmatmul.mubr.msk.f32.gmra.mrb[12].mxu0 %vm4843_vm2, %v11524_v2  ;;  %v14623_v32 = vld [vmem:[#allocation32_spill] sm:$0xff]  ;;  %v4544_v61 = vsel %vm2114_vm0, %v4542_v48, %v4543_v34  ;;  %v2160_v27 = vrot.slane %v2024_v51, 1  ;;  %v996_v42 = vmul.f32 %v8507_v30, %v815_v18 }
 0x20b   :  { %14620 = vst [vmem:[#allocation12_spill] sm:$0xff] %v11554_v39  ;;  %v11574_v47 = vsel %vm4758_vm1, %v14623_v32, %v11391_v31  ;;  %7574 = vmatprep.mubr.msk.f32.mxu0 %vm4843_vm2, %v11554_v39  ;;  %v14626_v31 = vmax.f32 %v14625_v26, 0.0  ;;  %v1964_v55 = vmul.f32 %v815_v18, %v8521_v38  ;;  %v11593_v48 = vmul.f32 %v8527_v41, %v11558_v29  ;;  %v1663_v26 = vpop.permute.xlu1 %1662 }
 0x20c   :  { %14624 = vst [vmem:[#allocation18_spill] sm:$0xff] %v11574_v47  ;;  %v11597_v32 = vmul.f32 %v11558_v29, %v8507_v30  ;;  %v11601_v7 = vmul.f32 %v8525_v40, %v14622_v13  ;;  %v632_v51 = vmul.f32 %v8521_v38, %v11459_v10  ;;  %v4545_v13 = vsel %vm2114_vm0, %v4543_v34, %v9868_v20  ;;  %v1239_v2 = vpop.permute.xlu0 %1238 }
 0x20d   :  { %4654 = vrot.lane.b32.xlu0 %v4544_v61, %s8171_s24  ;;  %v11588_v35 = vsel %vm4758_vm1, %v14626_v31, %v4627_v44  ;;  %545 = vperm.xlu1 %8129, %v99_v49   ;;  %v11608_v44 = vld [vmem:[%s14211_s5] ss:$0 sm:$0xff]  ;;  %v997_v10 = vmul.f32 %v8507_v30, %v11486_v16  ;;  %v1965_v49 = vmul.f32 %v11486_v16, %v8521_v38 }
 0x20e   :  { %14627 = vst [vmem:[#allocation39_spill] sm:$0xff] %v11588_v35  ;;  %v11611_v18 = vadd.f32 %v11608_v44, %v4195_v45  ;;  %v11614_v61 = vadd.f32 %v11608_v44, %v4196_v50  ;;  %7575 = vmatmul.mubr.msk.f32.gmra.mrb[14].mxu0 %vm4843_vm2, %v11574_v47  ;;  %v223_v45 = vld [vmem:[%s14208_s2 + $0x188] sm:$0xff]  ;;  %v2355_v50 = vmul.f32 %v1663_v26, %v8525_v40  ;;  %v2611_v47 = vrot.slane %v11593_v48, 1 }
 0x20f   :  { %7577 = vmatprep.mubr.msk.f32.mxu0 %vm4843_vm2, %v11588_v35  ;;  %v1056_v31 = vadd.f32 %v996_v42, %v632_v51  ;;  %v2162_v34 = vsel %vm2114_vm0, %v2160_v27, %v2161_v0  ;;  %v11633_v58 = vsel %vm4758_vm1, %v14628_v53, %v4629_v19  ;;  %v2925_v22 = vmul.f32 %v1663_v26, %v8507_v30  ;;  %v98_v27 = vld [vmem:[%s14206_s0 + $0x190] sm:$0xff] }
 0x210   :  { %14629 = vst [vmem:[#allocation40_spill] sm:$0xff] %v11633_v58  ;;  %v2295_v16 = vadd.f32 %v2162_v34, %v1964_v55  ;;  %v3581_v39 = vrot.slane %v11597_v32, 1  ;;  %v1844_v25 = vmul.f32 %v8527_v41, %v1663_v26  ;;  %v1420_v53 = vmul.f32 %v8525_v40, %v1239_v2  ;;  %v282_v32 = vld [vmem:[%s14209_s3 + $0x180] sm:$0xff]  ;;  %v1668_v63 = vpop.permute.xlu0 %1667 }
 0x211   :  { %4656 = vrot.lane.b32.xlu0 %v4545_v13, %s8171_s24  ;;  %1323 = vperm.xlu1 %8129, %v223_v45   ;;  %v2475_v19 = vmul.f32 %v8527_v41, %v1239_v2  ;;  %v2865_v42 = vmul.f32 %v1239_v2, %v8521_v38  ;;  %v3445_v55 = vmul.f32 %v1239_v2, %v8507_v30  ;;  %v14324_v51 = vmax.f32 %v11611_v18, 0.0  ;;  %v4633_v2 = vpop.permute.xlu1 %4632 }
 0x212   :  { %v633_v48 = vmul.f32 %v8521_v38, %v11445_v9  ;;  %7578 = vmatmul.mubr.msk.f32.gmra.mrb[16].mxu0 %vm4843_vm2, %v11633_v58  ;;  %v2415_v13 = vadd.f32 %v2355_v50, %v2295_v16  ;;  %v3385_v45 = vmul.f32 %v1663_v26, %v8521_v38  ;;  %v1480_v34 = vadd.f32 %v1420_v53, %v1056_v31  ;;  %v222_v50 = vld [vmem:[%s14208_s2 + $0x180] sm:$0xff] }
 0x213   :  { %v2610_v35 = vrot.slane %v2475_v19, 1  ;;  %v3580_v21 = vrot.slane %v3445_v55, 1  ;;  %v2985_v24 = vadd.f32 %v2925_v22, %v2865_v42  ;;  %v2296_v9 = vadd.f32 %v2161_v0, %v1965_v49  ;;  %v163_v0 = vld [vmem:[%s14207_s1 + $0x198] sm:$0xff] }
 0x214   :  { %v1057_v6 = vadd.f32 %v997_v10, %v633_v48  ;;  %v1421_v57 = vmul.f32 %v8525_v40, %v11558_v29  ;;  %v4322_v60 = vmax.f32 %v11614_v61, 0.0  ;;  %v1904_v26 = vadd.f32 %v1844_v25, %v1480_v34  ;;  %v14630_v42 = vld [vmem:[#allocation16_spill] sm:$0xff]  ;;  %v4631_v48 = vpop.permute.xlu0 %4630 }
 0x215   :  { %540 = vperm.xlu0 %8128, %v98_v27   ;;  %1742 = vperm.xlu1 %8129, %v282_v32   ;;  %v2612_v31 = vsel %vm2114_vm0, %v2610_v35, %v2611_v47  ;;  %v3125_v22 = vadd.f32 %v11548_v23, %v2985_v24  ;;  %v3582_v16 = vsel %vm2114_vm0, %v3580_v21, %v3581_v39  ;;  %v283_v32 = vld [vmem:[%s14209_s3 + $0x188] sm:$0xff] }
 0x216   :  { %v2745_v10 = vadd.f32 %v2612_v31, %v2415_v13  ;;  %v3715_v49 = vadd.f32 %v3582_v16, %v3385_v45  ;;  %v1845_v61 = vmul.f32 %v8527_v41, %v1668_v63  ;;  %v2356_v27 = vmul.f32 %v1668_v63, %v8525_v40  ;;  %v14632_v45 = vld [vmem:[#allocation17_spill] sm:$0xff] }
 0x217   :  { %v2866_v53 = vmul.f32 %v11558_v29, %v8521_v38  ;;  %v3265_v25 = vadd.f32 %v11567_v4, %v3125_v22  ;;  %v2926_v35 = vmul.f32 %v1668_v63, %v8507_v30  ;;  %v3386_v24 = vmul.f32 %v1668_v63, %v8521_v38 }
 0x218   :  { %v1481_v21 = vadd.f32 %v1421_v57, %v1057_v6  ;;  %v2805_v23 = vmax.f32 %v1904_v26, %v2745_v10  ;;  %v2416_v19 = vadd.f32 %v2356_v27, %v2296_v9  ;;  %v11677_v55 = vsel %vm4758_vm1, %v14630_v42, %v4633_v2  ;;  %v4637_v6 = vpop.permute.xlu1 %4636 }
 0x219   :  { %1318 = vperm.xlu0 %8128, %v222_v50   ;;  %14631 = vst [vmem:[#allocation15_spill] sm:$0xff] %v11677_v55  ;;  %909 = vperm.xlu1 %8129, %v163_v0   ;;  %v3835_v29 = vadd.f32 %v11601_v7, %v3715_v49  ;;  %v2986_v4 = vadd.f32 %v2926_v35, %v2866_v53  ;;  %v14633_v63 = vmax.f32 %v14632_v45, 0.0  ;;  %v11691_v2 = vsel %vm2114_vm0, %v4322_v60, 0.0  ;;  %v162_v7 = vld [vmem:[%s14207_s1 + $0x190] sm:$0xff]  ;;  %v4635_v49 = vpop.permute.xlu0 %4634 }
 0x21a   :  { %v3716_v13 = vadd.f32 %v3581_v39, %v3386_v24  ;;  %v3206_v34 = vmul.f32 %v8527_v41, %v14621_v12  ;;  %v1905_v9 = vadd.f32 %v1845_v61, %v1481_v21  ;;  %v2746_v50 = vadd.f32 %v2611_v47, %v2416_v19  ;;  %v14637_v0 = vld [vmem:[#allocation23_spill] sm:$0xff] }
 0x21b   :  { %v11686_v57 = vsel %vm4758_vm1, %v14633_v63, %v4631_v48  ;;  %v4477_v39 = vrot.slane %v14324_v51, 1  ;;  %v3126_v26 = vadd.f32 %v11544_v33, %v2986_v4  ;;  %v3325_v60 = vmax.f32 %v2805_v23, %v3265_v25  ;;  %v14639_v61 = vld [vmem:[#allocation19_spill] sm:$0xff] }
 0x21c   :  { %14634 = vst [vmem:[#allocation20_spill] sm:$0xff] %v11686_v57  ;;  %7580 = vmatprep.mubr.msk.f32.mxu0 %vm4843_vm2, %v11686_v57  ;;  %v3836_v31 = vadd.f32 %v11563_v17, %v3716_v13  ;;  %v14635_v12 = vrot.slane %v11509_v36, 1  ;;  %v14636_v47 = vrot.slane %v11517_v15, 1  ;;  %v2806_v16 = vmax.f32 %v1905_v9, %v2746_v50  ;;  %v101_v15 = vld [vmem:[%s14206_s0 + $0x1a8] sm:$0xff] }
 0x21d   :  { %7581 = vmatmul.mubr.msk.f32.gmra.mrb[18].mxu0 %vm4843_vm2, %v11677_v55  ;;  %1747 = vperm.xlu0 %8128, %v283_v32   ;;  %v11711_v10 = vsel %vm4758_vm1, %v14637_v0, %v4637_v6  ;;  %v4478_v33 = vrot.slane %v11691_v2, 1  ;;  %v3266_v17 = vadd.f32 %v3206_v34, %v3126_v26  ;;  %v14640_v27 = vmax.f32 %v14639_v61, 0.0  ;;  %v100_v6 = vld [vmem:[%s14206_s0 + $0x1a0] sm:$0xff]  ;;  %v4382_v26 = vld [vmem:[%s14212_s6 + $0x8] sm:$0xff] }
 0x21e   :  { %v4032_v22 = vsel %vm2114_vm0, %v14636_v47, %v14635_v12  ;;  %14638 = vst [vmem:[#allocation43_spill] sm:$0xff] %v11711_v10  ;;  %904 = vperm.xlu1 %8129, %v162_v7   ;;  %v14642_v21 = vmov %v14635_v12  ;;  %v2031_v48 = vmul.f32 %v8507_v30, %v14562_v46  ;;  %v2030_v32 = vmul.f32 %v8507_v30, %v14564_v28 }
 0x21f   :  { %v11717_v53 = vsel %vm4758_vm1, %v14640_v27, %v4635_v49  ;;  %v4165_v25 = vadd.f32 %v4032_v22, %v3835_v29  ;;  %v4479_v35 = vsel %vm2114_vm0, %v4477_v39, %v4478_v33  ;;  %v3326_v24 = vmax.f32 %v2806_v16, %v3266_v17  ;;  %v225_v29 = vld [vmem:[%s14208_s2 + $0x198] sm:$0xff]  ;;  %v284_v39 = vld [vmem:[%s14209_s3 + $0x190] sm:$0xff] }
 0x220   :  { %14641 = vst [vmem:[#allocation22_spill] sm:$0xff] %v11717_v53  ;;  %7583 = vmatprep.mubr.msk.f32.mxu0 %vm4843_vm2, %v11717_v53  ;;  %v4166_v23 = vadd.f32 %v14642_v21, %v3836_v31  ;;  %v4481_v36 = vsel %vm2114_vm0, %v4478_v33, %v9868_v20  ;;  %v1003_v45 = vmul.f32 %v8507_v30, %v14566_v62  ;;  %v2170_v9 = vrot.slane %v2031_v48, 1  ;;  %v224_v33 = vld [vmem:[%s14208_s2 + $0x190] sm:$0xff] }
 0x221   :  { %7584 = vmatmul.mubr.msk.f32.gmra.mrb[20].mxu0 %vm4843_vm2, %v11711_v10  ;;  %v4225_v19 = vmax.f32 %v3325_v60, %v4165_v25  ;;  %4590 = vrot.lane.b32.xlu0 %v4479_v35, %s8171_s24  ;;  %v1971_v63 = vmul.f32 %v14566_v62, %v8521_v38  ;;  %v639_v34 = vmul.f32 %v8521_v38, %v14562_v46  ;;  %v2169_v50 = vrot.slane %v2030_v32, 1  ;;  %v4381_v62 = vld [vmem:[%s14212_s6] sm:$0xff] }
 0x222   :  { %555 = vperm.xlu1 %8129, %v101_v15   ;;  %v4226_v42 = vmax.f32 %v3326_v24, %v4166_v23  ;;  %v1002_v7 = vmul.f32 %v8507_v30, %v10960_v52  ;;  %v1970_v46 = vmul.f32 %v10960_v52, %v8521_v38  ;;  %v7916_v22 = vpack.c.bf16 %v4382_v26, %v4381_v62 }
 0x223   :  { %v11741_v13 = vadd.f32 %v11608_v44, %v4225_v19  ;;  %v496_v31 = vpop.permute.xlu1 %495  ;;  %v11766_v60 = vpop.permute.xlu0 %490  ;;  %v638_v16 = vmul.f32 %v8521_v38, %v14564_v28  ;;  %v1063_v0 = vadd.f32 %v1003_v45, %v639_v34  ;;  %v2302_v49 = vadd.f32 %v2170_v9, %v1971_v63  ;;  %v164_v28 = vld [vmem:[%s14207_s1 + $0x1a0] sm:$0xff] }
 0x224   :  { %v4292_v4 = vadd.f32 %v11608_v44, %v4226_v42  ;;  %v2171_v52 = vsel %vm2114_vm0, %v2169_v50, %v2170_v9  ;;  %v11776_v61 = vmul.f32 %v8507_v30, %v496_v31  ;;  %v11779_v27 = vmul.f32 %v8527_v41, %v496_v31  ;;  %7917 = vmatprep.subr.bf16.mxu0 %v7916_v22 }
 0x225   :  { %14643 = vst [vmem:[#allocation46_spill] sm:$0xff] %v11741_v13  ;;  %4592 = vrot.lane.b32.xlu0 %v4481_v36, %s8171_s24  ;;  %v14323_v47 = vmax.f32 %v11741_v13, 0.0  ;;  %v1062_v17 = vadd.f32 %v1002_v7, %v638_v16  ;;  %v2301_v25 = vadd.f32 %v2171_v52, %v1970_v46  ;;  %v11786_v15 = vmul.f32 %v8507_v30, %v11766_v60  ;;  %v103_v7 = vld [vmem:[%s14206_s0 + $0x1b8] sm:$0xff] }
 0x226   :  { %1333 = vperm.xlu1 %8129, %v225_v29   ;;  %v4352_v12 = vmax.f32 %v4292_v4, 0.0  ;;  %7919 = vmatpush3.bf16.msra.mxu0 %v7916_v22  ;;  %v11796_v19 = vmul.f32 %v8521_v38, %v496_v31  ;;  %v3072_v42 = vmul.f32 %v8525_v40, %v496_v31  ;;  %v11803_v29 = vmul.f32 %v8525_v40, %v11766_v60  ;;  %v285_v4 = vld [vmem:[%s14209_s3 + $0x198] sm:$0xff] }
 0x227   :  { %v1274_v35 = vpop.permute.xlu1 %1273  ;;  %v1269_v24 = vpop.permute.xlu0 %1268  ;;  %v11793_v23 = vrot.slane %v14323_v47, 1  ;;  %v11807_v36 = vmul.f32 %v8527_v41, %v11766_v60 }
 0x228   :  { %v11789_v21 = vsel %vm2114_vm0, %v4352_v12, 0.0  ;;  %v2482_v48 = vmul.f32 %v8527_v41, %v1274_v35  ;;  %v3452_v32 = vmul.f32 %v1274_v35, %v8507_v30  ;;  %v2481_v45 = vmul.f32 %v8527_v41, %v1269_v24 }
 0x229   :  { %550 = vperm.xlu0 %8128, %v100_v6   ;;  %14644 = vst [vmem:[#allocation27_spill] sm:$0xff] %v11789_v21  ;;  %v3451_v63 = vmul.f32 %v1269_v24, %v8507_v30  ;;  %v1427_v9 = vmul.f32 %v8525_v40, %v1274_v35  ;;  %v1426_v62 = vmul.f32 %v8525_v40, %v1269_v24 }
 0x22a   :  { %1752 = vperm.xlu1 %8129, %v284_v39   ;;  %v3590_v50 = vrot.slane %v3452_v32, 1  ;;  %v2620_v22 = vrot.slane %v2482_v48, 1  ;;  %v2619_v16 = vrot.slane %v2481_v45, 1  ;;  %v2872_v32 = vmul.f32 %v1274_v35, %v8521_v38  ;;  %v227_v35 = vld [vmem:[%s14208_s2 + $0x1a8] sm:$0xff] }
 0x22b   :  { %v3589_v26 = vrot.slane %v3451_v63, 1  ;;  %v1693_v46 = vpop.permute.xlu1 %1692  ;;  %v1698_v31 = vpop.permute.xlu0 %1697  ;;  %v2871_v47 = vmul.f32 %v1269_v24, %v8521_v38  ;;  %v165_v63 = vld [vmem:[%s14207_s1 + $0x1a8] sm:$0xff] }
 0x22c   :  { %v2931_v52 = vmul.f32 %v1693_v46, %v8507_v30  ;;  %v2362_v51 = vmul.f32 %v1698_v31, %v8525_v40  ;;  %v3391_v48 = vmul.f32 %v1693_v46, %v8521_v38  ;;  %v1851_v12 = vmul.f32 %v8527_v41, %v1698_v31 }
 0x22d   :  { %1328 = vperm.xlu0 %8128, %v224_v33   ;;  %v2361_v33 = vmul.f32 %v1693_v46, %v8525_v40  ;;  %v3591_v45 = vsel %vm2114_vm0, %v3589_v26, %v3590_v50  ;;  %v2932_v34 = vmul.f32 %v1698_v31, %v8507_v30  ;;  %v3392_v39 = vmul.f32 %v1698_v31, %v8521_v38 }
 0x22e   :  { %914 = vperm.xlu1 %8129, %v164_v28   ;;  %v4039_v28 = vrot.slane %v11807_v36, 1  ;;  %v2422_v24 = vadd.f32 %v2362_v51, %v2302_v49  ;;  %v2991_v26 = vadd.f32 %v2931_v52, %v2871_v47  ;;  %v3721_v31 = vadd.f32 %v3591_v45, %v3391_v48  ;;  %v286_v47 = vld [vmem:[%s14209_s3 + $0x1a0] sm:$0xff]  ;;  %v4383_v48 = vld [vmem:[%s14212_s6 + $0x10] sm:$0xff] }
 0x22f   :  { %v2421_v36 = vadd.f32 %v2361_v33, %v2301_v25  ;;  %v860_v6 = vpop.permute.xlu1 %859  ;;  %v4639_v13 = vpop.permute.xlu0 %4638  ;;  %v2992_v53 = vadd.f32 %v2932_v34, %v2872_v32  ;;  %v102_v25 = vld [vmem:[%s14206_s0 + $0x1b0] sm:$0xff] }
 0x230   :  { %v2752_v10 = vadd.f32 %v2620_v22, %v2422_v24  ;;  %v3212_v51 = vmul.f32 %v8527_v41, %v860_v6  ;;  %v3782_v49 = vmul.f32 %v8525_v40, %v860_v6  ;;  %v3131_v45 = vadd.f32 %v11803_v29, %v2991_v26  ;;  %v166_v29 = vld [vmem:[%s14207_s1 + $0x1b0] sm:$0xff] }
 0x231   :  { %1757 = vperm.xlu0 %8128, %v285_v4   ;;  %v1487_v4 = vadd.f32 %v1427_v9, %v1063_v0  ;;  %v1850_v0 = vmul.f32 %v8527_v41, %v1693_v46  ;;  %v2621_v9 = vsel %vm2114_vm0, %v2619_v16, %v2620_v22  ;;  %v1005_v22 = vmul.f32 %v8507_v30, %v860_v6 }
 0x232   :  { %565 = vperm.xlu1 %8129, %v103_v7   ;;  %v1486_v7 = vadd.f32 %v1426_v62, %v1062_v17  ;;  %v3722_v17 = vadd.f32 %v3590_v50, %v3392_v39  ;;  %v14645_v62 = vld [vmem:[#allocation44_spill] sm:$0xff]  ;;  %v2751_v34 = vadd.f32 %v2621_v9, %v2421_v36  ;;  %v1973_v16 = vmul.f32 %v860_v6, %v8521_v38 }
 0x233   :  { %v1911_v33 = vadd.f32 %v1851_v12, %v1487_v4  ;;  %v3132_v52 = vadd.f32 %v3072_v42, %v2992_v53  ;;  %v855_v12 = vpop.permute.xlu1 %854  ;;  %v4641_v50 = vpop.permute.xlu0 %4640  ;;  %v4384_v53 = vld [vmem:[%s14212_s6 + $0x18] sm:$0xff]  ;;  %v226_v6 = vld [vmem:[%s14208_s2 + $0x1a0] sm:$0xff]  ;;  %v640_v24 = vmul.f32 %v8521_v38, %v11766_v60  ;;  %v14652_v60 = vrot.slane %v11779_v27, 1 }
 0x234   :  { %v3842_v32 = vadd.f32 %v3782_v49, %v3722_v17  ;;  %v3781_v4 = vmul.f32 %v8525_v40, %v855_v12  ;;  %v1910_v9 = vadd.f32 %v1850_v0, %v1486_v7  ;;  %v14651_v49 = vrot.slane %v11786_v15, 1 }
 0x235   :  { %919 = vperm.xlu0 %8128, %v165_v63   ;;  %v14646_v63 = vmax.f32 %v14645_v62, 0.0  ;;  %v2812_v39 = vmax.f32 %v1911_v33, %v2752_v10  ;;  %v3272_v42 = vadd.f32 %v3212_v51, %v3132_v52  ;;  %v1004_v10 = vmul.f32 %v8507_v30, %v855_v12 }
 0x236   :  { %1343 = vperm.xlu1 %8129, %v227_v35   ;;  %v14648_v35 = vld [vmem:[#allocation47_spill] sm:$0xff]  ;;  %v14650_v51 = vrot.slane %v11776_v61, 1  ;;  %v3841_v17 = vadd.f32 %v3781_v4, %v3721_v31  ;;  %v4041_v7 = vsel %vm2114_vm0, %v4039_v28, %v14652_v60  ;;  %v2811_v15 = vmax.f32 %v1910_v9, %v2751_v34  ;;  %v287_v34 = vld [vmem:[%s14209_s3 + $0x1a8] sm:$0xff] }
 0x237   :  { %v11850_v46 = vsel %vm4758_vm1, %v14646_v63, %v4639_v13  ;;  %v3211_v13 = vmul.f32 %v8527_v41, %v855_v12  ;;  %v11874_v36 = vsel %vm4758_vm1, %v14648_v35, %v4641_v50  ;;  %v506_v0 = vpop.permute.xlu1 %505  ;;  %v7920_v63 = vpack.c.bf16 %v4384_v53, %v4383_v48 }
 0x238   :  { %14647 = vst [vmem:[#allocation11_spill] sm:$0xff] %v11850_v46  ;;  %7586 = vmatprep.mubr.msk.f32.mxu0 %vm4843_vm2, %v11850_v46  ;;  %14649 = vst [vmem:[#allocation10_spill] sm:$0xff] %v11874_v36  ;;  %v2174_v33 = vsel %vm2114_vm0, %v14651_v49, %v14650_v51  ;;  %v11892_v62 = vpop.permute.xlu0 %500  ;;  %v14653_v52 = vmov %v14650_v51  ;;  %v11900_v50 = vmul.f32 %v8507_v30, %v506_v0  ;;  %v14655_v61 = vrot.slane %v11789_v21, 1  ;;  %v167_v51 = vld [vmem:[%s14207_s1 + $0x1b8] sm:$0xff] }
 0x239   :  { %560 = vperm.xlu0 %8128, %v102_v25   ;;  %v1972_v25 = vmul.f32 %v855_v12, %v8521_v38  ;;  %7587 = vmatmul.mubr.msk.f32.gmra.mrb[22].mxu0 %vm4843_vm2, %v11874_v36  ;;  %v3271_v26 = vadd.f32 %v3211_v13, %v3131_v45  ;;  %v11897_v12 = vadd.f32 %v14653_v52, %v1973_v16 }
 0x23a   :  { %1762 = vperm.xlu1 %8129, %v286_v47   ;;  %v1065_v47 = vadd.f32 %v1005_v22, %v11796_v19  ;;  %v11902_v31 = vmax.f32 %v2812_v39, %v3272_v42  ;;  %v14654_v13 = vmov %v14652_v60  ;;  %v1064_v4 = vadd.f32 %v1004_v10, %v640_v24  ;;  %v105_v39 = vld [vmem:[%s14206_s0 + $0x1c8] sm:$0xff]  ;;  %7921 = vmatprep.subr.bf16.mxu0 %v7920_v63 }
 0x23b   :  { %v11906_v28 = vadd.f32 %v14654_v13, %v3842_v32  ;;  %v11915_v19 = vsel %vm2114_vm0, %v14655_v61, %v9868_v20  ;;  %v2303_v22 = vadd.f32 %v2174_v33, %v1972_v25  ;;  %v11918_v16 = vmul.f32 %v8527_v41, %v506_v0  ;;  %v1284_v45 = vpop.permute.xlu1 %1283  ;;  %7923 = vmatpush3.bf16.msra.mxu0 %v7920_v63  ;;  %v229_v63 = vld [vmem:[%s14208_s2 + $0x1b8] sm:$0xff] }
 0x23c   :  { %v11922_v27 = vmul.f32 %v8507_v30, %v11892_v62  ;;  %v14656_v32 = vmov %v14655_v61  ;;  %v11933_v53 = vmax.f32 %v2811_v15, %v3271_v26  ;;  %v11935_v42 = vadd.f32 %v4041_v7, %v3841_v17  ;;  %v1279_v35 = vpop.permute.xlu0 %1278 }
 0x23d   :  { %1338 = vperm.xlu0 %8128, %v226_v6   ;;  %v11931_v48 = vsel %vm2114_vm0, %v11793_v23, %v14656_v32  ;;  %v11938_v6 = vmul.f32 %v8521_v38, %v506_v0  ;;  %v11941_v10 = vmul.f32 %v8525_v40, %v506_v0  ;;  %v11946_v23 = vmul.f32 %v8525_v40, %v11892_v62 }
 0x23e   :  { %924 = vperm.xlu1 %8129, %v166_v29   ;;  %v11950_v9 = vmul.f32 %v8527_v41, %v11892_v62  ;;  %v2484_v25 = vmul.f32 %v8527_v41, %v1284_v45  ;;  %v1429_v49 = vmul.f32 %v8525_v40, %v1284_v45  ;;  %v3454_v33 = vmul.f32 %v1284_v45, %v8507_v30 }
 0x23f   :  { %v2483_v29 = vmul.f32 %v8527_v41, %v1279_v35  ;;  %v1428_v7 = vmul.f32 %v8525_v40, %v1279_v35  ;;  %v3453_v0 = vmul.f32 %v1279_v35, %v8507_v30  ;;  %v2874_v32 = vmul.f32 %v1284_v45, %v8521_v38 }
 0x240   :  { %v2623_v15 = vrot.slane %v2484_v25, 1  ;;  %v3593_v52 = vrot.slane %v3454_v33, 1  ;;  %v1708_v61 = vpop.permute.xlu0 %1707  ;;  %v1489_v17 = vadd.f32 %v1429_v49, %v1065_v47  ;;  %v2873_v21 = vmul.f32 %v1279_v35, %v8521_v38  ;;  %v104_v25 = vld [vmem:[%s14206_s0 + $0x1c0] sm:$0xff]  ;;  %v288_v47 = vld [vmem:[%s14209_s3 + $0x1b0] sm:$0xff] }
 0x241   :  { %1767 = vperm.xlu0 %8128, %v287_v34   ;;  %v2622_v13 = vrot.slane %v2483_v29, 1  ;;  %v1703_v34 = vpop.permute.xlu1 %1702  ;;  %v3592_v60 = vrot.slane %v3453_v0, 1  ;;  %v1853_v33 = vmul.f32 %v8527_v41, %v1708_v61  ;;  %v2364_v29 = vmul.f32 %v1708_v61, %v8525_v40 }
 0x242   :  { %575 = vperm.xlu1 %8129, %v105_v39   ;;  %v2363_v24 = vmul.f32 %v1703_v34, %v8525_v40  ;;  %v2933_v26 = vmul.f32 %v1703_v34, %v8507_v30  ;;  %v1852_v45 = vmul.f32 %v8527_v41, %v1703_v34  ;;  %v3393_v39 = vmul.f32 %v1703_v34, %v8521_v38 }
 0x243   :  { %v2624_v35 = vsel %vm2114_vm0, %v2622_v13, %v2623_v15  ;;  %v3594_v49 = vsel %vm2114_vm0, %v3592_v60, %v3593_v52  ;;  %v2424_v36 = vadd.f32 %v2364_v29, %v11897_v12  ;;  %v2934_v46 = vmul.f32 %v1708_v61, %v8507_v30  ;;  %v228_v13 = vld [vmem:[%s14208_s2 + $0x1b0] sm:$0xff] }
 0x244   :  { %v2423_v0 = vadd.f32 %v2363_v24, %v2303_v22  ;;  %v1913_v22 = vadd.f32 %v1853_v33, %v1489_v17  ;;  %v3394_v24 = vmul.f32 %v1708_v61, %v8521_v38  ;;  %v3723_v58 = vadd.f32 %v3594_v49, %v3393_v39 }
 0x245   :  { %929 = vperm.xlu0 %8128, %v167_v51   ;;  %v1488_v51 = vadd.f32 %v1428_v7, %v1064_v4  ;;  %v870_v55 = vpop.permute.xlu1 %869  ;;  %v2993_v7 = vadd.f32 %v2933_v26, %v2873_v21  ;;  %v2754_v34 = vadd.f32 %v2623_v15, %v2424_v36  ;;  %v2994_v57 = vadd.f32 %v2934_v46, %v2874_v32  ;;  %v168_v21 = vld [vmem:[%s14207_s1 + $0x1c0] sm:$0xff] }
 0x246   :  { %1353 = vperm.xlu1 %8129, %v229_v63   ;;  %v4643_v63 = vpop.permute.xlu0 %4642  ;;  %v2753_v4 = vadd.f32 %v2624_v35, %v2423_v0  ;;  %v3214_v60 = vmul.f32 %v8527_v41, %v870_v55  ;;  %v3784_v12 = vmul.f32 %v8525_v40, %v870_v55  ;;  %v3724_v5 = vadd.f32 %v3593_v52, %v3394_v24 }
 0x247   :  { %v1912_v29 = vadd.f32 %v1852_v45, %v1488_v51  ;;  %v2814_v36 = vmax.f32 %v1913_v22, %v2754_v34  ;;  %v1975_v46 = vmul.f32 %v870_v55, %v8521_v38  ;;  %v3134_v26 = vadd.f32 %v11941_v10, %v2994_v57 }
 0x248   :  { %v14657_v17 = vmax.f32 %v10943_v14, 0.0  ;;  %v4042_v52 = vrot.slane %v11950_v9, 1  ;;  %v3844_v33 = vadd.f32 %v3784_v12, %v3724_v5  ;;  %v3133_v51 = vadd.f32 %v11946_v23, %v2993_v7  ;;  %v289_v14 = vld [vmem:[%s14209_s3 + $0x1b8] sm:$0xff] }
 0x249   :  { %570 = vperm.xlu0 %8128, %v104_v25   ;;  %v1007_v25 = vmul.f32 %v8507_v30, %v870_v55  ;;  %v865_v61 = vpop.permute.xlu1 %864  ;;  %v2813_v39 = vmax.f32 %v1912_v29, %v2753_v4  ;;  %v3274_v55 = vadd.f32 %v3214_v60, %v3134_v26  ;;  %v14658_v5 = vrot.slane %v11918_v16, 1  ;;  %v169_v29 = vld [vmem:[%s14207_s1 + $0x1c8] sm:$0xff] }
 0x24a   :  { %1772 = vperm.xlu1 %8129, %v288_v47   ;;  %v12003_v15 = vsel %vm4758_vm1, %v14657_v17, %v4643_v63  ;;  %v4645_v32 = vpop.permute.xlu0 %4644  ;;  %v3213_v57 = vmul.f32 %v8527_v41, %v865_v61  ;;  %v3783_v10 = vmul.f32 %v8525_v40, %v865_v61  ;;  %v1006_v0 = vmul.f32 %v8507_v30, %v865_v61  ;;  %v107_v47 = vld [vmem:[%s14206_s0 + $0x1d8] sm:$0xff] }
 0x24b   :  { %7589 = vmatprep.mubr.msk.f32.mxu0 %vm4843_vm2, %v12003_v15  ;;  %v12016_v9 = vsel %vm4758_vm1, %v10987_v59, %v4645_v32  ;;  %v4174_v45 = vadd.f32 %v14658_v5, %v3844_v33  ;;  %v1974_v23 = vmul.f32 %v865_v61, %v8521_v38  ;;  %v14659_v35 = vmax.f32 %v11902_v31, %v11906_v28 }
 0x24c   :  { %7590 = vmatmul.mubr.msk.f32.gmra.mrb[24].mxu0 %vm4843_vm2, %v12016_v9  ;;  %v3334_v49 = vmax.f32 %v2814_v36, %v3274_v55  ;;  %v3273_v63 = vadd.f32 %v3213_v57, %v3133_v51  ;;  %v3843_v4 = vadd.f32 %v3783_v10, %v3723_v58  ;;  %v14660_v22 = vmax.f32 %v11933_v53, %v11935_v42  ;;  %v231_v36 = vld [vmem:[%s14208_s2 + $0x1c8] sm:$0xff]  ;;  %v106_v55 = vld [vmem:[%s14206_s0 + $0x1d0] sm:$0xff] }
 0x24d   :  { %1348 = vperm.xlu0 %8128, %v228_v13   ;;  %v4298_v59 = vadd.f32 %v11608_v44, %v14659_v35  ;;  %v516_v7 = vpop.permute.xlu1 %515  ;;  %v642_v34 = vmul.f32 %v8521_v38, %v11892_v62  ;;  %v1067_v13 = vadd.f32 %v1007_v25, %v11938_v6  ;;  %v14662_v31 = vrot.slane %v11900_v50, 1  ;;  %v290_v35 = vld [vmem:[%s14209_s3 + $0x1c0] sm:$0xff] }
 0x24e   :  { %934 = vperm.xlu1 %8129, %v168_v21   ;;  %v12035_v24 = vadd.f32 %v11608_v44, %v14660_v22  ;;  %v14663_v28 = vrot.slane %v11922_v27, 1  ;;  %v14664_v58 = vmov %v14658_v5  ;;  %v3333_v53 = vmax.f32 %v2813_v39, %v3273_v63 }
 0x24f   :  { %v4044_v12 = vsel %vm2114_vm0, %v4042_v52, %v14664_v58  ;;  %v4358_v62 = vmax.f32 %v4298_v59, 0.0  ;;  %v14665_v25 = vmov %v14662_v31  ;;  %v12057_v27 = vmul.f32 %v8507_v30, %v516_v7  ;;  %v230_v58 = vld [vmem:[%s14208_s2 + $0x1c0] sm:$0xff] }
 0x250   :  { %14661 = vst [vmem:[#allocation5_spill] sm:$0xff] %v12035_v24  ;;  %v2177_v60 = vsel %vm2114_vm0, %v14663_v28, %v14662_v31  ;;  %v4173_v42 = vadd.f32 %v4044_v12, %v3843_v4  ;;  %v14336_v6 = vmax.f32 %v12035_v24, 0.0  ;;  %v12054_v21 = vadd.f32 %v14665_v25, %v1975_v46  ;;  %v170_v25 = vld [vmem:[%s14207_s1 + $0x1d0] sm:$0xff] }
 0x251   :  { %1777 = vperm.xlu0 %8128, %v289_v14   ;;  %v12060_v16 = vmul.f32 %v8527_v41, %v516_v7  ;;  %v4234_v26 = vmax.f32 %v3334_v49, %v4174_v45  ;;  %v1066_v17 = vadd.f32 %v1006_v0, %v642_v34  ;;  %v2305_v61 = vadd.f32 %v2177_v60, %v1974_v23  ;;  %v1294_v32 = vpop.permute.xlu1 %1293 }
 0x252   :  { %585 = vperm.xlu1 %8129, %v107_v47   ;;  %v12066_v52 = vsel %vm2114_vm0, %v4358_v62, 0.0  ;;  %v4233_v50 = vmax.f32 %v3333_v53, %v4173_v42  ;;  %v645_v46 = vmul.f32 %v8521_v38, %v516_v7  ;;  %v1431_v39 = vmul.f32 %v8525_v40, %v1294_v32 }
 0x253   :  { %14666 = vst [vmem:[#allocation7_spill] sm:$0xff] %v12066_v52  ;;  %v12071_v33 = vmul.f32 %v8527_v41, %v1294_v32  ;;  %v12074_v51 = vmul.f32 %v1294_v32, %v8507_v30  ;;  %v4547_v14 = vrot.slane %v12066_v52, 1  ;;  %v4546_v57 = vrot.slane %v14336_v6, 1 }
 0x254   :  { %v4300_v10 = vadd.f32 %v11608_v44, %v4234_v26  ;;  %v12084_v5 = vadd.f32 %v11608_v44, %v4233_v50  ;;  %v2179_v45 = vrot.slane %v12057_v27, 1  ;;  %v12088_v0 = vmul.f32 %v8525_v40, %v516_v7  ;;  %v511_v59 = vpop.permute.xlu0 %510 }
 0x255   :  { %939 = vperm.xlu0 %8128, %v169_v29   ;;  %v12092_v47 = vmul.f32 %v1294_v32, %v8521_v38  ;;  %v12097_v49 = vadd.f32 %v1431_v39, %v1067_v13  ;;  %v1713_v63 = vpop.permute.xlu1 %1712  ;;  %v2036_v7 = vmul.f32 %v8507_v30, %v511_v59  ;;  %v3905_v34 = vmul.f32 %v8527_v41, %v511_v59 }
 0x256   :  { %1363 = vperm.xlu1 %8129, %v231_v36   ;;  %14667 = vst [vmem:[#allocation8_spill] sm:$0xff] %v12084_v5  ;;  %v4360_v4 = vmax.f32 %v4300_v10, 0.0  ;;  %v14335_v22 = vmax.f32 %v12084_v5, 0.0  ;;  %v12106_v28 = vsel %vm2114_vm0, %v4547_v14, %v9868_v20  ;;  %v12109_v13 = vmul.f32 %v8521_v38, %v511_v59 }
 0x257   :  { %v12112_v60 = vmul.f32 %v8525_v40, %v511_v59  ;;  %v2365_v12 = vmul.f32 %v1713_v63, %v8525_v40  ;;  %v12119_v53 = vsel %vm2114_vm0, %v4546_v57, %v4547_v14  ;;  %v1854_v42 = vmul.f32 %v8527_v41, %v1713_v63 }
 0x258   :  { %v2935_v29 = vmul.f32 %v1713_v63, %v8507_v30  ;;  %v3395_v62 = vmul.f32 %v1713_v63, %v8521_v38  ;;  %v12128_v27 = vsel %vm2114_vm0, %v4360_v4, 0.0  ;;  %v2178_v36 = vrot.slane %v2036_v7, 1  ;;  %v1289_v32 = vpop.permute.xlu0 %1288 }
 0x259   :  { %580 = vperm.xlu0 %8128, %v106_v55   ;;  %14668 = vst [vmem:[#allocation25_spill] sm:$0xff] %v12128_v27  ;;  %v4045_v26 = vrot.slane %v3905_v34, 1  ;;  %v2425_v50 = vadd.f32 %v2365_v12, %v2305_v61  ;;  %v880_v39 = vpop.permute.xlu1 %879  ;;  %v12132_v55 = vrot.slane %v14335_v22, 1  ;;  %v1430_v14 = vmul.f32 %v8525_v40, %v1289_v32  ;;  %v291_v61 = vld [vmem:[%s14209_s3 + $0x1c8] sm:$0xff] }
 0x25a   :  { %1782 = vperm.xlu1 %8129, %v290_v35   ;;  %v2485_v57 = vmul.f32 %v8527_v41, %v1289_v32  ;;  %v3455_v10 = vmul.f32 %v1289_v32, %v8507_v30  ;;  %v2875_v59 = vmul.f32 %v1289_v32, %v8521_v38  ;;  %v1009_v63 = vmul.f32 %v8507_v30, %v880_v39  ;;  %v109_v32 = vld [vmem:[%s14206_s0 + $0x1e8] sm:$0xff] }
 0x25b   :  { %v1977_v4 = vmul.f32 %v880_v39, %v8521_v38  ;;  %v3216_v7 = vmul.f32 %v8527_v41, %v880_v39  ;;  %v1490_v34 = vadd.f32 %v1430_v14, %v1066_v17  ;;  %v2180_v5 = vsel %vm2114_vm0, %v2178_v36, %v2179_v45  ;;  %v171_v36 = vld [vmem:[%s14207_s1 + $0x1d8] sm:$0xff] }
 0x25c   :  { %v2625_v12 = vrot.slane %v2485_v57, 1  ;;  %v3595_v22 = vrot.slane %v3455_v10, 1  ;;  %v2995_v6 = vadd.f32 %v2935_v29, %v2875_v59  ;;  %v1718_v35 = vpop.permute.xlu0 %1717  ;;  %v12149_v23 = vadd.f32 %v1009_v63, %v645_v46 }
 0x25d   :  { %1358 = vperm.xlu0 %8128, %v230_v58   ;;  %v3786_v58 = vmul.f32 %v8525_v40, %v880_v39  ;;  %v12151_v31 = vadd.f32 %v2179_v45, %v1977_v4  ;;  %v875_v44 = vpop.permute.xlu1 %874  ;;  %v14670_v14 = vrot.slane %v12074_v51, 1  ;;  %v1855_v57 = vmul.f32 %v8527_v41, %v1718_v35 }
 0x25e   :  { %944 = vperm.xlu1 %8129, %v170_v25   ;;  %v14669_v25 = vrot.slane %v12071_v33, 1  ;;  %v14671_v29 = vrot.slane %v12060_v16, 1  ;;  %v1914_v10 = vadd.f32 %v1854_v42, %v1490_v34  ;;  %v2366_v63 = vmul.f32 %v1718_v35, %v8525_v40 }
 0x25f   :  { %v3597_v39 = vsel %vm2114_vm0, %v3595_v22, %v14670_v14  ;;  %v2936_v45 = vmul.f32 %v1718_v35, %v8507_v30  ;;  %v3396_v22 = vmul.f32 %v1718_v35, %v8521_v38  ;;  %v1915_v42 = vadd.f32 %v1855_v57, %v12097_v49 }
 0x260   :  { %v2627_v17 = vsel %vm2114_vm0, %v2625_v12, %v14669_v25  ;;  %v4047_v46 = vsel %vm2114_vm0, %v4045_v26, %v14671_v29  ;;  %v3725_v4 = vadd.f32 %v3597_v39, %v3395_v62  ;;  %v1976_v12 = vmul.f32 %v875_v44, %v8521_v38  ;;  %v4828_v34 = vpop.permute.xlu0 %4827 }
 0x261   :  { %1787 = vperm.xlu0 %8128, %v291_v61   ;;  %v2755_v59 = vadd.f32 %v2627_v17, %v2425_v50  ;;  %v1008_v61 = vmul.f32 %v8507_v30, %v875_v44  ;;  %v2426_v26 = vadd.f32 %v2366_v63, %v12054_v21  ;;  %v2996_v50 = vadd.f32 %v2936_v45, %v12092_v47  ;;  %v526_v17 = vpop.permute.xlu1 %525 }
 0x262   :  { %595 = vperm.xlu1 %8129, %v109_v32   ;;  %v233_v32 = vld [vmem:[%s14208_s2 + $0x1d8] sm:$0xff]  ;;  %v14672_v62 = vmov %v14670_v14  ;;  %v14673_v14 = vmax.f32 %v11083_v11, 0.0  ;;  %v3135_v21 = vadd.f32 %v12112_v60, %v2995_v6  ;;  %v14674_v47 = vrot.slane %v12071_v33, 1  ;;  %v108_v11 = vld [vmem:[%s14206_s0 + $0x1e0] sm:$0xff] }
 0x263   :  { %v2815_v25 = vmax.f32 %v1914_v10, %v2755_v59  ;;  %v3726_v35 = vadd.f32 %v14672_v62, %v3396_v22  ;;  %v12184_v49 = vadd.f32 %v1008_v61, %v12109_v13  ;;  %v3136_v29 = vadd.f32 %v12088_v0, %v2996_v50 }
 0x264   :  { %v4839_v39 = vsel %vm4758_vm1, %v14673_v14, %v4828_v34  ;;  %v2756_v57 = vadd.f32 %v14674_v47, %v2426_v26  ;;  %v3215_v51 = vmul.f32 %v8527_v41, %v875_v44  ;;  %v3785_v10 = vmul.f32 %v8525_v40, %v875_v44  ;;  %v292_v44 = vld [vmem:[%s14209_s3 + $0x1d0] sm:$0xff] }
 0x265   :  { %949 = vperm.xlu0 %8128, %v171_v36   ;;  %7592 = vmatprep.mubr.msk.f32.mxu0 %vm4843_vm2, %v4839_v39  ;;  %v3846_v59 = vadd.f32 %v3786_v58, %v3726_v35  ;;  %v2307_v13 = vadd.f32 %v2180_v5, %v1976_v12  ;;  %v12197_v63 = vmul.f32 %v8521_v38, %v526_v17  ;;  %v4830_v36 = vpop.permute.xlu0 %4829  ;;  %v14675_v22 = vrot.slane %v12060_v16, 1  ;;  %v232_v16 = vld [vmem:[%s14208_s2 + $0x1d0] sm:$0xff] }
 0x266   :  { %v12200_v6 = vmul.f32 %v8507_v30, %v526_v17  ;;  %1373 = vperm.xlu1 %8129, %v233_v32   ;;  %v2816_v33 = vmax.f32 %v1915_v42, %v2756_v57  ;;  %v3276_v0 = vadd.f32 %v3216_v7, %v3136_v29  ;;  %v3275_v60 = vadd.f32 %v3215_v51, %v3135_v21  ;;  %v1304_v7 = vpop.permute.xlu1 %1303 }
 0x267   :  { %v3845_v45 = vadd.f32 %v3785_v10, %v3725_v4  ;;  %v4176_v58 = vadd.f32 %v14675_v22, %v3846_v59  ;;  %v4840_v5 = vsel %vm4758_vm1, %v11139_v8, %v4830_v36  ;;  %v12210_v61 = vmul.f32 %v8525_v40, %v526_v17 }
 0x268   :  { %v12213_v12 = vmul.f32 %v8527_v41, %v526_v17  ;;  %v3336_v4 = vmax.f32 %v2816_v33, %v3276_v0  ;;  %v12215_v42 = vmax.f32 %v2815_v25, %v3275_v60  ;;  %7593 = vmatmul.mubr.msk.f32.gmra.mrb[26].mxu0 %vm4843_vm2, %v4840_v5  ;;  %v2182_v26 = vrot.slane %v12200_v6, 1  ;;  %v293_v33 = vld [vmem:[%s14209_s3 + $0x1d8] sm:$0xff]  ;;  %v235_v5 = vld [vmem:[%s14208_s2 + $0x1e8] sm:$0xff] }
 0x269   :  { %590 = vperm.xlu0 %8128, %v108_v11   ;;  %v1433_v8 = vmul.f32 %v8525_v40, %v1304_v7  ;;  %v12223_v50 = vadd.f32 %v4047_v46, %v3845_v45  ;;  %v12227_v17 = vmul.f32 %v8527_v41, %v1304_v7  ;;  %v12230_v25 = vmul.f32 %v1304_v7, %v8507_v30  ;;  %v521_v32 = vpop.permute.xlu0 %520  ;;  %v172_v46 = vld [vmem:[%s14207_s1 + $0x1e0] sm:$0xff] }
 0x26a   :  { %1792 = vperm.xlu1 %8129, %v292_v44   ;;  %v12234_v35 = vmul.f32 %v1304_v7, %v8521_v38  ;;  %v14676_v14 = vrot.slane %v12128_v27, 1  ;;  %v4236_v21 = vmax.f32 %v3336_v4, %v4176_v58  ;;  %v12246_v47 = vmul.f32 %v8521_v38, %v521_v32  ;;  %v1723_v29 = vpop.permute.xlu1 %1722  ;;  %v12272_v7 = vld [vmem:[%s14211_s5] ss:$0 sm:$0xff] }
 0x26b   :  { %v1493_v62 = vadd.f32 %v1433_v8, %v12149_v23  ;;  %v2038_v57 = vmul.f32 %v8507_v30, %v521_v32  ;;  %v3907_v23 = vmul.f32 %v8527_v41, %v521_v32  ;;  %v3077_v11 = vmul.f32 %v8525_v40, %v521_v32 }
 0x26c   :  { %v12243_v39 = vsel %vm2114_vm0, %v14676_v14, %v9868_v20  ;;  %v14677_v51 = vmov %v14676_v14  ;;  %v3599_v6 = vrot.slane %v12230_v25, 1  ;;  %v2367_v0 = vmul.f32 %v1723_v29, %v8525_v40  ;;  %v173_v14 = vld [vmem:[%s14207_s1 + $0x1e8] sm:$0xff] }
 0x26d   :  { %1368 = vperm.xlu0 %8128, %v232_v16   ;;  %v12254_v10 = vsel %vm2114_vm0, %v12132_v55, %v14677_v51  ;;  %v2181_v60 = vrot.slane %v2038_v57, 1  ;;  %v4048_v45 = vrot.slane %v3907_v23, 1  ;;  %v1856_v36 = vmul.f32 %v8527_v41, %v1723_v29  ;;  %v1299_v55 = vpop.permute.xlu0 %1298 }
 0x26e   :  { %v2937_v44 = vmul.f32 %v1723_v29, %v8507_v30  ;;  %954 = vperm.xlu1 %8129, %v172_v46   ;;  %v2427_v22 = vadd.f32 %v2367_v0, %v2307_v13  ;;  %v3397_v58 = vmul.f32 %v1723_v29, %v8521_v38  ;;  %v12275_v4 = vadd.f32 %v12272_v7, %v4236_v21  ;;  %v890_v46 = vpop.permute.xlu1 %889 }
 0x26f   :  { %v1432_v8 = vmul.f32 %v8525_v40, %v1299_v55  ;;  %v2487_v13 = vmul.f32 %v8527_v41, %v1299_v55  ;;  %v2877_v25 = vmul.f32 %v1299_v55, %v8521_v38  ;;  %v3457_v32 = vmul.f32 %v1299_v55, %v8507_v30 }
 0x270   :  { %v1011_v21 = vmul.f32 %v8507_v30, %v890_v46  ;;  %v1979_v57 = vmul.f32 %v890_v46, %v8521_v38  ;;  %v3218_v23 = vmul.f32 %v8527_v41, %v890_v46  ;;  %v3788_v29 = vmul.f32 %v8525_v40, %v890_v46 }
 0x271   :  { %1797 = vperm.xlu0 %8128, %v293_v33   ;;  %v1492_v51 = vadd.f32 %v1432_v8, %v12184_v49  ;;  %v2628_v0 = vrot.slane %v2487_v13, 1  ;;  %v3598_v16 = vrot.slane %v3457_v32, 1  ;;  %v2997_v59 = vadd.f32 %v2937_v44, %v2877_v25  ;;  %v1728_v33 = vpop.permute.xlu0 %1727  ;;  %v294_v49 = vld [vmem:[%s14209_s3 + $0x1e0] sm:$0xff] }
 0x272   :  { %1383 = vperm.xlu1 %8129, %v235_v5   ;;  %v12292_v55 = vadd.f32 %v1011_v21, %v12197_v63  ;;  %v12294_v34 = vadd.f32 %v2182_v26, %v1979_v57  ;;  %v2183_v27 = vsel %vm2114_vm0, %v2181_v60, %v2182_v26  ;;  %v14678_v24 = vrot.slane %v12213_v12, 1  ;;  %v885_v25 = vpop.permute.xlu1 %884 }
 0x273   :  { %v1916_v8 = vadd.f32 %v1856_v36, %v1492_v51  ;;  %v14679_v44 = vrot.slane %v12227_v17, 1  ;;  %v3600_v63 = vsel %vm2114_vm0, %v3598_v16, %v3599_v6  ;;  %v1857_v13 = vmul.f32 %v8527_v41, %v1728_v33 }
 0x274   :  { %v4050_v52 = vsel %vm2114_vm0, %v4048_v45, %v14678_v24  ;;  %v3727_v60 = vadd.f32 %v3600_v63, %v3397_v58  ;;  %v2368_v32 = vmul.f32 %v1728_v33, %v8525_v40  ;;  %v2938_v24 = vmul.f32 %v1728_v33, %v8507_v30  ;;  %v234_v45 = vld [vmem:[%s14208_s2 + $0x1e0] sm:$0xff] }
 0x275   :  { %v2630_v5 = vsel %vm2114_vm0, %v2628_v0, %v14679_v44  ;;  %959 = vperm.xlu0 %8128, %v173_v14   ;;  %v1917_v36 = vadd.f32 %v1857_v13, %v1493_v62  ;;  %v3398_v46 = vmul.f32 %v1728_v33, %v8521_v38  ;;  %v1010_v21 = vmul.f32 %v8507_v30, %v885_v25  ;;  %v4651_v57 = vpop.permute.xlu0 %4650  ;;  %v110_v0 = vld [vmem:[%s14206_s0 + $0x1f0] sm:$0xff] }
 0x276   :  { %v2757_v26 = vadd.f32 %v2630_v5, %v2427_v22  ;;  %v1978_v16 = vmul.f32 %v885_v25, %v8521_v38  ;;  %1802 = vperm.xlu1 %8129, %v294_v49   ;;  %v2428_v22 = vadd.f32 %v2368_v32, %v12151_v31  ;;  %v2998_v58 = vadd.f32 %v2938_v24, %v12234_v35  ;;  %v536_v31 = vpop.permute.xlu1 %535  ;;  %v174_v24 = vld [vmem:[%s14207_s1 + $0x1f0] sm:$0xff] }
 0x277   :  { %v3137_v51 = vadd.f32 %v3077_v11, %v2997_v59  ;;  %v3728_v44 = vadd.f32 %v3599_v6, %v3398_v46  ;;  %v14680_v62 = vmax.f32 %v11313_v54, 0.0  ;;  %v12327_v49 = vadd.f32 %v1010_v21, %v12246_v47  ;;  %v295_v6 = vld [vmem:[%s14209_s3 + $0x1e8] sm:$0xff] }
 0x278   :  { %v2817_v14 = vmax.f32 %v1916_v8, %v2757_v26  ;;  %v2309_v8 = vadd.f32 %v2183_v27, %v1978_v16  ;;  %v14681_v35 = vrot.slane %v12227_v17, 1  ;;  %v3138_v11 = vadd.f32 %v12210_v61, %v2998_v58 }
 0x279   :  { %v12324_v33 = vsel %vm4758_vm1, %v14680_v62, %v4651_v57  ;;  %1378 = vperm.xlu0 %8128, %v234_v45   ;;  %v3217_v59 = vmul.f32 %v8527_v41, %v885_v25  ;;  %v3787_v54 = vmul.f32 %v8525_v40, %v885_v25  ;;  %v3848_v47 = vadd.f32 %v3788_v29, %v3728_v44  ;;  %v4653_v25 = vpop.permute.xlu0 %4652 }
 0x27a   :  { %v2758_v5 = vadd.f32 %v14681_v35, %v2428_v22  ;;  %7595 = vmatprep.mubr.msk.f32.mxu0 %vm4843_vm2, %v12324_v33  ;;  %v12340_v27 = vmul.f32 %v8521_v38, %v536_v31  ;;  %v12343_v17 = vmul.f32 %v8507_v30, %v536_v31  ;;  %v12346_v61 = vmul.f32 %v8525_v40, %v536_v31 }
 0x27b   :  { %3027 = vperm.xlu1 %8129, %v110_v0   ;;  %v3278_v13 = vadd.f32 %v3218_v23, %v3138_v11  ;;  %v3277_v26 = vadd.f32 %v3217_v59, %v3137_v51  ;;  %v3847_v32 = vadd.f32 %v3787_v54, %v3727_v60  ;;  %v14682_v29 = vrot.slane %v12213_v12, 1  ;;  %v1314_v23 = vpop.permute.xlu1 %1313 }
 0x27c   :  { %v2818_v63 = vmax.f32 %v1917_v36, %v2758_v5  ;;  %v12355_v46 = vsel %vm4758_vm1, %v11349_v56, %v4653_v25  ;;  %v2185_v21 = vrot.slane %v12343_v17, 1  ;;  %v12359_v36 = vmul.f32 %v8527_v41, %v536_v31  ;;  %v111_v56 = vld [vmem:[%s14206_s0 + $0x1f8] sm:$0xff] }
 0x27d   :  { %v4178_v45 = vadd.f32 %v14682_v29, %v3848_v47  ;;  %1807 = vperm.xlu0 %8128, %v295_v6   ;;  %v12361_v16 = vmax.f32 %v2817_v14, %v3277_v26  ;;  %v12363_v22 = vadd.f32 %v4050_v52, %v3847_v32  ;;  %7596 = vmatmul.mubr.msk.f32.gmra.mrb[28].mxu0 %vm4843_vm2, %v12355_v46  ;;  %v4362_v44 = vmax.f32 %v12275_v4, 0.0 }
 0x27e   :  { %v3338_v60 = vmax.f32 %v2818_v63, %v3278_v13  ;;  %v1435_v12 = vmul.f32 %v8525_v40, %v1314_v23  ;;  %v4052_v58 = vrot.slane %v12359_v36, 1  ;;  %v12373_v57 = vmul.f32 %v8527_v41, %v1314_v23 }
 0x27f   :  { %v12376_v51 = vmul.f32 %v1314_v23, %v8521_v38  ;;  %v12379_v52 = vmul.f32 %v1314_v23, %v8507_v30  ;;  %3167 = vperm.xlu1 %8129, %v174_v24   ;;  %v14683_v62 = vmax.f32 %v12215_v42, %v12223_v50  ;;  %v175_v50 = vld [vmem:[%s14207_s1 + $0x1f8] sm:$0xff]  ;;  %v12410_v29 = vsel %vm2114_vm0, %v4362_v44, 0.0 }
 0x280   :  { %v531_v14 = vpop.permute.xlu0 %530  ;;  %v1495_v0 = vadd.f32 %v1435_v12, %v12292_v55  ;;  %v4238_v35 = vmax.f32 %v3338_v60, %v4178_v45  ;;  %v1733_v55 = vpop.permute.xlu1 %1732  ;;  %v2632_v4 = vrot.slane %v12373_v57, 1  ;;  %v4555_v63 = vrot.slane %v12410_v29, 1 }
 0x281   :  { %v12387_v31 = vadd.f32 %v12272_v7, %v14683_v62  ;;  %v12390_v5 = vmul.f32 %v8521_v38, %v531_v14  ;;  %v12393_v11 = vmul.f32 %v8507_v30, %v531_v14  ;;  %v3079_v59 = vmul.f32 %v8525_v40, %v531_v14  ;;  %3032 = vperm.xlu0 %8128, %v111_v56  }
 0x282   :  { %v3909_v54 = vmul.f32 %v8527_v41, %v531_v14  ;;  %v3602_v42 = vrot.slane %v12379_v52, 1  ;;  %v1858_v6 = vmul.f32 %v8527_v41, %v1733_v55  ;;  %v2369_v47 = vmul.f32 %v1733_v55, %v8525_v40 }
 0x283   :  { %v2939_v26 = vmul.f32 %v1733_v55, %v8507_v30  ;;  %v3399_v32 = vmul.f32 %v1733_v55, %v8521_v38  ;;  %4648 = vrot.lane.b32.xlu1 %v11915_v19, %s8171_s24  ;;  %v14341_v45 = vmax.f32 %v12387_v31, 0.0  ;;  %v12414_v23 = vadd.f32 %v12272_v7, %v4238_v35 }
 0x284   :  { %v4051_v13 = vrot.slane %v3909_v54, 1  ;;  %v1309_v25 = vpop.permute.xlu0 %1308  ;;  %v2429_v24 = vadd.f32 %v2369_v47, %v2309_v8  ;;  %v900_v19 = vpop.permute.xlu1 %899 }
 0x285   :  { %v1434_v60 = vmul.f32 %v8525_v40, %v1309_v25  ;;  %v2489_v56 = vmul.f32 %v8527_v41, %v1309_v25  ;;  %v2879_v12 = vmul.f32 %v1309_v25, %v8521_v38  ;;  %v3459_v57 = vmul.f32 %v1309_v25, %v8507_v30  ;;  %3172 = vperm.xlu0 %8128, %v175_v50  }
 0x286   :  { %v1013_v8 = vmul.f32 %v8507_v30, %v900_v19  ;;  %v12422_v52 = vmul.f32 %v900_v19, %v8521_v38  ;;  %v3220_v14 = vmul.f32 %v8527_v41, %v900_v19  ;;  %v3790_v44 = vmul.f32 %v8525_v40, %v900_v19 }
 0x287   :  { %v1494_v62 = vadd.f32 %v1434_v60, %v12327_v49  ;;  %v2631_v35 = vrot.slane %v2489_v56, 1  ;;  %v3601_v54 = vrot.slane %v3459_v57, 1  ;;  %v2999_v55 = vadd.f32 %v2939_v26, %v2879_v12  ;;  %4660 = vrot.lane.b32.xlu1 %v12106_v28, %s8171_s24 }
 0x288   :  { %v1738_v47 = vpop.permute.xlu0 %1737  ;;  %v12430_v50 = vadd.f32 %v1013_v8, %v12340_v27  ;;  %v4053_v25 = vsel %vm2114_vm0, %v4051_v13, %v4052_v58  ;;  %v4554_v19 = vrot.slane %v14341_v45, 1  ;;  %v895_v27 = vpop.permute.xlu1 %894 }
 0x289   :  { %v1918_v49 = vadd.f32 %v1858_v6, %v1494_v62  ;;  %v2633_v60 = vsel %vm2114_vm0, %v2631_v35, %v2632_v4  ;;  %v3603_v26 = vsel %vm2114_vm0, %v3601_v54, %v3602_v42  ;;  %v1859_v28 = vmul.f32 %v8527_v41, %v1738_v47  ;;  %4646 = vrot.lane.b32.xlu0 %v11931_v48, %s8171_s24 }
 0x28a   :  { %v2759_v56 = vadd.f32 %v2633_v60, %v2429_v24  ;;  %v3729_v12 = vadd.f32 %v3603_v26, %v3399_v32  ;;  %v2370_v13 = vmul.f32 %v1738_v47, %v8525_v40  ;;  %v2940_v57 = vmul.f32 %v1738_v47, %v8507_v30 }
 0x28b   :  { %v1919_v8 = vadd.f32 %v1859_v28, %v1495_v0  ;;  %v3400_v45 = vmul.f32 %v1738_v47, %v8521_v38  ;;  %v1012_v6 = vmul.f32 %v8507_v30, %v895_v27  ;;  %v12448_v62 = vmul.f32 %v895_v27, %v8521_v38  ;;  %4664 = vrot.lane.b32.xlu1 %v12243_v39, %s8171_s24 }
 0x28c   :  { %v2819_v35 = vmax.f32 %v1918_v49, %v2759_v56  ;;  %v2430_v48 = vadd.f32 %v2370_v13, %v12294_v34  ;;  %v3000_v32 = vadd.f32 %v2940_v57, %v12376_v51  ;;  %v4655_v24 = vpop.permute.xlu0 %4654  ;;  %v3139_v54 = vadd.f32 %v3079_v59, %v2999_v55  ;;  %v546_v49 = vpop.permute.xlu1 %545 }
 0x28d   :  { %v3730_v60 = vadd.f32 %v3602_v42, %v3400_v45  ;;  %v14684_v0 = vmax.f32 %v11470_v43, 0.0  ;;  %4658 = vrot.lane.b32.xlu0 %v12119_v53, %s8171_s24  ;;  %v12462_v26 = vadd.f32 %v1012_v6, %v12390_v5  ;;  %v3219_v39 = vmul.f32 %v8527_v41, %v895_v27 }
 0x28e   :  { %v2760_v34 = vadd.f32 %v2632_v4, %v2430_v48  ;;  %v3140_v51 = vadd.f32 %v12346_v61, %v3000_v32  ;;  %v3789_v43 = vmul.f32 %v8525_v40, %v895_v27  ;;  %v12470_v59 = vmul.f32 %v8521_v38, %v546_v49 }
 0x28f   :  { %v12457_v47 = vsel %vm4758_vm1, %v14684_v0, %v4655_v24  ;;  %v3850_v42 = vadd.f32 %v3790_v44, %v3730_v60  ;;  %v3279_v45 = vadd.f32 %v3219_v39, %v3139_v54  ;;  %v12473_v53 = vmul.f32 %v8507_v30, %v546_v49 }
 0x290   :  { %7598 = vmatprep.mubr.msk.f32.mxu0 %vm4843_vm2, %v12457_v47  ;;  %v12476_v5 = vmul.f32 %v8525_v40, %v546_v49  ;;  %v2820_v55 = vmax.f32 %v1919_v8, %v2760_v34  ;;  %v3280_v4 = vadd.f32 %v3220_v14, %v3140_v51  ;;  %v3849_v28 = vadd.f32 %v3789_v43, %v3729_v12  ;;  %v4657_v61 = vpop.permute.xlu0 %4656  ;;  %v1324_v12 = vpop.permute.xlu1 %1323 }
 0x291   :  { %v12479_v56 = vmul.f32 %v8527_v41, %v546_v49  ;;  %v12483_v27 = vadd.f32 %v4052_v58, %v3850_v42  ;;  %v12485_v13 = vmax.f32 %v2819_v35, %v3279_v45  ;;  %v12489_v44 = vsel %vm4758_vm1, %v11527_v3, %v4657_v61  ;;  %4662 = vrot.lane.b32.xlu0 %v12254_v10, %s8171_s24 }
 0x292   :  { %v12494_v57 = vmax.f32 %v2820_v55, %v3280_v4  ;;  %v12496_v8 = vadd.f32 %v4053_v25, %v3849_v28  ;;  %7599 = vmatmul.mubr.msk.f32.gmra.mrb[30].mxu0 %vm4843_vm2, %v12489_v44  ;;  %v4557_v58 = vsel %vm2114_vm0, %v4555_v63, %v9868_v20  ;;  %v4556_v3 = vsel %vm2114_vm0, %v4554_v19, %v4555_v63 }
 0x293   :  { %4668 = vrot.lane.b32.xlu1 %v4557_v58, %s8171_s24  ;;  %v1437_v10 = vmul.f32 %v8525_v40, %v1324_v12  ;;  %v12507_v6 = vmul.f32 %v8527_v41, %v1324_v12  ;;  %v2882_v25 = vmul.f32 %v1324_v12, %v8521_v38  ;;  %v3462_v48 = vmul.f32 %v1324_v12, %v8507_v30 }
 0x294   :  { %v541_v35 = vpop.permute.xlu0 %540  ;;  %v4364_v32 = vmax.f32 %v12414_v23, 0.0  ;;  %v4237_v24 = vmax.f32 %v12361_v16, %v12363_v22  ;;  %v14685_v54 = vrot.slane %v12393_v11, 1  ;;  %v1743_v16 = vpop.permute.xlu1 %1742  ;;  %v2312_v14 = vadd.f32 %v2185_v21, %v12422_v52 }
 0x295   :  { %v12520_v19 = vmul.f32 %v8521_v38, %v541_v35  ;;  %v12523_v60 = vmul.f32 %v8507_v30, %v541_v35  ;;  %v12526_v0 = vmul.f32 %v8525_v40, %v541_v35  ;;  %v12529_v23 = vmul.f32 %v8527_v41, %v541_v35  ;;  %4666 = vrot.lane.b32.xlu0 %v4556_v3, %s8171_s24 }
 0x296   :  { %v2186_v63 = vsel %vm2114_vm0, %v14685_v54, %v2185_v21  ;;  %v2635_v22 = vrot.slane %v12507_v6, 1  ;;  %v3605_v11 = vrot.slane %v3462_v48, 1  ;;  %v12534_v39 = vsel %vm2114_vm0, %v4364_v32, 0.0 }
 0x297   :  { %14686 = vst [vmem:[#allocation6_spill] sm:$0xff] %v12534_v39  ;;  %v12537_v49 = vadd.f32 %v12272_v7, %v4237_v24  ;;  %v4559_v43 = vrot.slane %v12534_v39, 1  ;;  %v1860_v42 = vmul.f32 %v8527_v41, %v1743_v16  ;;  %v2311_v4 = vadd.f32 %v2186_v63, %v12448_v62 }
 0x298   :  { %v1319_v45 = vpop.permute.xlu0 %1318  ;;  %v2371_v28 = vmul.f32 %v1743_v16, %v8525_v40  ;;  %v2941_v61 = vmul.f32 %v1743_v16, %v8507_v30  ;;  %v910_v35 = vpop.permute.xlu1 %909  ;;  %v3401_v24 = vmul.f32 %v1743_v16, %v8521_v38 }
 0x299   :  { %v14345_v55 = vmax.f32 %v12537_v49, 0.0  ;;  %v1436_v12 = vmul.f32 %v8525_v40, %v1319_v45  ;;  %v2491_v58 = vmul.f32 %v8527_v41, %v1319_v45  ;;  %v2881_v3 = vmul.f32 %v1319_v45, %v8521_v38 }
 0x29a   :  { %v3461_v6 = vmul.f32 %v1319_v45, %v8507_v30  ;;  %v4561_v48 = vsel %vm2114_vm0, %v4559_v43, %v9868_v20  ;;  %v2431_v62 = vadd.f32 %v2371_v28, %v2311_v4  ;;  %v1497_v45 = vadd.f32 %v1437_v10, %v12430_v50 }
 0x29b   :  { %v4558_v32 = vrot.slane %v14345_v55, 1  ;;  %v2634_v54 = vrot.slane %v2491_v58, 1  ;;  %4672 = vrot.lane.b32.xlu1 %v4561_v48, %s8171_s24  ;;  %v1496_v51 = vadd.f32 %v1436_v12, %v12462_v26  ;;  %v3001_v36 = vadd.f32 %v2941_v61, %v2881_v3 }
 0x29c   :  { %v3604_v63 = vrot.slane %v3461_v6, 1  ;;  %v1748_v39 = vpop.permute.xlu0 %1747  ;;  %v4240_v4 = vmax.f32 %v12494_v57, %v12483_v27  ;;  %v1983_v58 = vmul.f32 %v910_v35, %v8521_v38 }
 0x29d   :  { %v4560_v34 = vsel %vm2114_vm0, %v4558_v32, %v4559_v43  ;;  %v12566_v16 = vadd.f32 %v1860_v42, %v1496_v51  ;;  %v2636_v28 = vsel %vm2114_vm0, %v2634_v54, %v2635_v22  ;;  %v1861_v43 = vmul.f32 %v8527_v41, %v1748_v39  ;;  %v905_v61 = vpop.permute.xlu1 %904 }
 0x29e   :  { %4670 = vrot.lane.b32.xlu0 %v4560_v34, %s8171_s24  ;;  %v3606_v26 = vsel %vm2114_vm0, %v3604_v63, %v3605_v11  ;;  %v12571_v50 = vadd.f32 %v2636_v28, %v2431_v62  ;;  %v2372_v17 = vmul.f32 %v1748_v39, %v8525_v40  ;;  %v2942_v21 = vmul.f32 %v1748_v39, %v8507_v30 }
 0x29f   :  { %v3731_v10 = vadd.f32 %v3606_v26, %v3401_v24  ;;  %v1921_v52 = vadd.f32 %v1861_v43, %v1497_v45  ;;  %v3402_v27 = vmul.f32 %v1748_v39, %v8521_v38  ;;  %v4306_v57 = vadd.f32 %v12272_v7, %v4240_v4 }
 0x2a0   :  { %v1015_v34 = vmul.f32 %v8507_v30, %v910_v35  ;;  %v2821_v51 = vmax.f32 %v12566_v16, %v12571_v50  ;;  %v2432_v42 = vadd.f32 %v2372_v17, %v2312_v14  ;;  %v3002_v12 = vadd.f32 %v2942_v21, %v2882_v25  ;;  %v4591_v3 = vpop.permute.xlu0 %4590 }
 0x2a1   :  { %v3732_v6 = vadd.f32 %v3605_v11, %v3402_v27  ;;  %v4366_v48 = vmax.f32 %v4306_v57, 0.0  ;;  %v3222_v62 = vmul.f32 %v8527_v41, %v910_v35  ;;  %v556_v39 = vpop.permute.xlu1 %555  ;;  %v14687_v54 = vrot.slane %v12473_v53, 1 }
 0x2a2   :  { %v12582_v32 = vadd.f32 %v1015_v34, %v12470_v59  ;;  %v2762_v24 = vadd.f32 %v2635_v22, %v2432_v42  ;;  %v3142_v45 = vadd.f32 %v12476_v5, %v3002_v12  ;;  %v3792_v14 = vmul.f32 %v8525_v40, %v910_v35 }
 0x2a3   :  { %v12587_v63 = vadd.f32 %v14687_v54, %v1983_v58  ;;  %v12592_v25 = vsel %vm2114_vm0, %v4366_v48, 0.0  ;;  %v4239_v11 = vmax.f32 %v12485_v13, %v12496_v8  ;;  %v14688_v59 = vmax.f32 %v11611_v18, 0.0 }
 0x2a4   :  { %v1014_v22 = vmul.f32 %v8507_v30, %v905_v61  ;;  %v2822_v16 = vmax.f32 %v1921_v52, %v2762_v24  ;;  %v4563_v28 = vrot.slane %v12592_v25, 1  ;;  %v3282_v26 = vadd.f32 %v3222_v62, %v3142_v45  ;;  %v4593_v5 = vpop.permute.xlu0 %4592  ;;  %v14694_v45 = vld [vmem:[#allocation41_spill] sm:$0xff] }
 0x2a5   :  { %v4759_v4 = vsel %vm4758_vm1, %v14688_v59, %v4591_v3  ;;  %v3852_v43 = vadd.f32 %v3792_v14, %v3732_v6  ;;  %v12603_v35 = vadd.f32 %v12272_v7, %v4239_v11  ;;  %v1982_v13 = vmul.f32 %v905_v61, %v8521_v38  ;;  %v1334_v21 = vpop.permute.xlu1 %1333 }
 0x2a6   :  { %7645 = vmatprep.mubr.msk.f32.mxu0 %vm4843_vm2, %v4759_v4  ;;  %v1074_v50 = vadd.f32 %v1014_v22, %v12520_v19  ;;  %v14689_v18 = vmov %v14687_v54  ;;  %v14690_v8 = vrot.slane %v12523_v60, 1  ;;  %v4565_v52 = vsel %vm2114_vm0, %v4563_v28, %v9868_v20 }
 0x2a7   :  { %v12614_v27 = vmax.f32 %v2822_v16, %v3282_v26  ;;  %v14691_v57 = vrot.slane %v12479_v56, 1  ;;  %v3141_v19 = vadd.f32 %v12526_v0, %v3001_v36  ;;  %4676 = vrot.lane.b32.xlu1 %v4565_v52, %s8171_s24  ;;  %v14343_v53 = vmax.f32 %v12603_v35, 0.0 }
 0x2a8   :  { %v2189_v17 = vsel %vm2114_vm0, %v14690_v8, %v14689_v18  ;;  %v3221_v60 = vmul.f32 %v8527_v41, %v905_v61  ;;  %v3791_v12 = vmul.f32 %v8525_v40, %v905_v61  ;;  %v14693_v6 = vrot.slane %v12529_v23, 1  ;;  %v551_v62 = vpop.permute.xlu0 %550 }
 0x2a9   :  { %v12618_v34 = vadd.f32 %v14691_v57, %v3852_v43  ;;  %v2313_v42 = vadd.f32 %v2189_v17, %v1982_v13  ;;  %v14692_v3 = vmov %v14691_v57  ;;  %v4760_v36 = vsel %vm4758_vm1, %v11691_v2, %v4593_v5  ;;  %v1753_v23 = vpop.permute.xlu1 %1752 }
 0x2aa   :  { %v4056_v48 = vsel %vm2114_vm0, %v14693_v6, %v14692_v3  ;;  %v12635_v0 = vmul.f32 %v8521_v38, %v556_v39  ;;  %v4562_v24 = vrot.slane %v14343_v53, 1  ;;  %v3281_v61 = vadd.f32 %v3221_v60, %v3141_v19  ;;  %7646 = vmatmul.mubr.msk.f32.vlgmr.msra.gmra.mrb[0].mxu0 %vm4843_vm2, %v4760_v36  ;;  %v14696_v19 = vld [vmem:[#allocation42_spill] sm:$0xff] }
 0x2ab   :  { %v4242_v58 = vmax.f32 %v12614_v27, %v12618_v34  ;;  %v3851_v54 = vadd.f32 %v3791_v12, %v3731_v10  ;;  %v12641_v56 = vmul.f32 %v8507_v30, %v556_v39  ;;  %7648 = vmatprep.mubr.msk.f32.mxu0 %vm4843_vm2, %v14694_v45  ;;  %v12646_v2 = vmul.f32 %v8525_v40, %v556_v39 }
 0x2ac   :  { %v12649_v14 = vmul.f32 %v8527_v41, %v556_v39  ;;  %v12652_v11 = vmul.f32 %v8521_v38, %v551_v62  ;;  %v12655_v10 = vmul.f32 %v8507_v30, %v551_v62  ;;  %v4564_v59 = vsel %vm2114_vm0, %v4562_v24, %v4563_v28  ;;  %v1329_v13 = vpop.permute.xlu0 %1328  ;;  %v14695_v28 = vld [vmem:[#allocation14_spill] sm:$0xff] }
 0x2ad   :  { %v12658_v4 = vmax.f32 %v2821_v51, %v3281_v61  ;;  %v12660_v22 = vadd.f32 %v4056_v48, %v3851_v54  ;;  %v2191_v16 = vrot.slane %v12641_v56, 1  ;;  %4674 = vrot.lane.b32.xlu0 %v4564_v59, %s8171_s24  ;;  %v3083_v43 = vmul.f32 %v8525_v40, %v551_v62  ;;  %v915_v52 = vpop.permute.xlu1 %914 }
 0x2ae   :  { %v4058_v26 = vrot.slane %v12649_v14, 1  ;;  %v2190_v39 = vrot.slane %v12655_v10, 1  ;;  %v12668_v5 = vmul.f32 %v8527_v41, %v551_v62  ;;  %7649 = vmatmul.mubr.msk.f32.gmra.mrb[2].mxu0 %vm4843_vm2, %v14695_v28  ;;  %v1439_v18 = vmul.f32 %v8525_v40, %v1334_v21 }
 0x2af   :  { %v4241_v51 = vmax.f32 %v12658_v4, %v12660_v22  ;;  %v2494_v8 = vmul.f32 %v8527_v41, %v1334_v21  ;;  %v2884_v17 = vmul.f32 %v1334_v21, %v8521_v38  ;;  %7651 = vmatprep.mubr.msk.f32.mxu0 %vm4843_vm2, %v14696_v19  ;;  %v3464_v60 = vmul.f32 %v1334_v21, %v8507_v30 }
 0x2b0   :  { %v4057_v57 = vrot.slane %v12668_v5, 1  ;;  %v1438_v12 = vmul.f32 %v8525_v40, %v1329_v13  ;;  %v2493_v3 = vmul.f32 %v8527_v41, %v1329_v13  ;;  %v1499_v6 = vadd.f32 %v1439_v18, %v12582_v32  ;;  %v1758_v10 = vpop.permute.xlu0 %1757 }
 0x2b1   :  { %v2638_v48 = vrot.slane %v2494_v8, 1  ;;  %v2883_v36 = vmul.f32 %v1329_v13, %v8521_v38  ;;  %v3463_v62 = vmul.f32 %v1329_v13, %v8507_v30  ;;  %v3608_v24 = vrot.slane %v3464_v60, 1  ;;  %v12692_v28 = vpop.permute.xlu1 %565 }
 0x2b2   :  { %v1498_v61 = vadd.f32 %v1438_v12, %v1074_v50  ;;  %v2637_v54 = vrot.slane %v2493_v3, 1  ;;  %v1862_v45 = vmul.f32 %v8527_v41, %v1753_v23  ;;  %7652 = vmatmul.mubr.msk.f32.gmra.mrb[4].mxu0 %vm4843_vm2, %v11342_v1  ;;  %v2373_v21 = vmul.f32 %v1753_v23, %v8525_v40 }
 0x2b3   :  { %v3607_v59 = vrot.slane %v3463_v62, 1  ;;  %v2943_v5 = vmul.f32 %v1753_v23, %v8507_v30  ;;  %v3403_v32 = vmul.f32 %v1753_v23, %v8521_v38  ;;  %7654 = vmatprep.mubr.msk.f32.mxu0 %vm4843_vm2, %v11357_v37  ;;  %v1863_v18 = vmul.f32 %v8527_v41, %v1758_v10 }
 0x2b4   :  { %v1922_v50 = vadd.f32 %v1862_v45, %v1498_v61  ;;  %v2639_v13 = vsel %vm2114_vm0, %v2637_v54, %v2638_v48  ;;  %v2374_v8 = vmul.f32 %v1758_v10, %v8525_v40  ;;  %v2433_v19 = vadd.f32 %v2373_v21, %v2313_v42  ;;  %v920_v37 = vpop.permute.xlu0 %919  ;;  %v14697_v42 = vld [vmem:[#allocation48_spill] sm:$0xff] }
 0x2b5   :  { %v3003_v1 = vadd.f32 %v2943_v5, %v2883_v36  ;;  %v3609_v60 = vsel %vm2114_vm0, %v3607_v59, %v3608_v24  ;;  %v2944_v12 = vmul.f32 %v1758_v10, %v8507_v30  ;;  %v1923_v23 = vadd.f32 %v1863_v18, %v1499_v6  ;;  %v12710_v59 = vpop.permute.xlu1 %1343 }
 0x2b6   :  { %v3733_v3 = vadd.f32 %v3609_v60, %v3403_v32  ;;  %v2434_v62 = vadd.f32 %v2374_v8, %v12587_v63  ;;  %v3404_v53 = vmul.f32 %v1758_v10, %v8521_v38  ;;  %v2763_v61 = vadd.f32 %v2639_v13, %v2433_v19  ;;  %7655 = vmatmul.mubr.msk.f32.gmra.mrb[6].mxu0 %vm4843_vm2, %v14697_v42  ;;  %v14698_v63 = vld [vmem:[#allocation24_spill] sm:$0xff] }
 0x2b7   :  { %v3004_v45 = vadd.f32 %v2944_v12, %v2884_v17  ;;  %v4308_v54 = vadd.f32 %v12272_v7, %v4242_v58  ;;  %v1016_v36 = vmul.f32 %v8507_v30, %v915_v52  ;;  %7657 = vmatprep.mubr.msk.f32.mxu0 %vm4843_vm2, %v14698_v63  ;;  %v1984_v10 = vmul.f32 %v915_v52, %v8521_v38 }
 0x2b8   :  { %v2764_v6 = vadd.f32 %v2638_v48, %v2434_v62  ;;  %v3734_v21 = vadd.f32 %v3608_v24, %v3404_v53  ;;  %v2192_v27 = vsel %vm2114_vm0, %v2190_v39, %v2191_v16  ;;  %v2823_v34 = vmax.f32 %v1922_v50, %v2763_v61  ;;  %v561_v24 = vpop.permute.xlu0 %560  ;;  %v14700_v50 = vld [vmem:[#allocation45_spill] sm:$0xff] }
 0x2b9   :  { %v4368_v58 = vmax.f32 %v4308_v54, 0.0  ;;  %v12719_v17 = vadd.f32 %v1016_v36, %v12652_v11  ;;  %v3143_v5 = vadd.f32 %v3083_v43, %v3003_v1  ;;  %v12721_v13 = vadd.f32 %v2192_v27, %v1984_v10  ;;  %v14702_v36 = vld [vmem:[#allocation50_spill] sm:$0xff] }
 0x2ba   :  { %v2824_v32 = vmax.f32 %v1923_v23, %v2764_v6  ;;  %v3223_v53 = vmul.f32 %v8527_v41, %v915_v52  ;;  %v3793_v48 = vmul.f32 %v8525_v40, %v915_v52  ;;  %v4059_v39 = vsel %vm2114_vm0, %v4057_v57, %v4058_v26  ;;  %7658 = vmatmul.mubr.msk.f32.gmra.mrb[8].mxu0 %vm4843_vm2, %v14700_v50  ;;  %v12740_v52 = vpop.permute.xlu1 %1762  ;;  %v14701_v57 = vld [vmem:[#allocation49_spill] sm:$0xff]  ;;  %v14704_v50 = vld [vmem:[#allocation28_spill] sm:$0xff] }
 0x2bb   :  { %v12726_v18 = vsel %vm2114_vm0, %v4368_v58, 0.0  ;;  %v12735_v11 = vadd.f32 %v12272_v7, %v4241_v51  ;;  %v3144_v43 = vadd.f32 %v12646_v2, %v3004_v45  ;;  %v1017_v60 = vmul.f32 %v8507_v30, %v920_v37  ;;  %7660 = vmatprep.mubr.msk.f32.mxu0 %vm4843_vm2, %v14701_v57 }
 0x2bc   :  { %14699 = vst [vmem:[#allocation35_spill] sm:$0xff] %v12726_v18  ;;  %v4567_v8 = vrot.slane %v12726_v18, 1  ;;  %v3283_v19 = vadd.f32 %v3223_v53, %v3143_v5  ;;  %v3853_v1 = vadd.f32 %v3793_v48, %v3733_v3  ;;  %v1985_v22 = vmul.f32 %v920_v37, %v8521_v38  ;;  %v1339_v61 = vpop.permute.xlu0 %1338 }
 0x2bd   :  { %v14344_v4 = vmax.f32 %v12735_v11, 0.0  ;;  %v3224_v2 = vmul.f32 %v8527_v41, %v920_v37  ;;  %v3794_v51 = vmul.f32 %v8525_v40, %v920_v37  ;;  %v1077_v3 = vadd.f32 %v1017_v60, %v12635_v0 }
 0x2be   :  { %v4569_v12 = vsel %vm2114_vm0, %v4567_v8, %v9868_v20  ;;  %v12752_v23 = vmax.f32 %v2823_v34, %v3283_v19  ;;  %v12754_v62 = vadd.f32 %v4059_v39, %v3853_v1  ;;  %v2316_v54 = vadd.f32 %v2191_v16, %v1985_v22  ;;  %7661 = vmatmul.mubr.msk.f32.gmra.mrb[10].mxu0 %vm4843_vm2, %v14702_v36  ;;  %v12764_v6 = vpop.permute.xlu1 %924  ;;  %v14703_v16 = vld [vmem:[#allocation51_spill] sm:$0xff]  ;;  %v14705_v22 = vld [vmem:[#allocation52_spill] sm:$0xff] }
 0x2bf   :  { %4680 = vrot.lane.b32.xlu1 %v4569_v12, %s8171_s24  ;;  %v4566_v45 = vrot.slane %v14344_v4, 1  ;;  %v3284_v42 = vadd.f32 %v3224_v2, %v3144_v43  ;;  %v3854_v37 = vadd.f32 %v3794_v51, %v3734_v21  ;;  %v12770_v0 = vmul.f32 %v8521_v38, %v12692_v28  ;;  %7663 = vmatprep.mubr.msk.f32.mxu0 %vm4843_vm2, %v14703_v16 }
 0x2c0   :  { %v12774_v10 = vmul.f32 %v8507_v30, %v12692_v28  ;;  %v12778_v56 = vmul.f32 %v8525_v40, %v12692_v28  ;;  %v12791_v58 = vmul.f32 %v8527_v41, %v12692_v28  ;;  %v654_v53 = vmul.f32 %v8521_v38, %v561_v24 }
 0x2c1   :  { %v4568_v21 = vsel %vm2114_vm0, %v4566_v45, %v4567_v8  ;;  %v12783_v27 = vmax.f32 %v2824_v32, %v3284_v42  ;;  %v12787_v34 = vadd.f32 %v4058_v26, %v3854_v37  ;;  %v2046_v48 = vmul.f32 %v8507_v30, %v561_v24  ;;  %v1768_v32 = vpop.permute.xlu0 %1767 }
 0x2c2   :  { %4678 = vrot.lane.b32.xlu0 %v4568_v21, %s8171_s24  ;;  %v3085_v39 = vmul.f32 %v8525_v40, %v561_v24  ;;  %v3915_v43 = vmul.f32 %v8527_v41, %v561_v24  ;;  %v1441_v28 = vmul.f32 %v8525_v40, %v12710_v59  ;;  %7664 = vmatmul.mubr.msk.f32.gmra.mrb[12].mxu0 %vm4843_vm2, %v14704_v50  ;;  %v12806_v8 = vpop.permute.xlu1 %575 }
 0x2c3   :  { %v2193_v19 = vrot.slane %v2046_v48, 1  ;;  %v2496_v1 = vmul.f32 %v8527_v41, %v12710_v59  ;;  %v2886_v60 = vmul.f32 %v12710_v59, %v8521_v38  ;;  %v3466_v57 = vmul.f32 %v12710_v59, %v8507_v30  ;;  %7666 = vmatprep.mubr.msk.f32.mxu0 %vm4843_vm2, %v14705_v22 }
 0x2c4   :  { %v4060_v24 = vrot.slane %v3915_v43, 1  ;;  %v1501_v2 = vadd.f32 %v1441_v28, %v1077_v3  ;;  %v1440_v51 = vmul.f32 %v8525_v40, %v1339_v61  ;;  %v2495_v12 = vmul.f32 %v8527_v41, %v1339_v61  ;;  %v14706_v43 = vld [vmem:[#allocation13_spill] sm:$0xff] }
 0x2c5   :  { %v2641_v45 = vrot.slane %v2496_v1, 1  ;;  %v3611_v42 = vrot.slane %v3466_v57, 1  ;;  %v2885_v37 = vmul.f32 %v1339_v61, %v8521_v38  ;;  %v3465_v36 = vmul.f32 %v1339_v61, %v8507_v30  ;;  %v930_v16 = vpop.permute.xlu0 %929  ;;  %v14707_v57 = vld [vmem:[#allocation12_spill] sm:$0xff] }
 0x2c6   :  { %v1500_v21 = vadd.f32 %v1440_v51, %v12719_v17  ;;  %v2640_v48 = vrot.slane %v2495_v12, 1  ;;  %v1864_v59 = vmul.f32 %v8527_v41, %v12740_v52  ;;  %v2375_v3 = vmul.f32 %v12740_v52, %v8525_v40  ;;  %7667 = vmatmul.mubr.msk.f32.gmra.mrb[14].mxu0 %vm4843_vm2, %v14706_v43  ;;  %v12827_v28 = vpop.permute.xlu1 %1353 }
 0x2c7   :  { %v3610_v50 = vrot.slane %v3465_v36, 1  ;;  %v2945_v1 = vmul.f32 %v12740_v52, %v8507_v30  ;;  %v3405_v61 = vmul.f32 %v12740_v52, %v8521_v38  ;;  %v1865_v17 = vmul.f32 %v8527_v41, %v1768_v32  ;;  %7669 = vmatprep.mubr.msk.f32.mxu0 %vm4843_vm2, %v14707_v57 }
 0x2c8   :  { %v1924_v22 = vadd.f32 %v1864_v59, %v1500_v21  ;;  %v2435_v51 = vadd.f32 %v2375_v3, %v12721_v13  ;;  %v2642_v12 = vsel %vm2114_vm0, %v2640_v48, %v2641_v45  ;;  %v2376_v43 = vmul.f32 %v1768_v32, %v8525_v40  ;;  %v14708_v21 = vld [vmem:[#allocation18_spill] sm:$0xff] }
 0x2c9   :  { %v3005_v4 = vadd.f32 %v2945_v1, %v2885_v37  ;;  %v3612_v36 = vsel %vm2114_vm0, %v3610_v50, %v3611_v42  ;;  %v1925_v55 = vadd.f32 %v1865_v17, %v1501_v2  ;;  %v2946_v63 = vmul.f32 %v1768_v32, %v8507_v30  ;;  %v12841_v14 = vpop.permute.xlu0 %570  ;;  %v14710_v50 = vld [vmem:[#allocation39_spill] sm:$0xff] }
 0x2ca   :  { %v2765_v52 = vadd.f32 %v2642_v12, %v2435_v51  ;;  %v3735_v26 = vadd.f32 %v3612_v36, %v3405_v61  ;;  %v2436_v5 = vadd.f32 %v2376_v43, %v2316_v54  ;;  %v3406_v57 = vmul.f32 %v1768_v32, %v8521_v38  ;;  %7670 = vmatmul.mubr.msk.f32.gmra.mrb[16].mxu0 %vm4843_vm2, %v14708_v21  ;;  %v12846_v13 = vpop.permute.xlu1 %1772 }
 0x2cb   :  { %v3006_v48 = vadd.f32 %v2946_v63, %v2886_v60  ;;  %v1018_v37 = vmul.f32 %v8507_v30, %v12764_v6  ;;  %v1986_v2 = vmul.f32 %v12764_v6, %v8521_v38  ;;  %v14709_v59 = vrot.slane %v12774_v10, 1  ;;  %7672 = vmatprep.mubr.msk.f32.mxu0 %vm4843_vm2, %v14710_v50 }
 0x2cc   :  { %v2825_v54 = vmax.f32 %v1924_v22, %v2765_v52  ;;  %v2766_v32 = vadd.f32 %v2641_v45, %v2436_v5  ;;  %v3736_v1 = vadd.f32 %v3611_v42, %v3406_v57  ;;  %v3145_v61 = vadd.f32 %v3085_v39, %v3005_v4 }
 0x2cd   :  { %v2195_v3 = vsel %vm2114_vm0, %v2193_v19, %v14709_v59  ;;  %v12857_v17 = vadd.f32 %v1018_v37, %v654_v53  ;;  %v3225_v60 = vmul.f32 %v8527_v41, %v12764_v6  ;;  %v3795_v51 = vmul.f32 %v8525_v40, %v12764_v6  ;;  %v12865_v12 = vpop.permute.xlu0 %1348  ;;  %v14712_v53 = vld [vmem:[#allocation40_spill] sm:$0xff] }
 0x2ce   :  { %v12859_v63 = vadd.f32 %v2195_v3, %v1986_v2  ;;  %v2826_v19 = vmax.f32 %v1925_v55, %v2766_v32  ;;  %v14711_v43 = vrot.slane %v12791_v58, 1  ;;  %v3146_v5 = vadd.f32 %v12778_v56, %v3006_v48  ;;  %7673 = vmatmul.mubr.msk.f32.gmra.mrb[18].mxu0 %vm4843_vm2, %v14712_v53  ;;  %v12874_v39 = vpop.permute.xlu1 %934  ;;  %v14713_v55 = vld [vmem:[#allocation20_spill] sm:$0xff] }
 0x2cf   :  { %v1019_v4 = vmul.f32 %v8507_v30, %v930_v16  ;;  %v3285_v45 = vadd.f32 %v3225_v60, %v3145_v61  ;;  %v3855_v42 = vadd.f32 %v3795_v51, %v3735_v26  ;;  %v1987_v6 = vmul.f32 %v930_v16, %v8521_v38  ;;  %7675 = vmatprep.mubr.msk.f32.mxu0 %vm4843_vm2, %v14713_v55 }
 0x2d0   :  { %v4062_v22 = vsel %vm2114_vm0, %v4060_v24, %v14711_v43  ;;  %v3226_v36 = vmul.f32 %v8527_v41, %v930_v16  ;;  %v3796_v56 = vmul.f32 %v8525_v40, %v930_v16  ;;  %v14714_v52 = vmax.f32 %v12783_v27, %v12787_v34 }
 0x2d1   :  { %v1079_v24 = vadd.f32 %v1019_v4, %v12770_v0  ;;  %v14715_v21 = vmax.f32 %v12752_v23, %v12754_v62  ;;  %v12892_v48 = vmax.f32 %v2825_v54, %v3285_v45  ;;  %v12894_v37 = vadd.f32 %v4062_v22, %v3855_v42 }
 0x2d2   :  { %v4310_v57 = vadd.f32 %v12272_v7, %v14714_v52  ;;  %v14717_v2 = vmov %v14709_v59  ;;  %v3286_v16 = vadd.f32 %v3226_v36, %v3146_v5  ;;  %v12900_v59 = vpop.permute.xlu0 %1777  ;;  %v3856_v27 = vadd.f32 %v3796_v56, %v3736_v1  ;;  %v12909_v62 = vpop.permute.xlu1 %585  ;;  %v14719_v1 = vld [vmem:[#allocation22_spill] sm:$0xff]  ;;  %v14722_v36 = vld [vmem:[#allocation43_spill] sm:$0xff] }
 0x2d3   :  { %v12890_v26 = vadd.f32 %v12272_v7, %v14715_v21  ;;  %v12898_v0 = vadd.f32 %v14717_v2, %v1987_v6  ;;  %v12905_v23 = vmul.f32 %v8521_v38, %v12806_v8  ;;  %v14718_v7 = vld [vmem:[#allocation15_spill] sm:$0xff]  ;;  %v12917_v54 = vmul.f32 %v8507_v30, %v12806_v8 }
 0x2d4   :  { %v4370_v34 = vmax.f32 %v4310_v57, 0.0  ;;  %7676 = vmatmul.mubr.msk.f32.gmra.mrb[20].mxu0 %vm4843_vm2, %v14718_v7  ;;  %v12913_v50 = vmax.f32 %v2826_v19, %v3286_v16  ;;  %v12921_v32 = vmul.f32 %v8525_v40, %v12806_v8  ;;  %v14720_v61 = vmov %v14711_v43  ;;  %v14723_v2 = vld [vmem:[#allocation11_spill] sm:$0xff] }
 0x2d5   :  { %14716 = vst [vmem:[#allocation9_spill] sm:$0xff] %v12890_v26  ;;  %v14346_v3 = vmax.f32 %v12890_v26, 0.0  ;;  %7678 = vmatprep.mubr.msk.f32.mxu0 %vm4843_vm2, %v14719_v1  ;;  %v12927_v60 = vadd.f32 %v14720_v61, %v3856_v27  ;;  %v12936_v43 = vmul.f32 %v8527_v41, %v12806_v8  ;;  %v656_v4 = vmul.f32 %v8521_v38, %v12841_v14 }
 0x2d6   :  { %v12930_v51 = vsel %vm2114_vm0, %v4370_v34, 0.0  ;;  %v2048_v58 = vmul.f32 %v8507_v30, %v12841_v14  ;;  %v12944_v53 = vpop.permute.xlu0 %939  ;;  %v3087_v8 = vmul.f32 %v8525_v40, %v12841_v14  ;;  %v12953_v6 = vmul.f32 %v8527_v41, %v12841_v14  ;;  %v12957_v55 = vpop.permute.xlu1 %1363 }
 0x2d7   :  { %14721 = vst [vmem:[#allocation31_spill] sm:$0xff] %v12930_v51  ;;  %v4570_v19 = vrot.slane %v14346_v3, 1  ;;  %v4571_v22 = vrot.slane %v12930_v51, 1  ;;  %v1443_v21 = vmul.f32 %v8525_v40, %v12827_v28  ;;  %v2498_v16 = vmul.f32 %v8527_v41, %v12827_v28 }
 0x2d8   :  { %7679 = vmatmul.mubr.msk.f32.gmra.mrb[22].mxu0 %vm4843_vm2, %v14722_v36  ;;  %v2196_v57 = vrot.slane %v2048_v58, 1  ;;  %v4063_v14 = vrot.slane %v12953_v6, 1  ;;  %v2888_v27 = vmul.f32 %v12827_v28, %v8521_v38  ;;  %v3468_v34 = vmul.f32 %v12827_v28, %v8507_v30 }
 0x2d9   :  { %v4573_v56 = vsel %vm2114_vm0, %v4571_v22, %v9868_v20  ;;  %v4572_v52 = vsel %vm2114_vm0, %v4570_v19, %v4571_v22  ;;  %7681 = vmatprep.mubr.msk.f32.mxu0 %vm4843_vm2, %v14723_v2  ;;  %v1503_v7 = vadd.f32 %v1443_v21, %v1079_v24  ;;  %v1442_v1 = vmul.f32 %v8525_v40, %v12865_v12  ;;  %v14724_v24 = vld [vmem:[#allocation10_spill] sm:$0xff] }
 0x2da   :  { %4684 = vrot.lane.b32.xlu1 %v4573_v56, %s8171_s24  ;;  %4682 = vrot.lane.b32.xlu0 %v4572_v52, %s8171_s24  ;;  %v2497_v61 = vmul.f32 %v8527_v41, %v12865_v12  ;;  %v2887_v19 = vmul.f32 %v12865_v12, %v8521_v38  ;;  %v12981_v22 = vpop.permute.xlu0 %580  ;;  %v2644_v58 = vrot.slane %v2498_v16, 1  ;;  %v3614_v6 = vrot.slane %v3468_v34, 1  ;;  %v12989_v56 = vpop.permute.xlu1 %1782 }
 0x2db   :  { %v3467_v36 = vmul.f32 %v12865_v12, %v8507_v30  ;;  %v1866_v28 = vmul.f32 %v8527_v41, %v12846_v13  ;;  %v1502_v52 = vadd.f32 %v1442_v1, %v12857_v17  ;;  %v2377_v2 = vmul.f32 %v12846_v13, %v8525_v40 }
 0x2dc   :  { %7682 = vmatmul.mubr.msk.f32.gmra.mrb[24].mxu0 %vm4843_vm2, %v14724_v24  ;;  %v2643_v21 = vrot.slane %v2497_v61, 1  ;;  %v2947_v16 = vmul.f32 %v12846_v13, %v8507_v30  ;;  %v3407_v34 = vmul.f32 %v12846_v13, %v8521_v38  ;;  %v1867_v24 = vmul.f32 %v8527_v41, %v12900_v59 }
 0x2dd   :  { %7684 = vmatprep.mubr.msk.f32.mxu0 %vm4843_vm2, %v12003_v15  ;;  %v3613_v12 = vrot.slane %v3467_v36, 1  ;;  %v2378_v17 = vmul.f32 %v12900_v59, %v8525_v40  ;;  %v1926_v1 = vadd.f32 %v1866_v28, %v1502_v52  ;;  %v2437_v61 = vadd.f32 %v2377_v2, %v12859_v63 }
 0x2de   :  { %v2645_v3 = vsel %vm2114_vm0, %v2643_v21, %v2644_v58  ;;  %v3007_v10 = vadd.f32 %v2947_v16, %v2887_v19  ;;  %v13006_v45 = vpop.permute.xlu0 %1358  ;;  %v1927_v36 = vadd.f32 %v1867_v24, %v1503_v7  ;;  %v2948_v13 = vmul.f32 %v12900_v59, %v8507_v30  ;;  %v13014_v5 = vpop.permute.xlu1 %944 }
 0x2df   :  { %v3615_v15 = vsel %vm2114_vm0, %v3613_v12, %v3614_v6  ;;  %v2438_v42 = vadd.f32 %v2378_v17, %v12898_v0  ;;  %v2767_v28 = vadd.f32 %v2645_v3, %v2437_v61  ;;  %v3408_v19 = vmul.f32 %v12900_v59, %v8521_v38 }
 0x2e0   :  { %7685 = vmatmul.mubr.msk.f32.gmra.mrb[26].mxu0 %vm4843_vm2, %v12016_v9  ;;  %v3737_v63 = vadd.f32 %v3615_v15, %v3407_v34  ;;  %v1020_v52 = vmul.f32 %v8507_v30, %v12874_v39  ;;  %v3008_v7 = vadd.f32 %v2948_v13, %v2888_v27  ;;  %v1988_v0 = vmul.f32 %v12874_v39, %v8521_v38 }
 0x2e1   :  { %v2768_v21 = vadd.f32 %v2644_v58, %v2438_v42  ;;  %v14725_v2 = vrot.slane %v12917_v54, 1  ;;  %v2827_v9 = vmax.f32 %v1926_v1, %v2767_v28  ;;  %v3738_v12 = vadd.f32 %v3614_v6, %v3408_v19 }
 0x2e2   :  { %v13025_v24 = vadd.f32 %v1020_v52, %v656_v4  ;;  %v3147_v3 = vadd.f32 %v3087_v8, %v3007_v10  ;;  %v13027_v34 = vpop.permute.xlu0 %1787  ;;  %v3227_v42 = vmul.f32 %v8527_v41, %v12874_v39  ;;  %v3797_v27 = vmul.f32 %v8525_v40, %v12874_v39  ;;  %v13035_v58 = vpop.permute.xlu1 %595 }
 0x2e3   :  { %v2198_v16 = vsel %vm2114_vm0, %v2196_v57, %v14725_v2  ;;  %v2828_v59 = vmax.f32 %v1927_v36, %v2768_v21  ;;  %v14726_v57 = vrot.slane %v12936_v43, 1  ;;  %v3148_v4 = vadd.f32 %v12921_v32, %v3008_v7  ;;  %v13057_v32 = vld [vmem:[%s14211_s5] ss:$0 sm:$0xff]  ;;  %s8173_s5 = smov 64  }
 0x2e4   :  { %v13029_v17 = vadd.f32 %v2198_v16, %v1988_v0  ;;  %v1021_v10 = vmul.f32 %v8507_v30, %v12944_v53  ;;  %v1989_v8 = vmul.f32 %v12944_v53, %v8521_v38  ;;  %v3287_v1 = vadd.f32 %v3227_v42, %v3147_v3 }
 0x2e5   :  { %v4065_v6 = vsel %vm2114_vm0, %v4063_v14, %v14726_v57  ;;  %v3857_v61 = vadd.f32 %v3797_v27, %v3737_v63  ;;  %v3228_v15 = vmul.f32 %v8527_v41, %v12944_v53  ;;  %v3798_v39 = vmul.f32 %v8525_v40, %v12944_v53 }
 0x2e6   :  { %v1081_v36 = vadd.f32 %v1021_v10, %v12905_v23  ;;  %v14727_v14 = vmov %v14725_v2  ;;  %v14728_v28 = vmax.f32 %v12913_v50, %v12927_v60  ;;  %v14729_v19 = vmax.f32 %v12892_v48, %v12894_v37  ;;  %v13069_v23 = vpop.permute.xlu0 %949  ;;  %v13084_v37 = vpop.permute.xlu1 %1373 }
 0x2e7   :  { %v13052_v13 = vadd.f32 %v14727_v14, %v1989_v8  ;;  %v13071_v54 = vmax.f32 %v2827_v9, %v3287_v1  ;;  %v13073_v52 = vadd.f32 %v4065_v6, %v3857_v61  ;;  %v3288_v21 = vadd.f32 %v3228_v15, %v3148_v4 }
 0x2e8   :  { %v4312_v63 = vadd.f32 %v13057_v32, %v14728_v28  ;;  %v13067_v53 = vadd.f32 %v13057_v32, %v14729_v19  ;;  %v3858_v7 = vadd.f32 %v3798_v39, %v3738_v12  ;;  %v13078_v50 = vmul.f32 %v8521_v38, %v12909_v62 }
 0x2e9   :  { %v13082_v48 = vmul.f32 %v8507_v30, %v12909_v62  ;;  %v13088_v16 = vmax.f32 %v2828_v59, %v3288_v21  ;;  %v14731_v9 = vmov %v14726_v57  ;;  %v13096_v3 = vmul.f32 %v8525_v40, %v12909_v62 }
 0x2ea   :  { %14730 = vst [vmem:[#allocation30_spill] sm:$0xff] %v13067_v53  ;;  %v4372_v0 = vmax.f32 %v4312_v63, 0.0  ;;  %v14347_v2 = vmax.f32 %v13067_v53, 0.0  ;;  %v13092_v12 = vadd.f32 %v14731_v9, %v3858_v7  ;;  %v13106_v59 = vmul.f32 %v8527_v41, %v12909_v62  ;;  %v13108_v6 = vpop.permute.xlu0 %590  ;;  %v13137_v9 = vpop.permute.xlu1 %1792 }
 0x2eb   :  { %v658_v10 = vmul.f32 %v8521_v38, %v12981_v22  ;;  %v2050_v8 = vmul.f32 %v8507_v30, %v12981_v22  ;;  %v3089_v61 = vmul.f32 %v8525_v40, %v12981_v22  ;;  %v3919_v62 = vmul.f32 %v8527_v41, %v12981_v22 }
 0x2ec   :  { %v13099_v42 = vsel %vm2114_vm0, %v4372_v0, 0.0  ;;  %v4574_v27 = vrot.slane %v14347_v2, 1  ;;  %v1445_v15 = vmul.f32 %v8525_v40, %v12957_v55  ;;  %v2500_v63 = vmul.f32 %v8527_v41, %v12957_v55 }
 0x2ed   :  { %14732 = vst [vmem:[#allocation26_spill] sm:$0xff] %v13099_v42  ;;  %v4575_v4 = vrot.slane %v13099_v42, 1  ;;  %v2199_v28 = vrot.slane %v2050_v8, 1  ;;  %v4066_v19 = vrot.slane %v3919_v62, 1  ;;  %v2890_v22 = vmul.f32 %v12957_v55, %v8521_v38 }
 0x2ee   :  { %v1505_v21 = vadd.f32 %v1445_v15, %v1081_v36  ;;  %v3470_v7 = vmul.f32 %v12957_v55, %v8507_v30  ;;  %v13135_v0 = vpop.permute.xlu0 %1368  ;;  %v2499_v8 = vmul.f32 %v8527_v41, %v13006_v45  ;;  %v2889_v36 = vmul.f32 %v13006_v45, %v8521_v38 }
 0x2ef   :  { %v4577_v39 = vsel %vm2114_vm0, %v4575_v4, %v9868_v20  ;;  %v4576_v14 = vsel %vm2114_vm0, %v4574_v27, %v4575_v4  ;;  %v2647_v27 = vrot.slane %v2500_v63, 1  ;;  %v1444_v4 = vmul.f32 %v8525_v40, %v13006_v45 }
 0x2f0   :  { %4688 = vrot.lane.b32.xlu1 %v4577_v39, %s8171_s24  ;;  %4686 = vrot.lane.b32.xlu0 %v4576_v14, %s8171_s24  ;;  %v3617_v62 = vrot.slane %v3470_v7, 1  ;;  %v3469_v15 = vmul.f32 %v13006_v45, %v8507_v30  ;;  %v1868_v55 = vmul.f32 %v8527_v41, %v12989_v56  ;;  %v2379_v39 = vmul.f32 %v12989_v56, %v8525_v40 }
 0x2f1   :  { %v1504_v14 = vadd.f32 %v1444_v4, %v13025_v24  ;;  %v2646_v63 = vrot.slane %v2499_v8, 1  ;;  %v2949_v2 = vmul.f32 %v12989_v56, %v8507_v30  ;;  %v3409_v60 = vmul.f32 %v12989_v56, %v8521_v38 }
 0x2f2   :  { %v3616_v43 = vrot.slane %v3469_v15, 1  ;;  %v2439_v7 = vadd.f32 %v2379_v39, %v13029_v17  ;;  %v1869_v45 = vmul.f32 %v8527_v41, %v13027_v34  ;;  %v2380_v1 = vmul.f32 %v13027_v34, %v8525_v40  ;;  %v13161_v57 = vpop.permute.xlu0 %1797  ;;  %v13168_v39 = vpop.permute.xlu1 %954 }
 0x2f3   :  { %v1928_v53 = vadd.f32 %v1868_v55, %v1504_v14  ;;  %v2648_v24 = vsel %vm2114_vm0, %v2646_v63, %v2647_v27  ;;  %v3009_v4 = vadd.f32 %v2949_v2, %v2889_v36  ;;  %v2950_v8 = vmul.f32 %v13027_v34, %v8507_v30 }
 0x2f4   :  { %v2769_v42 = vadd.f32 %v2648_v24, %v2439_v7  ;;  %v3618_v56 = vsel %vm2114_vm0, %v3616_v43, %v3617_v62  ;;  %v1929_v15 = vadd.f32 %v1869_v45, %v1505_v21  ;;  %v2440_v17 = vadd.f32 %v2380_v1, %v13052_v13 }
 0x2f5   :  { %v3739_v26 = vadd.f32 %v3618_v56, %v3409_v60  ;;  %v3010_v51 = vadd.f32 %v2950_v8, %v2890_v22  ;;  %v3410_v18 = vmul.f32 %v13027_v34, %v8521_v38  ;;  %v1022_v55 = vmul.f32 %v8507_v30, %v13014_v5 }
 0x2f6   :  { %v2829_v2 = vmax.f32 %v1928_v53, %v2769_v42  ;;  %v2770_v36 = vadd.f32 %v2647_v27, %v2440_v17  ;;  %v1990_v14 = vmul.f32 %v13014_v5, %v8521_v38  ;;  %v14733_v43 = vrot.slane %v13082_v48, 1  ;;  %v13179_v13 = vpop.permute.xlu0 %959 }
 0x2f7   :  { %v3740_v1 = vadd.f32 %v3617_v62, %v3410_v18  ;;  %v13181_v60 = vadd.f32 %v1022_v55, %v658_v10  ;;  %v3149_v22 = vadd.f32 %v3089_v61, %v3009_v4  ;;  %v3229_v34 = vmul.f32 %v8527_v41, %v13014_v5  ;;  %v13205_v4 = vpop.permute.xlu1 %1383 }
 0x2f8   :  { %v2201_v21 = vsel %vm2114_vm0, %v2199_v28, %v14733_v43  ;;  %v2830_v63 = vmax.f32 %v1929_v15, %v2770_v36  ;;  %v3799_v53 = vmul.f32 %v8525_v40, %v13014_v5  ;;  %v14734_v42 = vrot.slane %v13106_v59, 1 }
 0x2f9   :  { %v13185_v7 = vadd.f32 %v2201_v21, %v1990_v14  ;;  %v3289_v28 = vadd.f32 %v3229_v34, %v3149_v22  ;;  %v3150_v45 = vadd.f32 %v13096_v3, %v3010_v51  ;;  %v1023_v18 = vmul.f32 %v8507_v30, %v13069_v23 }
 0x2fa   :  { %v4068_v27 = vsel %vm2114_vm0, %v4066_v19, %v14734_v42  ;;  %v1991_v10 = vmul.f32 %v13069_v23, %v8521_v38  ;;  %v3859_v61 = vadd.f32 %v3799_v53, %v3739_v26  ;;  %v3230_v62 = vmul.f32 %v8527_v41, %v13069_v23  ;;  %v13207_v51 = vpop.permute.xlu0 %1378 }
 0x2fb   :  { %v3800_v5 = vmul.f32 %v8525_v40, %v13069_v23  ;;  %v14735_v24 = vmax.f32 %v13088_v16, %v13092_v12  ;;  %v13209_v3 = vmax.f32 %v2829_v2, %v3289_v28  ;;  %v1083_v8 = vadd.f32 %v1023_v18, %v13078_v50 }
 0x2fc   :  { %v14736_v26 = vmov %v14733_v43  ;;  %v14737_v15 = vmax.f32 %v13071_v54, %v13073_v52  ;;  %v13220_v16 = vadd.f32 %v4068_v27, %v3859_v61  ;;  %v3290_v12 = vadd.f32 %v3230_v62, %v3150_v45  ;;  %v13264_v45 = vpop.permute.xlu1 %1802 }
 0x2fd   :  { %v4314_v19 = vadd.f32 %v13057_v32, %v14735_v24  ;;  %v2322_v56 = vadd.f32 %v14736_v26, %v1991_v10  ;;  %v3860_v17 = vadd.f32 %v3800_v5, %v3740_v1  ;;  %v13225_v2 = vmul.f32 %v8521_v38, %v13035_v58 }
 0x2fe   :  { %v13218_v23 = vadd.f32 %v13057_v32, %v14737_v15  ;;  %v13229_v50 = vmul.f32 %v8507_v30, %v13035_v58  ;;  %v13233_v54 = vmul.f32 %v8525_v40, %v13035_v58  ;;  %v13237_v48 = vmax.f32 %v2830_v63, %v3290_v12  ;;  %v13246_v1 = vpop.permute.xlu0 %1807 }
 0x2ff   :  { %v4374_v55 = vmax.f32 %v4314_v19, 0.0  ;;  %v14739_v14 = vmov %v14734_v42  ;;  %v13254_v63 = vmul.f32 %v8527_v41, %v13035_v58  ;;  %v660_v42 = vmul.f32 %v8521_v38, %v13108_v6 }
 0x300   :  { %14738 = vst [vmem:[#allocation21_spill] sm:$0xff] %v13218_v23  ;;  %v14353_v36 = vmax.f32 %v13218_v23, 0.0  ;;  %v13241_v43 = vadd.f32 %v14739_v14, %v3860_v17  ;;  %v2052_v27 = vmul.f32 %v8507_v30, %v13108_v6  ;;  %v3091_v28 = vmul.f32 %v8525_v40, %v13108_v6 }
 0x301   :  { %v13244_v21 = vsel %vm2114_vm0, %v4374_v55, 0.0  ;;  %v3921_v61 = vmul.f32 %v8527_v41, %v13108_v6  ;;  %v1447_v5 = vmul.f32 %v8525_v40, %v13084_v37  ;;  %v2502_v24 = vmul.f32 %v8527_v41, %v13084_v37 }
 0x302   :  { %14740 = vst [vmem:[#allocation29_spill] sm:$0xff] %v13244_v21  ;;  %v4579_v22 = vrot.slane %v13244_v21, 1  ;;  %v4578_v34 = vrot.slane %v14353_v36, 1  ;;  %v2202_v62 = vrot.slane %v2052_v27, 1  ;;  %v2892_v19 = vmul.f32 %v13084_v37, %v8521_v38  ;;  %v13286_v17 = vpop.permute.xlu0 %3032 }
 0x303   :  { %v4069_v26 = vrot.slane %v3921_v61, 1  ;;  %v3472_v15 = vmul.f32 %v13084_v37, %v8507_v30  ;;  %v1446_v6 = vmul.f32 %v8525_v40, %v13135_v0  ;;  %v2501_v12 = vmul.f32 %v8527_v41, %v13135_v0 }
 0x304   :  { %v4581_v18 = vsel %vm2114_vm0, %v4579_v22, %v9868_v20  ;;  %v4580_v58 = vsel %vm2114_vm0, %v4578_v34, %v4579_v22  ;;  %v1507_v55 = vadd.f32 %v1447_v5, %v1083_v8  ;;  %v2650_v14 = vrot.slane %v2502_v24, 1  ;;  %v13301_v24 = vpop.permute.xlu1 %3027 }
 0x305   :  { %4692 = vrot.lane.b32.xlu1 %v4581_v18, %s8171_s24  ;;  %4690 = vrot.lane.b32.xlu0 %v4580_v58, %s8171_s24  ;;  %v2891_v22 = vmul.f32 %v13135_v0, %v8521_v38  ;;  %v3471_v34 = vmul.f32 %v13135_v0, %v8507_v30  ;;  %v3620_v27 = vrot.slane %v3472_v15, 1  ;;  %v1506_v18 = vadd.f32 %v1446_v6, %v13181_v60 }
 0x306   :  { %v2649_v37 = vrot.slane %v2501_v12, 1  ;;  %v1870_v58 = vmul.f32 %v8527_v41, %v13137_v9  ;;  %v2381_v36 = vmul.f32 %v13137_v9, %v8525_v40  ;;  %v2951_v8 = vmul.f32 %v13137_v9, %v8507_v30 }
 0x307   :  { %v3619_v61 = vrot.slane %v3471_v34, 1  ;;  %v3411_v5 = vmul.f32 %v13137_v9, %v8521_v38  ;;  %v1871_v60 = vmul.f32 %v8527_v41, %v13161_v57  ;;  %v2382_v6 = vmul.f32 %v13161_v57, %v8525_v40 }
 0x308   :  { %v1930_v0 = vadd.f32 %v1870_v58, %v1506_v18  ;;  %v2651_v15 = vsel %vm2114_vm0, %v2649_v37, %v2650_v14  ;;  %v2441_v12 = vadd.f32 %v2381_v36, %v13185_v7  ;;  %v3011_v34 = vadd.f32 %v2951_v8, %v2891_v22  ;;  %v13314_v37 = vpop.permute.xlu0 %3172 }
 0x309   :  { %v3621_v52 = vsel %vm2114_vm0, %v3619_v61, %v3620_v27  ;;  %v2952_v59 = vmul.f32 %v13161_v57, %v8507_v30  ;;  %v1931_v10 = vadd.f32 %v1871_v60, %v1507_v55  ;;  %v2442_v53 = vadd.f32 %v2382_v6, %v2322_v56 }
 0x30a   :  { %v3741_v9 = vadd.f32 %v3621_v52, %v3411_v5  ;;  %v3412_v18 = vmul.f32 %v13161_v57, %v8521_v38  ;;  %v2771_v58 = vadd.f32 %v2651_v15, %v2441_v12  ;;  %v1024_v21 = vmul.f32 %v8507_v30, %v13168_v39 }
 0x30b   :  { %v3012_v23 = vadd.f32 %v2952_v59, %v2892_v19  ;;  %v1992_v7 = vmul.f32 %v13168_v39, %v8521_v38  ;;  %v2772_v36 = vadd.f32 %v2650_v14, %v2442_v53  ;;  %v14741_v61 = vrot.slane %v13229_v50, 1  ;;  %v13325_v59 = vpop.permute.xlu1 %3167 }
 0x30c   :  { %v3742_v22 = vadd.f32 %v3620_v27, %v3412_v18  ;;  %v3151_v56 = vadd.f32 %v3091_v28, %v3011_v34  ;;  %v2831_v55 = vmax.f32 %v1930_v0, %v2771_v58  ;;  %v1084_v8 = vadd.f32 %v1024_v21, %v660_v42  ;;  %v13351_v60 = vpop.permute.xlu0 %4646 }
 0x30d   :  { %v2204_v52 = vsel %vm2114_vm0, %v2202_v62, %v14741_v61  ;;  %v3231_v5 = vmul.f32 %v8527_v41, %v13168_v39  ;;  %v2832_v19 = vmax.f32 %v1931_v10, %v2772_v36  ;;  %v3801_v15 = vmul.f32 %v8525_v40, %v13168_v39 }
 0x30e   :  { %v2323_v57 = vadd.f32 %v2204_v52, %v1992_v7  ;;  %v14742_v53 = vrot.slane %v13254_v63, 1  ;;  %v3152_v27 = vadd.f32 %v13233_v54, %v3012_v23  ;;  %v1025_v21 = vmul.f32 %v8507_v30, %v13179_v13 }
 0x30f   :  { %v3291_v62 = vadd.f32 %v3231_v5, %v3151_v56  ;;  %v1993_v42 = vmul.f32 %v13179_v13, %v8521_v38  ;;  %v3232_v28 = vmul.f32 %v8527_v41, %v13179_v13  ;;  %v3861_v10 = vadd.f32 %v3801_v15, %v3741_v9  ;;  %v13369_v50 = vpop.permute.xlu1 %4648 }
 0x310   :  { %v4071_v14 = vsel %vm2114_vm0, %v4069_v26, %v14742_v53  ;;  %v3802_v39 = vmul.f32 %v8525_v40, %v13179_v13  ;;  %v14743_v0 = vmax.f32 %v13237_v48, %v13241_v43  ;;  %v14744_v23 = vmax.f32 %v13209_v3, %v13220_v16 }
 0x311   :  { %v13353_v6 = vmax.f32 %v2831_v55, %v3291_v62  ;;  %v1085_v12 = vadd.f32 %v1025_v21, %v13225_v2  ;;  %v14745_v34 = vmov %v14741_v61  ;;  %v3292_v9 = vadd.f32 %v3232_v28, %v3152_v27  ;;  %v13390_v62 = vpop.permute.xlu0 %4658 }
 0x312   :  { %v4316_v26 = vadd.f32 %v13057_v32, %v14743_v0  ;;  %v13349_v54 = vadd.f32 %v13057_v32, %v14744_v23  ;;  %v2324_v13 = vadd.f32 %v14745_v34, %v1993_v42  ;;  %v13358_v18 = vadd.f32 %v4071_v14, %v3861_v10 }
 0x313   :  { %v3862_v48 = vadd.f32 %v3802_v39, %v3742_v22  ;;  %v13361_v3 = vmax.f32 %v2832_v19, %v3292_v9  ;;  %v1449_v16 = vmul.f32 %v8525_v40, %v13205_v4  ;;  %v2504_v7 = vmul.f32 %v8527_v41, %v13205_v4  ;;  %v4661_v9 = vpop.permute.xlu1 %4660 }
 0x314   :  { %v4376_v43 = vmax.f32 %v4316_v26, 0.0  ;;  %v4375_v58 = vmax.f32 %v13349_v54, 0.0  ;;  %v2894_v2 = vmul.f32 %v13205_v4, %v8521_v38  ;;  %v4251_v36 = vmax.f32 %v13353_v6, %v13358_v18  ;;  %v14750_v6 = vld [vmem:[#allocation7_spill] sm:$0xff] }
 0x315   :  { %v14746_v22 = vmov %v14742_v53  ;;  %v1509_v5 = vadd.f32 %v1449_v16, %v1085_v12  ;;  %v2653_v19 = vrot.slane %v2504_v7, 1  ;;  %v3474_v15 = vmul.f32 %v13205_v4, %v8507_v30 }
 0x316   :  { %v4192_v61 = vadd.f32 %v14746_v22, %v3862_v48  ;;  %v13376_v52 = vsel %vm2114_vm0, %v4376_v43, 0.0  ;;  %v4582_v56 = vrot.slane %v4375_v58, 1  ;;  %v1448_v14 = vmul.f32 %v8525_v40, %v13207_v51 }
 0x317   :  { %v4583_v55 = vrot.slane %v13376_v52, 1  ;;  %v2503_v63 = vmul.f32 %v8527_v41, %v13207_v51  ;;  %v2893_v27 = vmul.f32 %v13207_v51, %v8521_v38  ;;  %v3623_v28 = vrot.slane %v3474_v15, 1  ;;  %v4663_v15 = vpop.permute.xlu0 %4662 }
 0x318   :  { %v4252_v53 = vmax.f32 %v13361_v3, %v4192_v61  ;;  %v3473_v4 = vmul.f32 %v13207_v51, %v8507_v30  ;;  %v1508_v10 = vadd.f32 %v1448_v14, %v1084_v8  ;;  %v1872_v0 = vmul.f32 %v8527_v41, %v13264_v45 }
 0x319   :  { %v4585_v21 = vsel %vm2114_vm0, %v4583_v55, %v9868_v20  ;;  %v4584_v42 = vsel %vm2114_vm0, %v4582_v56, %v4583_v55  ;;  %v2652_v39 = vrot.slane %v2503_v63, 1  ;;  %v2383_v26 = vmul.f32 %v13264_v45, %v8525_v40 }
 0x31a   :  { %4696 = vrot.lane.b32.xlu1 %v4585_v21, %s8171_s24  ;;  %4694 = vrot.lane.b32.xlu0 %v4584_v42, %s8171_s24  ;;  %v3622_v23 = vrot.slane %v3473_v4, 1  ;;  %v2953_v12 = vmul.f32 %v13264_v45, %v8507_v30  ;;  %v3413_v34 = vmul.f32 %v13264_v45, %v8521_v38  ;;  %v1873_v51 = vmul.f32 %v8527_v41, %v13246_v1  ;;  %v4665_v4 = vpop.permute.xlu1 %4664 }
 0x31b   :  { %v1932_v48 = vadd.f32 %v1872_v0, %v1508_v10  ;;  %v2443_v8 = vadd.f32 %v2383_v26, %v2323_v57  ;;  %v2384_v43 = vmul.f32 %v13246_v1, %v8525_v40  ;;  %v2954_v3 = vmul.f32 %v13246_v1, %v8507_v30 }
 0x31c   :  { %v1933_v16 = vadd.f32 %v1873_v51, %v1509_v5  ;;  %v3414_v7 = vmul.f32 %v13246_v1, %v8521_v38  ;;  %v3013_v22 = vadd.f32 %v2953_v12, %v2893_v27  ;;  %v3093_v45 = vmul.f32 %v13301_v24, %v8525_v40 }
 0x31d   :  { %v2444_v61 = vadd.f32 %v2384_v43, %v2324_v13  ;;  %v3923_v56 = vmul.f32 %v13301_v24, %v8527_v41  ;;  %v3014_v55 = vadd.f32 %v2954_v3, %v2894_v2  ;;  %v3094_v57 = vmul.f32 %v13286_v17, %v8525_v40  ;;  %v14747_v3 = vld [vmem:[#allocation27_spill] sm:$0xff] }
 0x31e   :  { %v3153_v14 = vadd.f32 %v3093_v45, %v3013_v22  ;;  %v3924_v30 = vmul.f32 %v13286_v17, %v8527_v41  ;;  %v2654_v5 = vsel %vm2114_vm0, %v2652_v39, %v2653_v19  ;;  %v3233_v38 = vmul.f32 %v13325_v59, %v8527_v41 }
 0x31f   :  { %v4072_v1 = vrot.slane %v3923_v56, 1  ;;  %v3154_v63 = vadd.f32 %v3094_v57, %v3014_v55  ;;  %v2773_v13 = vadd.f32 %v2654_v5, %v2443_v8  ;;  %v3624_v27 = vsel %vm2114_vm0, %v3622_v23, %v3623_v28  ;;  %v4669_v57 = vpop.permute.xlu1 %4668 }
 0x320   :  { %v4073_v24 = vrot.slane %v3924_v30, 1  ;;  %v3293_v2 = vadd.f32 %v3233_v38, %v3153_v14  ;;  %v3743_v21 = vadd.f32 %v3624_v27, %v3413_v34  ;;  %v3803_v42 = vmul.f32 %v13325_v59, %v8525_v40 }
 0x321   :  { %v2833_v10 = vmax.f32 %v1932_v48, %v2773_v13  ;;  %v2774_v0 = vadd.f32 %v2653_v19, %v2444_v61  ;;  %v3744_v17 = vadd.f32 %v3623_v28, %v3414_v7  ;;  %v3234_v39 = vmul.f32 %v13314_v37, %v8527_v41  ;;  %v4667_v19 = vpop.permute.xlu0 %4666  ;;  %v14755_v13 = vld [vmem:[#allocation25_spill] sm:$0xff] }
 0x322   :  { %v3863_v26 = vadd.f32 %v3803_v42, %v3743_v21  ;;  %v4074_v12 = vsel %vm2114_vm0, %v4072_v1, %v4073_v24  ;;  %v3804_v51 = vmul.f32 %v13314_v37, %v8525_v40  ;;  %v4318_v23 = vadd.f32 %v13057_v32, %v4252_v53  ;;  %v14748_v53 = vld [vmem:[#allocation46_spill] sm:$0xff] }
 0x323   :  { %v3353_v8 = vmax.f32 %v2833_v10, %v3293_v2  ;;  %v2834_v34 = vmax.f32 %v1933_v16, %v2774_v0  ;;  %v3294_v43 = vadd.f32 %v3234_v39, %v3154_v63  ;;  %v13439_v59 = vadd.f32 %v13057_v32, %v4251_v36 }
 0x324   :  { %v4193_v28 = vadd.f32 %v4074_v12, %v3863_v26  ;;  %v3864_v41 = vadd.f32 %v3804_v51, %v3744_v17  ;;  %v4378_v48 = vmax.f32 %v4318_v23, 0.0  ;;  %v4788_v7 = vsel %vm4758_vm1, %v14747_v3, %v13369_v50  ;;  %v14751_v50 = vld [vmem:[#allocation5_spill] sm:$0xff]  ;;  %v14758_v26 = vld [vmem:[#allocation6_spill] sm:$0xff] }
 0x325   :  { %v3354_v40 = vmax.f32 %v2834_v34, %v3294_v43  ;;  %v4377_v37 = vmax.f32 %v13439_v59, 0.0  ;;  %v14749_v16 = vmax.f32 %v14748_v53, 0.0  ;;  %v4794_v18 = vsel %vm4758_vm1, %v14750_v6, %v4661_v9  ;;  %v14753_v9 = vld [vmem:[#allocation8_spill] sm:$0xff]  ;;  %v14763_v3 = vld [vmem:[#allocation9_spill] sm:$0xff] }
 0x326   :  { %v4253_v36 = vmax.f32 %v3353_v8, %v4193_v28  ;;  %v4194_v45 = vadd.f32 %v4073_v24, %v3864_v41  ;;  %v13452_v61 = vsel %vm2114_vm0, %v4378_v48, 0.0  ;;  %v14752_v56 = vmax.f32 %v14751_v50, 0.0  ;;  %v14762_v41 = vld [vmem:[#allocation31_spill] sm:$0xff] }
 0x327   :  { %v4787_v22 = vsel %vm4758_vm1, %v14749_v16, %v13351_v60  ;;  %v4587_v14 = vrot.slane %v13452_v61, 1  ;;  %v4586_v60 = vrot.slane %v4377_v37, 1  ;;  %v14754_v30 = vmax.f32 %v14753_v9, 0.0 }
 0x328   :  { %7687 = vmatprep.mubr.msk.f32.mxu0 %vm4843_vm2, %v4787_v22  ;;  %v4793_v55 = vsel %vm4758_vm1, %v14752_v56, %v13390_v62  ;;  %v13468_v38 = vadd.f32 %v13057_v32, %v4253_v36  ;;  %v4254_v1 = vmax.f32 %v3354_v40, %v4194_v45  ;;  %v4796_v27 = vsel %vm4758_vm1, %v14755_v13, %v4665_v4  ;;  %v14765_v22 = vld [vmem:[#allocation26_spill] sm:$0xff] }
 0x329   :  { %7688 = vmatmul.mubr.msk.f32.gmra.mrb[28].mxu0 %vm4843_vm2, %v4788_v7  ;;  %7601 = vmatprep.mubr.msk.f32.mxu1 %vm4843_vm2, %v4793_v55  ;;  %v4795_v5 = vsel %vm4758_vm1, %v14754_v30, %v4663_v15  ;;  %v4589_v62 = vsel %vm2114_vm0, %v4587_v14, %v9868_v20  ;;  %v4588_v63 = vsel %vm2114_vm0, %v4586_v60, %v4587_v14  ;;  %v4671_v15 = vpop.permute.xlu0 %4670  ;;  %v14759_v12 = vmax.f32 %v12603_v35, 0.0  ;;  %v14769_v14 = vld [vmem:[#allocation21_spill] sm:$0xff]  ;;  %v13571_v30 = vld [vmem:[%s14213_s7] ss:$0 sm:$0xff] }
 0x32a   :  { %7690 = vmatprep.mubr.msk.f32.mxu0 %vm4843_vm2, %v12324_v33  ;;  %7602 = vmatmul.mubr.msk.f32.vlgmr.msra.gmra.mrb[0].mxu1 %vm4843_vm2, %v4794_v18  ;;  %v4320_v24 = vadd.f32 %v13057_v32, %v4254_v1  ;;  %v14756_v33 = vmax.f32 %v12387_v31, 0.0  ;;  %v4379_v21 = vmax.f32 %v13468_v38, 0.0  ;;  %v4673_v32 = vpop.permute.xlu1 %4672  ;;  %v4798_v4 = vsel %vm4758_vm1, %v12410_v29, %v4669_v57 }
 0x32b   :  { %7604 = vmatprep.mubr.msk.f32.mxu1 %vm4843_vm2, %v4795_v5  ;;  %4700 = vrot.lane.b32.xlu1 %v4589_v62, %s8171_s24  ;;  %v14760_v34 = vmax.f32 %v12735_v11, 0.0  ;;  %v14764_v7 = vmax.f32 %v14763_v3, 0.0  ;;  %v14770_v60 = vmax.f32 %v14769_v14, 0.0 }
 0x32c   :  { %4698 = vrot.lane.b32.xlu0 %v4588_v63, %s8171_s24  ;;  %v4797_v2 = vsel %vm4758_vm1, %v14756_v33, %v4667_v19  ;;  %v4380_v42 = vmax.f32 %v4320_v24, 0.0  ;;  %v4823_v31 = vrot.slane %v4379_v21, 1  ;;  %v14761_v19 = vld [vmem:[#allocation35_spill] sm:$0xff] }
 0x32d   :  { %7691 = vmatmul.mubr.msk.f32.gmra.mrb[30].mxu0 %vm4843_vm2, %v12355_v46  ;;  %v14757_v46 = vmax.f32 %v12537_v49, 0.0  ;;  %v4675_v17 = vpop.permute.xlu0 %4674  ;;  %v4800_v49 = vsel %vm4758_vm1, %v14758_v26, %v4673_v32 }
 0x32e   :  { %7693 = vmatprep.mubr.msk.f32.mxu0 %vm4843_vm2, %v12457_v47  ;;  %7605 = vmatmul.mubr.msk.f32.gmra.mrb[2].mxu1 %vm4843_vm2, %v4796_v27  ;;  %v13497_v10 = vsel %vm2114_vm0, %v4380_v42, 0.0  ;;  %v4801_v51 = vsel %vm4758_vm1, %v14759_v12, %v4675_v17 }
 0x32f   :  { %7607 = vmatprep.mubr.msk.f32.mxu1 %vm4843_vm2, %v4797_v2  ;;  %v4799_v0 = vsel %vm4758_vm1, %v14757_v46, %v4671_v15  ;;  %v4824_v47 = vrot.slane %v13497_v10, 1 }
 0x331   :  { %7694 = vmatmul.mubr.msk.f32.gmra.mrb[32].mxu0 %vm4843_vm2, %v12489_v44  ;;  %v4826_v29 = vsel %vm2114_vm0, %v4824_v47, %v9868_v20  ;;  %v4825_v39 = vsel %vm2114_vm0, %v4823_v31, %v4824_v47  ;;  %v4677_v44 = vpop.permute.xlu1 %4676 }
 0x332   :  { %7696 = vmatprep.mubr.msk.f32.mxu0 %vm4843_vm2, %v4793_v55  ;;  %7608 = vmatmul.mubr.msk.f32.gmra.mrb[4].mxu1 %vm4843_vm2, %v4798_v4  ;;  %v4802_v23 = vsel %vm4758_vm1, %v12592_v25, %v4677_v44  ;;  %v14768_v55 = vld [vmem:[#allocation29_spill] sm:$0xff] }
 0x333   :  { %7610 = vmatprep.mubr.msk.f32.mxu1 %vm4843_vm2, %v4799_v0  ;;  %4833 = vrot.lane.b32.xlu1 %v4826_v29, %s8171_s24 }
 0x334   :  { %4831 = vrot.lane.b32.xlu0 %v4825_v39, %s8171_s24  ;;  %v4679_v8 = vpop.permute.xlu0 %4678 }
 0x335   :  { %7697 = vmatmul.mubr.msk.f32.gmra.mrb[34].mxu0 %vm4843_vm2, %v4794_v18  ;;  %v4803_v35 = vsel %vm4758_vm1, %v14760_v34, %v4679_v8  ;;  %v4681_v43 = vpop.permute.xlu1 %4680  ;;  %v14766_v18 = vld [vmem:[#allocation30_spill] sm:$0xff] }
 0x336   :  { %7699 = vmatprep.mubr.msk.f32.mxu0 %vm4843_vm2, %v4795_v5  ;;  %7611 = vmatmul.mubr.msk.f32.gmra.mrb[6].mxu1 %vm4843_vm2, %v4800_v49  ;;  %v4804_v25 = vsel %vm4758_vm1, %v14761_v19, %v4681_v43  ;;  %v14767_v36 = vmax.f32 %v14766_v18, 0.0 }
 0x337   :  { %7613 = vmatprep.mubr.msk.f32.mxu1 %vm4843_vm2, %v4801_v51 }
 0x339   :  { %7700 = vmatmul.mubr.msk.f32.gmra.mrb[36].mxu0 %vm4843_vm2, %v4796_v27 }
 0x33a   :  { %7702 = vmatprep.mubr.msk.f32.mxu0 %vm4843_vm2, %v4797_v2  ;;  %7614 = vmatmul.mubr.msk.f32.gmra.mrb[8].mxu1 %vm4843_vm2, %v4802_v23 }
 0x33b   :  { %7616 = vmatprep.mubr.msk.f32.mxu1 %vm4843_vm2, %v4803_v35 }
 0x33d   :  { %7703 = vmatmul.mubr.msk.f32.gmra.mrb[38].mxu0 %vm4843_vm2, %v4798_v4 }
 0x33e   :  { %7705 = vmatprep.mubr.msk.f32.mxu0 %vm4843_vm2, %v4799_v0  ;;  %7617 = vmatmul.mubr.msk.f32.gmra.mrb[10].mxu1 %vm4843_vm2, %v4804_v25 }
 0x341   :  { %7706 = vmatmul.mubr.msk.f32.gmra.mrb[40].mxu0 %vm4843_vm2, %v4800_v49 }
 0x342   :  { %7708 = vmatprep.mubr.msk.f32.mxu0 %vm4843_vm2, %v4801_v51 }
 0x345   :  { %7709 = vmatmul.mubr.msk.f32.gmra.mrb[42].mxu0 %vm4843_vm2, %v4802_v23 }
 0x346   :  { %7711 = vmatprep.mubr.msk.f32.mxu0 %vm4843_vm2, %v4803_v35 }
 0x349   :  { %7712 = vmatmul.mubr.msk.f32.gmra.mrb[44].mxu0 %vm4843_vm2, %v4804_v25 }
 0x34c   :  { %v4685_v11 = vpop.permute.xlu1 %4684  ;;  %v4683_v28 = vpop.permute.xlu0 %4682 }
 0x34d   :  { %v4806_v48 = vsel %vm4758_vm1, %v14762_v41, %v4685_v11  ;;  %v4805_v40 = vsel %vm4758_vm1, %v14764_v7, %v4683_v28 }
 0x34e   :  { %7619 = vmatprep.mubr.msk.f32.mxu1 %vm4843_vm2, %v4805_v40  ;;  %7714 = vmatprep.mubr.msk.f32.mxu0 %vm4843_vm2, %v4805_v40 }
 0x34f   :  { %7620 = vmatmul.mubr.msk.f32.gmra.mrb[12].mxu1 %vm4843_vm2, %v4806_v48  ;;  %7715 = vmatmul.mubr.msk.f32.gmra.mrb[46].mxu0 %vm4843_vm2, %v4806_v48 }
 0x362   :  { %v4689_v53 = vpop.permute.xlu1 %4688  ;;  %v4687_v16 = vpop.permute.xlu0 %4686 }
 0x363   :  { %v4808_v6 = vsel %vm4758_vm1, %v14765_v22, %v4689_v53  ;;  %v4807_v45 = vsel %vm4758_vm1, %v14767_v36, %v4687_v16 }
 0x364   :  { %7622 = vmatprep.mubr.msk.f32.mxu1 %vm4843_vm2, %v4807_v45  ;;  %7717 = vmatprep.mubr.msk.f32.mxu0 %vm4843_vm2, %v4807_v45 }
 0x365   :  { %7623 = vmatmul.mubr.msk.f32.gmra.mrb[14].mxu1 %vm4843_vm2, %v4808_v6  ;;  %7718 = vmatmul.mubr.msk.f32.gmra.mrb[48].mxu0 %vm4843_vm2, %v4808_v6 }
 0x377   :  { %v4693_v50 = vpop.permute.xlu1 %4692  ;;  %v4691_v56 = vpop.permute.xlu0 %4690 }
 0x378   :  { %v4810_v57 = vsel %vm4758_vm1, %v14768_v55, %v4693_v50  ;;  %v4809_v9 = vsel %vm4758_vm1, %v14770_v60, %v4691_v56 }
 0x379   :  { %7625 = vmatprep.mubr.msk.f32.mxu1 %vm4843_vm2, %v4809_v9  ;;  %7720 = vmatprep.mubr.msk.f32.mxu0 %vm4843_vm2, %v4809_v9 }
 0x37a   :  { %7626 = vmatmul.mubr.msk.f32.gmra.mrb[16].mxu1 %vm4843_vm2, %v4810_v57  ;;  %7721 = vmatmul.mubr.msk.f32.gmra.mrb[50].mxu0 %vm4843_vm2, %v4810_v57 }
 0x37d   :  { %v7647_v5 = vpop.f32.mrb[0].mxu0 }
 0x37e   :  { %v5435_v1 = vpop.f32.mrb[1].mxu0  ;;  %v5721_v62 = vadd.f32 %v7647_v5, %v13571_v30 }
 0x37f   :  { %v5720_v63 = vadd.f32 %v13571_v30, %v5435_v1 }
 0x380   :  { %v5777_v33 = vmax.f32 %v5721_v62, 0.0 }
 0x381   :  { %v7650_v13 = vpop.f32.mrb[2].mxu0  ;;  %v5776_v42 = vmax.f32 %v5720_v63, 0.0 }
 0x382   :  { %v5723_v27 = vadd.f32 %v7650_v13, %v13571_v30  ;;  %v5445_v15 = vpop.f32.mrb[3].mxu0 }
 0x383   :  { %v5722_v24 = vadd.f32 %v13571_v30, %v5445_v15 }
 0x384   :  { %v5779_v2 = vmax.f32 %v5723_v27, 0.0 }
 0x385   :  { %v5778_v32 = vmax.f32 %v5722_v24, 0.0  ;;  %v7653_v4 = vpop.f32.mrb[4].mxu0 }
 0x386   :  { %v5833_v31 = vmax.f32 %v5777_v33, %v5779_v2  ;;  %v5455_v46 = vpop.f32.mrb[5].mxu0  ;;  %v5725_v39 = vadd.f32 %v7653_v4, %v13571_v30 }
 0x387   :  { %v5832_v0 = vmax.f32 %v5776_v42, %v5778_v32  ;;  %v5724_v12 = vadd.f32 %v13571_v30, %v5455_v46 }
 0x388   :  { %v5889_v29 = vrot.slane %v5833_v31, 1  ;;  %v5781_v35 = vmax.f32 %v5725_v39, 0.0 }
 0x389   :  { %v5888_v44 = vrot.slane %v5832_v0, 1  ;;  %v7656_v51 = vpop.f32.mrb[6].mxu0  ;;  %v5780_v43 = vmax.f32 %v5724_v12, 0.0 }
 0x38a   :  { %v5727_v23 = vadd.f32 %v7656_v51, %v13571_v30  ;;  %v5465_v8 = vpop.f32.mrb[7].mxu0 }
 0x38b   :  { %v5726_v54 = vadd.f32 %v13571_v30, %v5465_v8 }
 0x38c   :  { %v4697_v47 = vpop.permute.xlu1 %4696  ;;  %v4695_v17 = vpop.permute.xlu0 %4694  ;;  %v5783_v19 = vmax.f32 %v5727_v23, 0.0 }
 0x38d   :  { %v4812_v26 = vsel %vm4758_vm1, %v13376_v52, %v4697_v47  ;;  %v4811_v49 = vsel %vm4758_vm1, %v4375_v58, %v4695_v17  ;;  %v5890_v52 = vsel %vm2114_vm0, %v5888_v44, %v5889_v29  ;;  %v5959_v58 = vmax.f32 %v5833_v31, %v5889_v29  ;;  %v7659_v11 = vpop.f32.mrb[8].mxu0 }
 0x38e   :  { %7628 = vmatprep.mubr.msk.f32.mxu1 %vm4843_vm2, %v4811_v49  ;;  %7723 = vmatprep.mubr.msk.f32.mxu0 %vm4843_vm2, %v4811_v49  ;;  %v5958_v34 = vmax.f32 %v5832_v0, %v5890_v52  ;;  %v5782_v25 = vmax.f32 %v5726_v54, 0.0  ;;  %v5475_v48 = vpop.f32.mrb[9].mxu0  ;;  %v5835_v3 = vmax.f32 %v5781_v35, %v5783_v19  ;;  %v5729_v40 = vadd.f32 %v7659_v11, %v13571_v30 }
 0x38f   :  { %7629 = vmatmul.mubr.msk.f32.gmra.mrb[18].mxu1 %vm4843_vm2, %v4812_v26  ;;  %7724 = vmatmul.mubr.msk.f32.gmra.mrb[52].mxu0 %vm4843_vm2, %v4812_v26  ;;  %v6098_v53 = vrot.slane %v5959_v58, 4  ;;  %v5728_v45 = vadd.f32 %v13571_v30, %v5475_v48  ;;  %v6126_v56 = vrot.slane %v5959_v58, 5  ;;  %v6154_v15 = vrot.slane %v5959_v58, 6 }
 0x390   :  { %v6000_v28 = vrot.slane %v5958_v34, 1  ;;  %v6028_v41 = vrot.slane %v5958_v34, 2  ;;  %v5834_v7 = vmax.f32 %v5780_v43, %v5782_v25  ;;  %v6056_v16 = vrot.slane %v5958_v34, 3 }
 0x391   :  { %v5892_v18 = vrot.slane %v5835_v3, 1  ;;  %v7662_v50 = vpop.f32.mrb[10].mxu0  ;;  %v5785_v9 = vmax.f32 %v5729_v40, 0.0  ;;  %v5784_v24 = vmax.f32 %v5728_v45, 0.0 }
 0x392   :  { %v6183_v22 = vsel %vm6182_vm3, %v5958_v34, %v6000_v28  ;;  %v5891_v36 = vrot.slane %v5834_v7, 1  ;;  %v5731_v55 = vadd.f32 %v7662_v50, %v13571_v30  ;;  %v5485_v57 = vpop.f32.mrb[11].mxu0 }
 0x393   :  { %v6198_v6 = vsel %vm6197_vm4, %v6183_v22, %v6028_v41  ;;  %v5730_v5 = vadd.f32 %v13571_v30, %v5485_v57  ;;  %v5961_v62 = vmax.f32 %v5835_v3, %v5892_v18 }
 0x394   :  { %v6213_v14 = vsel %vm6212_vm5, %v6198_v6, %v6056_v16  ;;  %v5893_v60 = vsel %vm2114_vm0, %v5891_v36, %v5892_v18  ;;  %v5787_v13 = vmax.f32 %v5731_v55, 0.0 }
 0x395   :  { %v6228_v1 = vsel %vm6227_vm6, %v6213_v14, %v6098_v53  ;;  %v5960_v63 = vmax.f32 %v5834_v7, %v5893_v60  ;;  %v5786_v33 = vmax.f32 %v5730_v5, 0.0  ;;  %v7665_v2 = vpop.f32.mrb[12].mxu0  ;;  %v6099_v47 = vrot.slane %v5961_v62, 4 }
 0x396   :  { %v6243_v27 = vsel %vm6242_vm7, %v6228_v1, %v6126_v56  ;;  %v5837_v4 = vmax.f32 %v5785_v9, %v5787_v13  ;;  %v5495_v31 = vpop.f32.mrb[13].mxu0  ;;  %v5733_v51 = vadd.f32 %v7665_v2, %v13571_v30  ;;  %v6127_v35 = vrot.slane %v5961_v62, 5 }
 0x397   :  { %v6001_v42 = vrot.slane %v5960_v63, 1  ;;  %v6029_v32 = vrot.slane %v5960_v63, 2  ;;  %v5836_v46 = vmax.f32 %v5784_v24, %v5786_v33  ;;  %v13602_v0 = vsel %vm6257_vm8, %v6243_v27, %v6154_v15 }
 0x398   :  { %v6057_v17 = vrot.slane %v5960_v63, 3  ;;  %v5895_v39 = vrot.slane %v5837_v4, 1  ;;  %v5732_v23 = vadd.f32 %v13571_v30, %v5495_v31  ;;  %v6155_v59 = vrot.slane %v5961_v62, 6 }
 0x399   :  { %v6184_v29 = vsel %vm6182_vm3, %v5960_v63, %v6001_v42  ;;  %v5894_v12 = vrot.slane %v5836_v46, 1  ;;  %v7668_v58 = vpop.f32.mrb[14].mxu0  ;;  %v5789_v11 = vmax.f32 %v5733_v51, 0.0 }
 0x39a   :  { %v6199_v44 = vsel %vm6197_vm4, %v6184_v29, %v6029_v32  ;;  %v13613_v54 = vmax.f32 %v5837_v4, %v5895_v39  ;;  %v5735_v19 = vadd.f32 %v7668_v58, %v13571_v30  ;;  %v5505_v25 = vpop.f32.mrb[15].mxu0  ;;  %v5788_v16 = vmax.f32 %v5732_v23, 0.0 }
 0x39b   :  { %v6214_v34 = vsel %vm6212_vm5, %v6199_v44, %v6057_v17  ;;  %v5896_v43 = vsel %vm2114_vm0, %v5894_v12, %v5895_v39  ;;  %v5734_v41 = vadd.f32 %v13571_v30, %v5505_v25 }
 0x39c   :  { %v5791_v28 = vmax.f32 %v5735_v19, 0.0  ;;  %v6100_v7 = vrot.slane %v13613_v54, 4  ;;  %v6128_v6 = vrot.slane %v13613_v54, 5  ;;  %v6156_v31 = vrot.slane %v13613_v54, 6 }
 0x39d   :  { %v4701_v26 = vpop.permute.xlu1 %4700  ;;  %v7671_v48 = vpop.f32.mrb[16].mxu0  ;;  %v5790_v36 = vmax.f32 %v5734_v41, 0.0 }
 0x39e   :  { %v4699_v49 = vpop.permute.xlu0 %4698  ;;  %v4814_v8 = vsel %vm4758_vm1, %v13452_v61, %v4701_v26  ;;  %v6229_v61 = vsel %vm6227_vm6, %v6214_v34, %v6099_v47  ;;  %v5515_v22 = vpop.f32.mrb[17].mxu0  ;;  %v5839_v18 = vmax.f32 %v5789_v11, %v5791_v28  ;;  %v5737_v55 = vadd.f32 %v7671_v48, %v13571_v30 }
 0x39f   :  { %v4813_v52 = vsel %vm4758_vm1, %v4377_v37, %v4699_v49  ;;  %v5962_v37 = vmax.f32 %v5836_v46, %v5896_v43  ;;  %v6244_v3 = vsel %vm6242_vm7, %v6229_v61, %v6127_v35  ;;  %v5838_v1 = vmax.f32 %v5788_v16, %v5790_v36  ;;  %v6280_v35 = vld [vmem:[%s14214_s8 + $0x40] sm:$0xff]  ;;  %v6281_v43 = vld [vmem:[%s14214_s8 + $0x48] sm:$0xff] }
 0x3a0   :  { %7631 = vmatprep.mubr.msk.f32.mxu1 %vm4843_vm2, %v4813_v52  ;;  %7726 = vmatprep.mubr.msk.f32.mxu0 %vm4843_vm2, %v4813_v52  ;;  %v6259_v45 = vsel %vm6257_vm8, %v6244_v3, %v6155_v59  ;;  %v5898_v5 = vrot.slane %v5839_v18, 1  ;;  %v5736_v62 = vadd.f32 %v13571_v30, %v5515_v22  ;;  %v5793_v47 = vmax.f32 %v5737_v55, 0.0 }
 0x3a1   :  { %7632 = vmatmul.mubr.msk.f32.gmra.mrb[20].mxu1 %vm4843_vm2, %v4814_v8  ;;  %7727 = vmatmul.mubr.msk.f32.gmra.mrb[54].mxu0 %vm4843_vm2, %v4814_v8  ;;  %v6002_v40 = vrot.slane %v5962_v37, 1  ;;  %v6030_v53 = vrot.slane %v5962_v37, 2  ;;  %v6058_v50 = vrot.slane %v5962_v37, 3  ;;  %v13631_v57 = vsel %vm2114_vm0, %v6259_v45, 0.0  ;;  %v7674_v27 = vpop.f32.mrb[18].mxu0 }
 0x3a2   :  { %v6317_v15 = vrot.slane %v13631_v57, 1  ;;  %v13643_v33 = vmax.f32 %v5839_v18, %v5898_v5  ;;  %v5897_v2 = vrot.slane %v5838_v1, 1  ;;  %v5739_v42 = vadd.f32 %v7674_v27, %v13571_v30  ;;  %v5525_v32 = vpop.f32.mrb[19].mxu0 }
 0x3a3   :  { %v6185_v56 = vsel %vm6182_vm3, %v5962_v37, %v6002_v40  ;;  %v5738_v38 = vadd.f32 %v13571_v30, %v5525_v32  ;;  %v5792_v51 = vmax.f32 %v5736_v62, 0.0  ;;  %v6283_v40 = vld [vmem:[%s14214_s8 + $0x58] sm:$0xff] }
 0x3a4   :  { %v6200_v9 = vsel %vm6197_vm4, %v6185_v56, %v6030_v53  ;;  %v5899_v46 = vsel %vm2114_vm0, %v5897_v2, %v5898_v5  ;;  %v5795_v39 = vmax.f32 %v5739_v42, 0.0  ;;  %v6101_v12 = vrot.slane %v13643_v33, 4  ;;  %v6284_v2 = vld [vmem:[%s14214_s8 + $0x60] sm:$0xff]  ;;  %v6285_v42 = vld [vmem:[%s14214_s8 + $0x68] sm:$0xff] }
 0x3a5   :  { %v4834_v14 = vpop.permute.xlu1 %4833  ;;  %v6215_v24 = vsel %vm6212_vm5, %v6200_v9, %v6058_v50  ;;  %v5964_v29 = vmax.f32 %v5838_v1, %v5899_v46  ;;  %v5794_v26 = vmax.f32 %v5738_v38, 0.0  ;;  %v6129_v5 = vrot.slane %v13643_v33, 5 }
 0x3a6   :  { %v4832_v60 = vpop.permute.xlu0 %4831  ;;  %v4842_v63 = vsel %vm4758_vm1, %v13497_v10, %v4834_v14  ;;  %v6230_v4 = vsel %vm6227_vm6, %v6215_v24, %v6100_v7  ;;  %v5841_v34 = vmax.f32 %v5793_v47, %v5795_v39  ;;  %v6282_v7 = vld [vmem:[%s14214_s8 + $0x50] sm:$0xff]  ;;  %v6157_v1 = vrot.slane %v13643_v33, 6 }
 0x3a7   :  { %v4841_v13 = vsel %vm4758_vm1, %v4379_v21, %v4832_v60  ;;  %v6318_v21 = vsel %vm2114_vm0, %v6317_v15, %v9868_v20  ;;  %v6245_v10 = vsel %vm6242_vm7, %v6230_v4, %v6128_v6  ;;  %v7677_v17 = vpop.f32.mrb[20].mxu0  ;;  %v6003_v52 = vrot.slane %v5964_v29, 1 }
 0x3a8   :  { %7634 = vmatprep.mubr.msk.f32.mxu1 %vm4843_vm2, %v4841_v13  ;;  %6341 = vrot.lane.b32.xlu0 %v6318_v21, %s8172_s23  ;;  %v5741_v49 = vadd.f32 %v7677_v17, %v13571_v30  ;;  %v5535_v44 = vpop.f32.mrb[21].mxu0  ;;  %v6260_v8 = vsel %vm6257_vm8, %v6245_v10, %v6156_v31  ;;  %v6031_v54 = vrot.slane %v5964_v29, 2  ;;  %v6059_v58 = vrot.slane %v5964_v29, 3 }
 0x3a9   :  { %7635 = vmatmul.mubr.msk.f32.gmra.mrb[22].mxu1 %vm4843_vm2, %v4842_v63  ;;  %v5740_v23 = vadd.f32 %v13571_v30, %v5535_v44  ;;  %v5840_v19 = vmax.f32 %v5792_v51, %v5794_v26  ;;  %v13666_v37 = vsel %vm2114_vm0, %v6260_v8, 0.0  ;;  %v6186_v11 = vsel %vm6182_vm3, %v5964_v29, %v6003_v52 }
 0x3aa   :  { %v5797_v25 = vmax.f32 %v5741_v49, 0.0  ;;  %v5901_v28 = vrot.slane %v5841_v34, 1  ;;  %v6319_v3 = vrot.slane %v13666_v37, 1  ;;  %v6201_v53 = vsel %vm6197_vm4, %v6186_v11, %v6031_v54 }
 0x3ab   :  { %v5796_v61 = vmax.f32 %v5740_v23, 0.0  ;;  %v7680_v59 = vpop.f32.mrb[22].mxu0  ;;  %v5900_v16 = vrot.slane %v5840_v19, 1  ;;  %v7924_v6 = vpack.c.bf16 %v6281_v43, %v6280_v35  ;;  %v6216_v50 = vsel %vm6212_vm5, %v6201_v53, %v6059_v58  ;;  %v6287_v35 = vld [vmem:[%s14214_s8 + $0x78] sm:$0xff] }
 0x3ac   :  { %v5743_v41 = vadd.f32 %v7680_v59, %v13571_v30  ;;  %v5545_v48 = vpop.f32.mrb[23].mxu0  ;;  %v13679_v18 = vmax.f32 %v5841_v34, %v5901_v28  ;;  %v6320_v45 = vsel %vm2114_vm0, %v6319_v3, %v9868_v20  ;;  %v6231_v60 = vsel %vm6227_vm6, %v6216_v50, %v6101_v12  ;;  %v6286_v34 = vld [vmem:[%s14214_s8 + $0x70] sm:$0xff] }
 0x3ad   :  { %v5742_v22 = vadd.f32 %v13571_v30, %v5545_v48  ;;  %v5902_v56 = vsel %vm2114_vm0, %v5900_v16, %v5901_v28  ;;  %6343 = vrot.lane.b32.xlu1 %v6320_v45, %s8172_s23  ;;  %7925 = vmatprep.subr.bf16.mxu1 %v7924_v6  ;;  %v7928_v9 = vpack.c.bf16 %v6283_v40, %v6282_v7 }
 0x3ae   :  { %v5799_v36 = vmax.f32 %v5743_v41, 0.0  ;;  %v5966_v62 = vmax.f32 %v5840_v19, %v5902_v56  ;;  %7927 = vmatpush3.bf16.msra.mxu1 %v7924_v6  ;;  %v6102_v13 = vrot.slane %v13679_v18, 4  ;;  %v6246_v38 = vsel %vm6242_vm7, %v6231_v60, %v6129_v5 }
 0x3af   :  { %v5798_v55 = vmax.f32 %v5742_v22, 0.0  ;;  %v7683_v14 = vpop.f32.mrb[24].mxu0  ;;  %7929 = vmatprep.subr.bf16.mxu1 %v7928_v9  ;;  %v6261_v26 = vsel %vm6257_vm8, %v6246_v38, %v6157_v1  ;;  %v7932_v49 = vpack.c.bf16 %v6285_v42, %v6284_v2  ;;  %v6130_v43 = vrot.slane %v13679_v18, 5 }
 0x3b0   :  { %v5555_v63 = vpop.f32.mrb[25].mxu0  ;;  %v5843_v27 = vmax.f32 %v5797_v25, %v5799_v36  ;;  %v5745_v24 = vadd.f32 %v7683_v14, %v13571_v30  ;;  %v6004_v32 = vrot.slane %v5966_v62, 1  ;;  %v6032_v33 = vrot.slane %v5966_v62, 2 }
 0x3b1   :  { %v5842_v15 = vmax.f32 %v5796_v61, %v5798_v55  ;;  %v5744_v4 = vadd.f32 %v13571_v30, %v5555_v63  ;;  %v6060_v21 = vrot.slane %v5966_v62, 3  ;;  %v13706_v54 = vsel %vm2114_vm0, %v6261_v26, 0.0 }
 0x3b2   :  { %v5904_v10 = vrot.slane %v5843_v27, 1  ;;  %v5801_v46 = vmax.f32 %v5745_v24, 0.0  ;;  %v6187_v17 = vsel %vm6182_vm3, %v5966_v62, %v6004_v32  ;;  %7931 = vmatpush3.bf16.msra.mxu1 %v7928_v9  ;;  %v6158_v19 = vrot.slane %v13679_v18, 6 }
 0x3b3   :  { %v5903_v31 = vrot.slane %v5842_v15, 1  ;;  %v7686_v47 = vpop.f32.mrb[26].mxu0  ;;  %v6202_v44 = vsel %vm6197_vm4, %v6187_v17, %v6032_v33  ;;  %7933 = vmatprep.subr.bf16.mxu1 %v7932_v49  ;;  %v5800_v25 = vmax.f32 %v5744_v4, 0.0  ;;  %v6321_v3 = vrot.slane %v13706_v54, 1 }
 0x3b4   :  { %v5747_v29 = vadd.f32 %v7686_v47, %v13571_v30  ;;  %v5565_v39 = vpop.f32.mrb[27].mxu0  ;;  %v5969_v12 = vmax.f32 %v5843_v27, %v5904_v10  ;;  %v6217_v58 = vsel %vm6212_vm5, %v6202_v44, %v6060_v21  ;;  %v7936_v40 = vpack.c.bf16 %v6287_v35, %v6286_v34 }
 0x3b5   :  { %v5905_v51 = vsel %vm2114_vm0, %v5903_v31, %v5904_v10  ;;  %v5746_v23 = vadd.f32 %v13571_v30, %v5565_v39  ;;  %v6232_v7 = vsel %vm6227_vm6, %v6217_v58, %v6102_v13  ;;  %v6322_v45 = vsel %vm2114_vm0, %v6321_v3, %v9868_v20 }
 0x3b6   :  { %v5968_v8 = vmax.f32 %v5842_v15, %v5905_v51  ;;  %v5803_v52 = vmax.f32 %v5747_v29, 0.0  ;;  %v6103_v59 = vrot.slane %v5969_v12, 4  ;;  %7935 = vmatpush3.bf16.msra.mxu1 %v7932_v49  ;;  %v6247_v6 = vsel %vm6242_vm7, %v6232_v7, %v6130_v43  ;;  %6345 = vrot.lane.b32.xlu0 %v6322_v45, %s8172_s23 }
 0x3b7   :  { %v5802_v61 = vmax.f32 %v5746_v23, 0.0  ;;  %v6262_v50 = vsel %vm6257_vm8, %v6247_v6, %v6158_v19  ;;  %7937 = vmatprep.subr.bf16.mxu1 %v7936_v40  ;;  %v6131_v14 = vrot.slane %v5969_v12, 5  ;;  %v6159_v1 = vrot.slane %v5969_v12, 6 }
 0x3b8   :  { %v6005_v11 = vrot.slane %v5968_v8, 1  ;;  %v6033_v28 = vrot.slane %v5968_v8, 2  ;;  %v5845_v41 = vmax.f32 %v5801_v46, %v5803_v52  ;;  %v6061_v53 = vrot.slane %v5968_v8, 3 }
 0x3b9   :  { %v5844_v48 = vmax.f32 %v5800_v25, %v5802_v61  ;;  %v13727_v56 = vsel %vm2114_vm0, %v6262_v50, 0.0 }
 0x3ba   :  { %v6188_v16 = vsel %vm6182_vm3, %v5968_v8, %v6005_v11  ;;  %v5907_v22 = vrot.slane %v5845_v41, 1  ;;  %7939 = vmatpush3.bf16.msra.mxu1 %v7936_v40  ;;  %v6323_v9 = vrot.slane %v13727_v56, 1 }
 0x3bb   :  { %v6203_v18 = vsel %vm6197_vm4, %v6188_v16, %v6033_v28  ;;  %v5906_v36 = vrot.slane %v5844_v48, 1 }
 0x3bc   :  { %v6218_v55 = vsel %vm6212_vm5, %v6203_v18, %v6061_v53  ;;  %v5971_v63 = vmax.f32 %v5845_v41, %v5907_v22  ;;  %v6324_v13 = vsel %vm2114_vm0, %v6323_v9, %v9868_v20 }
 0x3bd   :  { %v5908_v60 = vsel %vm2114_vm0, %v5906_v36, %v5907_v22  ;;  %v6233_v5 = vsel %vm6227_vm6, %v6218_v55, %v6103_v59  ;;  %6347 = vrot.lane.b32.xlu1 %v6324_v13, %s8172_s23 }
 0x3be   :  { %v5970_v62 = vmax.f32 %v5844_v48, %v5908_v60  ;;  %v6248_v27 = vsel %vm6242_vm7, %v6233_v5, %v6131_v14  ;;  %v6104_v38 = vrot.slane %v5971_v63, 4  ;;  %v6132_v10 = vrot.slane %v5971_v63, 5 }
 0x3bf   :  { %v6263_v2 = vsel %vm6257_vm8, %v6248_v27, %v6159_v1  ;;  %v6160_v47 = vrot.slane %v5971_v63, 6 }
 0x3c0   :  { %v6006_v15 = vrot.slane %v5970_v62, 1  ;;  %v6034_v24 = vrot.slane %v5970_v62, 2  ;;  %v13739_v42 = vsel %vm2114_vm0, %v6263_v2, 0.0  ;;  %v6062_v32 = vrot.slane %v5970_v62, 3 }
 0x3c1   :  { %v6325_v4 = vrot.slane %v13739_v42, 1 }
 0x3c2   :  { %v6189_v33 = vsel %vm6182_vm3, %v5970_v62, %v6006_v15 }
 0x3c3   :  { %v6204_v21 = vsel %vm6197_vm4, %v6189_v33, %v6034_v24  ;;  %v6326_v31 = vsel %vm2114_vm0, %v6325_v4, %v9868_v20 }
 0x3c4   :  { %v6219_v46 = vsel %vm6212_vm5, %v6204_v21, %v6062_v32  ;;  %6349 = vrot.lane.b32.xlu0 %v6326_v31, %s8172_s23 }
 0x3c5   :  { %v6234_v17 = vsel %vm6227_vm6, %v6219_v46, %v6104_v38 }
 0x3c6   :  { %v6249_v29 = vsel %vm6242_vm7, %v6234_v17, %v6132_v10 }
 0x3c7   :  { %v6264_v39 = vsel %vm6257_vm8, %v6249_v29, %v6160_v47 }
 0x3c8   :  { %v13752_v26 = vsel %vm2114_vm0, %v6264_v39, 0.0 }
 0x3c9   :  { %v6389_v49 = vrot.slane %v13752_v26, 1 }
 0x3cb   :  { %v6390_v44 = vsel %vm2114_vm0, %v6389_v49, %v9868_v20 }
 0x3cc   :  { %6393 = vrot.lane.b32.xlu1 %v6390_v44, %s8172_s23 }
 0x3fc   :  { %v7689_v12 = vpop.f32.mrb[28].mxu0 }
 0x3fd   :  { %v5575_v51 = vpop.f32.mrb[29].mxu0  ;;  %v7603_v23 = vpop.f32.mrb[0].mxu1  ;;  %v5749_v52 = vadd.f32 %v7689_v12, %v13571_v30 }
 0x3fe   :  { %v5238_v8 = vpop.f32.mrb[1].mxu1  ;;  %v5748_v58 = vadd.f32 %v13571_v30, %v5575_v51 }
 0x3ff   :  { %v5805_v59 = vmax.f32 %v5749_v52, 0.0 }
 0x400   :  { %v7692_v34 = vpop.f32.mrb[30].mxu0  ;;  %v5804_v28 = vmax.f32 %v5748_v58, 0.0 }
 0x401   :  { %v5751_v35 = vadd.f32 %v7692_v34, %v13571_v30  ;;  %v5585_v43 = vpop.f32.mrb[31].mxu0  ;;  %v7606_v19 = vpop.f32.mrb[2].mxu1 }
 0x402   :  { %v5750_v25 = vadd.f32 %v13571_v30, %v5585_v43  ;;  %v5248_v61 = vpop.f32.mrb[3].mxu1 }
 0x403   :  { %v5807_v11 = vmax.f32 %v5751_v35, 0.0 }
 0x404   :  { %v5806_v41 = vmax.f32 %v5750_v25, 0.0  ;;  %v7695_v48 = vpop.f32.mrb[32].mxu0 }
 0x405   :  { %v5847_v3 = vmax.f32 %v5805_v59, %v5807_v11  ;;  %v5601_v7 = vadd.f32 %v7695_v48, %v7603_v23  ;;  %v5595_v40 = vpop.f32.mrb[33].mxu0  ;;  %v7609_v53 = vpop.f32.mrb[4].mxu1 }
 0x406   :  { %v5846_v16 = vmax.f32 %v5804_v28, %v5806_v41  ;;  %v5596_v22 = vadd.f32 %v5595_v40, %v5238_v8  ;;  %v5258_v6 = vpop.f32.mrb[5].mxu1 }
 0x407   :  { %v5910_v18 = vrot.slane %v5847_v3, 1  ;;  %v5753_v50 = vadd.f32 %v13571_v30, %v5601_v7 }
 0x408   :  { %v5909_v36 = vrot.slane %v5846_v16, 1  ;;  %v7698_v45 = vpop.f32.mrb[34].mxu0  ;;  %v5752_v5 = vadd.f32 %v13571_v30, %v5596_v22 }
 0x409   :  { %v5611_v55 = vadd.f32 %v7698_v45, %v7606_v19  ;;  %v5605_v14 = vpop.f32.mrb[35].mxu0  ;;  %v7612_v60 = vpop.f32.mrb[6].mxu1  ;;  %v5973_v13 = vmax.f32 %v5847_v3, %v5910_v18  ;;  %v5809_v33 = vmax.f32 %v5753_v50, 0.0 }
 0x40a   :  { %v5911_v9 = vsel %vm2114_vm0, %v5909_v36, %v5910_v18  ;;  %v5606_v1 = vadd.f32 %v5605_v14, %v5248_v61  ;;  %v5268_v62 = vpop.f32.mrb[7].mxu1  ;;  %v5808_v10 = vmax.f32 %v5752_v5, 0.0 }
 0x40b   :  { %v5972_v63 = vmax.f32 %v5846_v16, %v5911_v9  ;;  %v5755_v27 = vadd.f32 %v13571_v30, %v5611_v55  ;;  %v6105_v8 = vrot.slane %v5973_v13, 4  ;;  %v6133_v52 = vrot.slane %v5973_v13, 5 }
 0x40c   :  { %v5754_v15 = vadd.f32 %v13571_v30, %v5606_v1  ;;  %v7701_v24 = vpop.f32.mrb[36].mxu0  ;;  %v6161_v28 = vrot.slane %v5973_v13, 6 }
 0x40d   :  { %v6007_v2 = vrot.slane %v5972_v63, 1  ;;  %v6035_v32 = vrot.slane %v5972_v63, 2  ;;  %v5621_v4 = vadd.f32 %v7701_v24, %v7609_v53  ;;  %v5615_v38 = vpop.f32.mrb[37].mxu0  ;;  %v7615_v21 = vpop.f32.mrb[8].mxu1  ;;  %v5811_v31 = vmax.f32 %v5755_v27, 0.0 }
 0x40e   :  { %v5810_v46 = vmax.f32 %v5754_v15, 0.0  ;;  %v5616_v47 = vadd.f32 %v5615_v38, %v5258_v6  ;;  %v5278_v17 = vpop.f32.mrb[9].mxu1  ;;  %v6063_v29 = vrot.slane %v5972_v63, 3 }
 0x40f   :  { %v6190_v39 = vsel %vm6182_vm3, %v5972_v63, %v6007_v2  ;;  %v5849_v44 = vmax.f32 %v5809_v33, %v5811_v31  ;;  %v5757_v51 = vadd.f32 %v13571_v30, %v5621_v4 }
 0x410   :  { %v6205_v49 = vsel %vm6197_vm4, %v6190_v39, %v6035_v32  ;;  %v5848_v12 = vmax.f32 %v5808_v10, %v5810_v46  ;;  %v7704_v23 = vpop.f32.mrb[38].mxu0  ;;  %v5756_v61 = vadd.f32 %v13571_v30, %v5616_v47 }
 0x411   :  { %v5631_v58 = vadd.f32 %v7704_v23, %v7612_v60  ;;  %v5625_v34 = vpop.f32.mrb[39].mxu0  ;;  %v7618_v35 = vpop.f32.mrb[10].mxu1  ;;  %v6220_v43 = vsel %vm6212_vm5, %v6205_v49, %v6063_v29  ;;  %v5913_v19 = vrot.slane %v5849_v44, 1  ;;  %v5813_v7 = vmax.f32 %v5757_v51, 0.0 }
 0x412   :  { %v5912_v25 = vrot.slane %v5848_v12, 1  ;;  %v5626_v59 = vadd.f32 %v5625_v34, %v5268_v62  ;;  %v5288_v11 = vpop.f32.mrb[11].mxu1  ;;  %v6235_v48 = vsel %vm6227_vm6, %v6220_v43, %v6105_v8  ;;  %v5812_v55 = vmax.f32 %v5756_v61, 0.0 }
 0x413   :  { %v5759_v41 = vadd.f32 %v13571_v30, %v5631_v58  ;;  %v6250_v16 = vsel %vm6242_vm7, %v6235_v48, %v6133_v52  ;;  %v5975_v50 = vmax.f32 %v5849_v44, %v5913_v19 }
 0x414   :  { %v5914_v3 = vsel %vm2114_vm0, %v5912_v25, %v5913_v19  ;;  %v5758_v40 = vadd.f32 %v13571_v30, %v5626_v59  ;;  %v7707_v53 = vpop.f32.mrb[40].mxu0  ;;  %v13778_v45 = vsel %vm6257_vm8, %v6250_v16, %v6161_v28 }
 0x415   :  { %v5974_v22 = vmax.f32 %v5848_v12, %v5914_v3  ;;  %v5815_v6 = vmax.f32 %v5759_v41, 0.0  ;;  %v5641_v18 = vadd.f32 %v7707_v53, %v7615_v21  ;;  %v5635_v36 = vpop.f32.mrb[41].mxu0  ;;  %v6106_v33 = vrot.slane %v5975_v50, 4 }
 0x416   :  { %v5814_v14 = vmax.f32 %v5758_v40, 0.0  ;;  %v5636_v63 = vadd.f32 %v5635_v36, %v5278_v17  ;;  %v6134_v46 = vrot.slane %v5975_v50, 5  ;;  %v6162_v44 = vrot.slane %v5975_v50, 6 }
 0x417   :  { %v6008_v60 = vrot.slane %v5974_v22, 1  ;;  %v6036_v9 = vrot.slane %v5974_v22, 2  ;;  %v5851_v5 = vmax.f32 %v5813_v7, %v5815_v6  ;;  %v6064_v1 = vrot.slane %v5974_v22, 3 }
 0x418   :  { %v5850_v62 = vmax.f32 %v5812_v55, %v5814_v14  ;;  %v7710_v13 = vpop.f32.mrb[42].mxu0  ;;  %v5761_v24 = vadd.f32 %v13571_v30, %v5641_v18  ;;  %v5760_v17 = vadd.f32 %v13571_v30, %v5636_v63 }
 0x419   :  { %v6191_v27 = vsel %vm6182_vm3, %v5974_v22, %v6008_v60  ;;  %v5916_v15 = vrot.slane %v5851_v5, 1  ;;  %v5645_v2 = vpop.f32.mrb[43].mxu0  ;;  %v5651_v32 = vadd.f32 %v7710_v13, %v7618_v35 }
 0x41a   :  { %v6206_v4 = vsel %vm6197_vm4, %v6191_v27, %v6036_v9  ;;  %v5915_v38 = vrot.slane %v5850_v62, 1  ;;  %v5646_v10 = vadd.f32 %v5645_v2, %v5288_v11  ;;  %v6342_v49 = vpop.permute.xlu0 %6341  ;;  %v5817_v23 = vmax.f32 %v5761_v24, 0.0 }
 0x41b   :  { %v5763_v21 = vadd.f32 %v13571_v30, %v5651_v32  ;;  %v6221_v31 = vsel %vm6212_vm5, %v6206_v4, %v6064_v1  ;;  %v5977_v12 = vmax.f32 %v5851_v5, %v5916_v15  ;;  %v13792_v35 = vsel %vm4843_vm2, %v13631_v57, %v6342_v49 }
 0x41c   :  { %v5917_v47 = vsel %vm2114_vm0, %v5915_v38, %v5916_v15  ;;  %v7713_v29 = vpop.f32.mrb[44].mxu0  ;;  %v6236_v39 = vsel %vm6227_vm6, %v6221_v31, %v6106_v33  ;;  %v5762_v58 = vadd.f32 %v13571_v30, %v5646_v10  ;;  %7745 = vmatprep.mubr.msk.f32.mxu1 %vm6401_vm9, %v13792_v35  ;;  %v5816_v61 = vmax.f32 %v5760_v17, 0.0 }
 0x41d   :  { %v5976_v51 = vmax.f32 %v5850_v62, %v5917_v47  ;;  %v5655_v8 = vpop.f32.mrb[45].mxu0  ;;  %v5819_v52 = vmax.f32 %v5763_v21, 0.0  ;;  %v6251_v34 = vsel %vm6242_vm7, %v6236_v39, %v6134_v46  ;;  %v6107_v57 = vrot.slane %v5977_v12, 4 }
 0x41e   :  { %v6266_v25 = vsel %vm6257_vm8, %v6251_v34, %v6162_v44  ;;  %v5818_v11 = vmax.f32 %v5762_v58, 0.0  ;;  %v6135_v16 = vrot.slane %v5977_v12, 5  ;;  %v6163_v55 = vrot.slane %v5977_v12, 6 }
 0x41f   :  { %v6009_v43 = vrot.slane %v5976_v51, 1  ;;  %v6037_v19 = vrot.slane %v5976_v51, 2  ;;  %v5853_v59 = vmax.f32 %v5817_v23, %v5819_v52  ;;  %v13798_v28 = vsel %vm2114_vm0, %v6266_v25, 0.0  ;;  %v6344_v50 = vpop.permute.xlu1 %6343 }
 0x420   :  { %v6065_v41 = vrot.slane %v5976_v51, 3  ;;  %v6329_v3 = vrot.slane %v13798_v28, 1  ;;  %v5852_v53 = vmax.f32 %v5816_v61, %v5818_v11  ;;  %v13811_v5 = vsel %vm4843_vm2, %v13666_v37, %v6344_v50 }
 0x421   :  { %v6192_v48 = vsel %vm6182_vm3, %v5976_v51, %v6009_v43  ;;  %v5919_v40 = vrot.slane %v5853_v59, 1  ;;  %7746 = vmatmul.mubr.msk.f32.vlgmr.msra.gmra.mrb[24].mxu1 %vm6401_vm9, %v13811_v5 }
 0x422   :  { %v6207_v7 = vsel %vm6197_vm4, %v6192_v48, %v6037_v19  ;;  %v6330_v22 = vsel %vm2114_vm0, %v6329_v3, %v9868_v20  ;;  %v5918_v18 = vrot.slane %v5852_v53, 1  ;;  %v7621_v60 = vpop.f32.mrb[12].mxu1  ;;  %v7716_v9 = vpop.f32.mrb[46].mxu0 }
 0x423   :  { %v6222_v6 = vsel %vm6212_vm5, %v6207_v7, %v6065_v41  ;;  %6353 = vrot.lane.b32.xlu0 %v6330_v22, %s8172_s23  ;;  %v5298_v62 = vpop.f32.mrb[13].mxu1  ;;  %v5665_v63 = vpop.f32.mrb[47].mxu0  ;;  %v5661_v15 = vadd.f32 %v7713_v29, %v7621_v60  ;;  %v5979_v2 = vmax.f32 %v5853_v59, %v5919_v40 }
 0x424   :  { %v6237_v36 = vsel %vm6227_vm6, %v6222_v6, %v6107_v57  ;;  %v5920_v1 = vsel %vm2114_vm0, %v5918_v18, %v5919_v40  ;;  %v5656_v24 = vadd.f32 %v5655_v8, %v5298_v62 }
 0x425   :  { %v6252_v14 = vsel %vm6242_vm7, %v6237_v36, %v6135_v16  ;;  %v5978_v13 = vmax.f32 %v5852_v53, %v5920_v1  ;;  %v6108_v31 = vrot.slane %v5979_v2, 4  ;;  %v6136_v47 = vrot.slane %v5979_v2, 5 }
 0x426   :  { %v6267_v27 = vsel %vm6257_vm8, %v6252_v14, %v6163_v55  ;;  %v6164_v29 = vrot.slane %v5979_v2, 6  ;;  %v5764_v11 = vadd.f32 %v13571_v30, %v5656_v24 }
 0x427   :  { %v13818_v32 = vsel %vm2114_vm0, %v6267_v27, 0.0  ;;  %v6010_v33 = vrot.slane %v5978_v13, 1  ;;  %v6038_v4 = vrot.slane %v5978_v13, 2  ;;  %v6066_v38 = vrot.slane %v5978_v13, 3 }
 0x428   :  { %v6331_v37 = vrot.slane %v13818_v32, 1  ;;  %v6346_v51 = vpop.permute.xlu0 %6345  ;;  %v5820_v53 = vmax.f32 %v5764_v11, 0.0 }
 0x429   :  { %v6193_v21 = vsel %vm6182_vm3, %v5978_v13, %v6010_v33  ;;  %v13836_v8 = vsel %vm4843_vm2, %v13706_v54, %v6346_v51  ;;  %v5765_v54 = vadd.f32 %v13571_v30, %v5661_v15 }
 0x42a   :  { %v6332_v10 = vsel %vm2114_vm0, %v6331_v37, %v9868_v20  ;;  %v6208_v46 = vsel %vm6197_vm4, %v6193_v21, %v6038_v4  ;;  %7748 = vmatprep.mubr.msk.f32.mxu1 %vm6401_vm9, %v13836_v8 }
 0x42b   :  { %6355 = vrot.lane.b32.xlu1 %v6332_v10, %s8172_s23  ;;  %v6223_v17 = vsel %vm6212_vm5, %v6208_v46, %v6066_v38  ;;  %v5821_v7 = vmax.f32 %v5765_v54, 0.0 }
 0x42c   :  { %v6238_v39 = vsel %vm6227_vm6, %v6223_v17, %v6108_v31 }
 0x42d   :  { %v6253_v49 = vsel %vm6242_vm7, %v6238_v39, %v6136_v47 }
 0x42e   :  { %v6268_v44 = vsel %vm6257_vm8, %v6253_v49, %v6164_v29  ;;  %v13879_v49 = vld [vmem:[%s14213_s7] ss:$0 sm:$0xff] }
 0x42f   :  { %v13831_v12 = vsel %vm2114_vm0, %v6268_v44, 0.0  ;;  %v6348_v58 = vpop.permute.xlu1 %6347 }
 0x430   :  { %v6333_v23 = vrot.slane %v13831_v12, 1  ;;  %v13845_v34 = vsel %vm4843_vm2, %v13727_v56, %v6348_v58 }
 0x431   :  { %7749 = vmatmul.mubr.msk.f32.gmra.mrb[26].mxu1 %vm6401_vm9, %v13845_v34 }
 0x432   :  { %v6334_v52 = vsel %vm2114_vm0, %v6333_v23, %v9868_v20 }
 0x433   :  { %6357 = vrot.lane.b32.xlu0 %v6334_v52, %s8172_s23 }
 0x436   :  { %v6350_v48 = vpop.permute.xlu0 %6349 }
 0x437   :  { %v13854_v56 = vsel %vm4843_vm2, %v13739_v42, %v6350_v48 }
 0x438   :  { %v7624_v43 = vpop.f32.mrb[14].mxu1  ;;  %v7719_v19 = vpop.f32.mrb[48].mxu0  ;;  %7751 = vmatprep.mubr.msk.f32.mxu1 %vm6401_vm9, %v13854_v56 }
 0x439   :  { %v5671_v25 = vadd.f32 %v7716_v9, %v7624_v43  ;;  %v5308_v61 = vpop.f32.mrb[15].mxu1  ;;  %v5675_v59 = vpop.f32.mrb[49].mxu0 }
 0x43a   :  { %v5666_v41 = vadd.f32 %v5665_v63, %v5308_v61 }
 0x43b   :  { %v5767_v3 = vadd.f32 %v13571_v30, %v5671_v25 }
 0x43c   :  { %v5766_v57 = vadd.f32 %v13571_v30, %v5666_v41 }
 0x43d   :  { %v5823_v40 = vmax.f32 %v5767_v3, 0.0 }
 0x43e   :  { %v5822_v16 = vmax.f32 %v5766_v57, 0.0  ;;  %v6394_v6 = vpop.permute.xlu1 %6393 }
 0x43f   :  { %v5855_v22 = vmax.f32 %v5821_v7, %v5823_v40  ;;  %v6399_v36 = vsel %vm4843_vm2, %v13752_v26, %v6394_v6 }
 0x440   :  { %v5854_v18 = vmax.f32 %v5820_v53, %v5822_v16  ;;  %7752 = vmatmul.mubr.msk.f32.gmra.mrb[28].mxu1 %vm6401_vm9, %v6399_v36 }
 0x441   :  { %v5922_v50 = vrot.slane %v5855_v22, 1 }
 0x442   :  { %v5921_v42 = vrot.slane %v5854_v18, 1 }
 0x443   :  { %v5981_v14 = vmax.f32 %v5855_v22, %v5922_v50 }
 0x444   :  { %v5923_v55 = vsel %vm2114_vm0, %v5921_v42, %v5922_v50 }
 0x445   :  { %v5980_v30 = vmax.f32 %v5854_v18, %v5923_v55  ;;  %v6109_v63 = vrot.slane %v5981_v14, 4  ;;  %v6137_v27 = vrot.slane %v5981_v14, 5  ;;  %v6165_v26 = vrot.slane %v5981_v14, 6 }
 0x447   :  { %v6011_v60 = vrot.slane %v5980_v30, 1  ;;  %v6039_v9 = vrot.slane %v5980_v30, 2  ;;  %v6067_v1 = vrot.slane %v5980_v30, 3 }
 0x449   :  { %v6194_v62 = vsel %vm6182_vm3, %v5980_v30, %v6011_v60 }
 0x44a   :  { %v6209_v13 = vsel %vm6197_vm4, %v6194_v62, %v6039_v9  ;;  %v6272_v9 = vld [vmem:[%s14214_s8] sm:$0xff]  ;;  %v6274_v62 = vld [vmem:[%s14214_s8 + $0x10] sm:$0xff] }
 0x44b   :  { %v6224_v15 = vsel %vm6212_vm5, %v6209_v13, %v6067_v1  ;;  %v6273_v1 = vld [vmem:[%s14214_s8 + $0x8] sm:$0xff] }
 0x44c   :  { %v6239_v33 = vsel %vm6227_vm6, %v6224_v15, %v6109_v63  ;;  %v7940_v15 = vpack.c.bf16 %v6273_v1, %v6272_v9 }
 0x44d   :  { %v7627_v24 = vpop.f32.mrb[16].mxu1  ;;  %v7722_v2 = vpop.f32.mrb[50].mxu0  ;;  %v6254_v21 = vsel %vm6242_vm7, %v6239_v33, %v6137_v27 }
 0x44e   :  { %v5681_v4 = vadd.f32 %v7719_v19, %v7627_v24  ;;  %v5318_v37 = vpop.f32.mrb[17].mxu1  ;;  %v5685_v38 = vpop.f32.mrb[51].mxu0  ;;  %v6269_v31 = vsel %vm6257_vm8, %v6254_v21, %v6165_v26  ;;  %v6275_v26 = vld [vmem:[%s14214_s8 + $0x18] sm:$0xff]  ;;  %7941 = vmatprep.subr.bf16.mxu1 %v7940_v15 }
 0x44f   :  { %v5676_v10 = vadd.f32 %v5675_v59, %v5318_v37  ;;  %v13870_v46 = vsel %vm2114_vm0, %v6269_v31, 0.0  ;;  %v7944_v33 = vpack.c.bf16 %v6275_v26, %v6274_v62  ;;  %v6277_v37 = vld [vmem:[%s14214_s8 + $0x28] sm:$0xff]  ;;  %7943 = vmatpush3.bf16.msra.mxu1 %v7940_v15  ;;  %v13915_v31 = vsel %vm2114_vm0, %v13602_v0, 0.0 }
 0x450   :  { %v6335_v47 = vrot.slane %v13870_v46, 1  ;;  %v5769_v44 = vadd.f32 %v13879_v49, %v5681_v4  ;;  %v6276_v4 = vld [vmem:[%s14214_s8 + $0x20] sm:$0xff]  ;;  %v6315_v0 = vrot.slane %v13915_v31, 1 }
 0x451   :  { %v5768_v58 = vadd.f32 %v13879_v49, %v5676_v10  ;;  %7945 = vmatprep.subr.bf16.mxu1 %v7944_v33 }
 0x452   :  { %v6336_v17 = vsel %vm2114_vm0, %v6335_v47, %v9868_v20  ;;  %v5825_v25 = vmax.f32 %v5769_v44, 0.0  ;;  %v7948_v47 = vpack.c.bf16 %v6277_v37, %v6276_v4 }
 0x453   :  { %6359 = vrot.lane.b32.xlu1 %v6336_v17, %s8172_s23  ;;  %v5824_v59 = vmax.f32 %v5768_v58, 0.0  ;;  %7947 = vmatpush3.bf16.msra.mxu1 %v7944_v33 }
 0x454   :  { %7949 = vmatprep.subr.bf16.mxu1 %v7948_v47 }
 0x457   :  { %7951 = vmatpush3.bf16.msra.mxu1 %v7948_v47 }
 0x462   :  { %v7630_v29 = vpop.f32.mrb[18].mxu1  ;;  %v7725_v39 = vpop.f32.mrb[52].mxu0 }
 0x463   :  { %v5691_v51 = vadd.f32 %v7722_v2, %v7630_v29  ;;  %v5328_v23 = vpop.f32.mrb[19].mxu1  ;;  %v5695_v52 = vpop.f32.mrb[53].mxu0  ;;  %v6278_v29 = vld [vmem:[%s14214_s8 + $0x30] sm:$0xff] }
 0x464   :  { %v5686_v43 = vadd.f32 %v5685_v38, %v5328_v23 }
 0x465   :  { %v5771_v19 = vadd.f32 %v13879_v49, %v5691_v51 }
 0x466   :  { %v5770_v54 = vadd.f32 %v13879_v49, %v5686_v43 }
 0x467   :  { %v5827_v61 = vmax.f32 %v5771_v19, 0.0 }
 0x468   :  { %v5826_v11 = vmax.f32 %v5770_v54, 0.0 }
 0x469   :  { %v5857_v41 = vmax.f32 %v5825_v25, %v5827_v61 }
 0x46a   :  { %v5856_v48 = vmax.f32 %v5824_v59, %v5826_v11  ;;  %v6316_v11 = vsel %vm2114_vm0, %v6315_v0, %v9868_v20  ;;  %v6818_v0 = vld [vmem:[%s14216_s10 + $0xb0] sm:$0xff] }
 0x46b   :  { %v5925_v3 = vrot.slane %v5857_v41, 1 }
 0x46c   :  { %v5924_v57 = vrot.slane %v5856_v48, 1 }
 0x46d   :  { %v5983_v53 = vmax.f32 %v5857_v41, %v5925_v3 }
 0x46e   :  { %v5926_v7 = vsel %vm2114_vm0, %v5924_v57, %v5925_v3 }
 0x46f   :  { %v5982_v40 = vmax.f32 %v5856_v48, %v5926_v7  ;;  %v6110_v42 = vrot.slane %v5983_v53, 4  ;;  %v6138_v63 = vrot.slane %v5983_v53, 5  ;;  %v6166_v24 = vrot.slane %v5983_v53, 6 }
 0x471   :  { %v6012_v16 = vrot.slane %v5982_v40, 1  ;;  %v6040_v22 = vrot.slane %v5982_v40, 2  ;;  %v6068_v6 = vrot.slane %v5982_v40, 3 }
 0x473   :  { %v6195_v18 = vsel %vm6182_vm3, %v5982_v40, %v6012_v16 }
 0x474   :  { %v7633_v36 = vpop.f32.mrb[20].mxu1  ;;  %v7728_v50 = vpop.f32.mrb[54].mxu0  ;;  %v6210_v55 = vsel %vm6197_vm4, %v6195_v18, %v6040_v22 }
 0x475   :  { %v5701_v30 = vadd.f32 %v7725_v39, %v7633_v36  ;;  %v5338_v14 = vpop.f32.mrb[21].mxu1  ;;  %v5705_v60 = vpop.f32.mrb[55].mxu0  ;;  %v6225_v27 = vsel %vm6212_vm5, %v6210_v55, %v6068_v6  ;;  %v6279_v39 = vld [vmem:[%s14214_s8 + $0x38] sm:$0xff] }
 0x476   :  { %v5696_v13 = vadd.f32 %v5695_v52, %v5338_v14  ;;  %v6240_v2 = vsel %vm6227_vm6, %v6225_v27, %v6110_v42  ;;  %v7952_v54 = vpack.c.bf16 %v6279_v39, %v6278_v29 }
 0x477   :  { %v6255_v38 = vsel %vm6242_vm7, %v6240_v2, %v6138_v63  ;;  %v5773_v51 = vadd.f32 %v13879_v49, %v5701_v30 }
 0x478   :  { %v6270_v21 = vsel %vm6257_vm8, %v6255_v38, %v6166_v24  ;;  %v5772_v43 = vadd.f32 %v13879_v49, %v5696_v13  ;;  %7953 = vmatprep.subr.bf16.mxu1 %v7952_v54  ;;  %v6296_v13 = vsel %vm2114_vm0, %v13778_v45, 0.0 }
 0x479   :  { %v13911_v10 = vsel %vm2114_vm0, %v6270_v21, 0.0  ;;  %v5829_v59 = vmax.f32 %v5773_v51, 0.0  ;;  %7955 = vmatpush3.bf16.msra.mxu1 %v7952_v54  ;;  %v6327_v24 = vrot.slane %v6296_v13, 1  ;;  %v6817_v51 = vld [vmem:[%s14216_s10 + $0xa8] sm:$0xff] }
 0x47a   :  { %v6337_v17 = vrot.slane %v13911_v10, 1  ;;  %v5828_v48 = vmax.f32 %v5772_v43, 0.0  ;;  %v6820_v43 = vld [vmem:[%s14216_s10 + $0xc0] sm:$0xff] }
 0x47b   :  { %v6328_v33 = vsel %vm2114_vm0, %v6327_v24, %v9868_v20 }
 0x47c   :  { %v7636_v44 = vpop.f32.mrb[22].mxu1  ;;  %v6338_v23 = vsel %vm2114_vm0, %v6337_v17, %v9868_v20 }
 0x47d   :  { %v5711_v52 = vadd.f32 %v7728_v50, %v7636_v44  ;;  %v5348_v58 = vpop.f32.mrb[23].mxu1  ;;  %6361 = vrot.lane.b32.xlu0 %v6338_v23, %s8172_s23  ;;  %v6816_v44 = vld [vmem:[%s14216_s10 + $0xa0] sm:$0xff] }
 0x47e   :  { %v5706_v19 = vadd.f32 %v5705_v60, %v5348_v58  ;;  %v7964_v23 = vpack.c.bf16 %v6817_v51, %v6816_v44 }
 0x47f   :  { %v5775_v25 = vadd.f32 %v13879_v49, %v5711_v52  ;;  %v6819_v52 = vld [vmem:[%s14216_s10 + $0xb8] sm:$0xff] }
 0x480   :  { %v5774_v61 = vadd.f32 %v13879_v49, %v5706_v19  ;;  %v7968_v58 = vpack.c.bf16 %v6819_v52, %v6818_v0  ;;  %v6821_v19 = vld [vmem:[%s14216_s10 + $0xc8] sm:$0xff] }
 0x481   :  { %v5831_v41 = vmax.f32 %v5775_v25, 0.0  ;;  %6339 = vrot.lane.b32.xlu0 %v6316_v11, %s8172_s23  ;;  %v7972_v54 = vpack.c.bf16 %v6821_v19, %v6820_v43  ;;  %v6822_v25 = vld [vmem:[%s14216_s10 + $0xd0] sm:$0xff]  ;;  %v6824_v11 = vld [vmem:[%s14216_s10 + $0xe0] sm:$0xff] }
 0x482   :  { %v5830_v3 = vmax.f32 %v5774_v61, 0.0  ;;  %v6823_v61 = vld [vmem:[%s14216_s10 + $0xd8] sm:$0xff] }
 0x483   :  { %v5859_v57 = vmax.f32 %v5829_v59, %v5831_v41  ;;  %v7976_v59 = vpack.c.bf16 %v6823_v61, %v6822_v25  ;;  %v6825_v41 = vld [vmem:[%s14216_s10 + $0xe8] sm:$0xff] }
 0x484   :  { %v5858_v7 = vmax.f32 %v5828_v48, %v5830_v3  ;;  %v7980_v48 = vpack.c.bf16 %v6825_v41, %v6824_v11  ;;  %v6826_v3 = vld [vmem:[%s14216_s10 + $0xf0] sm:$0xff] }
 0x485   :  { %v5928_v40 = vrot.slane %v5859_v57, 1 }
 0x486   :  { %v5927_v53 = vrot.slane %v5858_v7, 1 }
 0x487   :  { %v5985_v49 = vmax.f32 %v5859_v57, %v5928_v40  ;;  %v6827_v57 = vld [vmem:[%s14216_s10 + $0xf8] sm:$0xff] }
 0x488   :  { %v5929_v16 = vsel %vm2114_vm0, %v5927_v53, %v5928_v40  ;;  %v7325_v40 = vld [vmem:[%s14215_s9] ss:$0 sm:$0xff] }
 0x489   :  { %v5984_v22 = vmax.f32 %v5858_v7, %v5929_v16  ;;  %v6111_v42 = vrot.slane %v5985_v49, 4  ;;  %v6139_v30 = vrot.slane %v5985_v49, 5  ;;  %v6167_v60 = vrot.slane %v5985_v49, 6 }
 0x48a   :  { %v7984_v7 = vpack.c.bf16 %v6827_v57, %v6826_v3 }
 0x48b   :  { %v6013_v6 = vrot.slane %v5984_v22, 1  ;;  %v6041_v18 = vrot.slane %v5984_v22, 2  ;;  %v6069_v36 = vrot.slane %v5984_v22, 3 }
 0x48d   :  { %v6196_v50 = vsel %vm6182_vm3, %v5984_v22, %v6013_v6 }
 0x48e   :  { %v6211_v55 = vsel %vm6197_vm4, %v6196_v50, %v6041_v18 }
 0x48f   :  { %v6226_v14 = vsel %vm6212_vm5, %v6211_v55, %v6069_v36 }
 0x490   :  { %v6241_v9 = vsel %vm6227_vm6, %v6226_v14, %v6111_v42 }
 0x491   :  { %v6256_v1 = vsel %vm6242_vm7, %v6241_v9, %v6139_v30 }
 0x492   :  { %v6271_v62 = vsel %vm6257_vm8, %v6256_v1, %v6167_v60 }
 0x493   :  { %v6302_v63 = vsel %vm2114_vm0, %v6271_v62, 0.0 }
 0x494   :  { %v6391_v27 = vrot.slane %v6302_v63, 1 }
 0x495   :  { %v6354_v15 = vpop.permute.xlu0 %6353 }
 0x496   :  { %v6392_v26 = vsel %vm2114_vm0, %v6391_v27, %v9868_v20  ;;  %v6382_v2 = vsel %vm4843_vm2, %v13798_v28, %v6354_v15 }
 0x497   :  { %6395 = vrot.lane.b32.xlu1 %v6392_v26, %s8172_s23  ;;  %7754 = vmatprep.mubr.msk.f32.mxu1 %vm6401_vm9, %v6382_v2 }
 0x49b   :  { %6351 = vrot.lane.b32.xlu1 %v6328_v33, %s8172_s23 }
 0x49d   :  { %v6356_v4 = vpop.permute.xlu1 %6355 }
 0x49e   :  { %v6383_v45 = vsel %vm4843_vm2, %v13818_v32, %v6356_v4 }
 0x49f   :  { %7755 = vmatmul.mubr.msk.f32.gmra.mrb[30].mxu1 %vm6401_vm9, %v6383_v45 }
 0x4a5   :  { %v6358_v37 = vpop.permute.xlu0 %6357 }
 0x4a6   :  { %v6384_v38 = vsel %vm4843_vm2, %v13831_v12, %v6358_v37 }
 0x4a7   :  { %7757 = vmatprep.mubr.msk.f32.mxu1 %vm6401_vm9, %v6384_v38 }
 0x4c5   :  { %v6360_v28 = vpop.permute.xlu1 %6359 }
 0x4c6   :  { %v6385_v21 = vsel %vm4843_vm2, %v13870_v46, %v6360_v28 }
 0x4c7   :  { %7758 = vmatmul.mubr.msk.f32.gmra.mrb[32].mxu1 %vm6401_vm9, %v6385_v21 }
 0x4ef   :  { %v6362_v47 = vpop.permute.xlu0 %6361 }
 0x4f0   :  { %v6386_v17 = vsel %vm4843_vm2, %v13911_v10, %v6362_v47 }
 0x4f1   :  { %7760 = vmatprep.mubr.msk.f32.mxu1 %vm6401_vm9, %v6386_v17 }
 0x4f3   :  { %v6340_v32 = vpop.permute.xlu0 %6339 }
 0x4f4   :  { %v6375_v12 = vsel %vm4843_vm2, %v13915_v31, %v6340_v32 }
 0x509   :  { %v6396_v29 = vpop.permute.xlu1 %6395 }
 0x50a   :  { %v6400_v39 = vsel %vm4843_vm2, %v6302_v63, %v6396_v29 }
 0x50b   :  { %7761 = vmatmul.mubr.msk.f32.gmra.mrb[34].mxu1 %vm6401_vm9, %v6400_v39 }
 0x50c   :  { %7779 = vmatprep.mubr.msk.f32.mxu1 %vm6401_vm9, %v6375_v12 }
 0x50d   :  { %v6352_v46 = vpop.permute.xlu1 %6351 }
 0x50e   :  { %v6381_v10 = vsel %vm4843_vm2, %v6296_v13, %v6352_v46 }
 0x50f   :  { %7780 = vmatmul.mubr.msk.f32.vlgmr.msra.gmra.mrb[24].mxu1 %vm6401_vm9, %v13792_v35  ;;  %v6812_v35 = vld [vmem:[%s14216_s10 + $0x80] sm:$0xff] }
 0x510   :  { %7782 = vmatprep.mubr.msk.f32.mxu1 %vm6401_vm9, %v13811_v5  ;;  %v6813_v5 = vld [vmem:[%s14216_s10 + $0x88] sm:$0xff] }
 0x513   :  { %7783 = vmatmul.mubr.msk.f32.gmra.mrb[26].mxu1 %vm6401_vm9, %v13836_v8  ;;  %v6814_v8 = vld [vmem:[%s14216_s10 + $0x90] sm:$0xff] }
 0x514   :  { %7785 = vmatprep.mubr.msk.f32.mxu1 %vm6401_vm9, %v13845_v34  ;;  %v7956_v34 = vpack.c.bf16 %v6813_v5, %v6812_v35  ;;  %v6796_v5 = vld [vmem:[%s14216_s10] sm:$0xff] }
 0x516   :  { %7957 = vmatprep.subr.bf16.mxu1 %v7956_v34 }
 0x517   :  { %7786 = vmatmul.mubr.msk.f32.gmra.mrb[28].mxu1 %vm6401_vm9, %v13854_v56  ;;  %v6815_v56 = vld [vmem:[%s14216_s10 + $0x98] sm:$0xff] }
 0x518   :  { %7788 = vmatprep.mubr.msk.f32.mxu1 %vm6401_vm9, %v6381_v10  ;;  %v7960_v31 = vpack.c.bf16 %v6815_v56, %v6814_v8  ;;  %7959 = vmatpush3.bf16.msra.mxu1 %v7956_v34  ;;  %v6797_v8 = vld [vmem:[%s14216_s10 + $0x8] sm:$0xff] }
 0x519   :  { %v14048_v52 = vpack.c.bf16 %v6797_v8, %v6796_v5  ;;  %v6798_v5 = vld [vmem:[%s14216_s10 + $0x10] sm:$0xff]  ;;  %v6799_v8 = vld [vmem:[%s14216_s10 + $0x18] sm:$0xff] }
 0x51a   :  { %7961 = vmatprep.subr.bf16.mxu1 %v7960_v31 }
 0x51b   :  { %7789 = vmatmul.mubr.msk.f32.gmra.mrb[30].mxu1 %vm6401_vm9, %v6382_v2 }
 0x51c   :  { %7791 = vmatprep.mubr.msk.f32.mxu1 %vm6401_vm9, %v6383_v45  ;;  %7963 = vmatpush3.bf16.msra.mxu1 %v7960_v31 }
 0x51d   :  { %7965 = vmatprep.subr.bf16.mxu1 %v7964_v23 }
 0x51f   :  { %7792 = vmatmul.mubr.msk.f32.gmra.mrb[32].mxu1 %vm6401_vm9, %v6384_v38 }
 0x520   :  { %7794 = vmatprep.mubr.msk.f32.mxu1 %vm6401_vm9, %v6385_v21  ;;  %7967 = vmatpush3.bf16.msra.mxu1 %v7964_v23 }
 0x521   :  { %7969 = vmatprep.subr.bf16.mxu1 %v7968_v58 }
 0x523   :  { %7795 = vmatmul.mubr.msk.f32.gmra.mrb[34].mxu1 %vm6401_vm9, %v6386_v17 }
 0x524   :  { %7971 = vmatpush3.bf16.msra.mxu1 %v7968_v58 }
 0x525   :  { %7973 = vmatprep.subr.bf16.mxu1 %v7972_v54 }
 0x528   :  { %7975 = vmatpush3.bf16.msra.mxu1 %v7972_v54 }
 0x529   :  { %7977 = vmatprep.subr.bf16.mxu1 %v7976_v59 }
 0x52c   :  { %7979 = vmatpush3.bf16.msra.mxu1 %v7976_v59 }
 0x52d   :  { %7981 = vmatprep.subr.bf16.mxu1 %v7980_v48 }
 0x530   :  { %7983 = vmatpush3.bf16.msra.mxu1 %v7980_v48 }
 0x531   :  { %7985 = vmatprep.subr.bf16.mxu1 %v7984_v7 }
 0x534   :  { %7987 = vmatpush3.bf16.msra.mxu1 %v7984_v7 }
 0x535   :  { %7989 = vmatprep.subr.bf16.mxu1 %v14048_v52 }
 0x5e2   :  { %v7781_v53 = vpop.f32.mrb[24].mxu1 }
 0x5e3   :  { %v6701_v16 = vadd.f32 %v7781_v53, %v7325_v40  ;;  %v6635_v22 = vpop.f32.mrb[25].mxu1 }
 0x5e4   :  { %v6700_v49 = vadd.f32 %v7325_v40, %v6635_v22 }
 0x5e5   :  { %v6713_v6 = vmax.f32 %v6701_v16, 0.0 }
 0x5e6   :  { %v6712_v18 = vmax.f32 %v6700_v49, 0.0  ;;  %v7784_v36 = vpop.f32.mrb[26].mxu1 }
 0x5e7   :  { %v6703_v50 = vadd.f32 %v7784_v36, %v7325_v40  ;;  %v6645_v42 = vpop.f32.mrb[27].mxu1 }
 0x5e8   :  { %v6724_v55 = vmax.f32 %v6712_v18, %v6713_v6  ;;  %v6702_v30 = vadd.f32 %v7325_v40, %v6645_v42 }
 0x5e9   :  { %v6715_v14 = vmax.f32 %v6703_v50, 0.0 }
 0x5ea   :  { %v6736_v60 = vrot.slane %v6724_v55, 1  ;;  %v6714_v9 = vmax.f32 %v6702_v30, 0.0  ;;  %v7787_v1 = vpop.f32.mrb[28].mxu1 }
 0x5eb   :  { %v6705_v62 = vadd.f32 %v7787_v1, %v7325_v40  ;;  %v6655_v63 = vpop.f32.mrb[29].mxu1 }
 0x5ec   :  { %v6725_v13 = vmax.f32 %v6714_v9, %v6715_v14  ;;  %v6704_v27 = vadd.f32 %v7325_v40, %v6655_v63  ;;  %v6748_v15 = vmax.f32 %v6724_v55, %v6736_v60 }
 0x5ed   :  { %v6717_v26 = vmax.f32 %v6705_v62, 0.0 }
 0x5ee   :  { %v6737_v24 = vrot.slane %v6725_v13, 1  ;;  %v6716_v2 = vmax.f32 %v6704_v27, 0.0  ;;  %v7790_v33 = vpop.f32.mrb[30].mxu1  ;;  %v6760_v21 = vrot.slane %v6748_v15, 1  ;;  %v6772_v46 = vrot.slane %v6748_v15, 2 }
 0x5ef   :  { %v6707_v4 = vadd.f32 %v7790_v33, %v7325_v40  ;;  %v6665_v45 = vpop.f32.mrb[31].mxu1 }
 0x5f0   :  { %v6749_v37 = vmax.f32 %v6725_v13, %v6737_v24  ;;  %v6726_v38 = vmax.f32 %v6716_v2, %v6717_v26  ;;  %v6706_v28 = vadd.f32 %v7325_v40, %v6665_v45  ;;  %v6784_v51 = vsel %vm6182_vm3, %v6748_v15, %v6760_v21 }
 0x5f1   :  { %v6719_v47 = vmax.f32 %v6707_v4, 0.0  ;;  %v6790_v3 = vsel %vm6197_vm4, %v6784_v51, %v6772_v46  ;;  %v7992_v51 = vpack.c.bf16 %v6799_v8, %v6798_v5 }
 0x5f2   :  { %v6761_v17 = vrot.slane %v6749_v37, 1  ;;  %v6773_v32 = vrot.slane %v6749_v37, 2  ;;  %v6738_v29 = vrot.slane %v6726_v38, 1  ;;  %v6718_v39 = vmax.f32 %v6706_v28, 0.0  ;;  %v7793_v12 = vpop.f32.mrb[32].mxu1 }
 0x5f3   :  { %v6709_v10 = vadd.f32 %v7793_v12, %v7325_v40  ;;  %v6675_v35 = vpop.f32.mrb[33].mxu1  ;;  %v14060_v42 = vsel %vm6212_vm5, %v6790_v3, 0.0 }
 0x5f4   :  { %v6785_v34 = vsel %vm6182_vm3, %v6749_v37, %v6761_v17  ;;  %v6750_v56 = vmax.f32 %v6726_v38, %v6738_v29  ;;  %v6727_v31 = vmax.f32 %v6718_v39, %v6719_v47  ;;  %v6708_v44 = vadd.f32 %v7325_v40, %v6675_v35 }
 0x5f5   :  { %v6791_v23 = vsel %vm6197_vm4, %v6785_v34, %v6773_v32  ;;  %v6721_v0 = vmax.f32 %v6709_v10, 0.0  ;;  %v6839_v63 = vrot.slane %v14060_v42, 1 }
 0x5f6   :  { %v14051_v58 = vsel %vm6212_vm5, %v6791_v23, 0.0  ;;  %v6762_v43 = vrot.slane %v6750_v56, 1  ;;  %v6774_v19 = vrot.slane %v6750_v56, 2  ;;  %v6739_v54 = vrot.slane %v6727_v31, 1  ;;  %v7796_v25 = vpop.f32.mrb[34].mxu1  ;;  %v6801_v23 = vld [vmem:[%s14216_s10 + $0x28] sm:$0xff] }
 0x5f7   :  { %v6720_v61 = vmax.f32 %v6708_v44, 0.0  ;;  %v6711_v59 = vadd.f32 %v7796_v25, %v7325_v40  ;;  %v6685_v11 = vpop.f32.mrb[35].mxu1  ;;  %v6841_v16 = vrot.slane %v14051_v58, 1  ;;  %v6840_v45 = vsel %vm2114_vm0, %v6839_v63, %v9868_v20  ;;  %v6804_v25 = vld [vmem:[%s14216_s10 + $0x40] sm:$0xff] }
 0x5f8   :  { %v6786_v41 = vsel %vm6182_vm3, %v6750_v56, %v6762_v43  ;;  %v6710_v48 = vadd.f32 %v7325_v40, %v6685_v11  ;;  %v6751_v49 = vmax.f32 %v6727_v31, %v6739_v54  ;;  %v6803_v43 = vld [vmem:[%s14216_s10 + $0x38] sm:$0xff]  ;;  %v7075_v63 = vld [vmem:[%s14218_s12 + $0x20] sm:$0xff] }
 0x5f9   :  { %v6792_v57 = vsel %vm6197_vm4, %v6786_v41, %v6774_v19  ;;  %v6728_v7 = vmax.f32 %v6720_v61, %v6721_v0  ;;  %v6723_v53 = vmax.f32 %v6711_v59, 0.0  ;;  %v6842_v40 = vsel %vm2114_vm0, %v6841_v16, %v9868_v20 }
 0x5fa   :  { %v6831_v22 = vsel %vm6212_vm5, %v6792_v57, 0.0  ;;  %v6722_v6 = vmax.f32 %v6710_v48, 0.0  ;;  %v6763_v14 = vrot.slane %v6751_v49, 1  ;;  %v6775_v27 = vrot.slane %v6751_v49, 2  ;;  %v6806_v57 = vld [vmem:[%s14216_s10 + $0x50] sm:$0xff] }
 0x5fb   :  { %v6740_v18 = vrot.slane %v6728_v7, 1  ;;  %v6865_v36 = vrot.slane %v6831_v22, 1 }
 0x5fc   :  { %v6729_v50 = vmax.f32 %v6722_v6, %v6723_v53  ;;  %v6787_v26 = vsel %vm6182_vm3, %v6751_v49, %v6763_v14  ;;  %v6809_v49 = vld [vmem:[%s14216_s10 + $0x68] sm:$0xff]  ;;  %v8174_v14 = vmov 0.0|0.0  }
 0x5fd   :  { %v6752_v55 = vmax.f32 %v6728_v7, %v6740_v18  ;;  %v6866_v30 = vsel %vm2114_vm0, %v6865_v36, %v9868_v20  ;;  %v6793_v21 = vsel %vm6197_vm4, %v6787_v26, %v6775_v27  ;;  %v6807_v7 = vld [vmem:[%s14216_s10 + $0x58] sm:$0xff]  ;;  %v6810_v18 = vld [vmem:[%s14216_s10 + $0x70] sm:$0xff] }
 0x5fe   :  { %v6741_v60 = vrot.slane %v6729_v50, 1  ;;  %v8130_v9 = vpack.i.bf16 %v6866_v30, %v6842_v40  ;;  %v14078_v32 = vsel %vm6212_vm5, %v6793_v21, 0.0  ;;  %v8008_v16 = vpack.c.bf16 %v6807_v7, %v6806_v57  ;;  %v6811_v36 = vld [vmem:[%s14216_s10 + $0x78] sm:$0xff]  ;;  %v7084_v21 = vld [vmem:[%s14218_s12 + $0x68] sm:$0xff] }
 0x5ff   :  { %v6764_v1 = vrot.slane %v6752_v55, 1  ;;  %v6776_v62 = vrot.slane %v6752_v55, 2  ;;  %v6843_v46 = vrot.slane %v14078_v32, 1  ;;  %v7078_v26 = vld [vmem:[%s14218_s12 + $0x38] sm:$0xff] }
 0x600   :  { %v6753_v13 = vmax.f32 %v6729_v50, %v6741_v60  ;;  %8131 = vrot.lane.b32.xlu0 %v8130_v9, %s8173_s5  ;;  %v8016_v50 = vpack.c.bf16 %v6811_v36, %v6810_v18  ;;  %v7073_v60 = vld [vmem:[%s14218_s12 + $0x10] sm:$0xff]  ;;  %v7074_v9 = vld [vmem:[%s14218_s12 + $0x18] sm:$0xff] }
 0x601   :  { %v6788_v15 = vsel %vm6182_vm3, %v6752_v55, %v6764_v1  ;;  %v6844_v10 = vsel %vm2114_vm0, %v6843_v46, %v9868_v20  ;;  %v7072_v55 = vld [vmem:[%s14218_s12 + $0x8] sm:$0xff] }
 0x602   :  { %v6794_v24 = vsel %vm6197_vm4, %v6788_v15, %v6776_v62  ;;  %v6765_v2 = vrot.slane %v6753_v13, 1  ;;  %v6777_v33 = vrot.slane %v6753_v13, 2  ;;  %v8024_v62 = vpack.c.bf16 %v7074_v9, %v7073_v60  ;;  %v7077_v15 = vld [vmem:[%s14218_s12 + $0x30] sm:$0xff] }
 0x603   :  { %v6833_v4 = vsel %vm6212_vm5, %v6794_v24, 0.0  ;;  %v8030_v24 = vpack.c.bf16 %v7078_v26, %v7077_v15 }
 0x604   :  { %v6789_v37 = vsel %vm6182_vm3, %v6753_v13, %v6765_v2  ;;  %6847 = vrot.lane.b32.xlu0 %v6840_v45, %s8173_s5  ;;  %v6845_v28 = vrot.slane %v6833_v4, 1  ;;  %v7076_v13 = vld [vmem:[%s14218_s12 + $0x28] sm:$0xff]  ;;  %v7079_v2 = vld [vmem:[%s14218_s12 + $0x40] sm:$0xff]  ;;  %v7081_v45 = vld [vmem:[%s14218_s12 + $0x50] sm:$0xff] }
 0x605   :  { %v6795_v38 = vsel %vm6197_vm4, %v6789_v37, %v6777_v33  ;;  %v8027_v27 = vpack.c.bf16 %v7076_v13, %v7075_v63  ;;  %v7080_v33 = vld [vmem:[%s14218_s12 + $0x48] sm:$0xff]  ;;  %v7082_v37 = vld [vmem:[%s14218_s12 + $0x58] sm:$0xff] }
 0x606   :  { %v6834_v47 = vsel %vm6212_vm5, %v6795_v38, 0.0  ;;  %v6846_v29 = vsel %vm2114_vm0, %v6845_v28, %v9868_v20  ;;  %v7083_v38 = vld [vmem:[%s14218_s12 + $0x60] sm:$0xff]  ;;  %v8036_v28 = vpack.c.bf16 %v7082_v37, %v7081_v45 }
 0x607   :  { %v6867_v17 = vrot.slane %v6834_v47, 1 }
 0x609   :  { %v6868_v39 = vsel %vm2114_vm0, %v6867_v17, %v9868_v20  ;;  %v6800_v20 = vld [vmem:[%s14216_s10 + $0x20] sm:$0xff]  ;;  %v8039_v17 = vpack.c.bf16 %v7084_v21, %v7083_v38 }
 0x60a   :  { %v8135_v12 = vpack.i.bf16 %v6868_v39, %v6846_v29  ;;  %v7996_v0 = vpack.c.bf16 %v6801_v23, %v6800_v20  ;;  %v7086_v29 = vld [vmem:[%s14218_s12 + $0x78] sm:$0xff] }
 0x60c   :  { %8136 = vrot.lane.b32.xlu1 %v8135_v12, %s8173_s5  ;;  %v7326_v12 = vld [vmem:[%s14217_s11] ss:$0 sm:$0xff] }
 0x610   :  { %6851 = vrot.lane.b32.xlu1 %v6844_v10, %s8173_s5 }
 0x672   :  { %v8132_v35 = vpop.permute.xlu0 %8131 }
 0x673   :  { %v8134_v34 = vunpack.i.h.bf16 %v8132_v35  ;;  %v8133_v56 = vunpack.i.l.bf16 %v8132_v35 }
 0x675   :  { %v6860_v31 = vsel %vm6401_vm9, %v14051_v58, %v8133_v56  ;;  %v6875_v44 = vsel %vm6401_vm9, %v6831_v22, %v8134_v34  ;;  %v6802_v58 = vld [vmem:[%s14216_s10 + $0x30] sm:$0xff]  ;;  %v6808_v22 = vld [vmem:[%s14216_s10 + $0x60] sm:$0xff] }
 0x676   :  { %7829 = vmatprep.mubr.f32.mxu1 %v6860_v31  ;;  %v8000_v19 = vpack.c.bf16 %v6803_v43, %v6802_v58  ;;  %v6848_v11 = vpop.permute.xlu0 %6847  ;;  %v8012_v6 = vpack.c.bf16 %v6809_v49, %v6808_v22 }
 0x677   :  { %7830 = vmatmul.mubr.f32.vlgmr.msra.gmra.mrb[36].mxu1 %v6875_v44  ;;  %v6859_v53 = vsel %vm6401_vm9, %v14060_v42, %v6848_v11  ;;  %v7071_v42 = vld [vmem:[%s14218_s12] sm:$0xff] }
 0x678   :  { %7991 = vmatpush3.bf16.msra.mxu1 %v14048_v52  ;;  %v6805_v52 = vld [vmem:[%s14216_s10 + $0x48] sm:$0xff]  ;;  %v8021_v30 = vpack.c.bf16 %v7072_v55, %v7071_v42 }
 0x679   :  { %7993 = vmatprep.subr.bf16.mxu1 %v7992_v51  ;;  %v8004_v3 = vpack.c.bf16 %v6805_v52, %v6804_v25 }
 0x67c   :  { %7995 = vmatpush3.bf16.msra.mxu1 %v7992_v51 }
 0x67d   :  { %7997 = vmatprep.subr.bf16.mxu1 %v7996_v0 }
 0x67e   :  { %v8137_v54 = vpop.permute.xlu1 %8136 }
 0x67f   :  { %v8139_v61 = vunpack.i.h.bf16 %v8137_v54  ;;  %v8138_v59 = vunpack.i.l.bf16 %v8137_v54 }
 0x680   :  { %7999 = vmatpush3.bf16.msra.mxu1 %v7996_v0 }
 0x681   :  { %8001 = vmatprep.subr.bf16.mxu1 %v8000_v19  ;;  %v6862_v41 = vsel %vm6401_vm9, %v6833_v4, %v8138_v59  ;;  %v6876_v48 = vsel %vm6401_vm9, %v6834_v47, %v8139_v61  ;;  %v8033_v4 = vpack.c.bf16 %v7080_v33, %v7079_v2  ;;  %v14771_v47 = vmov 0.0   ;;  %v7327_v59 = vld [vmem:[%s14219_s13] ss:$0 sm:$0xff] }
 0x682   :  { %7832 = vmatprep.mubr.f32.mxu1 %v6862_v41  ;;  %v6852_v40 = vpop.permute.xlu1 %6851 }
 0x683   :  { %7833 = vmatmul.mubr.f32.gmra.mrb[38].mxu1 %v6876_v48  ;;  %v6861_v1 = vsel %vm6401_vm9, %v14078_v32, %v6852_v40  ;;  %v7085_v32 = vld [vmem:[%s14218_s12 + $0x70] sm:$0xff] }
 0x684   :  { %8003 = vmatpush3.bf16.msra.mxu1 %v8000_v19  ;;  %7867 = vmatprep.mubr.f32.mxu1 %v6859_v53  ;;  %v8042_v39 = vpack.c.bf16 %v7086_v29, %v7085_v32 }
 0x685   :  { %8005 = vmatprep.subr.bf16.mxu1 %v8004_v3 }
 0x688   :  { %8007 = vmatpush3.bf16.msra.mxu1 %v8004_v3 }
 0x689   :  { %8009 = vmatprep.subr.bf16.mxu1 %v8008_v16 }
 0x68c   :  { %8011 = vmatpush3.bf16.msra.mxu1 %v8008_v16 }
 0x68d   :  { %8013 = vmatprep.subr.bf16.mxu1 %v8012_v6 }
 0x690   :  { %8015 = vmatpush3.bf16.msra.mxu1 %v8012_v6 }
 0x691   :  { %8017 = vmatprep.subr.bf16.mxu1 %v8016_v50 }
 0x694   :  { %8019 = vmatpush3.bf16.msra.mxu1 %v8016_v50 }
 0x695   :  { %8020 = vmatprep.subr.bf16.mxu1 %v8174_v14 }
 0x697   :  { %7868 = vmatmul.mubr.f32.vlgmr.msra.gmra.mrb[36].mxu1 %v6860_v31 }
 0x698   :  { %7870 = vmatprep.mubr.f32.mxu1 %v6861_v1  ;;  %8022 = vmatpush3.bf16.msra.mxu1 %v8021_v30 }
 0x699   :  { %8023 = vmatprep.subr.bf16.mxu1 %v8174_v14 }
 0x69b   :  { %7871 = vmatmul.mubr.f32.gmra.mrb[38].mxu1 %v6862_v41 }
 0x69c   :  { %8025 = vmatpush3.bf16.msra.mxu1 %v8024_v62  ;;  %7905 = vmatprep.mubr.msk.f32.mxu1 %vm8175_vm10, %v14771_v47 }
 0x69d   :  { %8026 = vmatprep.subr.bf16.mxu1 %v8174_v14 }
 0x6a0   :  { %8028 = vmatpush3.bf16.msra.mxu1 %v8027_v27 }
 0x6a1   :  { %8029 = vmatprep.subr.bf16.mxu1 %v8174_v14 }
 0x6a4   :  { %8031 = vmatpush3.bf16.msra.mxu1 %v8030_v24 }
 0x6a5   :  { %8032 = vmatprep.subr.bf16.mxu1 %v8174_v14 }
 0x6a8   :  { %8034 = vmatpush3.bf16.msra.mxu1 %v8033_v4 }
 0x6a9   :  { %8035 = vmatprep.subr.bf16.mxu1 %v8174_v14 }
 0x6ac   :  { %8037 = vmatpush3.bf16.msra.mxu1 %v8036_v28 }
 0x6ad   :  { %8038 = vmatprep.subr.bf16.mxu1 %v8174_v14 }
 0x6b0   :  { %8040 = vmatpush3.bf16.msra.mxu1 %v8039_v17 }
 0x6b1   :  { %8041 = vmatprep.subr.bf16.mxu1 %v8174_v14 }
 0x6b4   :  { %8043 = vmatpush3.bf16.msra.mxu1 %v8042_v39 }
 0x76a   :  { %v7869_v46 = vpop.f32.mrb[36].mxu1 }
 0x76b   :  { %v7054_v10 = vadd.f32 %v7869_v46, %v7326_v12  ;;  %v7028_v35 = vpop.f32.mrb[37].mxu1 }
 0x76c   :  { %v7053_v5 = vadd.f32 %v7326_v12, %v7028_v35 }
 0x76d   :  { %v7058_v8 = vmax.f32 %v7054_v10, 0.0 }
 0x76e   :  { %v7057_v34 = vmax.f32 %v7053_v5, 0.0  ;;  %v7872_v56 = vpop.f32.mrb[38].mxu1 }
 0x76f   :  { %v7056_v31 = vadd.f32 %v7872_v56, %v7326_v12  ;;  %v7038_v44 = vpop.f32.mrb[39].mxu1 }
 0x770   :  { %v7061_v51 = vmax.f32 %v7057_v34, %v7058_v8  ;;  %v7055_v20 = vadd.f32 %v7326_v12, %v7038_v44 }
 0x771   :  { %v7060_v23 = vmax.f32 %v7056_v31, 0.0 }
 0x772   :  { %v7059_v0 = vmax.f32 %v7055_v20, 0.0  ;;  %v7065_v43 = vrot.slane %v7061_v51, 1 }
 0x774   :  { %v7062_v58 = vmax.f32 %v7059_v0, %v7060_v23  ;;  %v7069_v25 = vmax.f32 %v7061_v51, %v7065_v43 }
 0x776   :  { %v7066_v19 = vrot.slane %v7062_v58, 1 }
 0x778   :  { %v7070_v54 = vmax.f32 %v7062_v58, %v7066_v19 }
 0x77a   :  { %v7096_v52 = vrot.slane %v7070_v54, 7 }
 0x77c   :  { %v7098_v61 = vsel %vm7097_vm11, %v7096_v52, %v7069_v25 }
 0x77d   :  { %7906 = vmatmul.mubr.f32.vlgmr.msra.gmra.mrb[40].mxu1 %v7098_v61 }
 0x850   :  { %v7166_v11 = vpop.f32.mrb[40].mxu1 }
 0x851   :  { %v7167_v41 = vadd.f32 %v7327_v59, %v7166_v11  ;;  %v7907_v48 = vpop.f32.mrb[41].mxu1 }
 0x853   :  { %v7170_v3 = vmax.f32 %v7167_v41, 0.0 }
 0x855   :  { %7172 = vst.msk [vmem:[#allocation2] sm:$0x3] %vm7171_vm12, %v7170_v3 }
 0x856   :  { %8156 = shalt.err (!%p8153_p4)
}
 0x857   :  { %s8157_s13 = scalar_lea.hbm %s14220_s14, 32 }
 0x858   :  { %p8158_p5 = scmp.ne.s32.totalorder %s14220_s14, %s8157_s13  ;;  %p8161_p6 = scmp.lt.u32.totalorder %s8157_s13, %s14220_s14 }
 0x85a   :  { %p8163_p7 = pnand %p8161_p6, %p8158_p5 }
 0x85c   :  { %8166 = shalt.err (!%p8163_p7)
}
 0x85d   :  { %7182 = dma.vmem_to_hbm [thread:$0]  %s7180_s17, 32, %s14220_s14, [#allocation3]  }
 0x85e   :  { %8167 = dma.done.wait [#allocation3], 32  }
 0x85f   :  { %8168 = vsyncadd [#allocation3], 4294967264 }
 0x860   :  { %7186 = vsyncpa [#allocation3], 1 }

</bundles_post_ra>
